<compile_context>
chip_gen: v5e
topology: v5e:2x2
jax: 0.10.0
libtpu: 0.0.40
codegen_flags: <defaults>
</compile_context>

<pallas_src>
import functools

import jax
import jax.numpy as jnp
from jax import lax
from jax.experimental import pallas as pl
from jax.experimental.pallas import tpu as pltpu

LN_EPS = 1e-5
BN_EPS = 1e-5
NUM_HEADS = 16  # module default; requires feature_dim % 16 == 0


def _full_spec(shape):
    """Whole-array BlockSpec for a grid=(1,) pallas_call."""
    n = len(shape)
    return pl.BlockSpec(shape, lambda i, _n=n: (0,) * _n)


# ----------------------------------------------------------------------------
# In-kernel streamed matmul: out = x @ W, with W resident in HBM and (K, tn)
# column tiles streamed through a double-buffered VMEM scratch `buf`.
# ----------------------------------------------------------------------------
def _stream_matmul(x_bf16, w_hbm, out_ref, buf, sem, tn):
    k_dim, n_dim = w_hbm.shape
    assert n_dim % tn == 0, (n_dim, tn)
    assert buf.shape == (2, k_dim, tn), (buf.shape, k_dim, tn)
    n_tiles = n_dim // tn

    def tile_copy(j, slot):
        start = j * tn
        if not isinstance(start, int):
            start = pl.multiple_of(start, tn)
        return pltpu.make_async_copy(
            w_hbm.at[:, pl.ds(start, tn)], buf.at[slot], sem.at[slot])

    tile_copy(0, 0).start()                         # prime slot 0

    def body(j, carry):
        slot = j % 2

        @pl.when(j + 1 < n_tiles)                   # prefetch next weight tile
        def _():
            tile_copy(j + 1, 1 - slot).start()

        tile_copy(j, slot).wait()                   # wait for current tile
        out_ref[:, pl.ds(pl.multiple_of(j * tn, tn), tn)] = jnp.dot(
            x_bf16, buf[slot], preferred_element_type=jnp.float32)
        return carry

    lax.fori_loop(0, n_tiles, body, 0)


# ----------------------------------------------------------------------------
# Fused kernel: synthetic backbone -> LayerNorm -> MHA(seq=1) -> channel attn
#               -> 6-layer classifier MLP (BN folded, eval mode)
# ----------------------------------------------------------------------------
def fused_kernel(
    # resident VMEM inputs
    x_ref, wb_ref, bb_ref, ln_g_ref, ln_b_ref,
    bv_ref, bo_ref,
    se_w1_ref, se_b1_ref, se_w2_ref, se_b2_ref,
    c0b_ref, c0s_ref, c0t_ref,
    c1b_ref, c1s_ref, c1t_ref,
    w2_ref, b2_ref, s2_ref, t2_ref,
    w3_ref, b3_ref, s3_ref, t3_ref,
    w4_ref, b4_ref, s4_ref, t4_ref,
    w5_ref, b5_ref,
    # large weights, left in HBM (memory_space=pl.ANY) and streamed
    wv_hbm, wo_hbm, wc0_hbm, wc1_hbm,
    # output (lane-dense padded logits)
    out_ref,
    # scratch
    v_s, att_s, h0_s, h1_s, buf_d, buf_k, sem,
    *, tn,
):
    f32 = jnp.float32
    bf16 = jnp.bfloat16

    # --- synthetic backbone: global average pool over spatial + linear C -> D ---
    # TODO(synk): real efficientnet_b7 trunk not reproduced; for a real feature map,
    # tile H*W via a grid axis and accumulate the pool in scratch instead of loading
    # the whole (B, C, H*W) block at once.
    pooled = jnp.mean(x_ref[...], axis=-1)                                     # (B, C)
    feat = jnp.dot(pooled.astype(bf16), wb_ref[...],
                   preferred_element_type=f32) + bb_ref[...]                   # (B, D)

    # --- feature_norm = LayerNorm(D) (biased variance, matches PyTorch) ---
    mu = jnp.mean(feat, axis=-1, keepdims=True)
    var = jnp.mean((feat - mu) ** 2, axis=-1, keepdims=True)
    f = (feat - mu) * lax.rsqrt(var + LN_EPS) * ln_g_ref[...] + ln_b_ref[...]
    f_bf16 = f.astype(bf16)

    # --- MultiheadAttention on a length-1 sequence: attended = out_proj(V) ---
    _stream_matmul(f_bf16, wv_hbm, v_s, buf_d, sem, tn)
    v = v_s[...] + bv_ref[...]
    _stream_matmul(v.astype(bf16), wo_hbm, att_s, buf_d, sem, tn)
    attended = att_s[...] + bo_ref[...]

    # --- channel attention (two 1x1 convs == two linears; bottleneck zero-padded
    #     to a lane-dense width, padded columns/rows contribute exactly 0) ---
    h = jnp.maximum(
        jnp.dot(f_bf16, se_w1_ref[...], preferred_element_type=f32) + se_b1_ref[...],
        0.0)
    cw = jax.nn.sigmoid(
        jnp.dot(h.astype(bf16), se_w2_ref[...], preferred_element_type=f32)
        + se_b2_ref[...])

    # final_features = features + attended_features + features_weighted
    ff = f + attended + f * cw
    ff_bf16 = ff.astype(bf16)

    # --- classifier: (Linear -> folded BN -> ReLU) x5 -> Linear; Dropout=identity ---
    _stream_matmul(ff_bf16, wc0_hbm, h0_s, buf_d, sem, tn)                     # D -> 2048
    h0 = jnp.maximum((h0_s[...] + c0b_ref[...]) * c0s_ref[...] + c0t_ref[...], 0.0)

    _stream_matmul(h0.astype(bf16), wc1_hbm, h1_s, buf_k, sem, tn)             # 2048 -> 1024
    h1 = jnp.maximum((h1_s[...] + c1b_ref[...]) * c1s_ref[...] + c1t_ref[...], 0.0)

    h2 = jnp.maximum(
        (jnp.dot(h1.astype(bf16), w2_ref[...], preferred_element_type=f32)
         + b2_ref[...]) * s2_ref[...] + t2_ref[...], 0.0)                      # 1024 -> 512
    h3 = jnp.maximum(
        (jnp.dot(h2.astype(bf16), w3_ref[...], preferred_element_type=f32)
         + b3_ref[...]) * s3_ref[...] + t3_ref[...], 0.0)                      # 512 -> 256
    h4 = jnp.maximum(
        (jnp.dot(h3.astype(bf16), w4_ref[...], preferred_element_type=f32)
         + b4_ref[...]) * s4_ref[...] + t4_ref[...], 0.0)                      # 256 -> 128

    # final Linear into a lane-dense, 128-wide padded logits slab
    out_ref[...] = (jnp.dot(h4.astype(bf16), w5_ref[...], preferred_element_type=f32)
                    + b5_ref[...])


# ----------------------------------------------------------------------------
# Parameter initialization (deterministic, synthetic; PyTorch-style layouts, f32)
# ----------------------------------------------------------------------------
def init_params(key, C, D, num_classes):
    assert D % NUM_HEADS == 0 and D % 16 == 0
    ks = iter(jax.random.split(key, 16))

    def nrm(k, shape, std):
        return std * jax.random.normal(k, shape, dtype=jnp.float32)

    D16 = D // 16
    p = {}
    # synthetic backbone projection (stand-in for the efficientnet_b7 trunk)
    p['wb'] = nrm(next(ks), (C, D), 1.0 / (C ** 0.5))
    p['bb'] = jnp.zeros((D,), jnp.float32)
    # LayerNorm (PyTorch defaults)
    p['ln_g'] = jnp.ones((D,), jnp.float32)
    p['ln_b'] = jnp.zeros((D,), jnp.float32)
    # MultiheadAttention in_proj (3D, D); only the V slice matters for seq_len == 1
    in_proj_w = nrm(next(ks), (3 * D, D), 1.0 / (D ** 0.5))
    p['wv_pt'] = in_proj_w[2 * D:, :]                     # (D, D), PyTorch layout
    p['bv'] = jnp.zeros((D,), jnp.float32)
    p['wo_pt'] = nrm(next(ks), (D, D), 1.0 / (D ** 0.5))  # out_proj.weight
    p['bo'] = jnp.zeros((D,), jnp.float32)
    # channel attention: Conv1d(D, D//16, 1) and Conv1d(D//16, D, 1)
    p['se_w1_pt'] = nrm(next(ks), (D16, D), 1.0 / (D ** 0.5))
    p['se_b1'] = jnp.zeros((D16,), jnp.float32)
    p['se_w2_pt'] = nrm(next(ks), (D, D16), 1.0 / (D16 ** 0.5))
    p['se_b2'] = jnp.zeros((D,), jnp.float32)
    # classifier: kaiming_normal_(fan_out) linears, zero bias, BN at defaults
    dims = [D, 2048, 1024, 512, 256, 128, num_classes]
    layers = []
    for i in range(6):
        fan_in, fan_out = dims[i], dims[i + 1]
        w = nrm(next(ks), (fan_out, fan_in), (2.0 / fan_out) ** 0.5)  # (out, in)
        b = jnp.zeros((fan_out,), jnp.float32)
        if i < 5:
            layers.append(dict(
                w=w, b=b,
                gamma=jnp.ones((fan_out,), jnp.float32),
                beta=jnp.zeros((fan_out,), jnp.float32),
                rmean=jnp.zeros((fan_out,), jnp.float32),
                rvar=jnp.ones((fan_out,), jnp.float32)))
        else:
            layers.append(dict(w=w, b=b))
    p['classifier'] = layers
    return p


# ----------------------------------------------------------------------------
# One-time parameter packing: bf16 weight cast, eval-mode BN fold, transposes,
# lane-dense zero padding (SE bottleneck and logits).
# ----------------------------------------------------------------------------
def pack_params(p, num_classes):
    D = p['wb'].shape[1]
    D16 = p['se_w1_pt'].shape[0]
    D16p = max(128, -(-D16 // 128) * 128)
    NCP = max(128, -(-num_classes // 128) * 128)

    bf = lambda a: a.astype(jnp.bfloat16)
    row = lambda a: a.reshape(1, -1).astype(jnp.float32)

    q = {'num_classes': num_classes}
    q['wb'] = bf(p['wb'])
    q['bb'] = row(p['bb'])
    q['ln_g'] = row(p['ln_g'])
    q['ln_b'] = row(p['ln_b'])
    q['wv'] = bf(p['wv_pt'].T)                            # (D, D): v = f @ wv + bv
    q['bv'] = row(p['bv'])
    q['wo'] = bf(p['wo_pt'].T)                            # (D, D)
    q['bo'] = row(p['bo'])
    se_w1 = jnp.zeros((D, D16p), jnp.float32).at[:, :D16].set(p['se_w1_pt'].T)
    se_b1 = jnp.zeros((1, D16p), jnp.float32).at[:, :D16].set(p['se_b1'])
    se_w2 = jnp.zeros((D16p, D), jnp.float32).at[:D16, :].set(p['se_w2_pt'].T)
    q['se_w1'], q['se_b1'] = bf(se_w1), se_b1
    q['se_w2'], q['se_b2'] = bf(se_w2), row(p['se_b2'])

    cls = []
    for i, layer in enumerate(p['classifier']):
        w = layer['w'].T                                  # (in, out)
        if i < 5:
            scale = layer['gamma'] / jnp.sqrt(layer['rvar'] + BN_EPS)
            shift = layer['beta'] - layer['rmean'] * scale
            cls.append(dict(w=bf(w), b=row(layer['b']), s=row(scale), t=row(shift)))
        else:
            wp = jnp.zeros((w.shape[0], NCP), jnp.float32).at[:, :num_classes].set(w)
            bp = jnp.zeros((1, NCP), jnp.float32).at[:, :num_classes].set(
                layer['b'].reshape(1, -1))
            cls.append(dict(w=bf(wp), b=bp))
    q['classifier'] = cls
    return q


# ----------------------------------------------------------------------------
# Forward wrapper
# ----------------------------------------------------------------------------
def ultra_forward(x, packed):
    B, C, H, W = x.shape
    D = packed['wb'].shape[1]
    num_classes = packed['num_classes']
    cls = packed['classifier']
    NCP = cls[5]['w'].shape[1]
    N0 = cls[0]['w'].shape[1]       # 2048
    N1 = cls[1]['w'].shape[1]       # 1024
    K1 = cls[1]['w'].shape[0]       # 2048

    # weight-tile width for streamed matmuls (256 is MXU/lane friendly on v6e/v7x)
    TN = 256 if D % 256 == 0 else 128
    for n_dim in (D, N0, N1):
        assert n_dim % TN == 0, (n_dim, TN)

    x_flat = x.reshape(B, C, H * W).astype(jnp.float32)

    resident = [
        x_flat, packed['wb'], packed['bb'], packed['ln_g'], packed['ln_b'],
        packed['bv'], packed['bo'],
        packed['se_w1'], packed['se_b1'], packed['se_w2'], packed['se_b2'],
        cls[0]['b'], cls[0]['s'], cls[0]['t'],
        cls[1]['b'], cls[1]['s'], cls[1]['t'],
        cls[2]['w'], cls[2]['b'], cls[2]['s'], cls[2]['t'],
        cls[3]['w'], cls[3]['b'], cls[3]['s'], cls[3]['t'],
        cls[4]['w'], cls[4]['b'], cls[4]['s'], cls[4]['t'],
        cls[5]['w'], cls[5]['b'],
    ]
    streamed = [packed['wv'], packed['wo'], cls[0]['w'], cls[1]['w']]

    in_specs = ([_full_spec(a.shape) for a in resident]
                + [pl.BlockSpec(memory_space=pl.ANY)] * len(streamed))

    scratch_shapes = [
        pltpu.VMEM((B, D), jnp.float32),           # v_s
        pltpu.VMEM((B, D), jnp.float32),           # att_s
        pltpu.VMEM((B, N0), jnp.float32),          # h0_s
        pltpu.VMEM((B, N1), jnp.float32),          # h1_s
        pltpu.VMEM((2, D, TN), jnp.bfloat16),      # weight double-buffer, K = D
        pltpu.VMEM((2, K1, TN), jnp.bfloat16),     # weight double-buffer, K = 2048
        pltpu.SemaphoreType.DMA((2,)),
    ]

    logits_padded = pl.pallas_call(
        functools.partial(fused_kernel, tn=TN),
        grid=(1,),
        in_specs=in_specs,
        out_specs=_full_spec((B, NCP)),
        out_shape=jax.ShapeDtypeStruct((B, NCP), jnp.float32),
        scratch_shapes=scratch_shapes,
        compiler_params=pltpu.CompilerParams(
            # Single-invocation grid; all pipelining is the in-kernel double-buffered
            # weight-tile DMA.  No megacore split: the layer chain is sequential and
            # HBM-bandwidth bound (both v7x cores share HBM bandwidth).
            dimension_semantics=("arbitrary",),
            # Well under v7x's 64 MiB physical VMEM (previous 100 MiB request removed).
            vmem_limit_bytes=48 * 1024 * 1024,
        ),
    )(*(resident + streamed))

    return logits_padded[:, :num_classes]


if __name__ == "__main__":
    key = jax.random.PRNGKey(0)
    kx, kp = jax.random.split(key)

    # small synthetic shapes: batch=2, channels=8, spatial=16x16, feature_dim=256
    # (efficientnet_b7's real feature_dim is 2560; 256 keeps the demo small while
    #  staying divisible by num_heads=16, the SE bottleneck factor 16, and the
    #  256-wide streamed weight tiles)
    B, C, H, W = 2, 8, 16, 16
    D = 256
    NUM_CLASSES = 7

    x = jax.random.normal(kx, (B, C, H, W), dtype=jnp.float32)
    params = init_params(kp, C=C, D=D, num_classes=NUM_CLASSES)
    packed = pack_params(params, NUM_CLASSES)   # bf16 cast / BN fold / padding, once

    out = jax.block_until_ready(ultra_forward(x, packed))
    assert out.shape == (B, NUM_CLASSES), out.shape
    print("KERNEL_OK")
</pallas_src>

<mosaic_0001>
module attributes {stable_mosaic.version = 11 : i64} {
  func.func @fused_kernel(%arg0: i32, %arg1: memref<2x8x256xf32, #tpu.memory_space<vmem>>, %arg2: memref<8x256xbf16, #tpu.memory_space<vmem>>, %arg3: memref<1x256xf32, #tpu.memory_space<vmem>>, %arg4: memref<1x256xf32, #tpu.memory_space<vmem>>, %arg5: memref<1x256xf32, #tpu.memory_space<vmem>>, %arg6: memref<1x256xf32, #tpu.memory_space<vmem>>, %arg7: memref<1x256xf32, #tpu.memory_space<vmem>>, %arg8: memref<256x128xbf16, #tpu.memory_space<vmem>>, %arg9: memref<1x128xf32, #tpu.memory_space<vmem>>, %arg10: memref<128x256xbf16, #tpu.memory_space<vmem>>, %arg11: memref<1x256xf32, #tpu.memory_space<vmem>>, %arg12: memref<1x2048xf32, #tpu.memory_space<vmem>>, %arg13: memref<1x2048xf32, #tpu.memory_space<vmem>>, %arg14: memref<1x2048xf32, #tpu.memory_space<vmem>>, %arg15: memref<1x1024xf32, #tpu.memory_space<vmem>>, %arg16: memref<1x1024xf32, #tpu.memory_space<vmem>>, %arg17: memref<1x1024xf32, #tpu.memory_space<vmem>>, %arg18: memref<1024x512xbf16, #tpu.memory_space<vmem>>, %arg19: memref<1x512xf32, #tpu.memory_space<vmem>>, %arg20: memref<1x512xf32, #tpu.memory_space<vmem>>, %arg21: memref<1x512xf32, #tpu.memory_space<vmem>>, %arg22: memref<512x256xbf16, #tpu.memory_space<vmem>>, %arg23: memref<1x256xf32, #tpu.memory_space<vmem>>, %arg24: memref<1x256xf32, #tpu.memory_space<vmem>>, %arg25: memref<1x256xf32, #tpu.memory_space<vmem>>, %arg26: memref<256x128xbf16, #tpu.memory_space<vmem>>, %arg27: memref<1x128xf32, #tpu.memory_space<vmem>>, %arg28: memref<1x128xf32, #tpu.memory_space<vmem>>, %arg29: memref<1x128xf32, #tpu.memory_space<vmem>>, %arg30: memref<128x128xbf16, #tpu.memory_space<vmem>>, %arg31: memref<1x128xf32, #tpu.memory_space<vmem>>, %arg32: memref<256x256xbf16, #tpu.memory_space<any>>, %arg33: memref<256x256xbf16, #tpu.memory_space<any>>, %arg34: memref<256x2048xbf16, #tpu.memory_space<any>>, %arg35: memref<2048x1024xbf16, #tpu.memory_space<any>>, %arg36: memref<2x128xf32, #tpu.memory_space<vmem>>, %arg37: memref<2x256xf32, #tpu.memory_space<vmem>>, %arg38: memref<2x256xf32, #tpu.memory_space<vmem>>, %arg39: memref<2x2048xf32, #tpu.memory_space<vmem>>, %arg40: memref<2x1024xf32, #tpu.memory_space<vmem>>, %arg41: memref<2x256x256xbf16, #tpu.memory_space<vmem>>, %arg42: memref<2x2048x256xbf16, #tpu.memory_space<vmem>>, %arg43: memref<2x!tpu.dma_semaphore, #tpu.memory_space<semaphore_mem>>) attributes {dimension_semantics = [#tpu.dimension_semantics<arbitrary>], iteration_bounds = array<i64: 1>, scalar_prefetch = 0 : i64, scratch_operands = 7 : i64, tpu.core_type = #tpu.core_type<tc>, window_params = [{pipeline_mode = #tpu.pipeline_mode<synchronous>, transform_indices = @transform_0, window_bounds = array<i64: 2, 8, 256>}, {pipeline_mode = #tpu.pipeline_mode<synchronous>, transform_indices = @transform_1, window_bounds = array<i64: 8, 256>}, {pipeline_mode = #tpu.pipeline_mode<synchronous>, transform_indices = @transform_2, window_bounds = array<i64: 1, 256>}, {pipeline_mode = #tpu.pipeline_mode<synchronous>, transform_indices = @transform_3, window_bounds = array<i64: 1, 256>}, {pipeline_mode = #tpu.pipeline_mode<synchronous>, transform_indices = @transform_4, window_bounds = array<i64: 1, 256>}, {pipeline_mode = #tpu.pipeline_mode<synchronous>, transform_indices = @transform_5, window_bounds = array<i64: 1, 256>}, {pipeline_mode = #tpu.pipeline_mode<synchronous>, transform_indices = @transform_6, window_bounds = array<i64: 1, 256>}, {pipeline_mode = #tpu.pipeline_mode<synchronous>, transform_indices = @transform_7, window_bounds = array<i64: 256, 128>}, {pipeline_mode = #tpu.pipeline_mode<synchronous>, transform_indices = @transform_8, window_bounds = array<i64: 1, 128>}, {pipeline_mode = #tpu.pipeline_mode<synchronous>, transform_indices = @transform_9, window_bounds = array<i64: 128, 256>}, {pipeline_mode = #tpu.pipeline_mode<synchronous>, transform_indices = @transform_10, window_bounds = array<i64: 1, 256>}, {pipeline_mode = #tpu.pipeline_mode<synchronous>, transform_indices = @transform_11, window_bounds = array<i64: 1, 2048>}, {pipeline_mode = #tpu.pipeline_mode<synchronous>, transform_indices = @transform_12, window_bounds = array<i64: 1, 2048>}, {pipeline_mode = #tpu.pipeline_mode<synchronous>, transform_indices = @transform_13, window_bounds = array<i64: 1, 2048>}, {pipeline_mode = #tpu.pipeline_mode<synchronous>, transform_indices = @transform_14, window_bounds = array<i64: 1, 1024>}, {pipeline_mode = #tpu.pipeline_mode<synchronous>, transform_indices = @transform_15, window_bounds = array<i64: 1, 1024>}, {pipeline_mode = #tpu.pipeline_mode<synchronous>, transform_indices = @transform_16, window_bounds = array<i64: 1, 1024>}, {pipeline_mode = #tpu.pipeline_mode<synchronous>, transform_indices = @transform_17, window_bounds = array<i64: 1024, 512>}, {pipeline_mode = #tpu.pipeline_mode<synchronous>, transform_indices = @transform_18, window_bounds = array<i64: 1, 512>}, {pipeline_mode = #tpu.pipeline_mode<synchronous>, transform_indices = @transform_19, window_bounds = array<i64: 1, 512>}, {pipeline_mode = #tpu.pipeline_mode<synchronous>, transform_indices = @transform_20, window_bounds = array<i64: 1, 512>}, {pipeline_mode = #tpu.pipeline_mode<synchronous>, transform_indices = @transform_21, window_bounds = array<i64: 512, 256>}, {pipeline_mode = #tpu.pipeline_mode<synchronous>, transform_indices = @transform_22, window_bounds = array<i64: 1, 256>}, {pipeline_mode = #tpu.pipeline_mode<synchronous>, transform_indices = @transform_23, window_bounds = array<i64: 1, 256>}, {pipeline_mode = #tpu.pipeline_mode<synchronous>, transform_indices = @transform_24, window_bounds = array<i64: 1, 256>}, {pipeline_mode = #tpu.pipeline_mode<synchronous>, transform_indices = @transform_25, window_bounds = array<i64: 256, 128>}, {pipeline_mode = #tpu.pipeline_mode<synchronous>, transform_indices = @transform_26, window_bounds = array<i64: 1, 128>}, {pipeline_mode = #tpu.pipeline_mode<synchronous>, transform_indices = @transform_27, window_bounds = array<i64: 1, 128>}, {pipeline_mode = #tpu.pipeline_mode<synchronous>, transform_indices = @transform_28, window_bounds = array<i64: 1, 128>}, {pipeline_mode = #tpu.pipeline_mode<synchronous>, transform_indices = @transform_29, window_bounds = array<i64: 128, 128>}, {pipeline_mode = #tpu.pipeline_mode<synchronous>, transform_indices = @transform_30, window_bounds = array<i64: 1, 128>}, {}, {}, {}, {}, {pipeline_mode = #tpu.pipeline_mode<synchronous>, transform_indices = @transform_35, window_bounds = array<i64: 2, 128>}]} {
    %c0 = arith.constant 0 : index
    %c0_0 = arith.constant 0 : index
    %c0_1 = arith.constant 0 : index
    %0 = vector.load %arg1[%c0, %c0_0, %c0_1] : memref<2x8x256xf32, #tpu.memory_space<vmem>>, vector<2x8x256xf32>
    %cst = arith.constant dense<0.000000e+00> : vector<2x8xf32>
    %1 = vector.multi_reduction <add>, %0, %cst [2] : vector<2x8x256xf32> to vector<2x8xf32>
    %cst_2 = arith.constant 2.560000e+02 : f32
    %2 = vector.broadcast %cst_2 : f32 to vector<2x8xf32>
    %3 = arith.divf %1, %2 : vector<2x8xf32>
    %4 = arith.truncf %3 : vector<2x8xf32> to vector<2x8xbf16>
    %c0_3 = arith.constant 0 : index
    %c0_4 = arith.constant 0 : index
    %5 = vector.load %arg2[%c0_3, %c0_4] : memref<8x256xbf16, #tpu.memory_space<vmem>>, vector<8x256xbf16>
    %cst_5 = arith.constant dense<0.000000e+00> : vector<2x256xf32>
    %6 = tpu.matmul %4, %5, %cst_5 {dimension_numbers = #tpu.dot_dimension_numbers<[1], [0], [0], [1], [0, 0, 1, 1], [], []>} : vector<2x8xbf16>, vector<8x256xbf16>, vector<2x256xf32> -> vector<2x256xf32>
    %c0_6 = arith.constant 0 : index
    %c0_7 = arith.constant 0 : index
    %7 = vector.load %arg3[%c0_6, %c0_7] : memref<1x256xf32, #tpu.memory_space<vmem>>, vector<1x256xf32>
    %8 = vector.broadcast %7 : vector<1x256xf32> to vector<2x256xf32>
    %9 = arith.addf %6, %8 : vector<2x256xf32>
    %cst_8 = arith.constant dense<0.000000e+00> : vector<2xf32>
    %10 = vector.multi_reduction <add>, %9, %cst_8 [1] : vector<2x256xf32> to vector<2xf32>
    %11 = vector.shape_cast %10 : vector<2xf32> to vector<2x1xf32>
    %cst_9 = arith.constant 2.560000e+02 : f32
    %12 = vector.broadcast %cst_9 : f32 to vector<2x1xf32>
    %13 = arith.divf %11, %12 : vector<2x1xf32>
    %14 = vector.broadcast %13 : vector<2x1xf32> to vector<2x256xf32>
    %15 = arith.subf %9, %14 : vector<2x256xf32>
    %16 = arith.mulf %15, %15 : vector<2x256xf32>
    %cst_10 = arith.constant dense<0.000000e+00> : vector<2xf32>
    %17 = vector.multi_reduction <add>, %16, %cst_10 [1] : vector<2x256xf32> to vector<2xf32>
    %18 = vector.shape_cast %17 : vector<2xf32> to vector<2x1xf32>
    %cst_11 = arith.constant 2.560000e+02 : f32
    %19 = vector.broadcast %cst_11 : f32 to vector<2x1xf32>
    %20 = arith.divf %18, %19 : vector<2x1xf32>
    %21 = vector.broadcast %13 : vector<2x1xf32> to vector<2x256xf32>
    %22 = arith.subf %9, %21 : vector<2x256xf32>
    %cst_12 = arith.constant 9.99999974E-6 : f32
    %23 = vector.broadcast %cst_12 : f32 to vector<2x1xf32>
    %24 = arith.addf %20, %23 : vector<2x1xf32>
    %25 = math.rsqrt %24 : vector<2x1xf32>
    %26 = vector.broadcast %25 : vector<2x1xf32> to vector<2x256xf32>
    %27 = arith.mulf %22, %26 : vector<2x256xf32>
    %c0_13 = arith.constant 0 : index
    %c0_14 = arith.constant 0 : index
    %28 = vector.load %arg4[%c0_13, %c0_14] : memref<1x256xf32, #tpu.memory_space<vmem>>, vector<1x256xf32>
    %29 = vector.broadcast %28 : vector<1x256xf32> to vector<2x256xf32>
    %30 = arith.mulf %27, %29 : vector<2x256xf32>
    %c0_15 = arith.constant 0 : index
    %c0_16 = arith.constant 0 : index
    %31 = vector.load %arg5[%c0_15, %c0_16] : memref<1x256xf32, #tpu.memory_space<vmem>>, vector<1x256xf32>
    %32 = vector.broadcast %31 : vector<1x256xf32> to vector<2x256xf32>
    %33 = arith.addf %30, %32 : vector<2x256xf32>
    %34 = arith.truncf %33 : vector<2x256xf32> to vector<2x256xbf16>
    %c0_i32 = arith.constant 0 : i32
    %c0_i32_17 = arith.constant 0 : i32
    %c0_i32_18 = arith.constant 0 : i32
    %c0_i32_19 = arith.constant 0 : i32
    %35 = tpu.memref_slice %arg32[%c0_i32_18, %c0_i32_19] : memref<256x256xbf16, #tpu.memory_space<any>> -> memref<256x256xbf16, #tpu.memory_space<any>>
    %c0_i32_20 = arith.constant 0 : i32
    %c0_i32_21 = arith.constant 0 : i32
    %36 = tpu.memref_slice %arg41[%c0_i32, %c0_i32_20, %c0_i32_21] : memref<2x256x256xbf16, #tpu.memory_space<vmem>> -> memref<1x256x256xbf16, #tpu.memory_space<vmem>>
    %37 = tpu.memref_squeeze %36 : memref<1x256x256xbf16, #tpu.memory_space<vmem>> -> memref<256x256xbf16, #tpu.memory_space<vmem>>
    %38 = tpu.memref_slice %arg43[%c0_i32_17] : memref<2x!tpu.dma_semaphore, #tpu.memory_space<semaphore_mem>> -> memref<1x!tpu.dma_semaphore, #tpu.memory_space<semaphore_mem>>
    %39 = tpu.memref_squeeze %38 : memref<1x!tpu.dma_semaphore, #tpu.memory_space<semaphore_mem>> -> memref<!tpu.dma_semaphore, #tpu.memory_space<semaphore_mem>>
    tpu.enqueue_dma source(%35 : memref<256x256xbf16, #tpu.memory_space<any>>) target(%37 : memref<256x256xbf16, #tpu.memory_space<vmem>>) target_semaphore(%39 : memref<!tpu.dma_semaphore, #tpu.memory_space<semaphore_mem>>)
    %c0_i32_22 = arith.constant 0 : i32
    %c2_i32 = arith.constant 2 : i32
    %c0_i32_23 = arith.constant 0 : i32
    %40 = arith.cmpi eq, %c2_i32, %c0_i32_23 : i32
    %c1_i32 = arith.constant 1 : i32
    %41 = arith.select %40, %c1_i32, %c2_i32 : i32
    %42 = arith.remsi %c0_i32_22, %41 : i32
    %c0_i32_24 = arith.constant 0 : i32
    %43 = arith.cmpi ne, %42, %c0_i32_24 : i32
    %c0_i32_25 = arith.constant 0 : i32
    %44 = arith.cmpi slt, %42, %c0_i32_25 : i32
    %c0_i32_26 = arith.constant 0 : i32
    %45 = arith.cmpi slt, %41, %c0_i32_26 : i32
    %46 = arith.xori %44, %45 : i1
    %47 = arith.andi %46, %43 : i1
    %48 = arith.addi %42, %41 : i32
    %49 = arith.select %47, %48, %42 : i32
    %c1_i32_27 = arith.constant 1 : i32
    %50 = arith.addi %c0_i32_22, %c1_i32_27 : i32
    %c1_i32_28 = arith.constant 1 : i32
    %51 = arith.cmpi slt, %50, %c1_i32_28 : i32
    %52 = arith.extui %51 : i1 to i32
    %c0_i32_29 = arith.constant 0 : i32
    %53 = arith.cmpi ne, %52, %c0_i32_29 : i32
    scf.if %53 {
      %c1_i32_158 = arith.constant 1 : i32
      %220 = arith.addi %c0_i32_22, %c1_i32_158 : i32
      %c1_i32_159 = arith.constant 1 : i32
      %221 = arith.subi %c1_i32_159, %49 : i32
      %c256_i32_160 = arith.constant 256 : i32
      %222 = arith.muli %220, %c256_i32_160 : i32
      %223 = tpu.assume_multiple %222, 256 : i32
      %c0_i32_161 = arith.constant 0 : i32
      %224 = tpu.memref_slice %arg32[%c0_i32_161, %223] : memref<256x256xbf16, #tpu.memory_space<any>> -> memref<256x256xbf16, #tpu.memory_space<any>>
      %c0_i32_162 = arith.constant 0 : i32
      %c0_i32_163 = arith.constant 0 : i32
      %225 = tpu.memref_slice %arg41[%221, %c0_i32_162, %c0_i32_163] : memref<2x256x256xbf16, #tpu.memory_space<vmem>> -> memref<1x256x256xbf16, #tpu.memory_space<vmem>>
      %226 = tpu.memref_squeeze %225 : memref<1x256x256xbf16, #tpu.memory_space<vmem>> -> memref<256x256xbf16, #tpu.memory_space<vmem>>
      %227 = tpu.memref_slice %arg43[%221] : memref<2x!tpu.dma_semaphore, #tpu.memory_space<semaphore_mem>> -> memref<1x!tpu.dma_semaphore, #tpu.memory_space<semaphore_mem>>
      %228 = tpu.memref_squeeze %227 : memref<1x!tpu.dma_semaphore, #tpu.memory_space<semaphore_mem>> -> memref<!tpu.dma_semaphore, #tpu.memory_space<semaphore_mem>>
      tpu.enqueue_dma source(%224 : memref<256x256xbf16, #tpu.memory_space<any>>) target(%226 : memref<256x256xbf16, #tpu.memory_space<vmem>>) target_semaphore(%228 : memref<!tpu.dma_semaphore, #tpu.memory_space<semaphore_mem>>)
    } else {
    }
    %c256_i32 = arith.constant 256 : i32
    %54 = arith.muli %c0_i32_22, %c256_i32 : i32
    %55 = tpu.assume_multiple %54, 256 : i32
    %c0_i32_30 = arith.constant 0 : i32
    %56 = tpu.memref_slice %arg32[%c0_i32_30, %55] : memref<256x256xbf16, #tpu.memory_space<any>> -> memref<256x256xbf16, #tpu.memory_space<any>>
    %c0_i32_31 = arith.constant 0 : i32
    %c0_i32_32 = arith.constant 0 : i32
    %57 = tpu.memref_slice %arg41[%49, %c0_i32_31, %c0_i32_32] : memref<2x256x256xbf16, #tpu.memory_space<vmem>> -> memref<1x256x256xbf16, #tpu.memory_space<vmem>>
    %58 = tpu.memref_squeeze %57 : memref<1x256x256xbf16, #tpu.memory_space<vmem>> -> memref<256x256xbf16, #tpu.memory_space<vmem>>
    %59 = tpu.memref_slice %arg43[%49] : memref<2x!tpu.dma_semaphore, #tpu.memory_space<semaphore_mem>> -> memref<1x!tpu.dma_semaphore, #tpu.memory_space<semaphore_mem>>
    %60 = tpu.memref_squeeze %59 : memref<1x!tpu.dma_semaphore, #tpu.memory_space<semaphore_mem>> -> memref<!tpu.dma_semaphore, #tpu.memory_space<semaphore_mem>>
    tpu.wait_dma2 semaphore(%60 : memref<!tpu.dma_semaphore, #tpu.memory_space<semaphore_mem>>) src(%56 : memref<256x256xbf16, #tpu.memory_space<any>>) dst(%58 : memref<256x256xbf16, #tpu.memory_space<vmem>>)
    %61 = arith.index_cast %49 : i32 to index
    %c0_33 = arith.constant 0 : index
    %c0_34 = arith.constant 0 : index
    %62 = vector.load %arg41[%61, %c0_33, %c0_34] : memref<2x256x256xbf16, #tpu.memory_space<vmem>>, vector<1x256x256xbf16>
    %63 = vector.shape_cast %62 : vector<1x256x256xbf16> to vector<256x256xbf16>
    %cst_35 = arith.constant dense<0.000000e+00> : vector<2x256xf32>
    %64 = tpu.matmul %34, %63, %cst_35 {dimension_numbers = #tpu.dot_dimension_numbers<[1], [0], [0], [1], [0, 0, 1, 1], [], []>} : vector<2x256xbf16>, vector<256x256xbf16>, vector<2x256xf32> -> vector<2x256xf32>
    %c256_i32_36 = arith.constant 256 : i32
    %65 = arith.muli %c0_i32_22, %c256_i32_36 : i32
    %66 = tpu.assume_multiple %65, 256 : i32
    %c0_37 = arith.constant 0 : index
    %67 = arith.index_cast %66 : i32 to index
    %68 = vector.load %arg37[%c0_37, %67] : memref<2x256xf32, #tpu.memory_space<vmem>>, vector<2x256xf32>
    tpu.vector_store %arg37[%c0_37, %67], %64 {strides = array<i32>} : memref<2x256xf32, #tpu.memory_space<vmem>>, vector<2x256xf32>,
    %c1_i32_38 = arith.constant 1 : i32
    %c0_39 = arith.constant 0 : index
    %c0_40 = arith.constant 0 : index
    %69 = vector.load %arg37[%c0_39, %c0_40] : memref<2x256xf32, #tpu.memory_space<vmem>>, vector<2x256xf32>
    %c0_41 = arith.constant 0 : index
    %c0_42 = arith.constant 0 : index
    %70 = vector.load %arg6[%c0_41, %c0_42] : memref<1x256xf32, #tpu.memory_space<vmem>>, vector<1x256xf32>
    %71 = vector.broadcast %70 : vector<1x256xf32> to vector<2x256xf32>
    %72 = arith.addf %69, %71 : vector<2x256xf32>
    %73 = arith.truncf %72 : vector<2x256xf32> to vector<2x256xbf16>
    %c0_i32_43 = arith.constant 0 : i32
    %c0_i32_44 = arith.constant 0 : i32
    %c0_i32_45 = arith.constant 0 : i32
    %c0_i32_46 = arith.constant 0 : i32
    %74 = tpu.memref_slice %arg33[%c0_i32_45, %c0_i32_46] : memref<256x256xbf16, #tpu.memory_space<any>> -> memref<256x256xbf16, #tpu.memory_space<any>>
    %c0_i32_47 = arith.constant 0 : i32
    %c0_i32_48 = arith.constant 0 : i32
    %75 = tpu.memref_slice %arg41[%c0_i32_43, %c0_i32_47, %c0_i32_48] : memref<2x256x256xbf16, #tpu.memory_space<vmem>> -> memref<1x256x256xbf16, #tpu.memory_space<vmem>>
    %76 = tpu.memref_squeeze %75 : memref<1x256x256xbf16, #tpu.memory_space<vmem>> -> memref<256x256xbf16, #tpu.memory_space<vmem>>
    %77 = tpu.memref_slice %arg43[%c0_i32_44] : memref<2x!tpu.dma_semaphore, #tpu.memory_space<semaphore_mem>> -> memref<1x!tpu.dma_semaphore, #tpu.memory_space<semaphore_mem>>
    %78 = tpu.memref_squeeze %77 : memref<1x!tpu.dma_semaphore, #tpu.memory_space<semaphore_mem>> -> memref<!tpu.dma_semaphore, #tpu.memory_space<semaphore_mem>>
    tpu.enqueue_dma source(%74 : memref<256x256xbf16, #tpu.memory_space<any>>) target(%76 : memref<256x256xbf16, #tpu.memory_space<vmem>>) target_semaphore(%78 : memref<!tpu.dma_semaphore, #tpu.memory_space<semaphore_mem>>)
    %c0_i32_49 = arith.constant 0 : i32
    %c2_i32_50 = arith.constant 2 : i32
    %c0_i32_51 = arith.constant 0 : i32
    %79 = arith.cmpi eq, %c2_i32_50, %c0_i32_51 : i32
    %c1_i32_52 = arith.constant 1 : i32
    %80 = arith.select %79, %c1_i32_52, %c2_i32_50 : i32
    %81 = arith.remsi %c0_i32_49, %80 : i32
    %c0_i32_53 = arith.constant 0 : i32
    %82 = arith.cmpi ne, %81, %c0_i32_53 : i32
    %c0_i32_54 = arith.constant 0 : i32
    %83 = arith.cmpi slt, %81, %c0_i32_54 : i32
    %c0_i32_55 = arith.constant 0 : i32
    %84 = arith.cmpi slt, %80, %c0_i32_55 : i32
    %85 = arith.xori %83, %84 : i1
    %86 = arith.andi %85, %82 : i1
    %87 = arith.addi %81, %80 : i32
    %88 = arith.select %86, %87, %81 : i32
    %c1_i32_56 = arith.constant 1 : i32
    %89 = arith.addi %c0_i32_49, %c1_i32_56 : i32
    %c1_i32_57 = arith.constant 1 : i32
    %90 = arith.cmpi slt, %89, %c1_i32_57 : i32
    %91 = arith.extui %90 : i1 to i32
    %c0_i32_58 = arith.constant 0 : i32
    %92 = arith.cmpi ne, %91, %c0_i32_58 : i32
    scf.if %92 {
      %c1_i32_158 = arith.constant 1 : i32
      %220 = arith.addi %c0_i32_49, %c1_i32_158 : i32
      %c1_i32_159 = arith.constant 1 : i32
      %221 = arith.subi %c1_i32_159, %88 : i32
      %c256_i32_160 = arith.constant 256 : i32
      %222 = arith.muli %220, %c256_i32_160 : i32
      %223 = tpu.assume_multiple %222, 256 : i32
      %c0_i32_161 = arith.constant 0 : i32
      %224 = tpu.memref_slice %arg33[%c0_i32_161, %223] : memref<256x256xbf16, #tpu.memory_space<any>> -> memref<256x256xbf16, #tpu.memory_space<any>>
      %c0_i32_162 = arith.constant 0 : i32
      %c0_i32_163 = arith.constant 0 : i32
      %225 = tpu.memref_slice %arg41[%221, %c0_i32_162, %c0_i32_163] : memref<2x256x256xbf16, #tpu.memory_space<vmem>> -> memref<1x256x256xbf16, #tpu.memory_space<vmem>>
      %226 = tpu.memref_squeeze %225 : memref<1x256x256xbf16, #tpu.memory_space<vmem>> -> memref<256x256xbf16, #tpu.memory_space<vmem>>
      %227 = tpu.memref_slice %arg43[%221] : memref<2x!tpu.dma_semaphore, #tpu.memory_space<semaphore_mem>> -> memref<1x!tpu.dma_semaphore, #tpu.memory_space<semaphore_mem>>
      %228 = tpu.memref_squeeze %227 : memref<1x!tpu.dma_semaphore, #tpu.memory_space<semaphore_mem>> -> memref<!tpu.dma_semaphore, #tpu.memory_space<semaphore_mem>>
      tpu.enqueue_dma source(%224 : memref<256x256xbf16, #tpu.memory_space<any>>) target(%226 : memref<256x256xbf16, #tpu.memory_space<vmem>>) target_semaphore(%228 : memref<!tpu.dma_semaphore, #tpu.memory_space<semaphore_mem>>)
    } else {
    }
    %c256_i32_59 = arith.constant 256 : i32
    %93 = arith.muli %c0_i32_49, %c256_i32_59 : i32
    %94 = tpu.assume_multiple %93, 256 : i32
    %c0_i32_60 = arith.constant 0 : i32
    %95 = tpu.memref_slice %arg33[%c0_i32_60, %94] : memref<256x256xbf16, #tpu.memory_space<any>> -> memref<256x256xbf16, #tpu.memory_space<any>>
    %c0_i32_61 = arith.constant 0 : i32
    %c0_i32_62 = arith.constant 0 : i32
    %96 = tpu.memref_slice %arg41[%88, %c0_i32_61, %c0_i32_62] : memref<2x256x256xbf16, #tpu.memory_space<vmem>> -> memref<1x256x256xbf16, #tpu.memory_space<vmem>>
    %97 = tpu.memref_squeeze %96 : memref<1x256x256xbf16, #tpu.memory_space<vmem>> -> memref<256x256xbf16, #tpu.memory_space<vmem>>
    %98 = tpu.memref_slice %arg43[%88] : memref<2x!tpu.dma_semaphore, #tpu.memory_space<semaphore_mem>> -> memref<1x!tpu.dma_semaphore, #tpu.memory_space<semaphore_mem>>
    %99 = tpu.memref_squeeze %98 : memref<1x!tpu.dma_semaphore, #tpu.memory_space<semaphore_mem>> -> memref<!tpu.dma_semaphore, #tpu.memory_space<semaphore_mem>>
    tpu.wait_dma2 semaphore(%99 : memref<!tpu.dma_semaphore, #tpu.memory_space<semaphore_mem>>) src(%95 : memref<256x256xbf16, #tpu.memory_space<any>>) dst(%97 : memref<256x256xbf16, #tpu.memory_space<vmem>>)
    %100 = arith.index_cast %88 : i32 to index
    %c0_63 = arith.constant 0 : index
    %c0_64 = arith.constant 0 : index
    %101 = vector.load %arg41[%100, %c0_63, %c0_64] : memref<2x256x256xbf16, #tpu.memory_space<vmem>>, vector<1x256x256xbf16>
    %102 = vector.shape_cast %101 : vector<1x256x256xbf16> to vector<256x256xbf16>
    %cst_65 = arith.constant dense<0.000000e+00> : vector<2x256xf32>
    %103 = tpu.matmul %73, %102, %cst_65 {dimension_numbers = #tpu.dot_dimension_numbers<[1], [0], [0], [1], [0, 0, 1, 1], [], []>} : vector<2x256xbf16>, vector<256x256xbf16>, vector<2x256xf32> -> vector<2x256xf32>
    %c256_i32_66 = arith.constant 256 : i32
    %104 = arith.muli %c0_i32_49, %c256_i32_66 : i32
    %105 = tpu.assume_multiple %104, 256 : i32
    %c0_67 = arith.constant 0 : index
    %106 = arith.index_cast %105 : i32 to index
    %107 = vector.load %arg38[%c0_67, %106] : memref<2x256xf32, #tpu.memory_space<vmem>>, vector<2x256xf32>
    tpu.vector_store %arg38[%c0_67, %106], %103 {strides = array<i32>} : memref<2x256xf32, #tpu.memory_space<vmem>>, vector<2x256xf32>,
    %c1_i32_68 = arith.constant 1 : i32
    %c0_69 = arith.constant 0 : index
    %c0_70 = arith.constant 0 : index
    %108 = vector.load %arg38[%c0_69, %c0_70] : memref<2x256xf32, #tpu.memory_space<vmem>>, vector<2x256xf32>
    %c0_71 = arith.constant 0 : index
    %c0_72 = arith.constant 0 : index
    %109 = vector.load %arg7[%c0_71, %c0_72] : memref<1x256xf32, #tpu.memory_space<vmem>>, vector<1x256xf32>
    %110 = vector.broadcast %109 : vector<1x256xf32> to vector<2x256xf32>
    %111 = arith.addf %108, %110 : vector<2x256xf32>
    %c0_73 = arith.constant 0 : index
    %c0_74 = arith.constant 0 : index
    %112 = vector.load %arg8[%c0_73, %c0_74] : memref<256x128xbf16, #tpu.memory_space<vmem>>, vector<256x128xbf16>
    %cst_75 = arith.constant dense<0.000000e+00> : vector<2x128xf32>
    %113 = tpu.matmul %34, %112, %cst_75 {dimension_numbers = #tpu.dot_dimension_numbers<[1], [0], [0], [1], [0, 0, 1, 1], [], []>} : vector<2x256xbf16>, vector<256x128xbf16>, vector<2x128xf32> -> vector<2x128xf32>
    %c0_76 = arith.constant 0 : index
    %c0_77 = arith.constant 0 : index
    %114 = vector.load %arg9[%c0_76, %c0_77] : memref<1x128xf32, #tpu.memory_space<vmem>>, vector<1x128xf32>
    %115 = vector.broadcast %114 : vector<1x128xf32> to vector<2x128xf32>
    %116 = arith.addf %113, %115 : vector<2x128xf32>
    %cst_78 = arith.constant 0.000000e+00 : f32
    %117 = vector.broadcast %cst_78 : f32 to vector<2x128xf32>
    %118 = arith.maximumf %116, %117 : vector<2x128xf32>
    %119 = arith.truncf %118 : vector<2x128xf32> to vector<2x128xbf16>
    %c0_79 = arith.constant 0 : index
    %c0_80 = arith.constant 0 : index
    %120 = vector.load %arg10[%c0_79, %c0_80] : memref<128x256xbf16, #tpu.memory_space<vmem>>, vector<128x256xbf16>
    %cst_81 = arith.constant dense<0.000000e+00> : vector<2x256xf32>
    %121 = tpu.matmul %119, %120, %cst_81 {dimension_numbers = #tpu.dot_dimension_numbers<[1], [0], [0], [1], [0, 0, 1, 1], [], []>} : vector<2x128xbf16>, vector<128x256xbf16>, vector<2x256xf32> -> vector<2x256xf32>
    %c0_82 = arith.constant 0 : index
    %c0_83 = arith.constant 0 : index
    %122 = vector.load %arg11[%c0_82, %c0_83] : memref<1x256xf32, #tpu.memory_space<vmem>>, vector<1x256xf32>
    %123 = vector.broadcast %122 : vector<1x256xf32> to vector<2x256xf32>
    %124 = arith.addf %121, %123 : vector<2x256xf32>
    %125 = arith.negf %124 : vector<2x256xf32>
    %126 = math.exp %125 : vector<2x256xf32>
    %cst_84 = arith.constant 1.000000e+00 : f32
    %127 = vector.broadcast %cst_84 : f32 to vector<2x256xf32>
    %128 = arith.addf %127, %126 : vector<2x256xf32>
    %129 = arith.divf %127, %128 : vector<2x256xf32>
    %130 = arith.addf %33, %111 : vector<2x256xf32>
    %131 = arith.mulf %33, %129 : vector<2x256xf32>
    %132 = arith.addf %130, %131 : vector<2x256xf32>
    %133 = arith.truncf %132 : vector<2x256xf32> to vector<2x256xbf16>
    %c0_i32_85 = arith.constant 0 : i32
    %c0_i32_86 = arith.constant 0 : i32
    %c0_i32_87 = arith.constant 0 : i32
    %c0_i32_88 = arith.constant 0 : i32
    %134 = tpu.memref_slice %arg34[%c0_i32_87, %c0_i32_88] : memref<256x2048xbf16, #tpu.memory_space<any>> -> memref<256x256xbf16, #tpu.memory_space<any>>
    %c0_i32_89 = arith.constant 0 : i32
    %c0_i32_90 = arith.constant 0 : i32
    %135 = tpu.memref_slice %arg41[%c0_i32_85, %c0_i32_89, %c0_i32_90] : memref<2x256x256xbf16, #tpu.memory_space<vmem>> -> memref<1x256x256xbf16, #tpu.memory_space<vmem>>
    %136 = tpu.memref_squeeze %135 : memref<1x256x256xbf16, #tpu.memory_space<vmem>> -> memref<256x256xbf16, #tpu.memory_space<vmem>>
    %137 = tpu.memref_slice %arg43[%c0_i32_86] : memref<2x!tpu.dma_semaphore, #tpu.memory_space<semaphore_mem>> -> memref<1x!tpu.dma_semaphore, #tpu.memory_space<semaphore_mem>>
    %138 = tpu.memref_squeeze %137 : memref<1x!tpu.dma_semaphore, #tpu.memory_space<semaphore_mem>> -> memref<!tpu.dma_semaphore, #tpu.memory_space<semaphore_mem>>
    tpu.enqueue_dma source(%134 : memref<256x256xbf16, #tpu.memory_space<any>>) target(%136 : memref<256x256xbf16, #tpu.memory_space<vmem>>) target_semaphore(%138 : memref<!tpu.dma_semaphore, #tpu.memory_space<semaphore_mem>>)
    %c0_i32_91 = arith.constant 0 : i32
    %c8_i32 = arith.constant 8 : i32
    %139 = arith.addi %c0_i32_91, %c8_i32 : i32
    %c1_i32_92 = arith.constant 1 : i32
    scf.for %arg44 = %c0_i32_91 to %139 step %c1_i32_92  : i32 {
      %c2_i32_158 = arith.constant 2 : i32
      %c0_i32_159 = arith.constant 0 : i32
      %220 = arith.cmpi eq, %c2_i32_158, %c0_i32_159 : i32
      %c1_i32_160 = arith.constant 1 : i32
      %221 = arith.select %220, %c1_i32_160, %c2_i32_158 : i32
      %222 = arith.remsi %arg44, %221 : i32
      %c0_i32_161 = arith.constant 0 : i32
      %223 = arith.cmpi ne, %222, %c0_i32_161 : i32
      %c0_i32_162 = arith.constant 0 : i32
      %224 = arith.cmpi slt, %222, %c0_i32_162 : i32
      %c0_i32_163 = arith.constant 0 : i32
      %225 = arith.cmpi slt, %221, %c0_i32_163 : i32
      %226 = arith.xori %224, %225 : i1
      %227 = arith.andi %226, %223 : i1
      %228 = arith.addi %222, %221 : i32
      %229 = arith.select %227, %228, %222 : i32
      %c1_i32_164 = arith.constant 1 : i32
      %230 = arith.addi %arg44, %c1_i32_164 : i32
      %c8_i32_165 = arith.constant 8 : i32
      %231 = arith.cmpi slt, %230, %c8_i32_165 : i32
      %232 = arith.extui %231 : i1 to i32
      %c0_i32_166 = arith.constant 0 : i32
      %233 = arith.cmpi ne, %232, %c0_i32_166 : i32
      scf.if %233 {
        %c1_i32_176 = arith.constant 1 : i32
        %249 = arith.addi %arg44, %c1_i32_176 : i32
        %c1_i32_177 = arith.constant 1 : i32
        %250 = arith.subi %c1_i32_177, %229 : i32
        %c256_i32_178 = arith.constant 256 : i32
        %251 = arith.muli %249, %c256_i32_178 : i32
        %252 = tpu.assume_multiple %251, 256 : i32
        %c0_i32_179 = arith.constant 0 : i32
        %253 = tpu.memref_slice %arg34[%c0_i32_179, %252] : memref<256x2048xbf16, #tpu.memory_space<any>> -> memref<256x256xbf16, #tpu.memory_space<any>>
        %c0_i32_180 = arith.constant 0 : i32
        %c0_i32_181 = arith.constant 0 : i32
        %254 = tpu.memref_slice %arg41[%250, %c0_i32_180, %c0_i32_181] : memref<2x256x256xbf16, #tpu.memory_space<vmem>> -> memref<1x256x256xbf16, #tpu.memory_space<vmem>>
        %255 = tpu.memref_squeeze %254 : memref<1x256x256xbf16, #tpu.memory_space<vmem>> -> memref<256x256xbf16, #tpu.memory_space<vmem>>
        %256 = tpu.memref_slice %arg43[%250] : memref<2x!tpu.dma_semaphore, #tpu.memory_space<semaphore_mem>> -> memref<1x!tpu.dma_semaphore, #tpu.memory_space<semaphore_mem>>
        %257 = tpu.memref_squeeze %256 : memref<1x!tpu.dma_semaphore, #tpu.memory_space<semaphore_mem>> -> memref<!tpu.dma_semaphore, #tpu.memory_space<semaphore_mem>>
        tpu.enqueue_dma source(%253 : memref<256x256xbf16, #tpu.memory_space<any>>) target(%255 : memref<256x256xbf16, #tpu.memory_space<vmem>>) target_semaphore(%257 : memref<!tpu.dma_semaphore, #tpu.memory_space<semaphore_mem>>)
      } else {
      }
      %c256_i32_167 = arith.constant 256 : i32
      %234 = arith.muli %arg44, %c256_i32_167 : i32
      %235 = tpu.assume_multiple %234, 256 : i32
      %c0_i32_168 = arith.constant 0 : i32
      %236 = tpu.memref_slice %arg34[%c0_i32_168, %235] : memref<256x2048xbf16, #tpu.memory_space<any>> -> memref<256x256xbf16, #tpu.memory_space<any>>
      %c0_i32_169 = arith.constant 0 : i32
      %c0_i32_170 = arith.constant 0 : i32
      %237 = tpu.memref_slice %arg41[%229, %c0_i32_169, %c0_i32_170] : memref<2x256x256xbf16, #tpu.memory_space<vmem>> -> memref<1x256x256xbf16, #tpu.memory_space<vmem>>
      %238 = tpu.memref_squeeze %237 : memref<1x256x256xbf16, #tpu.memory_space<vmem>> -> memref<256x256xbf16, #tpu.memory_space<vmem>>
      %239 = tpu.memref_slice %arg43[%229] : memref<2x!tpu.dma_semaphore, #tpu.memory_space<semaphore_mem>> -> memref<1x!tpu.dma_semaphore, #tpu.memory_space<semaphore_mem>>
      %240 = tpu.memref_squeeze %239 : memref<1x!tpu.dma_semaphore, #tpu.memory_space<semaphore_mem>> -> memref<!tpu.dma_semaphore, #tpu.memory_space<semaphore_mem>>
      tpu.wait_dma2 semaphore(%240 : memref<!tpu.dma_semaphore, #tpu.memory_space<semaphore_mem>>) src(%236 : memref<256x256xbf16, #tpu.memory_space<any>>) dst(%238 : memref<256x256xbf16, #tpu.memory_space<vmem>>)
      %241 = arith.index_cast %229 : i32 to index
      %c0_171 = arith.constant 0 : index
      %c0_172 = arith.constant 0 : index
      %242 = vector.load %arg41[%241, %c0_171, %c0_172] : memref<2x256x256xbf16, #tpu.memory_space<vmem>>, vector<1x256x256xbf16>
      %243 = vector.shape_cast %242 : vector<1x256x256xbf16> to vector<256x256xbf16>
      %cst_173 = arith.constant dense<0.000000e+00> : vector<2x256xf32>
      %244 = tpu.matmul %133, %243, %cst_173 {dimension_numbers = #tpu.dot_dimension_numbers<[1], [0], [0], [1], [0, 0, 1, 1], [], []>} : vector<2x256xbf16>, vector<256x256xbf16>, vector<2x256xf32> -> vector<2x256xf32>
      %c256_i32_174 = arith.constant 256 : i32
      %245 = arith.muli %arg44, %c256_i32_174 : i32
      %246 = tpu.assume_multiple %245, 256 : i32
      %c0_175 = arith.constant 0 : index
      %247 = arith.index_cast %246 : i32 to index
      %248 = vector.load %arg39[%c0_175, %247] : memref<2x2048xf32, #tpu.memory_space<vmem>>, vector<2x256xf32>
      tpu.vector_store %arg39[%c0_175, %247], %244 {strides = array<i32>} : memref<2x2048xf32, #tpu.memory_space<vmem>>, vector<2x256xf32>,
    }
    %c8_i32_93 = arith.constant 8 : i32
    %c0_94 = arith.constant 0 : index
    %c0_95 = arith.constant 0 : index
    %140 = vector.load %arg39[%c0_94, %c0_95] : memref<2x2048xf32, #tpu.memory_space<vmem>>, vector<2x2048xf32>
    %c0_96 = arith.constant 0 : index
    %c0_97 = arith.constant 0 : index
    %141 = vector.load %arg12[%c0_96, %c0_97] : memref<1x2048xf32, #tpu.memory_space<vmem>>, vector<1x2048xf32>
    %142 = vector.broadcast %141 : vector<1x2048xf32> to vector<2x2048xf32>
    %143 = arith.addf %140, %142 : vector<2x2048xf32>
    %c0_98 = arith.constant 0 : index
    %c0_99 = arith.constant 0 : index
    %144 = vector.load %arg13[%c0_98, %c0_99] : memref<1x2048xf32, #tpu.memory_space<vmem>>, vector<1x2048xf32>
    %145 = vector.broadcast %144 : vector<1x2048xf32> to vector<2x2048xf32>
    %146 = arith.mulf %143, %145 : vector<2x2048xf32>
    %c0_100 = arith.constant 0 : index
    %c0_101 = arith.constant 0 : index
    %147 = vector.load %arg14[%c0_100, %c0_101] : memref<1x2048xf32, #tpu.memory_space<vmem>>, vector<1x2048xf32>
    %148 = vector.broadcast %147 : vector<1x2048xf32> to vector<2x2048xf32>
    %149 = arith.addf %146, %148 : vector<2x2048xf32>
    %cst_102 = arith.constant 0.000000e+00 : f32
    %150 = vector.broadcast %cst_102 : f32 to vector<2x2048xf32>
    %151 = arith.maximumf %149, %150 : vector<2x2048xf32>
    %152 = arith.truncf %151 : vector<2x2048xf32> to vector<2x2048xbf16>
    %c0_i32_103 = arith.constant 0 : i32
    %c0_i32_104 = arith.constant 0 : i32
    %c0_i32_105 = arith.constant 0 : i32
    %c0_i32_106 = arith.constant 0 : i32
    %153 = tpu.memref_slice %arg35[%c0_i32_105, %c0_i32_106] : memref<2048x1024xbf16, #tpu.memory_space<any>> -> memref<2048x256xbf16, #tpu.memory_space<any>>
    %c0_i32_107 = arith.constant 0 : i32
    %c0_i32_108 = arith.constant 0 : i32
    %154 = tpu.memref_slice %arg42[%c0_i32_103, %c0_i32_107, %c0_i32_108] : memref<2x2048x256xbf16, #tpu.memory_space<vmem>> -> memref<1x2048x256xbf16, #tpu.memory_space<vmem>>
    %155 = tpu.memref_squeeze %154 : memref<1x2048x256xbf16, #tpu.memory_space<vmem>> -> memref<2048x256xbf16, #tpu.memory_space<vmem>>
    %156 = tpu.memref_slice %arg43[%c0_i32_104] : memref<2x!tpu.dma_semaphore, #tpu.memory_space<semaphore_mem>> -> memref<1x!tpu.dma_semaphore, #tpu.memory_space<semaphore_mem>>
    %157 = tpu.memref_squeeze %156 : memref<1x!tpu.dma_semaphore, #tpu.memory_space<semaphore_mem>> -> memref<!tpu.dma_semaphore, #tpu.memory_space<semaphore_mem>>
    tpu.enqueue_dma source(%153 : memref<2048x256xbf16, #tpu.memory_space<any>>) target(%155 : memref<2048x256xbf16, #tpu.memory_space<vmem>>) target_semaphore(%157 : memref<!tpu.dma_semaphore, #tpu.memory_space<semaphore_mem>>)
    %c0_i32_109 = arith.constant 0 : i32
    %c4_i32 = arith.constant 4 : i32
    %158 = arith.addi %c0_i32_109, %c4_i32 : i32
    %c1_i32_110 = arith.constant 1 : i32
    scf.for %arg44 = %c0_i32_109 to %158 step %c1_i32_110  : i32 {
      %c2_i32_158 = arith.constant 2 : i32
      %c0_i32_159 = arith.constant 0 : i32
      %220 = arith.cmpi eq, %c2_i32_158, %c0_i32_159 : i32
      %c1_i32_160 = arith.constant 1 : i32
      %221 = arith.select %220, %c1_i32_160, %c2_i32_158 : i32
      %222 = arith.remsi %arg44, %221 : i32
      %c0_i32_161 = arith.constant 0 : i32
      %223 = arith.cmpi ne, %222, %c0_i32_161 : i32
      %c0_i32_162 = arith.constant 0 : i32
      %224 = arith.cmpi slt, %222, %c0_i32_162 : i32
      %c0_i32_163 = arith.constant 0 : i32
      %225 = arith.cmpi slt, %221, %c0_i32_163 : i32
      %226 = arith.xori %224, %225 : i1
      %227 = arith.andi %226, %223 : i1
      %228 = arith.addi %222, %221 : i32
      %229 = arith.select %227, %228, %222 : i32
      %c1_i32_164 = arith.constant 1 : i32
      %230 = arith.addi %arg44, %c1_i32_164 : i32
      %c4_i32_165 = arith.constant 4 : i32
      %231 = arith.cmpi slt, %230, %c4_i32_165 : i32
      %232 = arith.extui %231 : i1 to i32
      %c0_i32_166 = arith.constant 0 : i32
      %233 = arith.cmpi ne, %232, %c0_i32_166 : i32
      scf.if %233 {
        %c1_i32_176 = arith.constant 1 : i32
        %249 = arith.addi %arg44, %c1_i32_176 : i32
        %c1_i32_177 = arith.constant 1 : i32
        %250 = arith.subi %c1_i32_177, %229 : i32
        %c256_i32_178 = arith.constant 256 : i32
        %251 = arith.muli %249, %c256_i32_178 : i32
        %252 = tpu.assume_multiple %251, 256 : i32
        %c0_i32_179 = arith.constant 0 : i32
        %253 = tpu.memref_slice %arg35[%c0_i32_179, %252] : memref<2048x1024xbf16, #tpu.memory_space<any>> -> memref<2048x256xbf16, #tpu.memory_space<any>>
        %c0_i32_180 = arith.constant 0 : i32
        %c0_i32_181 = arith.constant 0 : i32
        %254 = tpu.memref_slice %arg42[%250, %c0_i32_180, %c0_i32_181] : memref<2x2048x256xbf16, #tpu.memory_space<vmem>> -> memref<1x2048x256xbf16, #tpu.memory_space<vmem>>
        %255 = tpu.memref_squeeze %254 : memref<1x2048x256xbf16, #tpu.memory_space<vmem>> -> memref<2048x256xbf16, #tpu.memory_space<vmem>>
        %256 = tpu.memref_slice %arg43[%250] : memref<2x!tpu.dma_semaphore, #tpu.memory_space<semaphore_mem>> -> memref<1x!tpu.dma_semaphore, #tpu.memory_space<semaphore_mem>>
        %257 = tpu.memref_squeeze %256 : memref<1x!tpu.dma_semaphore, #tpu.memory_space<semaphore_mem>> -> memref<!tpu.dma_semaphore, #tpu.memory_space<semaphore_mem>>
        tpu.enqueue_dma source(%253 : memref<2048x256xbf16, #tpu.memory_space<any>>) target(%255 : memref<2048x256xbf16, #tpu.memory_space<vmem>>) target_semaphore(%257 : memref<!tpu.dma_semaphore, #tpu.memory_space<semaphore_mem>>)
      } else {
      }
      %c256_i32_167 = arith.constant 256 : i32
      %234 = arith.muli %arg44, %c256_i32_167 : i32
      %235 = tpu.assume_multiple %234, 256 : i32
      %c0_i32_168 = arith.constant 0 : i32
      %236 = tpu.memref_slice %arg35[%c0_i32_168, %235] : memref<2048x1024xbf16, #tpu.memory_space<any>> -> memref<2048x256xbf16, #tpu.memory_space<any>>
      %c0_i32_169 = arith.constant 0 : i32
      %c0_i32_170 = arith.constant 0 : i32
      %237 = tpu.memref_slice %arg42[%229, %c0_i32_169, %c0_i32_170] : memref<2x2048x256xbf16, #tpu.memory_space<vmem>> -> memref<1x2048x256xbf16, #tpu.memory_space<vmem>>
      %238 = tpu.memref_squeeze %237 : memref<1x2048x256xbf16, #tpu.memory_space<vmem>> -> memref<2048x256xbf16, #tpu.memory_space<vmem>>
      %239 = tpu.memref_slice %arg43[%229] : memref<2x!tpu.dma_semaphore, #tpu.memory_space<semaphore_mem>> -> memref<1x!tpu.dma_semaphore, #tpu.memory_space<semaphore_mem>>
      %240 = tpu.memref_squeeze %239 : memref<1x!tpu.dma_semaphore, #tpu.memory_space<semaphore_mem>> -> memref<!tpu.dma_semaphore, #tpu.memory_space<semaphore_mem>>
      tpu.wait_dma2 semaphore(%240 : memref<!tpu.dma_semaphore, #tpu.memory_space<semaphore_mem>>) src(%236 : memref<2048x256xbf16, #tpu.memory_space<any>>) dst(%238 : memref<2048x256xbf16, #tpu.memory_space<vmem>>)
      %241 = arith.index_cast %229 : i32 to index
      %c0_171 = arith.constant 0 : index
      %c0_172 = arith.constant 0 : index
      %242 = vector.load %arg42[%241, %c0_171, %c0_172] : memref<2x2048x256xbf16, #tpu.memory_space<vmem>>, vector<1x2048x256xbf16>
      %243 = vector.shape_cast %242 : vector<1x2048x256xbf16> to vector<2048x256xbf16>
      %cst_173 = arith.constant dense<0.000000e+00> : vector<2x256xf32>
      %244 = tpu.matmul %152, %243, %cst_173 {dimension_numbers = #tpu.dot_dimension_numbers<[1], [0], [0], [1], [0, 0, 1, 1], [], []>} : vector<2x2048xbf16>, vector<2048x256xbf16>, vector<2x256xf32> -> vector<2x256xf32>
      %c256_i32_174 = arith.constant 256 : i32
      %245 = arith.muli %arg44, %c256_i32_174 : i32
      %246 = tpu.assume_multiple %245, 256 : i32
      %c0_175 = arith.constant 0 : index
      %247 = arith.index_cast %246 : i32 to index
      %248 = vector.load %arg40[%c0_175, %247] : memref<2x1024xf32, #tpu.memory_space<vmem>>, vector<2x256xf32>
      tpu.vector_store %arg40[%c0_175, %247], %244 {strides = array<i32>} : memref<2x1024xf32, #tpu.memory_space<vmem>>, vector<2x256xf32>,
    }
    %c4_i32_111 = arith.constant 4 : i32
    %c0_112 = arith.constant 0 : index
    %c0_113 = arith.constant 0 : index
    %159 = vector.load %arg40[%c0_112, %c0_113] : memref<2x1024xf32, #tpu.memory_space<vmem>>, vector<2x1024xf32>
    %c0_114 = arith.constant 0 : index
    %c0_115 = arith.constant 0 : index
    %160 = vector.load %arg15[%c0_114, %c0_115] : memref<1x1024xf32, #tpu.memory_space<vmem>>, vector<1x1024xf32>
    %161 = vector.broadcast %160 : vector<1x1024xf32> to vector<2x1024xf32>
    %162 = arith.addf %159, %161 : vector<2x1024xf32>
    %c0_116 = arith.constant 0 : index
    %c0_117 = arith.constant 0 : index
    %163 = vector.load %arg16[%c0_116, %c0_117] : memref<1x1024xf32, #tpu.memory_space<vmem>>, vector<1x1024xf32>
    %164 = vector.broadcast %163 : vector<1x1024xf32> to vector<2x1024xf32>
    %165 = arith.mulf %162, %164 : vector<2x1024xf32>
    %c0_118 = arith.constant 0 : index
    %c0_119 = arith.constant 0 : index
    %166 = vector.load %arg17[%c0_118, %c0_119] : memref<1x1024xf32, #tpu.memory_space<vmem>>, vector<1x1024xf32>
    %167 = vector.broadcast %166 : vector<1x1024xf32> to vector<2x1024xf32>
    %168 = arith.addf %165, %167 : vector<2x1024xf32>
    %cst_120 = arith.constant 0.000000e+00 : f32
    %169 = vector.broadcast %cst_120 : f32 to vector<2x1024xf32>
    %170 = arith.maximumf %168, %169 : vector<2x1024xf32>
    %171 = arith.truncf %170 : vector<2x1024xf32> to vector<2x1024xbf16>
    %c0_121 = arith.constant 0 : index
    %c0_122 = arith.constant 0 : index
    %172 = vector.load %arg18[%c0_121, %c0_122] : memref<1024x512xbf16, #tpu.memory_space<vmem>>, vector<1024x512xbf16>
    %cst_123 = arith.constant dense<0.000000e+00> : vector<2x512xf32>
    %173 = tpu.matmul %171, %172, %cst_123 {dimension_numbers = #tpu.dot_dimension_numbers<[1], [0], [0], [1], [0, 0, 1, 1], [], []>} : vector<2x1024xbf16>, vector<1024x512xbf16>, vector<2x512xf32> -> vector<2x512xf32>
    %c0_124 = arith.constant 0 : index
    %c0_125 = arith.constant 0 : index
    %174 = vector.load %arg19[%c0_124, %c0_125] : memref<1x512xf32, #tpu.memory_space<vmem>>, vector<1x512xf32>
    %175 = vector.broadcast %174 : vector<1x512xf32> to vector<2x512xf32>
    %176 = arith.addf %173, %175 : vector<2x512xf32>
    %c0_126 = arith.constant 0 : index
    %c0_127 = arith.constant 0 : index
    %177 = vector.load %arg20[%c0_126, %c0_127] : memref<1x512xf32, #tpu.memory_space<vmem>>, vector<1x512xf32>
    %178 = vector.broadcast %177 : vector<1x512xf32> to vector<2x512xf32>
    %179 = arith.mulf %176, %178 : vector<2x512xf32>
    %c0_128 = arith.constant 0 : index
    %c0_129 = arith.constant 0 : index
    %180 = vector.load %arg21[%c0_128, %c0_129] : memref<1x512xf32, #tpu.memory_space<vmem>>, vector<1x512xf32>
    %181 = vector.broadcast %180 : vector<1x512xf32> to vector<2x512xf32>
    %182 = arith.addf %179, %181 : vector<2x512xf32>
    %cst_130 = arith.constant 0.000000e+00 : f32
    %183 = vector.broadcast %cst_130 : f32 to vector<2x512xf32>
    %184 = arith.maximumf %182, %183 : vector<2x512xf32>
    %185 = arith.truncf %184 : vector<2x512xf32> to vector<2x512xbf16>
    %c0_131 = arith.constant 0 : index
    %c0_132 = arith.constant 0 : index
    %186 = vector.load %arg22[%c0_131, %c0_132] : memref<512x256xbf16, #tpu.memory_space<vmem>>, vector<512x256xbf16>
    %cst_133 = arith.constant dense<0.000000e+00> : vector<2x256xf32>
    %187 = tpu.matmul %185, %186, %cst_133 {dimension_numbers = #tpu.dot_dimension_numbers<[1], [0], [0], [1], [0, 0, 1, 1], [], []>} : vector<2x512xbf16>, vector<512x256xbf16>, vector<2x256xf32> -> vector<2x256xf32>
    %c0_134 = arith.constant 0 : index
    %c0_135 = arith.constant 0 : index
    %188 = vector.load %arg23[%c0_134, %c0_135] : memref<1x256xf32, #tpu.memory_space<vmem>>, vector<1x256xf32>
    %189 = vector.broadcast %188 : vector<1x256xf32> to vector<2x256xf32>
    %190 = arith.addf %187, %189 : vector<2x256xf32>
    %c0_136 = arith.constant 0 : index
    %c0_137 = arith.constant 0 : index
    %191 = vector.load %arg24[%c0_136, %c0_137] : memref<1x256xf32, #tpu.memory_space<vmem>>, vector<1x256xf32>
    %192 = vector.broadcast %191 : vector<1x256xf32> to vector<2x256xf32>
    %193 = arith.mulf %190, %192 : vector<2x256xf32>
    %c0_138 = arith.constant 0 : index
    %c0_139 = arith.constant 0 : index
    %194 = vector.load %arg25[%c0_138, %c0_139] : memref<1x256xf32, #tpu.memory_space<vmem>>, vector<1x256xf32>
    %195 = vector.broadcast %194 : vector<1x256xf32> to vector<2x256xf32>
    %196 = arith.addf %193, %195 : vector<2x256xf32>
    %cst_140 = arith.constant 0.000000e+00 : f32
    %197 = vector.broadcast %cst_140 : f32 to vector<2x256xf32>
    %198 = arith.maximumf %196, %197 : vector<2x256xf32>
    %199 = arith.truncf %198 : vector<2x256xf32> to vector<2x256xbf16>
    %c0_141 = arith.constant 0 : index
    %c0_142 = arith.constant 0 : index
    %200 = vector.load %arg26[%c0_141, %c0_142] : memref<256x128xbf16, #tpu.memory_space<vmem>>, vector<256x128xbf16>
    %cst_143 = arith.constant dense<0.000000e+00> : vector<2x128xf32>
    %201 = tpu.matmul %199, %200, %cst_143 {dimension_numbers = #tpu.dot_dimension_numbers<[1], [0], [0], [1], [0, 0, 1, 1], [], []>} : vector<2x256xbf16>, vector<256x128xbf16>, vector<2x128xf32> -> vector<2x128xf32>
    %c0_144 = arith.constant 0 : index
    %c0_145 = arith.constant 0 : index
    %202 = vector.load %arg27[%c0_144, %c0_145] : memref<1x128xf32, #tpu.memory_space<vmem>>, vector<1x128xf32>
    %203 = vector.broadcast %202 : vector<1x128xf32> to vector<2x128xf32>
    %204 = arith.addf %201, %203 : vector<2x128xf32>
    %c0_146 = arith.constant 0 : index
    %c0_147 = arith.constant 0 : index
    %205 = vector.load %arg28[%c0_146, %c0_147] : memref<1x128xf32, #tpu.memory_space<vmem>>, vector<1x128xf32>
    %206 = vector.broadcast %205 : vector<1x128xf32> to vector<2x128xf32>
    %207 = arith.mulf %204, %206 : vector<2x128xf32>
    %c0_148 = arith.constant 0 : index
    %c0_149 = arith.constant 0 : index
    %208 = vector.load %arg29[%c0_148, %c0_149] : memref<1x128xf32, #tpu.memory_space<vmem>>, vector<1x128xf32>
    %209 = vector.broadcast %208 : vector<1x128xf32> to vector<2x128xf32>
    %210 = arith.addf %207, %209 : vector<2x128xf32>
    %cst_150 = arith.constant 0.000000e+00 : f32
    %211 = vector.broadcast %cst_150 : f32 to vector<2x128xf32>
    %212 = arith.maximumf %210, %211 : vector<2x128xf32>
    %213 = arith.truncf %212 : vector<2x128xf32> to vector<2x128xbf16>
    %c0_151 = arith.constant 0 : index
    %c0_152 = arith.constant 0 : index
    %214 = vector.load %arg30[%c0_151, %c0_152] : memref<128x128xbf16, #tpu.memory_space<vmem>>, vector<128x128xbf16>
    %cst_153 = arith.constant dense<0.000000e+00> : vector<2x128xf32>
    %215 = tpu.matmul %213, %214, %cst_153 {dimension_numbers = #tpu.dot_dimension_numbers<[1], [0], [0], [1], [0, 0, 1, 1], [], []>} : vector<2x128xbf16>, vector<128x128xbf16>, vector<2x128xf32> -> vector<2x128xf32>
    %c0_154 = arith.constant 0 : index
    %c0_155 = arith.constant 0 : index
    %216 = vector.load %arg31[%c0_154, %c0_155] : memref<1x128xf32, #tpu.memory_space<vmem>>, vector<1x128xf32>
    %217 = vector.broadcast %216 : vector<1x128xf32> to vector<2x128xf32>
    %218 = arith.addf %215, %217 : vector<2x128xf32>
    %c0_156 = arith.constant 0 : index
    %c0_157 = arith.constant 0 : index
    %219 = vector.load %arg36[%c0_156, %c0_157] : memref<2x128xf32, #tpu.memory_space<vmem>>, vector<2x128xf32>
    tpu.vector_store %arg36[%c0_156, %c0_157], %218 {strides = array<i32>} : memref<2x128xf32, #tpu.memory_space<vmem>>, vector<2x128xf32>,
    return
  }
  func.func @transform_0(%arg0: i32) -> (i32, i32, i32) {
    %c0_i32 = arith.constant 0 : i32
    %c0_i32_0 = arith.constant 0 : i32
    %c0_i32_1 = arith.constant 0 : i32
    %c0_i32_2 = arith.constant 0 : i32
    return %c0_i32, %c0_i32_0, %c0_i32_1 : i32, i32, i32
  }
  func.func @transform_1(%arg0: i32) -> (i32, i32) {
    %c0_i32 = arith.constant 0 : i32
    %c0_i32_0 = arith.constant 0 : i32
    %c0_i32_1 = arith.constant 0 : i32
    return %c0_i32, %c0_i32_0 : i32, i32
  }
  func.func @transform_2(%arg0: i32) -> (i32, i32) {
    %c0_i32 = arith.constant 0 : i32
    %c0_i32_0 = arith.constant 0 : i32
    %c0_i32_1 = arith.constant 0 : i32
    return %c0_i32, %c0_i32_0 : i32, i32
  }
  func.func @transform_3(%arg0: i32) -> (i32, i32) {
    %c0_i32 = arith.constant 0 : i32
    %c0_i32_0 = arith.constant 0 : i32
    %c0_i32_1 = arith.constant 0 : i32
    return %c0_i32, %c0_i32_0 : i32, i32
  }
  func.func @transform_4(%arg0: i32) -> (i32, i32) {
    %c0_i32 = arith.constant 0 : i32
    %c0_i32_0 = arith.constant 0 : i32
    %c0_i32_1 = arith.constant 0 : i32
    return %c0_i32, %c0_i32_0 : i32, i32
  }
  func.func @transform_5(%arg0: i32) -> (i32, i32) {
    %c0_i32 = arith.constant 0 : i32
    %c0_i32_0 = arith.constant 0 : i32
    %c0_i32_1 = arith.constant 0 : i32
    return %c0_i32, %c0_i32_0 : i32, i32
  }
  func.func @transform_6(%arg0: i32) -> (i32, i32) {
    %c0_i32 = arith.constant 0 : i32
    %c0_i32_0 = arith.constant 0 : i32
    %c0_i32_1 = arith.constant 0 : i32
    return %c0_i32, %c0_i32_0 : i32, i32
  }
  func.func @transform_7(%arg0: i32) -> (i32, i32) {
    %c0_i32 = arith.constant 0 : i32
    %c0_i32_0 = arith.constant 0 : i32
    %c0_i32_1 = arith.constant 0 : i32
    return %c0_i32, %c0_i32_0 : i32, i32
  }
  func.func @transform_8(%arg0: i32) -> (i32, i32) {
    %c0_i32 = arith.constant 0 : i32
    %c0_i32_0 = arith.constant 0 : i32
    %c0_i32_1 = arith.constant 0 : i32
    return %c0_i32, %c0_i32_0 : i32, i32
  }
  func.func @transform_9(%arg0: i32) -> (i32, i32) {
    %c0_i32 = arith.constant 0 : i32
    %c0_i32_0 = arith.constant 0 : i32
    %c0_i32_1 = arith.constant 0 : i32
    return %c0_i32, %c0_i32_0 : i32, i32
  }
  func.func @transform_10(%arg0: i32) -> (i32, i32) {
    %c0_i32 = arith.constant 0 : i32
    %c0_i32_0 = arith.constant 0 : i32
    %c0_i32_1 = arith.constant 0 : i32
    return %c0_i32, %c0_i32_0 : i32, i32
  }
  func.func @transform_11(%arg0: i32) -> (i32, i32) {
    %c0_i32 = arith.constant 0 : i32
    %c0_i32_0 = arith.constant 0 : i32
    %c0_i32_1 = arith.constant 0 : i32
    return %c0_i32, %c0_i32_0 : i32, i32
  }
  func.func @transform_12(%arg0: i32) -> (i32, i32) {
    %c0_i32 = arith.constant 0 : i32
    %c0_i32_0 = arith.constant 0 : i32
    %c0_i32_1 = arith.constant 0 : i32
    return %c0_i32, %c0_i32_0 : i32, i32
  }
  func.func @transform_13(%arg0: i32) -> (i32, i32) {
    %c0_i32 = arith.constant 0 : i32
    %c0_i32_0 = arith.constant 0 : i32
    %c0_i32_1 = arith.constant 0 : i32
    return %c0_i32, %c0_i32_0 : i32, i32
  }
  func.func @transform_14(%arg0: i32) -> (i32, i32) {
    %c0_i32 = arith.constant 0 : i32
    %c0_i32_0 = arith.constant 0 : i32
    %c0_i32_1 = arith.constant 0 : i32
    return %c0_i32, %c0_i32_0 : i32, i32
  }
  func.func @transform_15(%arg0: i32) -> (i32, i32) {
    %c0_i32 = arith.constant 0 : i32
    %c0_i32_0 = arith.constant 0 : i32
    %c0_i32_1 = arith.constant 0 : i32
    return %c0_i32, %c0_i32_0 : i32, i32
  }
  func.func @transform_16(%arg0: i32) -> (i32, i32) {
    %c0_i32 = arith.constant 0 : i32
    %c0_i32_0 = arith.constant 0 : i32
    %c0_i32_1 = arith.constant 0 : i32
    return %c0_i32, %c0_i32_0 : i32, i32
  }
  func.func @transform_17(%arg0: i32) -> (i32, i32) {
    %c0_i32 = arith.constant 0 : i32
    %c0_i32_0 = arith.constant 0 : i32
    %c0_i32_1 = arith.constant 0 : i32
    return %c0_i32, %c0_i32_0 : i32, i32
  }
  func.func @transform_18(%arg0: i32) -> (i32, i32) {
    %c0_i32 = arith.constant 0 : i32
    %c0_i32_0 = arith.constant 0 : i32
    %c0_i32_1 = arith.constant 0 : i32
    return %c0_i32, %c0_i32_0 : i32, i32
  }
  func.func @transform_19(%arg0: i32) -> (i32, i32) {
    %c0_i32 = arith.constant 0 : i32
    %c0_i32_0 = arith.constant 0 : i32
    %c0_i32_1 = arith.constant 0 : i32
    return %c0_i32, %c0_i32_0 : i32, i32
  }
  func.func @transform_20(%arg0: i32) -> (i32, i32) {
    %c0_i32 = arith.constant 0 : i32
    %c0_i32_0 = arith.constant 0 : i32
    %c0_i32_1 = arith.constant 0 : i32
    return %c0_i32, %c0_i32_0 : i32, i32
  }
  func.func @transform_21(%arg0: i32) -> (i32, i32) {
    %c0_i32 = arith.constant 0 : i32
    %c0_i32_0 = arith.constant 0 : i32
    %c0_i32_1 = arith.constant 0 : i32
    return %c0_i32, %c0_i32_0 : i32, i32
  }
  func.func @transform_22(%arg0: i32) -> (i32, i32) {
    %c0_i32 = arith.constant 0 : i32
    %c0_i32_0 = arith.constant 0 : i32
    %c0_i32_1 = arith.constant 0 : i32
    return %c0_i32, %c0_i32_0 : i32, i32
  }
  func.func @transform_23(%arg0: i32) -> (i32, i32) {
    %c0_i32 = arith.constant 0 : i32
    %c0_i32_0 = arith.constant 0 : i32
    %c0_i32_1 = arith.constant 0 : i32
    return %c0_i32, %c0_i32_0 : i32, i32
  }
  func.func @transform_24(%arg0: i32) -> (i32, i32) {
    %c0_i32 = arith.constant 0 : i32
    %c0_i32_0 = arith.constant 0 : i32
    %c0_i32_1 = arith.constant 0 : i32
    return %c0_i32, %c0_i32_0 : i32, i32
  }
  func.func @transform_25(%arg0: i32) -> (i32, i32) {
    %c0_i32 = arith.constant 0 : i32
    %c0_i32_0 = arith.constant 0 : i32
    %c0_i32_1 = arith.constant 0 : i32
    return %c0_i32, %c0_i32_0 : i32, i32
  }
  func.func @transform_26(%arg0: i32) -> (i32, i32) {
    %c0_i32 = arith.constant 0 : i32
    %c0_i32_0 = arith.constant 0 : i32
    %c0_i32_1 = arith.constant 0 : i32
    return %c0_i32, %c0_i32_0 : i32, i32
  }
  func.func @transform_27(%arg0: i32) -> (i32, i32) {
    %c0_i32 = arith.constant 0 : i32
    %c0_i32_0 = arith.constant 0 : i32
    %c0_i32_1 = arith.constant 0 : i32
    return %c0_i32, %c0_i32_0 : i32, i32
  }
  func.func @transform_28(%arg0: i32) -> (i32, i32) {
    %c0_i32 = arith.constant 0 : i32
    %c0_i32_0 = arith.constant 0 : i32
    %c0_i32_1 = arith.constant 0 : i32
    return %c0_i32, %c0_i32_0 : i32, i32
  }
  func.func @transform_29(%arg0: i32) -> (i32, i32) {
    %c0_i32 = arith.constant 0 : i32
    %c0_i32_0 = arith.constant 0 : i32
    %c0_i32_1 = arith.constant 0 : i32
    return %c0_i32, %c0_i32_0 : i32, i32
  }
  func.func @transform_30(%arg0: i32) -> (i32, i32) {
    %c0_i32 = arith.constant 0 : i32
    %c0_i32_0 = arith.constant 0 : i32
    %c0_i32_1 = arith.constant 0 : i32
    return %c0_i32, %c0_i32_0 : i32, i32
  }
  func.func @transform_35(%arg0: i32) -> (i32, i32) {
    %c0_i32 = arith.constant 0 : i32
    %c0_i32_0 = arith.constant 0 : i32
    %c0_i32_1 = arith.constant 0 : i32
    return %c0_i32, %c0_i32_0 : i32, i32
  }
}

</mosaic_0001>

<bundles_post_ra>
// kernel: tpu_custom_call.1
= control target key start
LH: loop header
LB: loop body
LE: loop exit
PB: predicated region body
PF: predicated region fallthrough
CT: control target
= control target key end

     0   :  { %s11917_s6 = smov 1   ;;  %s11918_s10 = smov 2   ;;  %s13471_s0 = inlined_call_operand.smem [shape: u32[36], index: -1, kind: input, shape index: {}] }
   0x1   :  { %s12011_s5 = sld [smem:[%s13471_s0]]   ;;  %s11919_s14 = smov 3  }
   0x2   :  { %s12016_s9 = sld [smem:[%s13471_s0 + %s11917_s6]]   ;;  %s11920_s18 = smov 4  }
   0x3   :  { %s12021_s13 = sld [smem:[%s13471_s0 + %s11918_s10]]   ;;  %s11921_s22 = smov 5  }
   0x4   :  { %s12026_s17 = sld [smem:[%s13471_s0 + %s11919_s14]]   ;;  %s11922_s26 = smov 6  }
   0x5   :  { %s12031_s21 = sld [smem:[%s13471_s0 + %s11920_s18]]   ;;  %s11923_s30 = smov 7  }
   0x6   :  { %s12036_s25 = sld [smem:[%s13471_s0 + %s11921_s22]]   ;;  %s11924_s4 = smov 8  }
   0x7   :  { %13490 = sst [smem:[#allocation89_spill]] %s12011_s5  ;;  %s11925_s10 = smov 9  }
   0x8   :  { %s12041_s29 = sld [smem:[%s13471_s0 + %s11922_s26]]   ;;  %s11926_s15 = smov 10  }
   0x9   :  { %13491 = sst [smem:[#allocation90_spill]] %s12021_s13  ;;  %s11927_s20 = smov 11  }
   0xa   :  { %s12046_s3 = sld [smem:[%s13471_s0 + %s11923_s30]]   ;;  %s11928_s26 = smov 12  }
   0xb   :  { %13492 = sst [smem:[#allocation91_spill]] %s12031_s21  ;;  %s11929_s1 = smov 13  }
   0xc   :  { %s12051_s8 = sld [smem:[%s13471_s0 + %s11924_s4]]   ;;  %s11930_s7 = smov 14  }
   0xd   :  { %s12056_s14 = sld [smem:[%s13471_s0 + %s11925_s10]]   ;;  %s11932_s22 = smov 16  }
   0xe   :  { %13493 = sst [smem:[#allocation92_spill]] %s12041_s29  ;;  %s11933_s28 = smov 17  }
   0xf   :  { %s12061_s19 = sld [smem:[%s13471_s0 + %s11926_s15]]   ;;  %s11931_s15 = smov 15  }
  0x10   :  { %s12066_s24 = sld [smem:[%s13471_s0 + %s11927_s20]]  }
  0x11   :  { %s12071_s30 = sld [smem:[%s13471_s0 + %s11928_s26]]  }
  0x12   :  { %13494 = sst [smem:[#allocation93_spill]] %s12051_s8 }
  0x13   :  { %s12076_s6 = sld [smem:[%s13471_s0 + %s11929_s1]]  }
  0x14   :  { %s12081_s12 = sld [smem:[%s13471_s0 + %s11930_s7]]   ;;  %s11934_s7 = smov 18  }
  0x15   :  { %13495 = sst [smem:[#allocation94_spill]] %s12061_s19 }
  0x16   :  { %s12086_s20 = sld [smem:[%s13471_s0 + %s11931_s15]]   ;;  %s11935_s15 = smov 19  }
  0x17   :  { %13496 = sst [smem:[#allocation95_spill]] %s12071_s30 }
  0x18   :  { %s12091_s27 = sld [smem:[%s13471_s0 + %s11932_s22]]   ;;  %s11936_s22 = smov 20  }
  0x19   :  { %s12096_s4 = sld [smem:[%s13471_s0 + %s11933_s28]]   ;;  %s11937_s28 = smov 21  }
  0x1a   :  { %13497 = sst [smem:[#allocation96_spill]] %s12081_s12 }
  0x1b   :  { %s12101_s12 = sld [smem:[%s13471_s0 + %s11934_s7]]   ;;  %s11938_s7 = smov 22  }
  0x1c   :  { %s12106_s30 = sld [smem:[%s13471_s0 + %s11935_s15]]   ;;  %s11939_s15 = smov 23  }
  0x1d   :  { %s12116_s19 = sld [smem:[%s13471_s0 + %s11937_s28]]   ;;  %s11941_s28 = smov 25  }
  0x1e   :  { %13498 = sst [smem:[#allocation97_spill]] %s12091_s27 }
  0x1f   :  { %s12111_s27 = sld [smem:[%s13471_s0 + %s11936_s22]]   ;;  %s11940_s22 = smov 24  }
  0x20   :  { %s12126_s8 = sld [smem:[%s13471_s0 + %s11939_s15]]   ;;  %s11943_s15 = smov 27  }
  0x21   :  { %13499 = sst [smem:[#allocation98_spill]] %s12101_s12 }
  0x22   :  { %s12121_s12 = sld [smem:[%s13471_s0 + %s11938_s7]]   ;;  %s11942_s7 = smov 26  }
  0x23   :  { %s12136_s29 = sld [smem:[%s13471_s0 + %s11941_s28]]   ;;  %s11945_s28 = smov 29  }
  0x24   :  { %s12146_s21 = sld [smem:[%s13471_s0 + %s11943_s15]]   ;;  %s11947_s15 = smov 31  }
  0x25   :  { %13500 = sst [smem:[#allocation99_spill]] %s12111_s27 }
  0x26   :  { %s12131_s27 = sld [smem:[%s13471_s0 + %s11940_s22]]   ;;  %s11944_s22 = smov 28  }
  0x27   :  { %s12156_s13 = sld [smem:[%s13471_s0 + %s11945_s28]]   ;;  %s11949_s28 = smov 33  }
  0x28   :  { %13501 = sst [smem:[#allocation100_spill]] %s12121_s12 }
  0x29   :  { %s12141_s12 = sld [smem:[%s13471_s0 + %s11942_s7]]   ;;  %s11946_s7 = smov 30  }
  0x2a   :  { %s12166_s5 = sld [smem:[%s13471_s0 + %s11947_s15]]   ;;  %s11951_s15 = smov 35  }
  0x2c   :  { %13502 = sst [smem:[#allocation101_spill]] %s12131_s27 }
  0x2d   :  { %s12151_s27 = sld [smem:[%s13471_s0 + %s11944_s22]]   ;;  %s11948_s22 = smov 32  }
  0x2e   :  { %13505 = sst [smem:[#allocation104_spill]] %s12156_s13 }
  0x2f   :  { %13503 = sst [smem:[#allocation102_spill]] %s12141_s12 }
  0x30   :  { %s12161_s12 = sld [smem:[%s13471_s0 + %s11946_s7]]   ;;  %s11950_s7 = smov 34  }
  0x31   :  { %13507 = sst [smem:[#allocation106_spill]] %s12166_s5 }
  0x32   :  { %s12176_s13 = sld [smem:[%s13471_s0 + %s11949_s28]]  }
  0x33   :  { %13504 = sst [smem:[#allocation103_spill]] %s12151_s27 }
  0x34   :  { %s12171_s27 = sld [smem:[%s13471_s0 + %s11948_s22]]  }
  0x35   :  { %s12186_s5 = sld [smem:[%s13471_s0 + %s11951_s15]]  }
  0x36   :  { %13506 = sst [smem:[#allocation105_spill]] %s12161_s12 }
  0x37   :  { %s12181_s12 = sld [smem:[%s13471_s0 + %s11950_s7]]  }
  0x38   :  { %76 = vsyncpa [#allocation10], 0 }
  0x39   :  { %77 = vsyncpa [#allocation13], 0 }
  0x3a   :  { %78 = vsyncpa [#allocation16], 0 }
  0x3b   :  { %79 = vsyncpa [#allocation19], 0 }
  0x3c   :  { %80 = vsyncpa [#allocation22], 0 }
  0x3d   :  { %81 = vsyncpa [#allocation25], 0 }
  0x3e   :  { %82 = vsyncpa [#allocation28], 0 }
  0x3f   :  { %83 = vsyncpa [#allocation31], 0 }
  0x40   :  { %84 = vsyncpa [#allocation34], 0 }
  0x41   :  { %85 = vsyncpa [#allocation37], 0 }
  0x42   :  { %86 = vsyncpa [#allocation40], 0 }
  0x43   :  { %87 = vsyncpa [#allocation43], 0 }
  0x44   :  { %88 = vsyncpa [#allocation46], 0 }
  0x45   :  { %89 = vsyncpa [#allocation49], 0 }
  0x46   :  { %90 = vsyncpa [#allocation52], 0 }
  0x47   :  { %91 = vsyncpa [#allocation55], 0  ;;  %s111_s22 = sshll.u32 %s12016_s9, 4  ;;  %s112_s22 = int_to_ptr.hbm [resolvable:$true] %s111_s22 }
  0x48   :  { %92 = vsyncpa [#allocation11], 0  ;;  %s11952_s0 = smov [#allocation12]   ;;  %s133_s26 = sshll.u32 %s12026_s17, 4  ;;  %s134_s26 = int_to_ptr.hbm [resolvable:$true] %s133_s26 }
  0x49   :  { %s113_s23 = sshll.u32 %s11952_s0, 4  ;;  %s10939_s28 = sshra.s32 %s112_s22, 4  ;;  %s114_s23 = int_to_ptr.vmem [resolvable:$true] %s113_s23  ;;  %s10940_s28 = int_to_ptr.hbm [resolvable:$true] %s10939_s28 }
  0x4a   :  { %s10941_s1 = scalar_lea.hbm %s10940_s28, 8  ;;  %s10943_s2 = scalar_lea.hbm %s12016_s9, 8 }
  0x4b   :  { %p10942_p0 = scmp.ne.s32.totalorder %s10940_s28, %s10941_s1  ;;  %p10944_p1 = scmp.lt.s32.totalorder %s10940_s28, %s12016_s9 }
  0x4c   :  { %p10945_p2 = scmp.lt.s32.totalorder %s10943_s2, %s10941_s1 }
  0x4e   :  { %p10946_p3 = por %p10945_p2, %p10944_p1 }
  0x50   :  { %p10947_p4 = pnand %p10946_p3, %p10942_p0 }
  0x52   :  { %10950 = shalt.err (!%p10947_p4)
}
  0x53   :  { %116 = dma.hbm_to_vmem [thread:$0]  %s112_s22, 128, %s114_s23, [#allocation13]  }
  0x54   :  { %s11953_s7 = smov [#allocation15]   ;;  %s155_s11 = sshll.u32 %s12036_s25, 4  ;;  %s156_s11 = int_to_ptr.hbm [resolvable:$true] %s155_s11 }
  0x55   :  { %s135_s10 = sshll.u32 %s11953_s7, 4  ;;  %s10963_s15 = sshra.s32 %s134_s26, 4  ;;  %s136_s10 = int_to_ptr.vmem [resolvable:$true] %s135_s10  ;;  %s10964_s15 = int_to_ptr.hbm [resolvable:$true] %s10963_s15 }
  0x56   :  { %s10965_s16 = scalar_lea.hbm %s10964_s15, 2  ;;  %s10967_s18 = scalar_lea.hbm %s12026_s17, 2 }
  0x57   :  { %p10966_p5 = scmp.ne.s32.totalorder %s10964_s15, %s10965_s16  ;;  %p10968_p6 = scmp.lt.s32.totalorder %s10964_s15, %s12026_s17 }
  0x58   :  { %p10969_p7 = scmp.lt.s32.totalorder %s10967_s18, %s10965_s16 }
  0x5a   :  { %p10970_p8 = por %p10969_p7, %p10968_p6 }
  0x5c   :  { %p10971_p9 = pnand %p10970_p8, %p10966_p5 }
  0x5e   :  { %10974 = shalt.err (!%p10971_p9)
}
  0x5f   :  { %138 = dma.hbm_to_vmem [thread:$0]  %s134_s26, 32, %s136_s10, [#allocation16]  }
  0x60   :  { %s176_s9 = sshll.u32 %s12046_s3, 4  ;;  %s11954_s22 = smov [#allocation18]   ;;  %s12196_s9 = int_to_ptr.hbm [resolvable:$true] %s176_s9 }
  0x61   :  { %s157_s0 = sshll.u32 %s11954_s22, 4  ;;  %s10987_s23 = sshra.s32 %s156_s11, 4  ;;  %s158_s0 = int_to_ptr.vmem [resolvable:$true] %s157_s0  ;;  %s10988_s23 = int_to_ptr.hbm [resolvable:$true] %s10987_s23 }
  0x62   :  { %s10989_s28 = scalar_lea.hbm %s10988_s23, 2  ;;  %s10991_s1 = scalar_lea.hbm %s12036_s25, 2 }
  0x63   :  { %p10990_p10 = scmp.ne.s32.totalorder %s10988_s23, %s10989_s28  ;;  %p10992_p11 = scmp.lt.s32.totalorder %s10988_s23, %s12036_s25 }
  0x64   :  { %p10993_p12 = scmp.lt.s32.totalorder %s10991_s1, %s10989_s28 }
  0x66   :  { %p10994_p13 = por %p10993_p12, %p10992_p11 }
  0x68   :  { %p10995_p0 = pnand %p10994_p13, %p10990_p10 }
  0x6a   :  { %10998 = shalt.err (!%p10995_p0)
}
  0x6b   :  { %160 = dma.hbm_to_vmem [thread:$0]  %s156_s11, 32, %s158_s0, [#allocation19]  }
  0x6c   :  { %s11955_s17 = smov [#allocation21]   ;;  %s11011_s2 = sshra.s32 %s12196_s9, 4  ;;  %s11012_s2 = int_to_ptr.hbm [resolvable:$true] %s11011_s2 }
  0x6d   :  { %s178_s26 = sshll.u32 %s11955_s17, 4  ;;  %s11013_s7 = scalar_lea.hbm %s11012_s2, 128  ;;  %s179_s26 = int_to_ptr.vmem [resolvable:$true] %s178_s26 }
  0x6e   :  { %p11014_p1 = scmp.ne.s32.totalorder %s11012_s2, %s11013_s7  ;;  %s11015_s10 = scalar_lea.hbm %s12046_s3, 128 }
  0x6f   :  { %p11016_p2 = scmp.lt.s32.totalorder %s11012_s2, %s12046_s3  ;;  %p11017_p3 = scmp.lt.s32.totalorder %s11015_s10, %s11013_s7 }
  0x71   :  { %p11018_p4 = por %p11017_p3, %p11016_p2 }
  0x73   :  { %p11019_p5 = pnand %p11018_p4, %p11014_p1 }
  0x75   :  { %11022 = shalt.err (!%p11019_p5)
}
  0x76   :  { %s11956_s25 = smov 64   ;;  %s11957_s11 = smov 4  }
  0x77   :  { %184 = dma.hbm_to_vmem [thread:$0]  %s12196_s9, 2048, %s179_s26, [#allocation22], %s11956_s25, %s11956_s25, %s11957_s11  }
  0x78   :  { %s200_s15 = sshll.u32 %s12056_s14, 4  ;;  %s11958_s16 = smov [#allocation24]   ;;  %s201_s15 = int_to_ptr.hbm [resolvable:$true] %s200_s15 }
  0x79   :  { %s202_s18 = sshll.u32 %s11958_s16, 4  ;;  %s225_s3 = sshll.u32 %s12066_s24, 4  ;;  %s203_s18 = int_to_ptr.vmem [resolvable:$true] %s202_s18  ;;  %s226_s3 = int_to_ptr.hbm [resolvable:$true] %s225_s3 }
  0x7a   :  { %s11035_s22 = sshra.s32 %s201_s15, 4  ;;  %s11039_s23 = scalar_lea.hbm %s12056_s14, 128  ;;  %s11036_s22 = int_to_ptr.hbm [resolvable:$true] %s11035_s22 }
  0x7b   :  { %s11037_s0 = scalar_lea.hbm %s11036_s22, 128  ;;  %p11040_p7 = scmp.lt.s32.totalorder %s11036_s22, %s12056_s14 }
  0x7c   :  { %p11038_p6 = scmp.ne.s32.totalorder %s11036_s22, %s11037_s0  ;;  %p11041_p8 = scmp.lt.s32.totalorder %s11039_s23, %s11037_s0 }
  0x7e   :  { %p11042_p9 = por %p11041_p8, %p11040_p7 }
  0x80   :  { %p11043_p10 = pnand %p11042_p9, %p11038_p6 }
  0x82   :  { %11046 = shalt.err (!%p11043_p10)
}
  0x83   :  { %s11959_s28 = smov 128   ;;  %s11960_s9 = smov 8  }
  0x84   :  { %208 = dma.hbm_to_vmem [thread:$0]  %s201_s15, 2048, %s203_s18, [#allocation25], %s11959_s28, %s11959_s28, %s11960_s9  }
  0x85   :  { %s11961_s1 = smov [#allocation27]   ;;  %s247_s26 = sshll.u32 %s12076_s6, 4  ;;  %s248_s26 = int_to_ptr.hbm [resolvable:$true] %s247_s26 }
  0x86   :  { %s227_s17 = sshll.u32 %s11961_s1, 4  ;;  %s11059_s14 = sshra.s32 %s226_s3, 4  ;;  %s228_s17 = int_to_ptr.vmem [resolvable:$true] %s227_s17  ;;  %s11060_s14 = int_to_ptr.hbm [resolvable:$true] %s11059_s14 }
  0x87   :  { %s11061_s2 = scalar_lea.hbm %s11060_s14, 16  ;;  %s11063_s7 = scalar_lea.hbm %s12066_s24, 16 }
  0x88   :  { %p11062_p11 = scmp.ne.s32.totalorder %s11060_s14, %s11061_s2  ;;  %p11064_p12 = scmp.lt.s32.totalorder %s11060_s14, %s12066_s24 }
  0x89   :  { %p11065_p13 = scmp.lt.s32.totalorder %s11063_s7, %s11061_s2 }
  0x8b   :  { %p11066_p0 = por %p11065_p13, %p11064_p12 }
  0x8d   :  { %p11067_p1 = pnand %p11066_p0, %p11062_p11 }
  0x8f   :  { %11070 = shalt.err (!%p11067_p1)
}
  0x90   :  { %230 = dma.hbm_to_vmem [thread:$0]  %s226_s3, 256, %s228_s17, [#allocation28]  }
  0x91   :  { %s269_s10 = sshll.u32 %s12086_s20, 4  ;;  %s11962_s15 = smov [#allocation30]   ;;  %s270_s10 = int_to_ptr.hbm [resolvable:$true] %s269_s10 }
  0x92   :  { %s249_s16 = sshll.u32 %s11962_s15, 4  ;;  %s11083_s18 = sshra.s32 %s248_s26, 4  ;;  %s250_s16 = int_to_ptr.vmem [resolvable:$true] %s249_s16  ;;  %s11084_s18 = int_to_ptr.hbm [resolvable:$true] %s11083_s18 }
  0x93   :  { %s11085_s22 = scalar_lea.hbm %s11084_s18, 16  ;;  %s11087_s0 = scalar_lea.hbm %s12076_s6, 16 }
  0x94   :  { %p11086_p2 = scmp.ne.s32.totalorder %s11084_s18, %s11085_s22  ;;  %p11088_p3 = scmp.lt.s32.totalorder %s11084_s18, %s12076_s6 }
  0x95   :  { %p11089_p4 = scmp.lt.s32.totalorder %s11087_s0, %s11085_s22 }
  0x97   :  { %p11090_p5 = por %p11089_p4, %p11088_p3 }
  0x99   :  { %p11091_p6 = pnand %p11090_p5, %p11086_p2 }
  0x9b   :  { %11094 = shalt.err (!%p11091_p6)
}
  0x9c   :  { %252 = dma.hbm_to_vmem [thread:$0]  %s248_s26, 256, %s250_s16, [#allocation31]  }
  0x9d   :  { %s11963_s24 = smov [#allocation33]   ;;  %s11107_s23 = sshra.s32 %s270_s10, 4  ;;  %s11108_s23 = int_to_ptr.hbm [resolvable:$true] %s11107_s23 }
  0x9e   :  { %s271_s3 = sshll.u32 %s11963_s24, 4  ;;  %s11109_s1 = scalar_lea.hbm %s11108_s23, 8  ;;  %s272_s3 = int_to_ptr.vmem [resolvable:$true] %s271_s3 }
  0x9f   :  { %p11110_p7 = scmp.ne.s32.totalorder %s11108_s23, %s11109_s1  ;;  %s11111_s17 = scalar_lea.hbm %s12086_s20, 8 }
  0xa0   :  { %p11112_p8 = scmp.lt.s32.totalorder %s11108_s23, %s12086_s20  ;;  %p11113_p9 = scmp.lt.s32.totalorder %s11111_s17, %s11109_s1 }
  0xa2   :  { %p11114_p10 = por %p11113_p9, %p11112_p8 }
  0xa4   :  { %p11115_p11 = pnand %p11114_p10, %p11110_p7 }
  0xa6   :  { %11118 = shalt.err (!%p11115_p11)
}
  0xa7   :  { %274 = dma.hbm_to_vmem [thread:$0]  %s270_s10, 128, %s272_s3, [#allocation34]  }
  0xa8   :  { %s290_s6 = sshll.u32 %s12096_s4, 4  ;;  %s11964_s26 = smov [#allocation36]   ;;  %s291_s6 = int_to_ptr.hbm [resolvable:$true] %s290_s6 }
  0xa9   :  { %s292_s14 = sshll.u32 %s11964_s26, 4  ;;  %s315_s2 = sshll.u32 %s12106_s30, 4  ;;  %s293_s14 = int_to_ptr.vmem [resolvable:$true] %s292_s14  ;;  %s316_s2 = int_to_ptr.hbm [resolvable:$true] %s315_s2 }
  0xaa   :  { %s11131_s7 = sshra.s32 %s291_s6, 4  ;;  %s11135_s20 = scalar_lea.hbm %s12096_s4, 2048  ;;  %s11132_s7 = int_to_ptr.hbm [resolvable:$true] %s11131_s7 }
  0xab   :  { %s11133_s15 = scalar_lea.hbm %s11132_s7, 2048  ;;  %p11136_p13 = scmp.lt.s32.totalorder %s11132_s7, %s12096_s4 }
  0xac   :  { %p11134_p12 = scmp.ne.s32.totalorder %s11132_s7, %s11133_s15  ;;  %p11137_p0 = scmp.lt.s32.totalorder %s11135_s20, %s11133_s15 }
  0xae   :  { %p11138_p1 = por %p11137_p0, %p11136_p13 }
  0xb0   :  { %p11139_p2 = pnand %p11138_p1, %p11134_p12 }
  0xb2   :  { %11142 = shalt.err (!%p11139_p2)
}
  0xb3   :  { %s11965_s10 = smov 256   ;;  %s11966_s16 = smov 16  }
  0xb4   :  { %298 = dma.hbm_to_vmem [thread:$0]  %s291_s6, 32768, %s293_s14, [#allocation37], %s11965_s10, %s11965_s10, %s11966_s16  }
  0xb5   :  { %s11967_s18 = smov [#allocation39]   ;;  %s336_s0 = sshll.u32 %s12116_s19, 4  ;;  %s12230_s0 = int_to_ptr.hbm [resolvable:$true] %s336_s0 }
  0xb6   :  { %s317_s22 = sshll.u32 %s11967_s18, 4  ;;  %s11155_s4 = sshra.s32 %s316_s2, 4  ;;  %s318_s22 = int_to_ptr.vmem [resolvable:$true] %s317_s22  ;;  %s11156_s4 = int_to_ptr.hbm [resolvable:$true] %s11155_s4 }
  0xb7   :  { %s11157_s24 = scalar_lea.hbm %s11156_s4, 4  ;;  %s11159_s3 = scalar_lea.hbm %s12106_s30, 4 }
  0xb8   :  { %p11158_p3 = scmp.ne.s32.totalorder %s11156_s4, %s11157_s24  ;;  %p11160_p4 = scmp.lt.s32.totalorder %s11156_s4, %s12106_s30 }
  0xb9   :  { %p11161_p5 = scmp.lt.s32.totalorder %s11159_s3, %s11157_s24 }
  0xbb   :  { %p11162_p6 = por %p11161_p5, %p11160_p4 }
  0xbd   :  { %p11163_p7 = pnand %p11162_p6, %p11158_p3 }
  0xbf   :  { %11166 = shalt.err (!%p11163_p7)
}
  0xc0   :  { %320 = dma.hbm_to_vmem [thread:$0]  %s316_s2, 64, %s318_s22, [#allocation40]  }
  0xc1   :  { %s361_s23 = sshll.u32 %s12126_s8, 4  ;;  %s11968_s1 = smov [#allocation42]   ;;  %s362_s23 = int_to_ptr.hbm [resolvable:$true] %s361_s23 }
  0xc2   :  { %s338_s17 = sshll.u32 %s11968_s1, 4  ;;  %s11179_s6 = sshra.s32 %s12230_s0, 4  ;;  %s339_s17 = int_to_ptr.vmem [resolvable:$true] %s338_s17  ;;  %s11180_s6 = int_to_ptr.hbm [resolvable:$true] %s11179_s6 }
  0xc3   :  { %s11181_s26 = scalar_lea.hbm %s11180_s6, 512  ;;  %s11183_s14 = scalar_lea.hbm %s12116_s19, 512 }
  0xc4   :  { %p11182_p8 = scmp.ne.s32.totalorder %s11180_s6, %s11181_s26  ;;  %p11184_p9 = scmp.lt.s32.totalorder %s11180_s6, %s12116_s19 }
  0xc5   :  { %p11185_p10 = scmp.lt.s32.totalorder %s11183_s14, %s11181_s26 }
  0xc7   :  { %p11186_p11 = por %p11185_p10, %p11184_p9 }
  0xc9   :  { %p11187_p12 = pnand %p11186_p11, %p11182_p8 }
  0xcb   :  { %11190 = shalt.err (!%p11187_p12)
}
  0xcc   :  { %344 = dma.hbm_to_vmem [thread:$0]  %s12230_s0, 8192, %s339_s17, [#allocation43], %s11959_s28, %s11959_s28, %s11960_s9  }
  0xcd   :  { %s11969_s30 = smov [#allocation45]   ;;  %s382_s7 = sshll.u32 %s12136_s29, 4  ;;  %s12243_s7 = int_to_ptr.hbm [resolvable:$true] %s382_s7 }
  0xce   :  { %s363_s2 = sshll.u32 %s11969_s30, 4  ;;  %s11203_s15 = sshra.s32 %s362_s23, 4  ;;  %s364_s2 = int_to_ptr.vmem [resolvable:$true] %s363_s2  ;;  %s11204_s15 = int_to_ptr.hbm [resolvable:$true] %s11203_s15 }
  0xcf   :  { %s11205_s19 = scalar_lea.hbm %s11204_s15, 2  ;;  %s11207_s20 = scalar_lea.hbm %s12126_s8, 2 }
  0xd0   :  { %p11206_p13 = scmp.ne.s32.totalorder %s11204_s15, %s11205_s19  ;;  %p11208_p0 = scmp.lt.s32.totalorder %s11204_s15, %s12126_s8 }
  0xd1   :  { %p11209_p1 = scmp.lt.s32.totalorder %s11207_s20, %s11205_s19 }
  0xd3   :  { %p11210_p2 = por %p11209_p1, %p11208_p0 }
  0xd5   :  { %p11211_p3 = pnand %p11210_p2, %p11206_p13 }
  0xd7   :  { %11214 = shalt.err (!%p11211_p3)
}
  0xd8   :  { %366 = dma.hbm_to_vmem [thread:$0]  %s362_s23, 32, %s364_s2, [#allocation46]  }
  0xd9   :  { %s407_s18 = sshll.u32 %s12146_s21, 4  ;;  %s11970_s22 = smov [#allocation48]   ;;  %s408_s18 = int_to_ptr.hbm [resolvable:$true] %s407_s18 }
  0xda   :  { %s384_s0 = sshll.u32 %s11970_s22, 4  ;;  %s11227_s4 = sshra.s32 %s12243_s7, 4  ;;  %s385_s0 = int_to_ptr.vmem [resolvable:$true] %s384_s0  ;;  %s11228_s4 = int_to_ptr.hbm [resolvable:$true] %s11227_s4 }
  0xdb   :  { %s11229_s24 = scalar_lea.hbm %s11228_s4, 128  ;;  %s11231_s3 = scalar_lea.hbm %s12136_s29, 128 }
  0xdc   :  { %p11230_p4 = scmp.ne.s32.totalorder %s11228_s4, %s11229_s24  ;;  %p11232_p5 = scmp.lt.s32.totalorder %s11228_s4, %s12136_s29 }
  0xdd   :  { %p11233_p6 = scmp.lt.s32.totalorder %s11231_s3, %s11229_s24 }
  0xdf   :  { %p11234_p7 = por %p11233_p6, %p11232_p5 }
  0xe1   :  { %p11235_p8 = pnand %p11234_p7, %p11230_p4 }
  0xe3   :  { %11238 = shalt.err (!%p11235_p8)
}
  0xe4   :  { %s13508_s8 = sld [smem:[#allocation104_spill]]  ;;  %s11971_s23 = smov [#allocation51]  }
  0xe5   :  { %390 = dma.hbm_to_vmem [thread:$0]  %s12243_s7, 2048, %s385_s0, [#allocation49], %s11956_s25, %s11956_s25, %s11957_s11  }
  0xe6   :  { %s409_s1 = sshll.u32 %s11971_s23, 4  ;;  %s11251_s6 = sshra.s32 %s408_s18, 4  ;;  %s410_s1 = int_to_ptr.vmem [resolvable:$true] %s409_s1  ;;  %s11252_s6 = int_to_ptr.hbm [resolvable:$true] %s11251_s6 }
  0xe7   :  { %s11253_s29 = scalar_lea.hbm %s11252_s6, 1  ;;  %s11255_s26 = scalar_lea.hbm %s12146_s21, 1 }
  0xe8   :  { %p11254_p9 = scmp.ne.s32.totalorder %s11252_s6, %s11253_s29  ;;  %p11256_p10 = scmp.lt.s32.totalorder %s11252_s6, %s12146_s21 }
  0xe9   :  { %p11257_p11 = scmp.lt.s32.totalorder %s11255_s26, %s11253_s29 }
  0xea   :  { %s428_s17 = sshll.u32 %s13508_s8, 4  ;;  %s12256_s17 = int_to_ptr.hbm [resolvable:$true] %s428_s17 }
  0xeb   :  { %p11258_p12 = por %p11257_p11, %p11256_p10 }
  0xed   :  { %p11259_p13 = pnand %p11258_p12, %p11254_p9 }
  0xef   :  { %11262 = shalt.err (!%p11259_p13)
}
  0xf0   :  { %412 = dma.hbm_to_vmem [thread:$0]  %s408_s18, 16, %s410_s1, [#allocation52]  }
  0xf1   :  { %s13509_s14 = sld [smem:[#allocation89_spill]]  ;;  %s11972_s2 = smov [#allocation54]  }
  0xf2   :  { %s430_s7 = sshll.u32 %s11972_s2, 4  ;;  %s11275_s15 = sshra.s32 %s12256_s17, 4  ;;  %s431_s7 = int_to_ptr.vmem [resolvable:$true] %s430_s7  ;;  %s11276_s15 = int_to_ptr.hbm [resolvable:$true] %s11275_s15 }
  0xf3   :  { %s11277_s19 = scalar_lea.hbm %s11276_s15, 64  ;;  %s11279_s21 = scalar_lea.hbm %s13508_s8, 64 }
  0xf4   :  { %p11278_p0 = scmp.ne.s32.totalorder %s11276_s15, %s11277_s19  ;;  %p11280_p1 = scmp.lt.s32.totalorder %s11276_s15, %s13508_s8 }
  0xf5   :  { %p11281_p2 = scmp.lt.s32.totalorder %s11279_s21, %s11277_s19 }
  0xf7   :  { %s97_s30 = sshll.u32 %s13509_s14, 4  ;;  %p11282_p3 = por %p11281_p2, %p11280_p1  ;;  %s12261_s30 = int_to_ptr.hbm [resolvable:$true] %s97_s30 }
  0xf9   :  { %p11283_p4 = pnand %p11282_p3, %p11278_p0 }
  0xfb   :  { %11286 = shalt.err (!%p11283_p4)
}
  0xfc   :  { %s13510_s20 = sld [smem:[#allocation90_spill]]  ;;  %s11973_s18 = smov [#allocation9]  }
  0xfd   :  { %436 = dma.hbm_to_vmem [thread:$0]  %s12256_s17, 1024, %s431_s7, [#allocation55], %s11956_s25, %s11956_s25, %s11957_s11  }
  0xfe   :  { %s99_s22 = sshll.u32 %s11973_s18, 4  ;;  %s11299_s4 = sshra.s32 %s12261_s30, 4  ;;  %s100_s22 = int_to_ptr.vmem [resolvable:$true] %s99_s22  ;;  %s11300_s4 = int_to_ptr.hbm [resolvable:$true] %s11299_s4 }
  0xff   :  { %s11301_s24 = scalar_lea.hbm %s11300_s4, 32  ;;  %s11303_s3 = scalar_lea.hbm %s13509_s14, 32 }
 0x100   :  { %p11302_p5 = scmp.ne.s32.totalorder %s11300_s4, %s11301_s24  ;;  %p11304_p6 = scmp.lt.s32.totalorder %s11300_s4, %s13509_s14 }
 0x101   :  { %p11305_p7 = scmp.lt.s32.totalorder %s11303_s3, %s11301_s24 }
 0x102   :  { %s122_s0 = sshll.u32 %s13510_s20, 4  ;;  %s123_s0 = int_to_ptr.hbm [resolvable:$true] %s122_s0 }
 0x103   :  { %p11306_p8 = por %p11305_p7, %p11304_p6 }
 0x105   :  { %p11307_p9 = pnand %p11306_p8, %p11302_p5 }
 0x107   :  { %11310 = shalt.err (!%p11307_p9)
}
 0x108   :  { %s13511_s25 = sld [smem:[#allocation91_spill]]  ;;  %s11974_s8 = smov [#allocation14]  }
 0x109   :  { %105 = dma.hbm_to_vmem [thread:$0]  %s12261_s30, 512, %s100_s22, [#allocation10], %s11965_s10, %s11965_s10, %s11966_s16  }
 0x10a   :  { %s124_s23 = sshll.u32 %s11974_s8, 4  ;;  %s11323_s1 = sshra.s32 %s123_s0, 4  ;;  %s125_s23 = int_to_ptr.vmem [resolvable:$true] %s124_s23  ;;  %s11324_s1 = int_to_ptr.hbm [resolvable:$true] %s11323_s1 }
 0x10b   :  { %s11325_s17 = scalar_lea.hbm %s11324_s1, 2  ;;  %s11327_s6 = scalar_lea.hbm %s13510_s20, 2 }
 0x10c   :  { %p11326_p10 = scmp.ne.s32.totalorder %s11324_s1, %s11325_s17  ;;  %p11328_p11 = scmp.lt.s32.totalorder %s11324_s1, %s13510_s20 }
 0x10d   :  { %p11329_p12 = scmp.lt.s32.totalorder %s11327_s6, %s11325_s17 }
 0x10e   :  { %s144_s11 = sshll.u32 %s13511_s25, 4  ;;  %s145_s11 = int_to_ptr.hbm [resolvable:$true] %s144_s11 }
 0x10f   :  { %p11330_p13 = por %p11329_p12, %p11328_p11 }
 0x111   :  { %p11331_p0 = pnand %p11330_p13, %p11326_p10 }
 0x113   :  { %11334 = shalt.err (!%p11331_p0)
}
 0x114   :  { %127 = dma.hbm_to_vmem [thread:$0]  %s123_s0, 32, %s125_s23, [#allocation13]  }
 0x115   :  { %s13512_s29 = sld [smem:[#allocation92_spill]]  ;;  %s11975_s10 = smov [#allocation17]  }
 0x116   :  { %s146_s16 = sshll.u32 %s11975_s10, 4  ;;  %s11347_s14 = sshra.s32 %s145_s11, 4  ;;  %s147_s16 = int_to_ptr.vmem [resolvable:$true] %s146_s16  ;;  %s11348_s14 = int_to_ptr.hbm [resolvable:$true] %s11347_s14 }
 0x117   :  { %s11349_s30 = scalar_lea.hbm %s11348_s14, 2  ;;  %s11351_s2 = scalar_lea.hbm %s13511_s25, 2 }
 0x118   :  { %p11350_p1 = scmp.ne.s32.totalorder %s11348_s14, %s11349_s30  ;;  %p11352_p2 = scmp.lt.s32.totalorder %s11348_s14, %s13511_s25 }
 0x119   :  { %p11353_p3 = scmp.lt.s32.totalorder %s11351_s2, %s11349_s30 }
 0x11b   :  { %s166_s26 = sshll.u32 %s13512_s29, 4  ;;  %p11354_p4 = por %p11353_p3, %p11352_p2  ;;  %s167_s26 = int_to_ptr.hbm [resolvable:$true] %s166_s26 }
 0x11d   :  { %p11355_p5 = pnand %p11354_p4, %p11350_p1 }
 0x11f   :  { %11358 = shalt.err (!%p11355_p5)
}
 0x120   :  { %149 = dma.hbm_to_vmem [thread:$0]  %s145_s11, 32, %s147_s16, [#allocation16]  }
 0x121   :  { %s13513_s7 = sld [smem:[#allocation93_spill]]  ;;  %s11976_s19 = smov [#allocation20]  }
 0x122   :  { %s168_s21 = sshll.u32 %s11976_s19, 4  ;;  %s11371_s20 = sshra.s32 %s167_s26, 4  ;;  %s169_s21 = int_to_ptr.vmem [resolvable:$true] %s168_s21  ;;  %s11372_s20 = int_to_ptr.hbm [resolvable:$true] %s11371_s20 }
 0x123   :  { %s11373_s18 = scalar_lea.hbm %s11372_s20, 2  ;;  %s11375_s22 = scalar_lea.hbm %s13512_s29, 2 }
 0x124   :  { %p11374_p6 = scmp.ne.s32.totalorder %s11372_s20, %s11373_s18  ;;  %p11376_p7 = scmp.lt.s32.totalorder %s11372_s20, %s13512_s29 }
 0x125   :  { %p11377_p8 = scmp.lt.s32.totalorder %s11375_s22, %s11373_s18 }
 0x127   :  { %s190_s15 = sshll.u32 %s13513_s7, 4  ;;  %p11378_p9 = por %p11377_p8, %p11376_p7  ;;  %s191_s15 = int_to_ptr.hbm [resolvable:$true] %s190_s15 }
 0x129   :  { %p11379_p10 = pnand %p11378_p9, %p11374_p6 }
 0x12b   :  { %11382 = shalt.err (!%p11379_p10)
}
 0x12c   :  { %171 = dma.hbm_to_vmem [thread:$0]  %s167_s26, 32, %s169_s21, [#allocation19]  }
 0x12d   :  { %s13514_s0 = sld [smem:[#allocation94_spill]]  ;;  %s11977_s4 = smov [#allocation23]  }
 0x12e   :  { %s192_s24 = sshll.u32 %s11977_s4, 4  ;;  %s11395_s25 = sshra.s32 %s191_s15, 4  ;;  %s193_s24 = int_to_ptr.vmem [resolvable:$true] %s192_s24  ;;  %s11396_s25 = int_to_ptr.hbm [resolvable:$true] %s11395_s25 }
 0x12f   :  { %s11397_s11 = scalar_lea.hbm %s11396_s25, 1  ;;  %s11399_s8 = scalar_lea.hbm %s13513_s7, 1 }
 0x130   :  { %p11398_p11 = scmp.ne.s32.totalorder %s11396_s25, %s11397_s11  ;;  %p11400_p12 = scmp.lt.s32.totalorder %s11396_s25, %s13513_s7 }
 0x131   :  { %p11401_p13 = scmp.lt.s32.totalorder %s11399_s8, %s11397_s11 }
 0x133   :  { %s214_s3 = sshll.u32 %s13514_s0, 4  ;;  %p11402_p0 = por %p11401_p13, %p11400_p12  ;;  %s215_s3 = int_to_ptr.hbm [resolvable:$true] %s214_s3 }
 0x135   :  { %p11403_p1 = pnand %p11402_p0, %p11398_p11 }
 0x137   :  { %11406 = shalt.err (!%p11403_p1)
}
 0x138   :  { %195 = dma.hbm_to_vmem [thread:$0]  %s191_s15, 16, %s193_s24, [#allocation22]  }
 0x139   :  { %s13515_s23 = sld [smem:[#allocation95_spill]]  ;;  %s11978_s17 = smov [#allocation26]  }
 0x13a   :  { %s216_s6 = sshll.u32 %s11978_s17, 4  ;;  %s11419_s29 = sshra.s32 %s215_s3, 4  ;;  %s217_s6 = int_to_ptr.vmem [resolvable:$true] %s216_s6  ;;  %s11420_s29 = int_to_ptr.hbm [resolvable:$true] %s11419_s29 }
 0x13b   :  { %s11421_s10 = scalar_lea.hbm %s11420_s29, 2  ;;  %s11423_s16 = scalar_lea.hbm %s13514_s0, 2 }
 0x13c   :  { %p11422_p2 = scmp.ne.s32.totalorder %s11420_s29, %s11421_s10  ;;  %p11424_p3 = scmp.lt.s32.totalorder %s11420_s29, %s13514_s0 }
 0x13d   :  { %p11425_p4 = scmp.lt.s32.totalorder %s11423_s16, %s11421_s10 }
 0x13f   :  { %s236_s1 = sshll.u32 %s13515_s23, 4  ;;  %p11426_p5 = por %p11425_p4, %p11424_p3  ;;  %s237_s1 = int_to_ptr.hbm [resolvable:$true] %s236_s1 }
 0x141   :  { %p11427_p6 = pnand %p11426_p5, %p11422_p2 }
 0x143   :  { %11430 = shalt.err (!%p11427_p6)
}
 0x144   :  { %219 = dma.hbm_to_vmem [thread:$0]  %s215_s3, 32, %s217_s6, [#allocation25]  }
 0x145   :  { %s13516_s26 = sld [smem:[#allocation96_spill]]  ;;  %s11979_s14 = smov [#allocation29]  }
 0x146   :  { %s238_s30 = sshll.u32 %s11979_s14, 4  ;;  %s11443_s7 = sshra.s32 %s237_s1, 4  ;;  %s239_s30 = int_to_ptr.vmem [resolvable:$true] %s238_s30  ;;  %s11444_s7 = int_to_ptr.hbm [resolvable:$true] %s11443_s7 }
 0x147   :  { %s11445_s15 = scalar_lea.hbm %s11444_s7, 16  ;;  %s11447_s19 = scalar_lea.hbm %s13515_s23, 16 }
 0x148   :  { %p11446_p7 = scmp.ne.s32.totalorder %s11444_s7, %s11445_s15  ;;  %p11448_p8 = scmp.lt.s32.totalorder %s11444_s7, %s13515_s23 }
 0x149   :  { %p11449_p9 = scmp.lt.s32.totalorder %s11447_s19, %s11445_s15 }
 0x14b   :  { %s258_s2 = sshll.u32 %s13516_s26, 4  ;;  %p11450_p10 = por %p11449_p9, %p11448_p8  ;;  %s259_s2 = int_to_ptr.hbm [resolvable:$true] %s258_s2 }
 0x14d   :  { %p11451_p11 = pnand %p11450_p10, %p11446_p7 }
 0x14f   :  { %11454 = shalt.err (!%p11451_p11)
}
 0x150   :  { %241 = dma.hbm_to_vmem [thread:$0]  %s237_s1, 256, %s239_s30, [#allocation28]  }
 0x151   :  { %s13517_s21 = sld [smem:[#allocation97_spill]]  ;;  %s11980_s18 = smov [#allocation32]  }
 0x152   :  { %s260_s22 = sshll.u32 %s11980_s18, 4  ;;  %s11467_s0 = sshra.s32 %s259_s2, 4  ;;  %s261_s22 = int_to_ptr.vmem [resolvable:$true] %s260_s22  ;;  %s11468_s0 = int_to_ptr.hbm [resolvable:$true] %s11467_s0 }
 0x153   :  { %s11469_s4 = scalar_lea.hbm %s11468_s0, 8  ;;  %s11471_s24 = scalar_lea.hbm %s13516_s26, 8 }
 0x154   :  { %p11470_p12 = scmp.ne.s32.totalorder %s11468_s0, %s11469_s4  ;;  %p11472_p13 = scmp.lt.s32.totalorder %s11468_s0, %s13516_s26 }
 0x155   :  { %p11473_p0 = scmp.lt.s32.totalorder %s11471_s24, %s11469_s4 }
 0x157   :  { %s280_s20 = sshll.u32 %s13517_s21, 4  ;;  %p11474_p1 = por %p11473_p0, %p11472_p13  ;;  %s281_s20 = int_to_ptr.hbm [resolvable:$true] %s280_s20 }
 0x159   :  { %p11475_p2 = pnand %p11474_p1, %p11470_p12 }
 0x15b   :  { %11478 = shalt.err (!%p11475_p2)
}
 0x15c   :  { %263 = dma.hbm_to_vmem [thread:$0]  %s259_s2, 128, %s261_s22, [#allocation31]  }
 0x15d   :  { %s13518_s3 = sld [smem:[#allocation98_spill]]  ;;  %s11981_s25 = smov [#allocation35]  }
 0x15e   :  { %s282_s11 = sshll.u32 %s11981_s25, 4  ;;  %s11491_s23 = sshra.s32 %s281_s20, 4  ;;  %s283_s11 = int_to_ptr.vmem [resolvable:$true] %s282_s11  ;;  %s11492_s23 = int_to_ptr.hbm [resolvable:$true] %s11491_s23 }
 0x15f   :  { %s11493_s1 = scalar_lea.hbm %s11492_s23, 8  ;;  %s11495_s17 = scalar_lea.hbm %s13517_s21, 8 }
 0x160   :  { %p11494_p3 = scmp.ne.s32.totalorder %s11492_s23, %s11493_s1  ;;  %p11496_p4 = scmp.lt.s32.totalorder %s11492_s23, %s13517_s21 }
 0x161   :  { %p11497_p5 = scmp.lt.s32.totalorder %s11495_s17, %s11493_s1 }
 0x163   :  { %s304_s8 = sshll.u32 %s13518_s3, 4  ;;  %p11498_p6 = por %p11497_p5, %p11496_p4  ;;  %s305_s8 = int_to_ptr.hbm [resolvable:$true] %s304_s8 }
 0x165   :  { %p11499_p7 = pnand %p11498_p6, %p11494_p3 }
 0x167   :  { %11502 = shalt.err (!%p11499_p7)
}
 0x168   :  { %285 = dma.hbm_to_vmem [thread:$0]  %s281_s20, 128, %s283_s11, [#allocation34]  }
 0x169   :  { %s13519_s6 = sld [smem:[#allocation99_spill]]  ;;  %s11982_s10 = smov [#allocation38]  }
 0x16a   :  { %s306_s16 = sshll.u32 %s11982_s10, 4  ;;  %s11515_s26 = sshra.s32 %s305_s8, 4  ;;  %s307_s16 = int_to_ptr.vmem [resolvable:$true] %s306_s16  ;;  %s11516_s26 = int_to_ptr.hbm [resolvable:$true] %s11515_s26 }
 0x16b   :  { %s11517_s14 = scalar_lea.hbm %s11516_s26, 4  ;;  %s11519_s30 = scalar_lea.hbm %s13518_s3, 4 }
 0x16c   :  { %p11518_p8 = scmp.ne.s32.totalorder %s11516_s26, %s11517_s14  ;;  %p11520_p9 = scmp.lt.s32.totalorder %s11516_s26, %s13518_s3 }
 0x16d   :  { %p11521_p10 = scmp.lt.s32.totalorder %s11519_s30, %s11517_s14 }
 0x16f   :  { %s326_s29 = sshll.u32 %s13519_s6, 4  ;;  %p11522_p11 = por %p11521_p10, %p11520_p9  ;;  %s327_s29 = int_to_ptr.hbm [resolvable:$true] %s326_s29 }
 0x171   :  { %p11523_p12 = pnand %p11522_p11, %p11518_p8 }
 0x173   :  { %11526 = shalt.err (!%p11523_p12)
}
 0x174   :  { %309 = dma.hbm_to_vmem [thread:$0]  %s305_s8, 64, %s307_s16, [#allocation37]  }
 0x175   :  { %s13520_s2 = sld [smem:[#allocation100_spill]]  ;;  %s11983_s7 = smov [#allocation41]  }
 0x176   :  { %s328_s15 = sshll.u32 %s11983_s7, 4  ;;  %s11539_s21 = sshra.s32 %s327_s29, 4  ;;  %s329_s15 = int_to_ptr.vmem [resolvable:$true] %s328_s15  ;;  %s11540_s21 = int_to_ptr.hbm [resolvable:$true] %s11539_s21 }
 0x177   :  { %s11541_s20 = scalar_lea.hbm %s11540_s21, 4  ;;  %s11543_s18 = scalar_lea.hbm %s13519_s6, 4 }
 0x178   :  { %p11542_p13 = scmp.ne.s32.totalorder %s11540_s21, %s11541_s20  ;;  %p11544_p0 = scmp.lt.s32.totalorder %s11540_s21, %s13519_s6 }
 0x179   :  { %p11545_p1 = scmp.lt.s32.totalorder %s11543_s18, %s11541_s20 }
 0x17b   :  { %s350_s19 = sshll.u32 %s13520_s2, 4  ;;  %p11546_p2 = por %p11545_p1, %p11544_p0  ;;  %s351_s19 = int_to_ptr.hbm [resolvable:$true] %s350_s19 }
 0x17d   :  { %p11547_p3 = pnand %p11546_p2, %p11542_p13 }
 0x17f   :  { %11550 = shalt.err (!%p11547_p3)
}
 0x180   :  { %331 = dma.hbm_to_vmem [thread:$0]  %s327_s29, 64, %s329_s15, [#allocation40]  }
 0x181   :  { %s13521_s22 = sld [smem:[#allocation101_spill]]  ;;  %s11984_s4 = smov [#allocation44]  }
 0x182   :  { %s352_s24 = sshll.u32 %s11984_s4, 4  ;;  %s11563_s3 = sshra.s32 %s351_s19, 4  ;;  %s353_s24 = int_to_ptr.vmem [resolvable:$true] %s352_s24  ;;  %s11564_s3 = int_to_ptr.hbm [resolvable:$true] %s11563_s3 }
 0x183   :  { %s11565_s25 = scalar_lea.hbm %s11564_s3, 2  ;;  %s11567_s11 = scalar_lea.hbm %s13520_s2, 2 }
 0x184   :  { %p11566_p4 = scmp.ne.s32.totalorder %s11564_s3, %s11565_s25  ;;  %p11568_p5 = scmp.lt.s32.totalorder %s11564_s3, %s13520_s2 }
 0x185   :  { %p11569_p6 = scmp.lt.s32.totalorder %s11567_s11, %s11565_s25 }
 0x187   :  { %s372_s0 = sshll.u32 %s13521_s22, 4  ;;  %p11570_p7 = por %p11569_p6, %p11568_p5  ;;  %s373_s0 = int_to_ptr.hbm [resolvable:$true] %s372_s0 }
 0x189   :  { %p11571_p8 = pnand %p11570_p7, %p11566_p4 }
 0x18b   :  { %11574 = shalt.err (!%p11571_p8)
}
 0x18c   :  { %355 = dma.hbm_to_vmem [thread:$0]  %s351_s19, 32, %s353_s24, [#allocation43]  }
 0x18d   :  { %s13522_s8 = sld [smem:[#allocation102_spill]]  ;;  %s11985_s23 = smov [#allocation47]  }
 0x18e   :  { %s374_s1 = sshll.u32 %s11985_s23, 4  ;;  %s11587_s6 = sshra.s32 %s373_s0, 4  ;;  %s375_s1 = int_to_ptr.vmem [resolvable:$true] %s374_s1  ;;  %s11588_s6 = int_to_ptr.hbm [resolvable:$true] %s11587_s6 }
 0x18f   :  { %s11589_s29 = scalar_lea.hbm %s11588_s6, 2  ;;  %s11591_s10 = scalar_lea.hbm %s13521_s22, 2 }
 0x190   :  { %p11590_p9 = scmp.ne.s32.totalorder %s11588_s6, %s11589_s29  ;;  %p11592_p10 = scmp.lt.s32.totalorder %s11588_s6, %s13521_s22 }
 0x191   :  { %p11593_p11 = scmp.lt.s32.totalorder %s11591_s10, %s11589_s29 }
 0x193   :  { %s396_s17 = sshll.u32 %s13522_s8, 4  ;;  %p11594_p12 = por %p11593_p11, %p11592_p10  ;;  %s397_s17 = int_to_ptr.hbm [resolvable:$true] %s396_s17 }
 0x195   :  { %p11595_p13 = pnand %p11594_p12, %p11590_p9 }
 0x197   :  { %11598 = shalt.err (!%p11595_p13)
}
 0x198   :  { %377 = dma.hbm_to_vmem [thread:$0]  %s373_s0, 32, %s375_s1, [#allocation46]  }
 0x199   :  { %s13523_s16 = sld [smem:[#allocation103_spill]]  ;;  %s11986_s14 = smov [#allocation50]  }
 0x19a   :  { %s398_s30 = sshll.u32 %s11986_s14, 4  ;;  %s11611_s2 = sshra.s32 %s397_s17, 4  ;;  %s399_s30 = int_to_ptr.vmem [resolvable:$true] %s398_s30  ;;  %s11612_s2 = int_to_ptr.hbm [resolvable:$true] %s11611_s2 }
 0x19b   :  { %s11613_s7 = scalar_lea.hbm %s11612_s2, 1  ;;  %s11615_s15 = scalar_lea.hbm %s13522_s8, 1 }
 0x19c   :  { %p11614_p0 = scmp.ne.s32.totalorder %s11612_s2, %s11613_s7  ;;  %p11616_p1 = scmp.lt.s32.totalorder %s11612_s2, %s13522_s8 }
 0x19d   :  { %p11617_p2 = scmp.lt.s32.totalorder %s11615_s15, %s11613_s7 }
 0x19f   :  { %s418_s26 = sshll.u32 %s13523_s16, 4  ;;  %p11618_p3 = por %p11617_p2, %p11616_p1  ;;  %s419_s26 = int_to_ptr.hbm [resolvable:$true] %s418_s26 }
 0x1a1   :  { %p11619_p4 = pnand %p11618_p3, %p11614_p0 }
 0x1a3   :  { %11622 = shalt.err (!%p11619_p4)
}
 0x1a4   :  { %401 = dma.hbm_to_vmem [thread:$0]  %s397_s17, 16, %s399_s30, [#allocation49]  }
 0x1a5   :  { %s13524_s19 = sld [smem:[#allocation105_spill]]  ;;  %s11987_s21 = smov [#allocation53]  }
 0x1a6   :  { %s420_s20 = sshll.u32 %s11987_s21, 4  ;;  %s11635_s22 = sshra.s32 %s419_s26, 4  ;;  %s421_s20 = int_to_ptr.vmem [resolvable:$true] %s420_s20  ;;  %s11636_s22 = int_to_ptr.hbm [resolvable:$true] %s11635_s22 }
 0x1a7   :  { %s11637_s0 = scalar_lea.hbm %s11636_s22, 1  ;;  %s11639_s4 = scalar_lea.hbm %s13523_s16, 1 }
 0x1a8   :  { %p11638_p5 = scmp.ne.s32.totalorder %s11636_s22, %s11637_s0  ;;  %p11640_p6 = scmp.lt.s32.totalorder %s11636_s22, %s13523_s16 }
 0x1a9   :  { %p11641_p7 = scmp.lt.s32.totalorder %s11639_s4, %s11637_s0 }
 0x1ab   :  { %s442_s18 = sshll.u32 %s13524_s19, 4  ;;  %p11642_p8 = por %p11641_p7, %p11640_p6  ;;  %s443_s18 = int_to_ptr.hbm [resolvable:$true] %s442_s18 }
 0x1ad   :  { %p11643_p9 = pnand %p11642_p8, %p11638_p5 }
 0x1af   :  { %11646 = shalt.err (!%p11643_p9)
}
 0x1b0   :  { %423 = dma.hbm_to_vmem [thread:$0]  %s419_s26, 16, %s421_s20, [#allocation52]  }
 0x1b1   :  { %s11988_s24 = smov [#allocation56]   ;;  %s11659_s25 = sshra.s32 %s443_s18, 4  ;;  %s11660_s25 = int_to_ptr.hbm [resolvable:$true] %s11659_s25 }
 0x1b2   :  { %s444_s3 = sshll.u32 %s11988_s24, 4  ;;  %s11661_s11 = scalar_lea.hbm %s11660_s25, 1  ;;  %s445_s3 = int_to_ptr.vmem [resolvable:$true] %s444_s3 }
 0x1b3   :  { %p11662_p10 = scmp.ne.s32.totalorder %s11660_s25, %s11661_s11  ;;  %s11663_s8 = scalar_lea.hbm %s13524_s19, 1 }
 0x1b4   :  { %p11664_p11 = scmp.lt.s32.totalorder %s11660_s25, %s13524_s19  ;;  %p11665_p12 = scmp.lt.s32.totalorder %s11663_s8, %s11661_s11 }
 0x1b6   :  { %p11666_p13 = por %p11665_p12, %p11664_p11 }
 0x1b8   :  { %p11667_p0 = pnand %p11666_p13, %p11662_p10 }
 0x1ba   :  { %11670 = shalt.err (!%p11667_p0)
}
 0x1bb   :  { %447 = dma.hbm_to_vmem [thread:$0]  %s443_s18, 16, %s445_s3, [#allocation55]  }
 0x1bc   :  { %11867 = dma.done.wait [#allocation10], 512  }
 0x1bd   :  { %11868 = vsyncadd [#allocation10], 4294966784 }
 0x1be   :  { %11869 = dma.done.wait [#allocation13], 160  }
 0x1bf   :  { %11870 = vsyncadd [#allocation13], 4294967136 }
 0x1c0   :  { %11871 = dma.done.wait [#allocation16], 64  }
 0x1c1   :  { %11872 = vsyncadd [#allocation16], 4294967232 }
 0x1c2   :  { %11873 = dma.done.wait [#allocation19], 64  }
 0x1c3   :  { %11874 = vsyncadd [#allocation19], 4294967232 }
 0x1c4   :  { %11875 = dma.done.wait [#allocation22], 2064  }
 0x1c5   :  { %11876 = vsyncadd [#allocation22], 4294965232 }
 0x1c6   :  { %11877 = dma.done.wait [#allocation25], 2080  }
 0x1c7   :  { %11878 = vsyncadd [#allocation25], 4294965216 }
 0x1c8   :  { %11879 = dma.done.wait [#allocation28], 512  }
 0x1c9   :  { %11880 = vsyncadd [#allocation28], 4294966784 }
 0x1ca   :  { %11881 = dma.done.wait [#allocation31], 384  }
 0x1cb   :  { %11882 = vsyncadd [#allocation31], 4294966912 }
 0x1cc   :  { %11883 = dma.done.wait [#allocation34], 256  }
 0x1cd   :  { %11884 = vsyncadd [#allocation34], 4294967040 }
 0x1ce   :  { %11885 = dma.done.wait [#allocation37], 32832  }
 0x1cf   :  { %11886 = vsyncadd [#allocation37], 4294934464 }
 0x1d0   :  { %11887 = dma.done.wait [#allocation40], 128  }
 0x1d1   :  { %11888 = vsyncadd [#allocation40], 4294967168 }
 0x1d2   :  { %11889 = dma.done.wait [#allocation43], 8224  }
 0x1d3   :  { %11890 = vsyncadd [#allocation43], 4294959072 }
 0x1d4   :  { %11891 = dma.done.wait [#allocation46], 64  }
 0x1d5   :  { %11892 = vsyncadd [#allocation46], 4294967232 }
 0x1d6   :  { %11893 = dma.done.wait [#allocation49], 2064  }
 0x1d7   :  { %11894 = vsyncadd [#allocation49], 4294965232 }
 0x1d8   :  { %11895 = dma.done.wait [#allocation52], 32  }
 0x1d9   :  { %11896 = vsyncadd [#allocation52], 4294967264 }
 0x1da   :  { %11897 = dma.done.wait [#allocation55], 1040  }
 0x1db   :  { %11898 = vsyncadd [#allocation55], 4294966256  ;;  %v573_v0 = vld [vmem:[#allocation9] sm:$0xff]  ;;  %v574_v1 = vld [vmem:[#allocation9 + $0x8] sm:$0xff]  ;;  %v11989_v6 = vmov 256.0   ;;  %vm621_vm0 = vcmask 1043456   ;;  %v605_v22 = vlaneseq }
 0x1dc   :  { %v577_v2 = vadd.f32 %v574_v1, %v573_v0  ;;  %v575_v3 = vld [vmem:[#allocation9 + $0x10] sm:$0xff]  ;;  %v576_v4 = vld [vmem:[#allocation9 + $0x18] sm:$0xff]  ;;  %10921 = vrcp.f32 %v11989_v6  ;;  %v594_v7 = vld [vmem:[#allocation12] sm:$0xff]  ;;  %vm609_vm2 = vcmask 1041409   ;;  %vm617_vm3 = vcmask 64512   ;;  %s13525_s23 = sld [smem:[#allocation106_spill]] }
 0x1dd   :  { %v580_v5 = vadd.f32 %v576_v4, %v575_v3  ;;  %v613_v8 = vunpack.c.l.b16 %v594_v7  ;;  %v614_v9 = vunpack.c.h.b16 %v594_v7  ;;  %v606_v26 = vand.u32 127, %v605_v22  ;;  %v595_v34 = vld [vmem:[#allocation14] sm:$0x3]  ;;  %s11990_s17 = smov [#allocation6]  }
 0x1de   :  { %578 = vadd.xlane.f32.xlu0 %v577_v2  ;;  %v597_v35 = vperm.slane %v595_v34, 0  ;;  %v598_v36 = vperm.slane %v595_v34, 1  ;;  %vm654_vm4 = vcmask 1041408   ;;  %s711_s6 = sshll.u32 %s11990_s17, 4  ;;  %s12329_s6 = int_to_ptr.vmem [resolvable:$true] %s711_s6 }
 0x1df   :  { %v615_v11 = vpack.c.b16 %v613_v8, %v613_v8  ;;  %v616_v12 = vpack.c.b16 %v614_v9, %v614_v9 }
 0x1e1   :  { %v623_v14 = vsel %vm621_vm0, %v615_v11, 0  ;;  %v626_v15 = vsel %vm621_vm0, %v616_v12, 0 }
 0x1e2   :  { %v10922_v10 = vpop.eup %10921  ;;  %635 = vmatpush.bf16.msra.mxu0 %v623_v14  ;;  %648 = vmatpush.bf16.msra.mxu1 %v626_v15  ;;  %s709_s1 = sshll.u32 %s13525_s23, 4  ;;  %s11687_s16 = scalar_lea.hbm %s13525_s23, 256  ;;  %s710_s1 = int_to_ptr.hbm [resolvable:$true] %s709_s1 }
 0x1e3   :  { %v584_v13 = vmul.f32 256.0, %v10922_v10  ;;  %vm588_vm1 = vweird.f32 %v10922_v10  ;;  %s11683_s29 = sshra.s32 %s710_s1, 4  ;;  %s11684_s29 = int_to_ptr.hbm [resolvable:$true] %s11683_s29 }
 0x1e4   :  { %s11685_s10 = scalar_lea.hbm %s11684_s29, 256  ;;  %p11688_p2 = scmp.lt.s32.totalorder %s11684_s29, %s13525_s23 }
 0x1e5   :  { %v585_v16 = vsub.f32 1.0, %v584_v13  ;;  %p11686_p1 = scmp.ne.s32.totalorder %s11684_s29, %s11685_s10  ;;  %p11689_p3 = scmp.lt.s32.totalorder %s11687_s16, %s11685_s10 }
 0x1e6   :  { %581 = vadd.xlane.f32.xlu0 %v580_v5 }
 0x1e7   :  { %v586_v17 = vmul.f32 %v10922_v10, %v585_v16  ;;  %p11690_p4 = por %p11689_p3, %p11688_p2 }
 0x1e9   :  { %v587_v18 = vadd.f32 %v10922_v10, %v586_v17  ;;  %p11691_p5 = pnand %p11690_p4, %p11686_p1 }
 0x1eb   :  { %v589_v19 = vsel %vm588_vm1, %v10922_v10, %v587_v18 }
 0x251   :  { %v579_v20 = vpop.xlane.xlu0 %578 }
 0x252   :  { %v590_v21 = vmul.f32 %v589_v19, %v579_v20 }
 0x254   :  { %v592_v23 = vpack.c.bf16 %v590_v21, %v590_v21 }
 0x256   :  { %v603_v27 = vunpack.c.l.b16 %v592_v23 }
 0x258   :  { %v607_v30 = vperm.slane %v603_v27, %v606_v26 }
 0x259   :  { %v582_v24 = vpop.xlane.xlu0 %581 }
 0x25a   :  { %v591_v25 = vmul.f32 %v589_v19, %v582_v24 }
 0x25c   :  { %v593_v28 = vpack.c.bf16 %v591_v25, %v591_v25 }
 0x25e   :  { %v604_v29 = vunpack.c.l.b16 %v593_v28 }
 0x260   :  { %v608_v31 = vperm.slane %v604_v29, %v606_v26 }
 0x262   :  { %v610_v32 = vsel %vm609_vm2, %v608_v31, %v607_v30 }
 0x263   :  { %v611_v33 = vpack.c.b16 %v610_v32, %v610_v32 }
 0x265   :  { %7137 = vmatmul.msk.bf16.vlgmr.msra.gmra.mxu0 %vm617_vm3, %v611_v33  ;;  %7138 = vmatmul.msk.bf16.vlgmr.msra.gmra.mxu1 %vm617_vm3, %v611_v33 }
 0x2e2   :  { %v637_v37 = vpop.f32.mrf.mxu0  ;;  %v650_v38 = vpop.f32.mrf.mxu1 }
 0x2e3   :  { %v638_v39 = vadd.f32 %v637_v37, %v597_v35  ;;  %v651_v40 = vadd.f32 %v650_v38, %v598_v36 }
 0x2e5   :  { %v655_v41 = vsel %vm654_vm4, %v638_v39, 0.0  ;;  %v656_v42 = vsel %vm654_vm4, %v651_v40, 0.0 }
 0x2e6   :  { %v657_v43 = vadd.f32 %v656_v42, %v655_v41 }
 0x2e8   :  { %658 = vadd.xlane.f32.xlu1 %v657_v43 }
 0x2ea   :  { %v639_v44 = vpop.f32.mrf.mxu0  ;;  %v652_v45 = vpop.f32.mrf.mxu1 }
 0x35b   :  { %v659_v46 = vpop.xlane.xlu1 %658 }
 0x35c   :  { %v660_v47 = vmul.f32 %v659_v46, %v589_v19 }
 0x35e   :  { %v661_v48 = vsub.f32 %v638_v39, %v660_v47  ;;  %v662_v49 = vsub.f32 %v651_v40, %v660_v47 }
 0x360   :  { %v663_v50 = vmul.f32 %v661_v48, %v661_v48  ;;  %v664_v51 = vmul.f32 %v662_v49, %v662_v49 }
 0x362   :  { %v665_v52 = vsel %vm654_vm4, %v663_v50, 0.0  ;;  %v666_v53 = vsel %vm654_vm4, %v664_v51, 0.0 }
 0x363   :  { %v667_v54 = vadd.f32 %v666_v53, %v665_v52 }
 0x365   :  { %668 = vadd.xlane.f32.xlu1 %v667_v54 }
 0x366   :  { %11694 = shalt.err (!%p11691_p5)  }
 0x367   :  { %714 = dma.hbm_to_vmem [thread:$0]  %s710_s1, 4096, %s12329_s6, [#allocation8]  ;;  %v684_v62 = vld [vmem:[#allocation15] sm:$0x3]  ;;  %v692_v0 = vld [vmem:[#allocation17] sm:$0x3] }
 0x368   :  { %v686_v2 = vperm.slane %v684_v62, 0  ;;  %v687_v3 = vperm.slane %v684_v62, 1  ;;  %v694_v5 = vperm.slane %v692_v0, 0  ;;  %v695_v6 = vperm.slane %v692_v0, 1 }
 0x3d8   :  { %v669_v55 = vpop.xlane.xlu1 %668 }
 0x3d9   :  { %v670_v56 = vmul.f32 %v669_v55, %v589_v19 }
 0x3db   :  { %v671_v57 = vadd.f32 1e-05, %v670_v56 }
 0x3dd   :  { %10923 = vrsqrt.f32 %v671_v57  ;;  %vm678_vm6 = vweird.f32 %v671_v57 }
 0x3e3   :  { %v10924_v58 = vpop.eup %10923 }
 0x3e4   :  { %v673_v59 = vmul.f32 %v10924_v58, %v671_v57  ;;  %vm679_vm5 = vweird.f32 %v10924_v58 }
 0x3e5   :  { %vm680_vm7 = vmor %vm678_vm6, %vm679_vm5 }
 0x3e6   :  { %v674_v60 = vmul.f32 %v10924_v58, %v673_v59 }
 0x3e8   :  { %v675_v61 = vmul.f32 0.5, %v674_v60 }
 0x3ea   :  { %v676_v63 = vsub.f32 1.5, %v675_v61 }
 0x3ec   :  { %v677_v1 = vmul.f32 %v10924_v58, %v676_v63 }
 0x3ee   :  { %v681_v4 = vsel %vm680_vm7, %v10924_v58, %v677_v1 }
 0x3ef   :  { %v682_v7 = vmul.f32 %v681_v4, %v661_v48  ;;  %v683_v8 = vmul.f32 %v681_v4, %v662_v49 }
 0x3f1   :  { %v690_v9 = vmul.f32 %v686_v2, %v682_v7  ;;  %v691_v10 = vmul.f32 %v687_v3, %v683_v8 }
 0x3f3   :  { %v12334_v11 = vadd.f32 %v694_v5, %v690_v9  ;;  %v12336_v12 = vadd.f32 %v695_v6, %v691_v10 }
 0x3f5   :  { %v12340_v13 = vpack.c.bf16 %v12334_v11, %v12334_v11  ;;  %v12344_v14 = vpack.c.bf16 %v12336_v12, %v12336_v12 }
 0x3f6   :  { %11899 = dma.done.wait [#allocation8], 4096 }
 0x3f7   :  { %11900 = vsyncadd [#allocation8], 4294963200  ;;  %v7197_v15 = vld [vmem:[#allocation6 + $0x70] sm:$0xf]  ;;  %v10094_v16 = vld [vmem:[#allocation6 + $0x74] sm:$0xf0] }
 0x3f8   :  { %v7261_v17 = vld [vmem:[#allocation6 + $0xf0] sm:$0xf]  ;;  %v7198_v18 = vor.u32 %v10094_v16, %v7197_v15  ;;  %v10110_v19 = vld [vmem:[#allocation6 + $0xf4] sm:$0xf0]  ;;  %v10093_v20 = vld [vmem:[#allocation6 + $0x74] sm:$0xf] }
 0x3f9   :  { %v7199_v21 = vld [vmem:[#allocation6 + $0x78] sm:$0xf0]  ;;  %v7262_v22 = vor.u32 %v10110_v19, %v7261_v17  ;;  %v10109_v24 = vld [vmem:[#allocation6 + $0xf4] sm:$0xf]  ;;  %v7189_v26 = vld [vmem:[#allocation6 + $0x60] sm:$0xf] }
 0x3fa   :  { %v7202_v23 = vor.u32 %v10093_v20, %v7199_v21  ;;  %v7263_v25 = vld [vmem:[#allocation6 + $0xf8] sm:$0xf0]  ;;  %911 = vmatpush.bf16.msra.mxu2 %v7198_v18  ;;  %v10092_v28 = vld [vmem:[#allocation6 + $0x64] sm:$0xf0]  ;;  %v7253_v29 = vld [vmem:[#allocation6 + $0xe0] sm:$0xf] }
 0x3fb   :  { %v7266_v27 = vor.u32 %v10109_v24, %v7263_v25  ;;  %v10108_v30 = vld [vmem:[#allocation6 + $0xe4] sm:$0xf0]  ;;  %924 = vmatpush.bf16.msra.mxu3 %v7262_v22  ;;  %v7190_v31 = vor.u32 %v10092_v28, %v7189_v26  ;;  %v10091_v33 = vld [vmem:[#allocation6 + $0x64] sm:$0xf]  ;;  %v7191_v34 = vld [vmem:[#allocation6 + $0x68] sm:$0xf0] }
 0x3fc   :  { %937 = vmatpush.bf16.msrb.mxu0 %v7202_v23  ;;  %v7254_v32 = vor.u32 %v10108_v30, %v7253_v29  ;;  %v10107_v35 = vld [vmem:[#allocation6 + $0xe4] sm:$0xf]  ;;  %v7194_v36 = vor.u32 %v10091_v33, %v7191_v34  ;;  %v7255_v37 = vld [vmem:[#allocation6 + $0xe8] sm:$0xf0]  ;;  %v7181_v38 = vld [vmem:[#allocation6 + $0x50] sm:$0xf] }
 0x3fd   :  { %950 = vmatpush.bf16.msrb.mxu1 %v7266_v27  ;;  %v10090_v39 = vld [vmem:[#allocation6 + $0x54] sm:$0xf0]  ;;  %v7258_v40 = vor.u32 %v10107_v35, %v7255_v37  ;;  %v7245_v41 = vld [vmem:[#allocation6 + $0xd0] sm:$0xf]  ;;  %v10089_v43 = vld [vmem:[#allocation6 + $0x54] sm:$0xf] }
 0x3fe   :  { %v10106_v42 = vld [vmem:[#allocation6 + $0xd4] sm:$0xf0]  ;;  %912 = vmatpush.bf16.msra.mxu2 %v7190_v31  ;;  %v7182_v44 = vor.u32 %v10090_v39, %v7181_v38  ;;  %v7183_v45 = vld [vmem:[#allocation6 + $0x58] sm:$0xf0]  ;;  %v10105_v46 = vld [vmem:[#allocation6 + $0xd4] sm:$0xf] }
 0x3ff   :  { %v7247_v47 = vld [vmem:[#allocation6 + $0xd8] sm:$0xf0]  ;;  %925 = vmatpush.bf16.msra.mxu3 %v7254_v32  ;;  %v7246_v48 = vor.u32 %v10106_v42, %v7245_v41  ;;  %v7186_v49 = vor.u32 %v10089_v43, %v7183_v45  ;;  %v7173_v50 = vld [vmem:[#allocation6 + $0x40] sm:$0xf]  ;;  %v10088_v51 = vld [vmem:[#allocation6 + $0x44] sm:$0xf0] }
 0x400   :  { %938 = vmatpush.bf16.msrb.mxu0 %v7194_v36  ;;  %v7237_v52 = vld [vmem:[#allocation6 + $0xc0] sm:$0xf]  ;;  %v7250_v53 = vor.u32 %v10105_v46, %v7247_v47  ;;  %v10104_v54 = vld [vmem:[#allocation6 + $0xc4] sm:$0xf0]  ;;  %v10087_v55 = vld [vmem:[#allocation6 + $0x44] sm:$0xf]  ;;  %v7174_v59 = vor.u32 %v10088_v51, %v7173_v50 }
 0x401   :  { %951 = vmatpush.bf16.msrb.mxu1 %v7258_v40  ;;  %v7175_v56 = vld [vmem:[#allocation6 + $0x48] sm:$0xf0]  ;;  %v10103_v57 = vld [vmem:[#allocation6 + $0xc4] sm:$0xf]  ;;  %v7238_v60 = vor.u32 %v10104_v54, %v7237_v52  ;;  %v7165_v62 = vld [vmem:[#allocation6 + $0x30] sm:$0xf] }
 0x402   :  { %v7239_v58 = vld [vmem:[#allocation6 + $0xc8] sm:$0xf0]  ;;  %913 = vmatpush.bf16.msra.mxu2 %v7182_v44  ;;  %v7178_v61 = vor.u32 %v10087_v55, %v7175_v56  ;;  %v10086_v63 = vld [vmem:[#allocation6 + $0x34] sm:$0xf0]  ;;  %v7229_v0 = vld [vmem:[#allocation6 + $0xb0] sm:$0xf] }
 0x403   :  { %926 = vmatpush.bf16.msra.mxu3 %v7246_v48  ;;  %v7242_v1 = vor.u32 %v10103_v57, %v7239_v58  ;;  %v10102_v2 = vld [vmem:[#allocation6 + $0xb4] sm:$0xf0]  ;;  %v10085_v3 = vld [vmem:[#allocation6 + $0x34] sm:$0xf]  ;;  %v7167_v4 = vld [vmem:[#allocation6 + $0x38] sm:$0xf0]  ;;  %v7166_v7 = vor.u32 %v10086_v63, %v7165_v62 }
 0x404   :  { %939 = vmatpush.bf16.msrb.mxu0 %v7186_v49  ;;  %v10101_v5 = vld [vmem:[#allocation6 + $0xb4] sm:$0xf]  ;;  %v7231_v6 = vld [vmem:[#allocation6 + $0xb8] sm:$0xf0]  ;;  %v7230_v8 = vor.u32 %v10102_v2, %v7229_v0  ;;  %v7170_v9 = vor.u32 %v10085_v3, %v7167_v4  ;;  %v7157_v10 = vld [vmem:[#allocation6 + $0x20] sm:$0xf] }
 0x405   :  { %952 = vmatpush.bf16.msrb.mxu1 %v7250_v53  ;;  %v10084_v15 = vld [vmem:[#allocation6 + $0x24] sm:$0xf0]  ;;  %v7221_v16 = vld [vmem:[#allocation6 + $0xa0] sm:$0xf]  ;;  %v7234_v17 = vor.u32 %v10101_v5, %v7231_v6  ;;  %v10083_v19 = vld [vmem:[#allocation6 + $0x24] sm:$0xf] }
 0x406   :  { %914 = vmatpush.bf16.msra.mxu2 %v7174_v59  ;;  %v10100_v18 = vld [vmem:[#allocation6 + $0xa4] sm:$0xf0]  ;;  %v7159_v20 = vld [vmem:[#allocation6 + $0x28] sm:$0xf0]  ;;  %v10099_v21 = vld [vmem:[#allocation6 + $0xa4] sm:$0xf]  ;;  %v7158_v23 = vor.u32 %v10084_v15, %v7157_v10 }
 0x407   :  { %927 = vmatpush.bf16.msra.mxu3 %v7238_v60  ;;  %v7223_v22 = vld [vmem:[#allocation6 + $0xa8] sm:$0xf0]  ;;  %v7222_v24 = vor.u32 %v10100_v18, %v7221_v16  ;;  %v7162_v25 = vor.u32 %v10083_v19, %v7159_v20  ;;  %v7149_v26 = vld [vmem:[#allocation6 + $0x10] sm:$0xf]  ;;  %v10082_v27 = vld [vmem:[#allocation6 + $0x14] sm:$0xf0] }
 0x408   :  { %940 = vmatpush.bf16.msrb.mxu0 %v7178_v61  ;;  %v7213_v28 = vld [vmem:[#allocation6 + $0x90] sm:$0xf]  ;;  %v7226_v29 = vor.u32 %v10099_v21, %v7223_v22  ;;  %v10098_v30 = vld [vmem:[#allocation6 + $0x94] sm:$0xf0]  ;;  %v10081_v31 = vld [vmem:[#allocation6 + $0x14] sm:$0xf]  ;;  %v7150_v35 = vor.u32 %v10082_v27, %v7149_v26 }
 0x409   :  { %953 = vmatpush.bf16.msrb.mxu1 %v7242_v1  ;;  %v7151_v32 = vld [vmem:[#allocation6 + $0x18] sm:$0xf0]  ;;  %v10097_v33 = vld [vmem:[#allocation6 + $0x94] sm:$0xf]  ;;  %v7214_v36 = vor.u32 %v10098_v30, %v7213_v28  ;;  %v7141_v38 = vld [vmem:[#allocation6] sm:$0xf] }
 0x40a   :  { %915 = vmatpush.bf16.msra.mxu2 %v7166_v7  ;;  %v7215_v34 = vld [vmem:[#allocation6 + $0x98] sm:$0xf0]  ;;  %v7154_v37 = vor.u32 %v10081_v31, %v7151_v32  ;;  %v10080_v39 = vld [vmem:[#allocation6 + $0x4] sm:$0xf0]  ;;  %v7205_v40 = vld [vmem:[#allocation6 + $0x80] sm:$0xf] }
 0x40b   :  { %928 = vmatpush.bf16.msra.mxu3 %v7230_v8  ;;  %v7218_v41 = vor.u32 %v10097_v33, %v7215_v34  ;;  %v10096_v42 = vld [vmem:[#allocation6 + $0x84] sm:$0xf0]  ;;  %v10079_v43 = vld [vmem:[#allocation6 + $0x4] sm:$0xf]  ;;  %v7143_v44 = vld [vmem:[#allocation6 + $0x8] sm:$0xf0]  ;;  %v7142_v47 = vor.u32 %v10080_v39, %v7141_v38 }
 0x40c   :  { %941 = vmatpush.bf16.msrb.mxu0 %v7170_v9  ;;  %v10095_v45 = vld [vmem:[#allocation6 + $0x84] sm:$0xf]  ;;  %v7207_v46 = vld [vmem:[#allocation6 + $0x88] sm:$0xf0]  ;;  %v7206_v48 = vor.u32 %v10096_v42, %v7205_v40  ;;  %v7146_v49 = vor.u32 %v10079_v43, %v7143_v44  ;;  %s993_s26 = sshll.u32 %s12171_s27, 4  ;;  %s11711_s2 = scalar_lea.hbm %s12171_s27, 256  ;;  %s994_s26 = int_to_ptr.hbm [resolvable:$true] %s993_s26 }
 0x40d   :  { %954 = vmatpush.bf16.msrb.mxu1 %v7234_v17  ;;  %v7210_v50 = vor.u32 %v10095_v45, %v7207_v46  ;;  %s11707_s14 = sshra.s32 %s994_s26, 4  ;;  %s11708_s14 = int_to_ptr.hbm [resolvable:$true] %s11707_s14 }
 0x40e   :  { %916 = vmatpush.bf16.msra.mxu2 %v7158_v23  ;;  %s11709_s30 = scalar_lea.hbm %s11708_s14, 256  ;;  %p11712_p7 = scmp.lt.s32.totalorder %s11708_s14, %s12171_s27 }
 0x40f   :  { %929 = vmatpush.bf16.msra.mxu3 %v7222_v24  ;;  %p11710_p6 = scmp.ne.s32.totalorder %s11708_s14, %s11709_s30  ;;  %p11713_p8 = scmp.lt.s32.totalorder %s11711_s2, %s11709_s30 }
 0x410   :  { %942 = vmatpush.bf16.msrb.mxu0 %v7162_v25 }
 0x411   :  { %955 = vmatpush.bf16.msrb.mxu1 %v7226_v29  ;;  %p11714_p9 = por %p11713_p8, %p11712_p7 }
 0x412   :  { %917 = vmatpush.bf16.msra.mxu2 %v7150_v35 }
 0x413   :  { %930 = vmatpush.bf16.msra.mxu3 %v7214_v36  ;;  %p11715_p10 = pnand %p11714_p9, %p11710_p6 }
 0x414   :  { %943 = vmatpush.bf16.msrb.mxu0 %v7154_v37 }
 0x415   :  { %956 = vmatpush.bf16.msrb.mxu1 %v7218_v41 }
 0x416   :  { %918 = vmatpush.bf16.msra.mxu2 %v7142_v47 }
 0x417   :  { %931 = vmatpush.bf16.msra.mxu3 %v7206_v48 }
 0x418   :  { %944 = vmatpush.bf16.msrb.mxu0 %v7146_v49 }
 0x419   :  { %957 = vmatpush.bf16.msrb.mxu1 %v7210_v50  ;;  %919 = vmatmul.bf16.vlgmr.msra.gmra.mxu2 %v12340_v13 }
 0x41a   :  { %932 = vmatmul.bf16.vlgmr.msra.gmra.mxu3 %v12344_v14 }
 0x41b   :  { %945 = vmatmul.bf16.vlgmr.msrb.gmra.mxu0 %v12340_v13 }
 0x41c   :  { %958 = vmatmul.bf16.vlgmr.msrb.gmra.mxu1 %v12344_v14 }
 0x41d   :  { %11718 = shalt.err (!%p11715_p10)  }
 0x41e   :  { %998 = dma.hbm_to_vmem [thread:$0]  %s994_s26, 4096, %s12329_s6, [#allocation8]  ;;  %v970_v54 = vld [vmem:[#allocation18] sm:$0x3] }
 0x41f   :  { %v973_v59 = vperm.slane %v970_v54, 1  ;;  %v972_v63 = vperm.slane %v970_v54, 0 }
 0x421   :  { %v974_v0 = vrot.slane %v973_v59, 6 }
 0x423   :  { %v975_v3 = vsel %vm654_vm4, %v972_v63, %v974_v0 }
 0x498   :  { %v946_v51 = vpop.f32.mrf.mxu0 }
 0x499   :  { %v959_v52 = vpop.f32.mrf.mxu1 }
 0x49a   :  { %v960_v53 = vadd.f32 %v959_v52, %v946_v51 }
 0x49c   :  { %v965_v55 = vrot.slane %v960_v53, 6  ;;  %v920_v56 = vpop.f32.mrf.mxu2 }
 0x49d   :  { %v933_v57 = vpop.f32.mrf.mxu3 }
 0x49e   :  { %v934_v58 = vadd.f32 %v933_v57, %v920_v56 }
 0x4a0   :  { %v948_v60 = vpop.f32.mrf.mxu0  ;;  %v966_v61 = vsel %vm654_vm4, %v934_v58, %v965_v55 }
 0x4a1   :  { %v961_v62 = vpop.f32.mrf.mxu1  ;;  %968 = vst [vmem:[#allocation2] sm:$0xf] %v966_v61 }
 0x4a4   :  { %v922_v1 = vpop.f32.mrf.mxu2 }
 0x4a5   :  { %v935_v2 = vpop.f32.mrf.mxu3 }
 0x4a8   :  { %v969_v4 = vld [vmem:[#allocation2] sm:$0xf] }
 0x4a9   :  { %v977_v5 = vadd.f32 %v975_v3, %v969_v4 }
 0x4ab   :  { %979 = vst [vmem:[#allocation1] ss:$4 sm:$0xff] %v977_v5 }
 0x4b2   :  { %v980_v6 = vld.sshfl [vmem:[#allocation1] sm:$0xff pattern:$0x73625140]  ;;  %v981_v7 = vld.sshfl [vmem:[#allocation1 + $0x8] sm:$0xff pattern:$0x73625140] }
 0x4b3   :  { %v12356_v8 = vpack.c.bf16 %v980_v6, %v980_v6  ;;  %v12358_v9 = vpack.c.bf16 %v981_v7, %v981_v7 }
 0x4b4   :  { %11901 = dma.done.wait [#allocation8], 4096 }
 0x4b5   :  { %11902 = vsyncadd [#allocation8], 4294963200  ;;  %v7325_v10 = vld [vmem:[#allocation6 + $0x70] sm:$0xf]  ;;  %v10126_v15 = vld [vmem:[#allocation6 + $0x74] sm:$0xf0] }
 0x4b6   :  { %v7389_v16 = vld [vmem:[#allocation6 + $0xf0] sm:$0xf]  ;;  %v7326_v17 = vor.u32 %v10126_v15, %v7325_v10  ;;  %v10142_v18 = vld [vmem:[#allocation6 + $0xf4] sm:$0xf0]  ;;  %v7317_v19 = vld [vmem:[#allocation6 + $0x60] sm:$0xf] }
 0x4b7   :  { %v10124_v20 = vld [vmem:[#allocation6 + $0x64] sm:$0xf0]  ;;  %v7390_v21 = vor.u32 %v10142_v18, %v7389_v16  ;;  %v7381_v22 = vld [vmem:[#allocation6 + $0xe0] sm:$0xf]  ;;  %v7309_v26 = vld [vmem:[#allocation6 + $0x50] sm:$0xf] }
 0x4b8   :  { %v10140_v23 = vld [vmem:[#allocation6 + $0xe4] sm:$0xf0]  ;;  %1193 = vmatpush.bf16.msrb.mxu2 %v7326_v17  ;;  %v7318_v24 = vor.u32 %v10124_v20, %v7317_v19  ;;  %v10122_v27 = vld [vmem:[#allocation6 + $0x54] sm:$0xf0]  ;;  %v7373_v28 = vld [vmem:[#allocation6 + $0xd0] sm:$0xf] }
 0x4b9   :  { %1206 = vmatpush.bf16.msrb.mxu3 %v7390_v21  ;;  %v7382_v25 = vor.u32 %v10140_v23, %v7381_v22  ;;  %v10138_v29 = vld [vmem:[#allocation6 + $0xd4] sm:$0xf0]  ;;  %v10125_v30 = vld [vmem:[#allocation6 + $0x74] sm:$0xf]  ;;  %v7310_v31 = vor.u32 %v10122_v27, %v7309_v26  ;;  %v7327_v32 = vld [vmem:[#allocation6 + $0x78] sm:$0xf0] }
 0x4ba   :  { %v10141_v33 = vld [vmem:[#allocation6 + $0xf4] sm:$0xf]  ;;  %v7391_v34 = vld [vmem:[#allocation6 + $0xf8] sm:$0xf0]  ;;  %v7374_v35 = vor.u32 %v10138_v29, %v7373_v28  ;;  %v7301_v36 = vld [vmem:[#allocation6 + $0x40] sm:$0xf]  ;;  %v7330_v39 = vor.u32 %v10125_v30, %v7327_v32 }
 0x4bb   :  { %v10120_v37 = vld [vmem:[#allocation6 + $0x44] sm:$0xf0]  ;;  %v7365_v38 = vld [vmem:[#allocation6 + $0xc0] sm:$0xf]  ;;  %v7394_v40 = vor.u32 %v10141_v33, %v7391_v34  ;;  %v10123_v42 = vld [vmem:[#allocation6 + $0x64] sm:$0xf] }
 0x4bc   :  { %1194 = vmatpush.bf16.msrb.mxu2 %v7318_v24  ;;  %v10136_v41 = vld [vmem:[#allocation6 + $0xc4] sm:$0xf0]  ;;  %v7319_v43 = vld [vmem:[#allocation6 + $0x68] sm:$0xf0]  ;;  %1219 = vmatpush.bf16.msra.mxu0 %v7330_v39  ;;  %v10139_v45 = vld [vmem:[#allocation6 + $0xe4] sm:$0xf]  ;;  %v7302_v47 = vor.u32 %v10120_v37, %v7301_v36 }
 0x4bd   :  { %1207 = vmatpush.bf16.msrb.mxu3 %v7382_v25  ;;  %1232 = vmatpush.bf16.msra.mxu1 %v7394_v40  ;;  %v7322_v44 = vor.u32 %v10123_v42, %v7319_v43  ;;  %v7383_v46 = vld [vmem:[#allocation6 + $0xe8] sm:$0xf0]  ;;  %v7293_v48 = vld [vmem:[#allocation6 + $0x30] sm:$0xf]  ;;  %v10118_v49 = vld [vmem:[#allocation6 + $0x34] sm:$0xf0]  ;;  %v7366_v51 = vor.u32 %v10136_v41, %v7365_v38 }
 0x4be   :  { %v7386_v50 = vor.u32 %v10139_v45, %v7383_v46  ;;  %v10121_v52 = vld [vmem:[#allocation6 + $0x54] sm:$0xf]  ;;  %v7311_v53 = vld [vmem:[#allocation6 + $0x58] sm:$0xf0]  ;;  %v7357_v55 = vld [vmem:[#allocation6 + $0xb0] sm:$0xf]  ;;  %v7294_v61 = vor.u32 %v10118_v49, %v7293_v48 }
 0x4bf   :  { %v10137_v54 = vld [vmem:[#allocation6 + $0xd4] sm:$0xf]  ;;  %v10134_v56 = vld [vmem:[#allocation6 + $0xb4] sm:$0xf0]  ;;  %v7375_v57 = vld [vmem:[#allocation6 + $0xd8] sm:$0xf0]  ;;  %v7314_v58 = vor.u32 %v10121_v52, %v7311_v53 }
 0x4c0   :  { %1195 = vmatpush.bf16.msrb.mxu2 %v7310_v31  ;;  %1220 = vmatpush.bf16.msra.mxu0 %v7322_v44  ;;  %v7378_v59 = vor.u32 %v10137_v54, %v7375_v57  ;;  %v10119_v60 = vld [vmem:[#allocation6 + $0x44] sm:$0xf]  ;;  %v7303_v62 = vld [vmem:[#allocation6 + $0x48] sm:$0xf0]  ;;  %v7358_v1 = vor.u32 %v10134_v56, %v7357_v55  ;;  %v7285_v2 = vld [vmem:[#allocation6 + $0x20] sm:$0xf] }
 0x4c1   :  { %1208 = vmatpush.bf16.msrb.mxu3 %v7374_v35  ;;  %1233 = vmatpush.bf16.msra.mxu1 %v7386_v50  ;;  %v10135_v63 = vld [vmem:[#allocation6 + $0xc4] sm:$0xf]  ;;  %v7367_v0 = vld [vmem:[#allocation6 + $0xc8] sm:$0xf0]  ;;  %v10116_v3 = vld [vmem:[#allocation6 + $0x24] sm:$0xf0]  ;;  %v7306_v6 = vor.u32 %v10119_v60, %v7303_v62 }
 0x4c2   :  { %v7349_v4 = vld [vmem:[#allocation6 + $0xa0] sm:$0xf]  ;;  %v10132_v5 = vld [vmem:[#allocation6 + $0xa4] sm:$0xf0]  ;;  %v7370_v7 = vor.u32 %v10135_v63, %v7367_v0  ;;  %v10117_v10 = vld [vmem:[#allocation6 + $0x34] sm:$0xf]  ;;  %v7286_v15 = vor.u32 %v10116_v3, %v7285_v2 }
 0x4c3   :  { %v7295_v16 = vld [vmem:[#allocation6 + $0x38] sm:$0xf0]  ;;  %v10133_v17 = vld [vmem:[#allocation6 + $0xb4] sm:$0xf]  ;;  %v7350_v19 = vor.u32 %v10132_v5, %v7349_v4  ;;  %v7277_v20 = vld [vmem:[#allocation6 + $0x10] sm:$0xf] }
 0x4c4   :  { %1196 = vmatpush.bf16.msrb.mxu2 %v7302_v47  ;;  %1221 = vmatpush.bf16.msra.mxu0 %v7314_v58  ;;  %v7359_v18 = vld [vmem:[#allocation6 + $0xb8] sm:$0xf0]  ;;  %v10114_v21 = vld [vmem:[#allocation6 + $0x14] sm:$0xf0]  ;;  %v7341_v22 = vld [vmem:[#allocation6 + $0x90] sm:$0xf]  ;;  %v7298_v24 = vor.u32 %v10117_v10, %v7295_v16 }
 0x4c5   :  { %1209 = vmatpush.bf16.msrb.mxu3 %v7366_v51  ;;  %1234 = vmatpush.bf16.msra.mxu1 %v7378_v59  ;;  %v10130_v23 = vld [vmem:[#allocation6 + $0x94] sm:$0xf0]  ;;  %v7362_v25 = vor.u32 %v10133_v17, %v7359_v18  ;;  %v10115_v26 = vld [vmem:[#allocation6 + $0x24] sm:$0xf]  ;;  %v7278_v27 = vor.u32 %v10114_v21, %v7277_v20  ;;  %v7287_v28 = vld [vmem:[#allocation6 + $0x28] sm:$0xf0] }
 0x4c6   :  { %v10131_v29 = vld [vmem:[#allocation6 + $0xa4] sm:$0xf]  ;;  %v7351_v30 = vld [vmem:[#allocation6 + $0xa8] sm:$0xf0]  ;;  %v7342_v31 = vor.u32 %v10130_v23, %v7341_v22  ;;  %v7269_v32 = vld [vmem:[#allocation6] sm:$0xf]  ;;  %v7290_v36 = vor.u32 %v10115_v26, %v7287_v28 }
 0x4c7   :  { %v10112_v33 = vld [vmem:[#allocation6 + $0x4] sm:$0xf0]  ;;  %v7333_v34 = vld [vmem:[#allocation6 + $0x80] sm:$0xf]  ;;  %v7354_v37 = vor.u32 %v10131_v29, %v7351_v30  ;;  %v10113_v39 = vld [vmem:[#allocation6 + $0x14] sm:$0xf] }
 0x4c8   :  { %1197 = vmatpush.bf16.msrb.mxu2 %v7294_v61  ;;  %1222 = vmatpush.bf16.msra.mxu0 %v7306_v6  ;;  %v10128_v35 = vld [vmem:[#allocation6 + $0x84] sm:$0xf0]  ;;  %v7270_v38 = vor.u32 %v10112_v33, %v7269_v32  ;;  %v7279_v40 = vld [vmem:[#allocation6 + $0x18] sm:$0xf0]  ;;  %v10129_v43 = vld [vmem:[#allocation6 + $0x94] sm:$0xf] }
 0x4c9   :  { %1210 = vmatpush.bf16.msrb.mxu3 %v7358_v1  ;;  %1235 = vmatpush.bf16.msra.mxu1 %v7370_v7  ;;  %v7334_v41 = vor.u32 %v10128_v35, %v7333_v34  ;;  %v10150_v42 = vld [vmem:[#allocation21 + $0x38] sm:$0xff]  ;;  %v7343_v44 = vld [vmem:[#allocation6 + $0x98] sm:$0xf0]  ;;  %v7282_v46 = vor.u32 %v10113_v39, %v7279_v40  ;;  %v10111_v48 = vld [vmem:[#allocation6 + $0x4] sm:$0xf]  ;;  %s1600_s27 = sshll.u32 %s12176_s13, 4  ;;  %s1601_s27 = int_to_ptr.hbm [resolvable:$true] %s1600_s27 }
 0x4ca   :  { %v10158_v45 = vld [vmem:[#allocation21 + $0x78] sm:$0xff]  ;;  %v7346_v47 = vor.u32 %v10129_v43, %v7343_v44  ;;  %v10149_v50 = vld [vmem:[#allocation21 + $0x30] sm:$0xff]  ;;  %v10148_v56 = vld [vmem:[#allocation21 + $0x28] sm:$0xff]  ;;  %s11731_s7 = sshra.s32 %s1601_s27, 4  ;;  %s11735_s19 = scalar_lea.hbm %s12176_s13, 2048  ;;  %s11732_s7 = int_to_ptr.hbm [resolvable:$true] %s11731_s7 }
 0x4cb   :  { %v7271_v49 = vld [vmem:[#allocation6 + $0x8] sm:$0xf0]  ;;  %v10127_v51 = vld [vmem:[#allocation6 + $0x84] sm:$0xf]  ;;  %v10156_v57 = vld [vmem:[#allocation21 + $0x68] sm:$0xff]  ;;  %s11733_s15 = scalar_lea.hbm %s11732_s7, 256  ;;  %p11736_p12 = scmp.lt.s32.totalorder %s11732_s7, %s12176_s13 }
 0x4cc   :  { %1198 = vmatpush.bf16.msrb.mxu2 %v7286_v15  ;;  %1223 = vmatpush.bf16.msra.mxu0 %v7298_v24  ;;  %v7335_v52 = vld [vmem:[#allocation6 + $0x88] sm:$0xf0]  ;;  %v10157_v53 = vld [vmem:[#allocation21 + $0x70] sm:$0xff]  ;;  %v7274_v54 = vor.u32 %v10111_v48, %v7271_v49  ;;  %v10147_v58 = vld [vmem:[#allocation21 + $0x20] sm:$0xff]  ;;  %p11734_p11 = scmp.ne.s32.totalorder %s11732_s7, %s11733_s15  ;;  %p11737_p13 = scmp.lt.s32.totalorder %s11735_s19, %s11733_s15 }
 0x4cd   :  { %1211 = vmatpush.bf16.msrb.mxu3 %v7350_v19  ;;  %1236 = vmatpush.bf16.msra.mxu1 %v7362_v25  ;;  %v7338_v55 = vor.u32 %v10127_v51, %v7335_v52  ;;  %v10155_v59 = vld [vmem:[#allocation21 + $0x60] sm:$0xff]  ;;  %v10146_v60 = vld [vmem:[#allocation21 + $0x18] sm:$0xff]  ;;  %v10145_v62 = vld [vmem:[#allocation21 + $0x10] sm:$0xff] }
 0x4ce   :  { %v10154_v61 = vld [vmem:[#allocation21 + $0x58] sm:$0xff]  ;;  %v10153_v63 = vld [vmem:[#allocation21 + $0x50] sm:$0xff]  ;;  %v10144_v0 = vld [vmem:[#allocation21 + $0x8] sm:$0xff]  ;;  %p11738_p0 = por %p11737_p13, %p11736_p12 }
 0x4cf   :  { %v10152_v1 = vld [vmem:[#allocation21 + $0x48] sm:$0xff]  ;;  %v10143_v2 = vld [vmem:[#allocation21] sm:$0xff]  ;;  %v10173_v4 = vld [vmem:[#allocation24 + $0x74] sm:$0xf] }
 0x4d0   :  { %1199 = vmatpush.bf16.msrb.mxu2 %v7278_v27  ;;  %1224 = vmatpush.bf16.msra.mxu0 %v7290_v36  ;;  %v10151_v3 = vld [vmem:[#allocation21 + $0x40] sm:$0xff]  ;;  %v10172_v15 = vld [vmem:[#allocation24 + $0x64] sm:$0xf0]  ;;  %v7511_v18 = vld [vmem:[#allocation24 + $0x68] sm:$0xf0]  ;;  %p11739_p1 = pnand %p11738_p0, %p11734_p11 }
 0x4d1   :  { %1212 = vmatpush.bf16.msrb.mxu3 %v7342_v31  ;;  %1237 = vmatpush.bf16.msra.mxu1 %v7354_v37  ;;  %v7519_v6 = vld [vmem:[#allocation24 + $0x78] sm:$0xf0]  ;;  %v7509_v10 = vld [vmem:[#allocation24 + $0x60] sm:$0xf]  ;;  %v10171_v16 = vld [vmem:[#allocation24 + $0x64] sm:$0xf] }
 0x4d2   :  { %v7522_v7 = vor.u32 %v10173_v4, %v7519_v6  ;;  %v7510_v17 = vor.u32 %v10172_v15, %v7509_v10  ;;  %v7514_v19 = vor.u32 %v10171_v16, %v7511_v18  ;;  %v7501_v20 = vld [vmem:[#allocation24 + $0x50] sm:$0xf]  ;;  %v10169_v21 = vld [vmem:[#allocation24 + $0x54] sm:$0xf]  ;;  %v7503_v22 = vld [vmem:[#allocation24 + $0x58] sm:$0xf0] }
 0x4d3   :  { %v7506_v23 = vor.u32 %v10169_v21, %v7503_v22  ;;  %v7493_v24 = vld [vmem:[#allocation24 + $0x40] sm:$0xf]  ;;  %v10168_v25 = vld [vmem:[#allocation24 + $0x44] sm:$0xf0]  ;;  %v10167_v26 = vld [vmem:[#allocation24 + $0x44] sm:$0xf] }
 0x4d4   :  { %1200 = vmatpush.bf16.msrb.mxu2 %v7270_v38  ;;  %1225 = vmatpush.bf16.msra.mxu0 %v7282_v46  ;;  %v7494_v27 = vor.u32 %v10168_v25, %v7493_v24  ;;  %v7495_v28 = vld [vmem:[#allocation24 + $0x48] sm:$0xf0]  ;;  %v7485_v29 = vld [vmem:[#allocation24 + $0x30] sm:$0xf]  ;;  %v10166_v31 = vld [vmem:[#allocation24 + $0x34] sm:$0xf0] }
 0x4d5   :  { %1213 = vmatpush.bf16.msrb.mxu3 %v7334_v41  ;;  %1238 = vmatpush.bf16.msra.mxu1 %v7346_v47  ;;  %v7498_v30 = vor.u32 %v10167_v26, %v7495_v28  ;;  %v10165_v32 = vld [vmem:[#allocation24 + $0x34] sm:$0xf]  ;;  %v7487_v33 = vld [vmem:[#allocation24 + $0x38] sm:$0xf0]  ;;  %v7486_v34 = vor.u32 %v10166_v31, %v7485_v29  ;;  %v7477_v36 = vld [vmem:[#allocation24 + $0x20] sm:$0xf] }
 0x4d6   :  { %v7490_v35 = vor.u32 %v10165_v32, %v7487_v33  ;;  %v10164_v37 = vld [vmem:[#allocation24 + $0x24] sm:$0xf0]  ;;  %v10163_v38 = vld [vmem:[#allocation24 + $0x24] sm:$0xf]  ;;  %v7479_v39 = vld [vmem:[#allocation24 + $0x28] sm:$0xf0] }
 0x4d7   :  { %1201 = vmatmul.bf16.vlgmr.msrb.gmra.mxu2 %v12356_v8  ;;  %v7478_v40 = vor.u32 %v10164_v37, %v7477_v36  ;;  %v7482_v41 = vor.u32 %v10163_v38, %v7479_v39  ;;  %v10162_v43 = vld [vmem:[#allocation24 + $0x14] sm:$0xf0]  ;;  %v10161_v44 = vld [vmem:[#allocation24 + $0x14] sm:$0xf]  ;;  %v7471_v46 = vld [vmem:[#allocation24 + $0x18] sm:$0xf0] }
 0x4d8   :  { %1392 = vmatpush.bf16.msra.mxu2 %v10150_v42  ;;  %1214 = vmatmul.bf16.vlgmr.msrb.gmra.mxu3 %v12358_v9  ;;  %v7469_v42 = vld [vmem:[#allocation24 + $0x10] sm:$0xf]  ;;  %v7474_v47 = vor.u32 %v10161_v44, %v7471_v46  ;;  %v7461_v51 = vld [vmem:[#allocation24] sm:$0xf]  ;;  %v10160_v52 = vld [vmem:[#allocation24 + $0x4] sm:$0xf0] }
 0x4d9   :  { %1405 = vmatpush.bf16.msra.mxu3 %v10158_v45  ;;  %1226 = vmatpush.bf16.msra.mxu0 %v7274_v54  ;;  %v7470_v45 = vor.u32 %v10162_v43, %v7469_v42 }
 0x4da   :  { %1239 = vmatpush.bf16.msra.mxu1 %v7338_v55  ;;  %v1252_v55 = vld [vmem:[#allocation20] sm:$0x3] }
 0x4dc   :  { %1393 = vmatpush.bf16.msra.mxu2 %v10149_v50  ;;  %1227 = vmatmul.bf16.vlgmr.msra.gmra.mxu0 %v12356_v8  ;;  %v7517_v8 = vld [vmem:[#allocation24 + $0x70] sm:$0xf] }
 0x4dd   :  { %1406 = vmatpush.bf16.msra.mxu3 %v10157_v53  ;;  %1240 = vmatmul.bf16.vlgmr.msra.gmra.mxu1 %v12358_v9  ;;  %v10174_v9 = vld [vmem:[#allocation24 + $0x74] sm:$0xf0]  ;;  %v10159_v53 = vld [vmem:[#allocation24 + $0x4] sm:$0xf] }
 0x4de   :  { %v7518_v5 = vor.u32 %v10174_v9, %v7517_v8  ;;  %1535 = vmatpush.bf16.msrb.mxu1 %v7522_v7  ;;  %v10925_v7 = vld [vmem:[#allocation23] ss:$0 sm:$0xff] }
 0x4e0   :  { %1394 = vmatpush.bf16.msra.mxu2 %v10148_v56  ;;  %1522 = vmatpush.bf16.msrb.mxu0 %v7518_v5  ;;  %v7462_v56 = vor.u32 %v10160_v52, %v7461_v51 }
 0x4e1   :  { %1407 = vmatpush.bf16.msra.mxu3 %v10156_v57  ;;  %v7463_v57 = vld [vmem:[#allocation24 + $0x8] sm:$0xf0] }
 0x4e2   :  { %1536 = vmatpush.bf16.msrb.mxu1 %v7514_v19 }
 0x4e4   :  { %1395 = vmatpush.bf16.msra.mxu2 %v10147_v58  ;;  %1523 = vmatpush.bf16.msrb.mxu0 %v7510_v17 }
 0x4e5   :  { %1408 = vmatpush.bf16.msra.mxu3 %v10155_v59 }
 0x4e6   :  { %1537 = vmatpush.bf16.msrb.mxu1 %v7506_v23 }
 0x4e8   :  { %1396 = vmatpush.bf16.msra.mxu2 %v10146_v60  ;;  %v7466_v60 = vor.u32 %v10159_v53, %v7463_v57 }
 0x4e9   :  { %1409 = vmatpush.bf16.msra.mxu3 %v10154_v61 }
 0x4ea   :  { %1538 = vmatpush.bf16.msrb.mxu1 %v7498_v30 }
 0x4ec   :  { %1397 = vmatpush.bf16.msra.mxu2 %v10145_v62  ;;  %v1255_v62 = vperm.slane %v1252_v55, 1 }
 0x4ed   :  { %1410 = vmatpush.bf16.msra.mxu3 %v10153_v63 }
 0x4ee   :  { %1539 = vmatpush.bf16.msrb.mxu1 %v7490_v35 }
 0x4f0   :  { %1398 = vmatpush.bf16.msra.mxu2 %v10144_v0 }
 0x4f1   :  { %1411 = vmatpush.bf16.msra.mxu3 %v10152_v1  ;;  %v1254_v1 = vperm.slane %v1252_v55, 0 }
 0x4f2   :  { %1540 = vmatpush.bf16.msrb.mxu1 %v7482_v41 }
 0x4f4   :  { %1399 = vmatpush.bf16.msra.mxu2 %v10143_v2  ;;  %v1256_v2 = vrot.slane %v1255_v62, 6 }
 0x4f5   :  { %1412 = vmatpush.bf16.msra.mxu3 %v10151_v3 }
 0x4f6   :  { %1541 = vmatpush.bf16.msrb.mxu1 %v7474_v47  ;;  %v1257_v4 = vsel %vm654_vm4, %v1254_v1, %v1256_v2 }
 0x4f7   :  { %1400 = vmatmul.bf16.vlgmr.msra.gmra.mxu2 %v12340_v13  ;;  %v10170_v13 = vld [vmem:[#allocation24 + $0x54] sm:$0xf0] }
 0x4f8   :  { %1413 = vmatmul.bf16.vlgmr.msra.gmra.mxu3 %v12344_v14  ;;  %v7502_v14 = vor.u32 %v10170_v13, %v7501_v20 }
 0x4fa   :  { %1524 = vmatpush.bf16.msrb.mxu0 %v7502_v14  ;;  %1542 = vmatpush.bf16.msrb.mxu1 %v7466_v60 }
 0x4fe   :  { %1525 = vmatpush.bf16.msrb.mxu0 %v7494_v27 }
 0x502   :  { %1526 = vmatpush.bf16.msrb.mxu0 %v7486_v34 }
 0x506   :  { %1527 = vmatpush.bf16.msrb.mxu0 %v7478_v40 }
 0x50a   :  { %1528 = vmatpush.bf16.msrb.mxu0 %v7470_v45 }
 0x50e   :  { %1529 = vmatpush.bf16.msrb.mxu0 %v7462_v56 }
 0x559   :  { %v1228_v50 = vpop.f32.mrf.mxu0 }
 0x55a   :  { %v1202_v48 = vpop.f32.mrf.mxu2  ;;  %v1241_v54 = vpop.f32.mrf.mxu1 }
 0x55b   :  { %v1215_v49 = vpop.f32.mrf.mxu3  ;;  %v1242_v59 = vadd.f32 %v1241_v54, %v1228_v50 }
 0x55c   :  { %v1216_v58 = vadd.f32 %v1215_v49, %v1202_v48 }
 0x55d   :  { %v1247_v61 = vrot.slane %v1242_v59, 6 }
 0x55f   :  { %v1248_v63 = vsel %vm654_vm4, %v1216_v58, %v1247_v61 }
 0x560   :  { %1250 = vst [vmem:[#allocation3] sm:$0xf] %v1248_v63 }
 0x561   :  { %v1230_v8 = vpop.f32.mrf.mxu0 }
 0x562   :  { %v1204_v0 = vpop.f32.mrf.mxu2  ;;  %v1243_v9 = vpop.f32.mrf.mxu1 }
 0x563   :  { %v1217_v3 = vpop.f32.mrf.mxu3 }
 0x567   :  { %v1251_v5 = vld [vmem:[#allocation3] sm:$0xf] }
 0x568   :  { %v1259_v6 = vadd.f32 %v1257_v4, %v1251_v5 }
 0x56a   :  { %1587 = vst [vmem:[#allocation1] ss:$4 sm:$0xff] %v1259_v6 }
 0x57a   :  { %v1401_v10 = vpop.f32.mrf.mxu2 }
 0x57b   :  { %v1402_v15 = vadd.f32 %v10925_v7, %v1401_v10  ;;  %v1414_v16 = vpop.f32.mrf.mxu3 }
 0x57d   :  { %v1415_v17 = vadd.f32 %v1414_v16, %v1402_v15 }
 0x57f   :  { %v1418_v18 = vmax.f32 %v1415_v17, 0.0 }
 0x581   :  { %v1419_v19 = vpack.c.bf16 %v1418_v18, %v1418_v18 }
 0x582   :  { %v1403_v20 = vpop.f32.mrf.mxu2 }
 0x583   :  { %v1416_v13 = vpop.f32.mrf.mxu3  ;;  %1530 = vmatmul.bf16.vlgmr.msrb.gmra.mxu0 %v1419_v19  ;;  %1543 = vmatmul.bf16.vlgmr.msrb.gmra.mxu1 %v1419_v19 }
 0x584   :  { %11742 = shalt.err (!%p11739_p1)  }
 0x585   :  { %s11991_s21 = smov 1024   ;;  %v1436_v21 = vld [vmem:[#allocation26] sm:$0x3]  ;;  %v1588_v49 = vld.sshfl [vmem:[#allocation1] sm:$0xff pattern:$0x73625140] }
 0x586   :  { %1607 = dma.hbm_to_vmem [thread:$0]  %s1601_s27, 4096, %s12329_s6, [#allocation8], %s11991_s21, %s11959_s28, %s11960_s9  ;;  %v1438_v14 = vperm.slane %v1436_v21, 0  ;;  %v1439_v22 = vperm.slane %v1436_v21, 1  ;;  %v1592_v56 = vadd.f32 %v1588_v49, %v12334_v11 }
 0x587   :  { %v1589_v53 = vld.sshfl [vmem:[#allocation1 + $0x8] sm:$0xff pattern:$0x73625140]  ;;  %s12384_s20 = smov 0  }
 0x588   :  { %v1593_v59 = vadd.f32 %v1589_v53, %v12336_v12 }
 0x600   :  { %v1531_v23 = vpop.f32.mrf.mxu0  ;;  %v1544_v24 = vpop.f32.mrf.mxu1 }
 0x601   :  { %v1532_v25 = vadd.f32 %v1531_v23, %v1438_v14  ;;  %v1545_v26 = vadd.f32 %v1544_v24, %v1439_v22 }
 0x603   :  { %v7523_v27 = vmul.f32 -1.442695, %v1532_v25  ;;  %v7524_v28 = vmul.f32 -1.442695, %v1545_v26 }
 0x605   :  { %10926 = vpow2.f32 %v7523_v27 }
 0x606   :  { %10928 = vpow2.f32 %v7524_v28 }
 0x608   :  { %v1533_v29 = vpop.f32.mrf.mxu0  ;;  %v1546_v30 = vpop.f32.mrf.mxu1 }
 0x60b   :  { %v10927_v31 = vpop.eup %10926 }
 0x60c   :  { %v10929_v32 = vpop.eup %10928  ;;  %v1554_v33 = vadd.f32 1.0, %v10927_v31 }
 0x60d   :  { %v1555_v34 = vadd.f32 1.0, %v10929_v32 }
 0x60e   :  { %10930 = vrcp.f32 %v1554_v33  ;;  %v1567_v40 = vand.u32 2147483648, %v1554_v33  ;;  %v1565_v43 = vand.u32 2147483647, %v1554_v33  ;;  %vm1561_vm10 = vweird.f32 %v1554_v33 }
 0x60f   :  { %10932 = vrcp.f32 %v1555_v34  ;;  %v1582_v44 = vand.u32 2147483648, %v1555_v34  ;;  %v1580_v46 = vand.u32 2147483647, %v1555_v34  ;;  %vm1576_vm12 = vweird.f32 %v1555_v34 }
 0x610   :  { %v1568_v48 = vor.u32 1.1754944e-38, %v1567_v40  ;;  %vm1566_vm13 = vcmp.eq.f32.partialorder %v1565_v43, 8.507059e+37 }
 0x611   :  { %v1583_v52 = vor.u32 1.1754944e-38, %v1582_v44  ;;  %vm1581_vm15 = vcmp.eq.f32.partialorder %v1580_v46, 8.507059e+37 }
 0x614   :  { %v10931_v35 = vpop.eup %10930 }
 0x615   :  { %v10933_v36 = vpop.eup %10932  ;;  %v1557_v37 = vmul.f32 %v10931_v35, %v1554_v33  ;;  %vm1562_vm8 = vweird.f32 %v10931_v35 }
 0x616   :  { %v1572_v38 = vmul.f32 %v10933_v36, %v1555_v34  ;;  %vm1577_vm9 = vweird.f32 %v10933_v36  ;;  %vm1563_vm11 = vmor %vm1561_vm10, %vm1562_vm8 }
 0x617   :  { %v1558_v39 = vsub.f32 1.0, %v1557_v37  ;;  %vm1578_vm14 = vmor %vm1576_vm12, %vm1577_vm9 }
 0x618   :  { %v1573_v41 = vsub.f32 1.0, %v1572_v38 }
 0x619   :  { %v1559_v42 = vmul.f32 %v10931_v35, %v1558_v39 }
 0x61a   :  { %v1574_v45 = vmul.f32 %v10933_v36, %v1573_v41 }
 0x61b   :  { %v1560_v47 = vadd.f32 %v10931_v35, %v1559_v42 }
 0x61c   :  { %v1575_v50 = vadd.f32 %v10933_v36, %v1574_v45 }
 0x61d   :  { %v1564_v51 = vsel %vm1563_vm11, %v10931_v35, %v1560_v47 }
 0x61e   :  { %v1569_v54 = vsel %vm1566_vm13, %v1568_v48, %v1564_v51  ;;  %v1579_v55 = vsel %vm1578_vm14, %v10933_v36, %v1575_v50 }
 0x61f   :  { %v1594_v57 = vmul.f32 %v1569_v54, %v12334_v11  ;;  %v1584_v58 = vsel %vm1581_vm15, %v1583_v52, %v1579_v55 }
 0x620   :  { %v1595_v60 = vmul.f32 %v1584_v58, %v12336_v12 }
 0x621   :  { %v1596_v61 = vadd.f32 %v1594_v57, %v1592_v56 }
 0x622   :  { %v1597_v62 = vadd.f32 %v1595_v60, %v1593_v59 }
 0x623   :  { %v12380_v63 = vpack.c.bf16 %v1596_v61, %v1596_v61 }
 0x624   :  { %v12382_v0 = vpack.c.bf16 %v1597_v62, %v1597_v62 }
 0x625 LB: > { %p1614_p2 = scmp.lt.s32.totalorder %s11911_s20, 0  ;;  %s1615_s18 = ssub.s32 0, %s11911_s20  ;;  %s11911_s20 = sphi %s12384_s20, %s13526_s20  }
 0x626   : > { %s7525_s22 = smin.u32 %s11911_s20, %s1615_s18  ;;  %s12393_s0 = sadd.s32 1, %s11911_s20  }
 0x627   : > { %s1617_s4 = sand.u32 1, %s7525_s22   ;;  %p7528_p3 = scmp.ge.s32.totalorder %s12393_s0, 8 }
 0x628   : > { %s1618_s24 = ssub.s32 0, %s1617_s4  ;;  %s10175_s3 = sshll.u32 %s11911_s20, 8 }
 0x629   : > { %s13529_s24 = smov (!%p1614_p2, %s1618_s24), %s1617_s4  ;;  %p10819_p5 = scmp.lt.s32.totalorder %s12393_s0, 8 }
 0x62a   : > { %p7527_p4 = scmp.lt.s32.totalorder %s13529_s24, 0  ;;  %s1624_s25 = sadd.s32 2, %s13529_s24 }
 0x62b   : > { %s10176_s11 = sadd.s32 256, %s10175_s3 }
 0x62c   : > { %s13531_s25 = smov (!%p7527_p4, %s1624_s25), %s13529_s24  ;;  %s1633_s8 = sshra.s32 %s10176_s11, 7 }
 0x62d   : > { %s1631_s23 = ssub.s32 1, %s13531_s25  ;;  %s7530_s1 = sshll.u32 %s1633_s8, 2 }
 0x62e   : > { %s1636_s17 = scalar_lea.hbm %s12176_s13, %s7530_s1  ;;  %s10177_s6 = sshll.u32 %s1631_s23, 8 }
 0x62f   : > { %s12404_s29 = sshll.u32 %s1636_s17, 4  ;;  %s1639_s10 = scalar_lea.vmem [#allocation6], %s10177_s6  ;;  %s1642_s29 = int_to_ptr.hbm [resolvable:$true] %s12404_s29 }
 0x630   : > { %s12406_s16 = sshll.u32 %s1639_s10, 4  ;;  %s12410_s26 = scalar_lea.sflag [#allocation8], %s1631_s23  ;;  %s1644_s16 = int_to_ptr.vmem [resolvable:$true] %s12406_s16 }
 0x631   : > { %s11755_s14 = sshra.s32 %s1642_s29, 4  ;;  %s11756_s14 = int_to_ptr.hbm [resolvable:$true] %s11755_s14 }
 0x632   : > { %s11757_s30 = scalar_lea.hbm %s11756_s14, 256  ;;  %p11762_p9 = scmp.lt.s32.totalorder %s11756_s14, %s12176_s13 }
 0x633   : > { %p11758_p6 = scmp.ne.s32.totalorder %s11756_s14, %s11757_s30  ;;  %p11763_p10 = scmp.lt.s32.totalorder %s11735_s19, %s11757_s30 }
 0x635   : > { %p11759_p7 = pnand %p11758_p6, %p10819_p5  ;;  %p11764_p11 = por %p11763_p10, %p11762_p9 }
 0x637   : > { %p11760_p8 = pneg %p11759_p7 }
 0x639   : > { %p11765_p12 = pnand %p11764_p11, %p11760_p8 }
 0x63b   : > { %11768 = shalt.err (!%p11765_p12)  }
 0x63c   : > { %s11769_s2 = sshra.s32 %s1644_s16, 4  ;;  %s11992_s7 = smov [#allocation6]   ;;  %s11770_s2 = int_to_ptr.vmem [resolvable:$true] %s11769_s2 }
 0x63d   : > { %s11771_s27 = scalar_lea.vmem %s11770_s2, 256  ;;  %s11775_s15 = scalar_lea.vmem %s11992_s7, 512 }
 0x63e   : > { %p11772_p13 = scmp.ne.s32.totalorder %s11770_s2, %s11771_s27  ;;  %p11776_p2 = scmp.lt.s32.totalorder %s11770_s2, [#allocation6] }
 0x63f   : > { %p11777_p4 = scmp.lt.s32.totalorder %s11775_s15, %s11771_s27 }
 0x640   : > { %p11773_p0 = pnand %p11772_p13, %p10819_p5 }
 0x641   : > { %p11778_p6 = por %p11777_p4, %p11776_p2 }
 0x642   : > { %p11774_p1 = pneg %p11773_p0 }
 0x644   : > { %p11779_p7 = pnand %p11778_p6, %p11774_p1 }
 0x646   : > { %11782 = shalt.err (!%p11779_p7)  }
 0x647   : > { %s11993_s21 = smov 1024   ;;  %s11994_s18 = smov 128  }
 0x648   : > { %s11995_s22 = smov 8   ;;  %s10178_s4 = sshll.u32 %s13531_s25, 8 }
 0x649   : > { %10816 = dma.hbm_to_vmem [thread:$0]  (%p10819_p5), %s1642_s29, 4096, %s1644_s16, %s12410_s26, %s11993_s21, %s11994_s18, %s11995_s22 }
 0x64a   : > { %s12431_s24 = scalar_lea.vmem [#allocation6], %s10178_s4  ;;  %s1653_s11 = scalar_lea.sflag [#allocation8], %s13531_s25 }
 0x64b   : > { %11903 = dma.done.wait %s1653_s11, 4096 }
 0x64c   : > { %11904 = vsyncadd %s1653_s11, 4294963200  ;;  %v7594_v11 = vld [vmem:[%s12431_s24 + $0x70] sm:$0xf]  ;;  %v10194_v12 = vld [vmem:[%s12431_s24 + $0x74] sm:$0xf0]  ;;  %s1905_s25 = sshra.s32 %s10175_s3, 7  ;;  %s13526_s20 = smov %s12393_s0 }
 0x64d   : > { %v7658_v1 = vld [vmem:[%s12431_s24 + $0xf0] sm:$0xf]  ;;  %v7595_v2 = vor.u32 %v10194_v12, %v7594_v11  ;;  %v10210_v3 = vld [vmem:[%s12431_s24 + $0xf4] sm:$0xf0]  ;;  %v10193_v8 = vld [vmem:[%s12431_s24 + $0x74] sm:$0xf] }
 0x64e   : > { %v7596_v9 = vld [vmem:[%s12431_s24 + $0x78] sm:$0xf0]  ;;  %v7659_v4 = vor.u32 %v10210_v3, %v7658_v1  ;;  %v10209_v6 = vld [vmem:[%s12431_s24 + $0xf4] sm:$0xf]  ;;  %v7586_v10 = vld [vmem:[%s12431_s24 + $0x60] sm:$0xf] }
 0x64f   : > { %v7599_v5 = vor.u32 %v10193_v8, %v7596_v9  ;;  %v7660_v7 = vld [vmem:[%s12431_s24 + $0xf8] sm:$0xf0]  ;;  %1848 = vmatpush.bf16.msra.mxu0 %v7595_v2  ;;  %v10192_v16 = vld [vmem:[%s12431_s24 + $0x64] sm:$0xf0]  ;;  %v7650_v17 = vld [vmem:[%s12431_s24 + $0xe0] sm:$0xf] }
 0x650   : > { %v7663_v15 = vor.u32 %v10209_v6, %v7660_v7  ;;  %v10208_v18 = vld [vmem:[%s12431_s24 + $0xe4] sm:$0xf0]  ;;  %1861 = vmatpush.bf16.msra.mxu1 %v7659_v4  ;;  %v7587_v19 = vor.u32 %v10192_v16, %v7586_v10  ;;  %v10191_v13 = vld [vmem:[%s12431_s24 + $0x64] sm:$0xf]  ;;  %v7588_v21 = vld [vmem:[%s12431_s24 + $0x68] sm:$0xf0] }
 0x651   : > { %1874 = vmatpush.bf16.msra.mxu2 %v7599_v5  ;;  %v7651_v20 = vor.u32 %v10208_v18, %v7650_v17  ;;  %v10207_v14 = vld [vmem:[%s12431_s24 + $0xe4] sm:$0xf]  ;;  %v7591_v22 = vor.u32 %v10191_v13, %v7588_v21  ;;  %v7652_v23 = vld [vmem:[%s12431_s24 + $0xe8] sm:$0xf0]  ;;  %v7578_v24 = vld [vmem:[%s12431_s24 + $0x50] sm:$0xf] }
 0x652   : > { %1887 = vmatpush.bf16.msra.mxu3 %v7663_v15  ;;  %v10190_v25 = vld [vmem:[%s12431_s24 + $0x54] sm:$0xf0]  ;;  %v7655_v26 = vor.u32 %v10207_v14, %v7652_v23  ;;  %v7642_v27 = vld [vmem:[%s12431_s24 + $0xd0] sm:$0xf]  ;;  %v10189_v29 = vld [vmem:[%s12431_s24 + $0x54] sm:$0xf] }
 0x653   : > { %v10206_v28 = vld [vmem:[%s12431_s24 + $0xd4] sm:$0xf0]  ;;  %1849 = vmatpush.bf16.msra.mxu0 %v7587_v19  ;;  %v7579_v30 = vor.u32 %v10190_v25, %v7578_v24  ;;  %v7580_v31 = vld [vmem:[%s12431_s24 + $0x58] sm:$0xf0]  ;;  %v10205_v32 = vld [vmem:[%s12431_s24 + $0xd4] sm:$0xf] }
 0x654   : > { %v7644_v33 = vld [vmem:[%s12431_s24 + $0xd8] sm:$0xf0]  ;;  %1862 = vmatpush.bf16.msra.mxu1 %v7651_v20  ;;  %v7643_v34 = vor.u32 %v10206_v28, %v7642_v27  ;;  %v7583_v35 = vor.u32 %v10189_v29, %v7580_v31  ;;  %v7570_v36 = vld [vmem:[%s12431_s24 + $0x40] sm:$0xf]  ;;  %v10188_v37 = vld [vmem:[%s12431_s24 + $0x44] sm:$0xf0] }
 0x655   : > { %1875 = vmatpush.bf16.msra.mxu2 %v7591_v22  ;;  %v7634_v38 = vld [vmem:[%s12431_s24 + $0xc0] sm:$0xf]  ;;  %v7647_v39 = vor.u32 %v10205_v32, %v7644_v33  ;;  %v10204_v40 = vld [vmem:[%s12431_s24 + $0xc4] sm:$0xf0]  ;;  %v10187_v41 = vld [vmem:[%s12431_s24 + $0x44] sm:$0xf]  ;;  %v7571_v45 = vor.u32 %v10188_v37, %v7570_v36 }
 0x656   : > { %1888 = vmatpush.bf16.msra.mxu3 %v7655_v26  ;;  %v7572_v42 = vld [vmem:[%s12431_s24 + $0x48] sm:$0xf0]  ;;  %v10203_v43 = vld [vmem:[%s12431_s24 + $0xc4] sm:$0xf]  ;;  %v7635_v46 = vor.u32 %v10204_v40, %v7634_v38  ;;  %v7562_v48 = vld [vmem:[%s12431_s24 + $0x30] sm:$0xf] }
 0x657   : > { %v7636_v44 = vld [vmem:[%s12431_s24 + $0xc8] sm:$0xf0]  ;;  %1850 = vmatpush.bf16.msra.mxu0 %v7579_v30  ;;  %v7575_v47 = vor.u32 %v10187_v41, %v7572_v42  ;;  %v10186_v49 = vld [vmem:[%s12431_s24 + $0x34] sm:$0xf0]  ;;  %v7626_v50 = vld [vmem:[%s12431_s24 + $0xb0] sm:$0xf] }
 0x658   : > { %1863 = vmatpush.bf16.msra.mxu1 %v7643_v34  ;;  %v7639_v51 = vor.u32 %v10203_v43, %v7636_v44  ;;  %v10202_v52 = vld [vmem:[%s12431_s24 + $0xb4] sm:$0xf0]  ;;  %v10185_v53 = vld [vmem:[%s12431_s24 + $0x34] sm:$0xf]  ;;  %v7564_v54 = vld [vmem:[%s12431_s24 + $0x38] sm:$0xf0]  ;;  %v7563_v57 = vor.u32 %v10186_v49, %v7562_v48 }
 0x659   : > { %1876 = vmatpush.bf16.msra.mxu2 %v7583_v35  ;;  %v10201_v55 = vld [vmem:[%s12431_s24 + $0xb4] sm:$0xf]  ;;  %v7628_v56 = vld [vmem:[%s12431_s24 + $0xb8] sm:$0xf0]  ;;  %v7627_v58 = vor.u32 %v10202_v52, %v7626_v50  ;;  %v7567_v59 = vor.u32 %v10185_v53, %v7564_v54  ;;  %v7554_v60 = vld [vmem:[%s12431_s24 + $0x20] sm:$0xf] }
 0x65a   : > { %1889 = vmatpush.bf16.msra.mxu3 %v7647_v39  ;;  %v10184_v61 = vld [vmem:[%s12431_s24 + $0x24] sm:$0xf0]  ;;  %v7618_v62 = vld [vmem:[%s12431_s24 + $0xa0] sm:$0xf]  ;;  %v7631_v11 = vor.u32 %v10201_v55, %v7628_v56  ;;  %v10183_v1 = vld [vmem:[%s12431_s24 + $0x24] sm:$0xf] }
 0x65b   : > { %1851 = vmatpush.bf16.msra.mxu0 %v7571_v45  ;;  %v10200_v12 = vld [vmem:[%s12431_s24 + $0xa4] sm:$0xf0]  ;;  %v7556_v2 = vld [vmem:[%s12431_s24 + $0x28] sm:$0xf0]  ;;  %v10199_v3 = vld [vmem:[%s12431_s24 + $0xa4] sm:$0xf]  ;;  %v7555_v9 = vor.u32 %v10184_v61, %v7554_v60 }
 0x65c   : > { %1864 = vmatpush.bf16.msra.mxu1 %v7635_v46  ;;  %v7620_v8 = vld [vmem:[%s12431_s24 + $0xa8] sm:$0xf0]  ;;  %v7619_v4 = vor.u32 %v10200_v12, %v7618_v62  ;;  %v7559_v5 = vor.u32 %v10183_v1, %v7556_v2  ;;  %v7546_v6 = vld [vmem:[%s12431_s24 + $0x10] sm:$0xf]  ;;  %v10182_v7 = vld [vmem:[%s12431_s24 + $0x14] sm:$0xf0] }
 0x65d   : > { %1877 = vmatpush.bf16.msra.mxu2 %v7575_v47  ;;  %v7610_v10 = vld [vmem:[%s12431_s24 + $0x90] sm:$0xf]  ;;  %v7623_v15 = vor.u32 %v10199_v3, %v7620_v8  ;;  %v10198_v16 = vld [vmem:[%s12431_s24 + $0x94] sm:$0xf0]  ;;  %v10181_v17 = vld [vmem:[%s12431_s24 + $0x14] sm:$0xf]  ;;  %v7547_v13 = vor.u32 %v10182_v7, %v7546_v6 }
 0x65e   : > { %1890 = vmatpush.bf16.msra.mxu3 %v7639_v51  ;;  %v7548_v18 = vld [vmem:[%s12431_s24 + $0x18] sm:$0xf0]  ;;  %v10197_v19 = vld [vmem:[%s12431_s24 + $0x94] sm:$0xf]  ;;  %v7611_v21 = vor.u32 %v10198_v16, %v7610_v10  ;;  %v7538_v22 = vld [vmem:[%s12431_s24] sm:$0xf] }
 0x65f   : > { %1852 = vmatpush.bf16.msra.mxu0 %v7563_v57  ;;  %v7612_v20 = vld [vmem:[%s12431_s24 + $0x98] sm:$0xf0]  ;;  %v7551_v14 = vor.u32 %v10181_v17, %v7548_v18  ;;  %v10180_v23 = vld [vmem:[%s12431_s24 + $0x4] sm:$0xf0]  ;;  %v7602_v24 = vld [vmem:[%s12431_s24 + $0x80] sm:$0xf] }
 0x660   : > { %1865 = vmatpush.bf16.msra.mxu1 %v7627_v58  ;;  %v7615_v25 = vor.u32 %v10197_v19, %v7612_v20  ;;  %v10196_v26 = vld [vmem:[%s12431_s24 + $0x84] sm:$0xf0]  ;;  %v10179_v27 = vld [vmem:[%s12431_s24 + $0x4] sm:$0xf]  ;;  %v7540_v28 = vld [vmem:[%s12431_s24 + $0x8] sm:$0xf0]  ;;  %v7539_v31 = vor.u32 %v10180_v23, %v7538_v22 }
 0x661   : > { %1878 = vmatpush.bf16.msra.mxu2 %v7567_v59  ;;  %v10195_v29 = vld [vmem:[%s12431_s24 + $0x84] sm:$0xf]  ;;  %v7604_v30 = vld [vmem:[%s12431_s24 + $0x88] sm:$0xf0]  ;;  %v7603_v32 = vor.u32 %v10196_v26, %v7602_v24  ;;  %v7543_v33 = vor.u32 %v10179_v27, %v7540_v28  ;;  %s7664_s8 = sshll.u32 %s1905_s25, 1  ;;  %v12510_v47 = vld [vmem:[#allocation27] sm:$0xff] (%p7528_p3) }
 0x662   : > { %1891 = vmatpush.bf16.msra.mxu3 %v7631_v11  ;;  %v7607_v34 = vor.u32 %v10195_v29, %v7604_v30  ;;  %s1908_s23 = scalar_lea.vmem [#allocation4], %s7664_s8  ;;  %vm1947_vm1 = vcmask (%p7528_p3), 1045508   ;;  %v12512_v48 = vld [vmem:[#allocation29] sm:$0xff] (%p7528_p3)  ;;  %s2132_s20 = sshll.u32 (%p7528_p3), %s12181_s12, 4  ;;  %v1918_v49 = vperm.slane (%p7528_p3), %v12510_v47, 0  ;;  %v1919_v50 = vperm.slane (%p7528_p3), %v12510_v47, 1  ;;  %s12526_s20 = int_to_ptr.hbm [resolvable:$true] %s2132_s20 }
 0x663   : > { %1853 = vmatpush.bf16.msra.mxu0 %v7555_v9  ;;  %v1920_v51 = vperm.slane (%p7528_p3), %v12510_v47, 2  ;;  %v1921_v52 = vperm.slane (%p7528_p3), %v12510_v47, 3  ;;  %v12519_v53 = vld [vmem:[#allocation30] sm:$0xff] (%p7528_p3)  ;;  %v1971_v54 = vperm.slane (%p7528_p3), %v12512_v48, 0  ;;  %v1974_v55 = vperm.slane (%p7528_p3), %v12512_v48, 3  ;;  %s11996_s13 = smov (%p7528_p3), [#allocation7]  }
 0x664   : > { %1866 = vmatpush.bf16.msra.mxu1 %v7619_v4  ;;  %v1934_v56 = vrot.slane (%p7528_p3), %v1919_v50, 6  ;;  %v2023_v59 = vperm.slane (%p7528_p3), %v12519_v53, 0  ;;  %v2024_v12 = vperm.slane (%p7528_p3), %v12519_v53, 1  ;;  %s2134_s19 = sshll.u32 (%p7528_p3), %s11996_s13, 4  ;;  %v2025_v3 = vperm.slane (%p7528_p3), %v12519_v53, 2  ;;  %s11783_s0 = sshra.s32 (%p7528_p3), %s12526_s20, 4  ;;  %s2135_s19 = int_to_ptr.vmem [resolvable:$true] %s2134_s19  ;;  %s11784_s0 = int_to_ptr.hbm [resolvable:$true] %s11783_s0 }
 0x665   : > { %1879 = vmatpush.bf16.msra.mxu2 %v7559_v5  ;;  %v1935_v57 = vrot.slane (%p7528_p3), %v1920_v51, 4  ;;  %v1936_v58 = vrot.slane (%p7528_p3), %v1921_v52, 2  ;;  %v1989_v11 = vrot.slane (%p7528_p3), %v1974_v55, 2  ;;  %v2026_v8 = vperm.slane (%p7528_p3), %v12519_v53, 3  ;;  %s11785_s3 = scalar_lea.hbm (%p7528_p3), %s11784_s0, 2048  ;;  %s11787_s1 = scalar_lea.hbm (%p7528_p3), %s12181_s12, 8192 }
 0x666   : > { %1892 = vmatpush.bf16.msra.mxu3 %v7623_v15  ;;  %v1946_v1 = vsel (%p7528_p3), %vm654_vm4, %v1918_v49, %v1934_v56  ;;  %v2039_v6 = vrot.slane (%p7528_p3), %v2024_v12, 6  ;;  %p11788_p5 = scmp.lt.s32.totalorder (%p7528_p3), %s11784_s0, %s12181_s12  ;;  %p11789_p8 = scmp.lt.s32.totalorder (%p7528_p3), %s11787_s1, %s11785_s3 }
 0x667   : > { %1854 = vmatpush.bf16.msra.mxu0 %v7547_v13  ;;  %v1948_v2 = vsel (%p7528_p3), %vm1947_vm1, %v1935_v57, %v1936_v58 }
 0x668   : > { %1867 = vmatpush.bf16.msra.mxu1 %v7611_v21  ;;  %v1949_v9 = vsel (%p7528_p3), %vm621_vm0, %v1946_v1, %v1948_v2  ;;  %p11790_p9 = por (%p7528_p3), %p11789_p8, %p11788_p5 }
 0x669   : > { %1880 = vmatpush.bf16.msra.mxu2 %v7551_v14 }
 0x66a   : > { %1893 = vmatpush.bf16.msra.mxu3 %v7615_v25 }
 0x66b   : > { %1855 = vmatpush.bf16.msra.mxu0 %v7539_v31 }
 0x66c   : > { %1868 = vmatpush.bf16.msra.mxu1 %v7603_v32 }
 0x66d   : > { %1881 = vmatpush.bf16.msra.mxu2 %v7543_v33 }
 0x66e   : > { %1894 = vmatpush.bf16.msra.mxu3 %v7607_v34  ;;  %1856 = vmatmul.bf16.vlgmr.msra.gmra.mxu0 %v12380_v63 }
 0x66f   : > { %1869 = vmatmul.bf16.vlgmr.msra.gmra.mxu1 %v12382_v0 }
 0x670   : > { %1882 = vmatmul.bf16.vlgmr.msra.gmra.mxu2 %v12380_v63  ;;  %v1972_v63 = vperm.slane (%p7528_p3), %v12512_v48, 1 }
 0x671   : > { %1895 = vmatmul.bf16.vlgmr.msra.gmra.mxu3 %v12382_v0  ;;  %v1973_v0 = vperm.slane (%p7528_p3), %v12512_v48, 2 }
 0x672   :  { %v1987_v61 = vrot.slane (%p7528_p3), %v1972_v63, 6 }
 0x673   :  { %v1988_v62 = vrot.slane (%p7528_p3), %v1973_v0, 4 }
 0x674   :  { %v1999_v4 = vsel (%p7528_p3), %vm654_vm4, %v1971_v54, %v1987_v61 }
 0x675   :  { %v2000_v5 = vsel (%p7528_p3), %vm1947_vm1, %v1988_v62, %v1989_v11 }
 0x6eb   : > { %v1857_v35 = vpop.f32.mrf.mxu0 }
 0x6ec   : > { %v1870_v36 = vpop.f32.mrf.mxu1 }
 0x6ed   : > { %v1871_v42 = vadd.f32 %v1870_v36, %v1857_v35 }
 0x6f3   : > { %v1883_v37 = vpop.f32.mrf.mxu2  ;;  %v1859_v39 = vpop.f32.mrf.mxu0 }
 0x6f4   : > { %v1896_v38 = vpop.f32.mrf.mxu3  ;;  %v1872_v41 = vpop.f32.mrf.mxu1 }
 0x6f5   : > { %v1897_v40 = vadd.f32 %v1896_v38, %v1883_v37 }
 0x6f7   : > { %v1902_v43 = vrot.slane %v1897_v40, 6 }
 0x6f8   :  { %1612 = sbr.rel (!%p7528_p3) target bundleno = 1573 (0x625), region = 348  ;;  %p11786_p3 = scmp.ne.s32.totalorder (%p7528_p3), %s11784_s0, %s11785_s3 }
 0x6f9   : > { %v1903_v44 = vsel %vm654_vm4, %v1871_v42, %v1902_v43 }
 0x6fa   : > { %1909 = vst [vmem:[%s1908_s23] sm:$0xf] %v1903_v44 }
 0x6fb   : > { %v1885_v45 = vpop.f32.mrf.mxu2 }
 0x6fc   : > { %v1898_v46 = vpop.f32.mrf.mxu3 }
 0x6fd   :  { %p11791_p10 = pnand %p11790_p9, %p11786_p3 }
 0x701   :  { %v1910_v60 = vld [vmem:[#allocation4] sm:$0xff] }
 0x702   :  { %11794 = shalt.err (!%p11791_p10)  }
 0x703   :  { %s11997_s17 = smov 512   ;;  %v1963_v7 = vadd.f32 %v1949_v9, %v1910_v60  ;;  %v2001_v10 = vsel %vm621_vm0, %v1999_v4, %v2000_v5  ;;  %v2040_v15 = vrot.slane %v2025_v3, 4  ;;  %v2041_v16 = vrot.slane %v2026_v8, 2  ;;  %v1911_v31 = vld [vmem:[#allocation4 + $0x8] sm:$0xff]  ;;  %v12568_v49 = vld [vmem:[#allocation29 + $0x8] sm:$0xff]  ;;  %v1912_v2 = vld [vmem:[#allocation4 + $0x10] sm:$0xff] }
 0x704   :  { %2139 = dma.hbm_to_vmem [thread:$0]  %s12526_s20, 32768, %s2135_s19, [#allocation8], %s11997_s17, %s11959_s28, %s11960_s9  ;;  %v2051_v17 = vsel %vm654_vm4, %v2023_v59, %v2039_v6  ;;  %v1922_v18 = vperm.slane %v12510_v47, 4  ;;  %v1923_v19 = vperm.slane %v12510_v47, 5  ;;  %v1924_v20 = vperm.slane %v12510_v47, 6  ;;  %v12560_v40 = vld [vmem:[#allocation27 + $0x8] sm:$0xff] }
 0x705   :  { %v2015_v13 = vmul.f32 %v2001_v10, %v1963_v7  ;;  %v2052_v21 = vsel %vm1947_vm1, %v2040_v15, %v2041_v16  ;;  %v1925_v14 = vperm.slane %v12510_v47, 7  ;;  %v1975_v22 = vperm.slane %v12512_v48, 4  ;;  %v12578_v60 = vld [vmem:[#allocation30 + $0x8] sm:$0xff]  ;;  %s12649_s28 = smov 0  }
 0x706   :  { %v2053_v23 = vsel %vm621_vm0, %v2051_v17, %v2052_v21  ;;  %v1937_v24 = vrot.slane %v1923_v19, 6  ;;  %v1938_v25 = vrot.slane %v1924_v20, 4  ;;  %v1976_v26 = vperm.slane %v12512_v48, 5 }
 0x707   :  { %v2067_v27 = vadd.f32 %v2053_v23, %v2015_v13  ;;  %v1939_v28 = vrot.slane %v1925_v14, 2  ;;  %v1977_v29 = vperm.slane %v12512_v48, 6  ;;  %v1978_v30 = vperm.slane %v12512_v48, 7 }
 0x708   :  { %v1950_v32 = vsel %vm654_vm4, %v1922_v18, %v1937_v24  ;;  %v1990_v33 = vrot.slane %v1976_v26, 6  ;;  %v2027_v34 = vperm.slane %v12519_v53, 4  ;;  %v2028_v35 = vperm.slane %v12519_v53, 5 }
 0x709   :  { %v2071_v36 = vmax.f32 %v2067_v27, 0.0  ;;  %v1951_v37 = vsel %vm1947_vm1, %v1938_v25, %v1939_v28  ;;  %v1991_v38 = vrot.slane %v1977_v29, 4  ;;  %v1992_v39 = vrot.slane %v1978_v30, 2 }
 0x70a   :  { %v1952_v41 = vsel %vm621_vm0, %v1950_v32, %v1951_v37  ;;  %v2002_v42 = vsel %vm654_vm4, %v1975_v22, %v1990_v33  ;;  %v2029_v43 = vperm.slane %v12519_v53, 6  ;;  %v2030_v44 = vperm.slane %v12519_v53, 7 }
 0x70b   :  { %2079 = vst [vmem:[#allocation1] ss:$4 sm:$0xff] %v2071_v36  ;;  %v1964_v45 = vadd.f32 %v1952_v41, %v1911_v31  ;;  %v2003_v46 = vsel %vm1947_vm1, %v1991_v38, %v1992_v39  ;;  %v2042_v47 = vrot.slane %v2028_v35, 6  ;;  %v1926_v48 = vperm.slane %v12560_v40, 0 }
 0x70c   :  { %v2004_v50 = vsel %vm621_vm0, %v2002_v42, %v2003_v46  ;;  %v2043_v51 = vrot.slane %v2029_v43, 4  ;;  %v2044_v52 = vrot.slane %v2030_v44, 2  ;;  %v1927_v54 = vperm.slane %v12560_v40, 1 }
 0x70d   :  { %v2016_v63 = vmul.f32 %v2004_v50, %v1964_v45  ;;  %v2054_v0 = vsel %vm654_vm4, %v2027_v34, %v2042_v47  ;;  %v1928_v53 = vperm.slane %v12560_v40, 2  ;;  %v1929_v55 = vperm.slane %v12560_v40, 3  ;;  %v1913_v50 = vld [vmem:[#allocation4 + $0x18] sm:$0xff] }
 0x70e   :  { %v2055_v56 = vsel %vm1947_vm1, %v2043_v51, %v2044_v52  ;;  %v1940_v57 = vrot.slane %v1927_v54, 6  ;;  %v1979_v58 = vperm.slane %v12568_v49, 0  ;;  %v1980_v59 = vperm.slane %v12568_v49, 1 }
 0x70f   :  { %v2056_v61 = vsel %vm621_vm0, %v2054_v0, %v2055_v56  ;;  %v1941_v62 = vrot.slane %v1928_v53, 4  ;;  %v1942_v11 = vrot.slane %v1929_v55, 2  ;;  %v1981_v12 = vperm.slane %v12568_v49, 2 }
 0x710   :  { %v2068_v1 = vadd.f32 %v2056_v61, %v2016_v63  ;;  %v1953_v3 = vsel %vm654_vm4, %v1926_v48, %v1940_v57  ;;  %v1982_v8 = vperm.slane %v12568_v49, 3  ;;  %v1993_v9 = vrot.slane %v1980_v59, 6 }
 0x711   :  { %v1954_v4 = vsel %vm1947_vm1, %v1941_v62, %v1942_v11  ;;  %v1994_v5 = vrot.slane %v1981_v12, 4  ;;  %v2031_v6 = vperm.slane %v12578_v60, 0  ;;  %v2032_v7 = vperm.slane %v12578_v60, 1 }
 0x712   :  { %v2072_v10 = vmax.f32 %v2068_v1, 0.0  ;;  %v1955_v15 = vsel %vm621_vm0, %v1953_v3, %v1954_v4  ;;  %v1995_v16 = vrot.slane %v1982_v8, 2  ;;  %v2005_v17 = vsel %vm654_vm4, %v1979_v58, %v1993_v9  ;;  %v2082_v18 = vld.sshfl [vmem:[#allocation1] sm:$0xff pattern:$0x73625140] }
 0x713   :  { %v1965_v19 = vadd.f32 %v1955_v15, %v1912_v2  ;;  %v2033_v20 = vperm.slane %v12578_v60, 2  ;;  %v2034_v13 = vperm.slane %v12578_v60, 3  ;;  %v2045_v21 = vrot.slane %v2032_v7, 6  ;;  %v2083_v14 = vld.sshfl [vmem:[#allocation1 + $0x8] sm:$0xff pattern:$0x73625140] }
 0x714   :  { %2081 = vst [vmem:[#allocation1 + $0x20] ss:$4 sm:$0xff] %v2072_v10  ;;  %v2006_v22 = vsel %vm1947_vm1, %v1994_v5, %v1995_v16  ;;  %v2084_v23 = vld.sshfl [vmem:[#allocation1 + $0x10] sm:$0xff pattern:$0x73625140]  ;;  %v12592_v24 = vpack.c.bf16 %v2082_v18, %v2082_v18  ;;  %v12594_v25 = vpack.c.bf16 %v2083_v14, %v2083_v14  ;;  %v1930_v26 = vperm.slane %v12560_v40, 4 }
 0x715   :  { %v2007_v27 = vsel %vm621_vm0, %v2005_v17, %v2006_v22  ;;  %v2046_v28 = vrot.slane %v2033_v20, 4  ;;  %v2047_v29 = vrot.slane %v2034_v13, 2  ;;  %v2057_v30 = vsel %vm654_vm4, %v2031_v6, %v2045_v21  ;;  %v2085_v31 = vld.sshfl [vmem:[#allocation1 + $0x18] sm:$0xff pattern:$0x73625140] }
 0x716   :  { %v2017_v32 = vmul.f32 %v2007_v27, %v1965_v19  ;;  %v12599_v33 = vpack.c.bf16 %v2084_v23, %v2084_v23  ;;  %v12601_v34 = vpack.c.bf16 %v2085_v31, %v2085_v31  ;;  %v1931_v35 = vperm.slane %v12560_v40, 5 }
 0x717   :  { %v2058_v36 = vsel %vm1947_vm1, %v2046_v28, %v2047_v29  ;;  %v1932_v37 = vperm.slane %v12560_v40, 6  ;;  %v1933_v38 = vperm.slane %v12560_v40, 7  ;;  %v1983_v39 = vperm.slane %v12568_v49, 4 }
 0x718   :  { %v2059_v41 = vsel %vm621_vm0, %v2057_v30, %v2058_v36  ;;  %v1943_v42 = vrot.slane %v1931_v35, 6  ;;  %v1984_v43 = vperm.slane %v12568_v49, 5  ;;  %v1985_v44 = vperm.slane %v12568_v49, 6 }
 0x719   :  { %v2069_v45 = vadd.f32 %v2059_v41, %v2017_v32  ;;  %v1944_v46 = vrot.slane %v1932_v37, 4  ;;  %v1945_v47 = vrot.slane %v1933_v38, 2  ;;  %v1986_v48 = vperm.slane %v12568_v49, 7 }
 0x71a   :  { %v1956_v51 = vsel %vm654_vm4, %v1930_v26, %v1943_v42  ;;  %v1996_v52 = vrot.slane %v1984_v43, 6  ;;  %v1997_v54 = vrot.slane %v1985_v44, 4  ;;  %v2035_v40 = vperm.slane %v12578_v60, 4 }
 0x71b   :  { %v2073_v63 = vmax.f32 %v2069_v45, 0.0  ;;  %v1957_v0 = vsel %vm1947_vm1, %v1944_v46, %v1945_v47  ;;  %v1998_v53 = vrot.slane %v1986_v48, 2  ;;  %v2036_v55 = vperm.slane %v12578_v60, 5  ;;  %v2086_v56 = vld.sshfl [vmem:[#allocation1 + $0x20] sm:$0xff pattern:$0x73625140] }
 0x71c   :  { %v1958_v57 = vsel %vm621_vm0, %v1956_v51, %v1957_v0  ;;  %v2008_v58 = vsel %vm654_vm4, %v1983_v39, %v1996_v52  ;;  %v2037_v49 = vperm.slane %v12578_v60, 6  ;;  %v2038_v59 = vperm.slane %v12578_v60, 7  ;;  %v2087_v61 = vld.sshfl [vmem:[#allocation1 + $0x28] sm:$0xff pattern:$0x73625140] }
 0x71d   :  { %2090 = vst [vmem:[#allocation1] ss:$4 sm:$0xff] %v2073_v63  ;;  %v1966_v62 = vadd.f32 %v1958_v57, %v1913_v50  ;;  %v2009_v11 = vsel %vm1947_vm1, %v1997_v54, %v1998_v53  ;;  %v2048_v12 = vrot.slane %v2036_v55, 6  ;;  %v2088_v1 = vld.sshfl [vmem:[#allocation1 + $0x30] sm:$0xff pattern:$0x73625140]  ;;  %v12621_v2 = vpack.c.bf16 %v2086_v56, %v2086_v56 }
 0x71e   :  { %v2010_v3 = vsel %vm621_vm0, %v2008_v58, %v2009_v11  ;;  %v2049_v8 = vrot.slane %v2037_v49, 4  ;;  %v2050_v9 = vrot.slane %v2038_v59, 2  ;;  %v2089_v4 = vld.sshfl [vmem:[#allocation1 + $0x38] sm:$0xff pattern:$0x73625140]  ;;  %v12624_v5 = vpack.c.bf16 %v2087_v61, %v2087_v61 }
 0x71f   :  { %v2018_v6 = vmul.f32 %v2010_v3, %v1966_v62  ;;  %v2060_v7 = vsel %vm654_vm4, %v2035_v40, %v2048_v12  ;;  %v12627_v60 = vpack.c.bf16 %v2088_v1, %v2088_v1  ;;  %v12629_v10 = vpack.c.bf16 %v2089_v4, %v2089_v4 }
 0x720   :  { %v2061_v15 = vsel %vm1947_vm1, %v2049_v8, %v2050_v9 }
 0x721   :  { %v2062_v16 = vsel %vm621_vm0, %v2060_v7, %v2061_v15 }
 0x722   :  { %v2070_v17 = vadd.f32 %v2062_v16, %v2018_v6 }
 0x724   :  { %v2092_v18 = vld.sshfl [vmem:[#allocation1] sm:$0xff pattern:$0x73625140]  ;;  %v2093_v19 = vld.sshfl [vmem:[#allocation1 + $0x8] sm:$0xff pattern:$0x73625140] }
 0x725   :  { %v2094_v20 = vld.sshfl [vmem:[#allocation1 + $0x10] sm:$0xff pattern:$0x73625140]  ;;  %v2095_v13 = vld.sshfl [vmem:[#allocation1 + $0x18] sm:$0xff pattern:$0x73625140]  ;;  %v12633_v21 = vpack.c.bf16 %v2092_v18, %v2092_v18  ;;  %v12635_v14 = vpack.c.bf16 %v2093_v19, %v2093_v19 }
 0x726   :  { %v12637_v22 = vpack.c.bf16 %v2094_v20, %v2094_v20  ;;  %v12639_v23 = vpack.c.bf16 %v2095_v13, %v2095_v13  ;;  %v2074_v26 = vmax.f32 %v2070_v17, 0.0 }
 0x728   :  { %2091 = vst [vmem:[#allocation1 + $0x20] ss:$4 sm:$0xff] %v2074_v26 }
 0x72f   :  { %v2096_v27 = vld.sshfl [vmem:[#allocation1 + $0x20] sm:$0xff pattern:$0x73625140]  ;;  %v2097_v28 = vld.sshfl [vmem:[#allocation1 + $0x28] sm:$0xff pattern:$0x73625140] }
 0x730   :  { %v2098_v29 = vld.sshfl [vmem:[#allocation1 + $0x30] sm:$0xff pattern:$0x73625140]  ;;  %v2099_v30 = vld.sshfl [vmem:[#allocation1 + $0x38] sm:$0xff pattern:$0x73625140]  ;;  %v12641_v31 = vpack.c.bf16 %v2096_v27, %v2096_v27  ;;  %v12643_v32 = vpack.c.bf16 %v2097_v28, %v2097_v28 }
 0x731   :  { %v12645_v35 = vpack.c.bf16 %v2098_v29, %v2098_v29  ;;  %v12647_v36 = vpack.c.bf16 %v2099_v30, %v2099_v30 }
 0x732 LB: > { %p2146_p11 = scmp.lt.s32.totalorder %s11915_s28, 0  ;;  %s2147_s9 = ssub.s32 0, %s11915_s28  ;;  %s11915_s28 = sphi %s12649_s28, %s13527_s28  }
 0x733   : > { %s7665_s6 = smin.u32 %s11915_s28, %s2147_s9  ;;  %s12658_s29 = sadd.s32 1, %s11915_s28  }
 0x734   : > { %s2149_s10 = sand.u32 1, %s7665_s6   ;;  %p7668_p12 = scmp.ge.s32.totalorder %s12658_s29, 4 }
 0x735   : > { %s2150_s16 = ssub.s32 0, %s2149_s10  ;;  %s10211_s26 = sshll.u32 %s11915_s28, 8 }
 0x736   : > { %s13533_s16 = smov (!%p2146_p11, %s2150_s16), %s2149_s10  ;;  %p10820_p0 = scmp.lt.s32.totalorder %s12658_s29, 4 }
 0x737   : > { %p7667_p13 = scmp.lt.s32.totalorder %s13533_s16, 0  ;;  %s2156_s14 = sadd.s32 2, %s13533_s16 }
 0x738   : > { %s10212_s30 = sadd.s32 256, %s10211_s26 }
 0x739   : > { %s13535_s14 = smov (!%p7667_p13, %s2156_s14), %s13533_s16  ;;  %s2165_s2 = sshra.s32 %s10212_s30, 7 }
 0x73a   : > { %s2163_s27 = ssub.s32 1, %s13535_s14  ;;  %s7670_s7 = sshll.u32 %s2165_s2, 2 }
 0x73b   : > { %s2168_s15 = scalar_lea.hbm %s12181_s12, %s7670_s7  ;;  %s10213_s21 = sshll.u32 %s2163_s27, 11 }
 0x73c   : > { %s12669_s18 = sshll.u32 %s2168_s15, 4  ;;  %s2171_s22 = scalar_lea.vmem [#allocation7], %s10213_s21  ;;  %s2174_s18 = int_to_ptr.hbm [resolvable:$true] %s12669_s18 }
 0x73d   : > { %s12671_s4 = sshll.u32 %s2171_s22, 4  ;;  %s12675_s24 = scalar_lea.sflag [#allocation8], %s2163_s27  ;;  %s2176_s4 = int_to_ptr.vmem [resolvable:$true] %s12671_s4 }
 0x73e   : > { %s11807_s11 = sshra.s32 %s2174_s18, 4  ;;  %s11808_s11 = int_to_ptr.hbm [resolvable:$true] %s11807_s11 }
 0x73f   : > { %s11809_s25 = scalar_lea.hbm %s11808_s11, 2048  ;;  %p11814_p6 = scmp.lt.s32.totalorder %s11808_s11, %s12181_s12 }
 0x740   : > { %p11810_p1 = scmp.ne.s32.totalorder %s11808_s11, %s11809_s25  ;;  %p11815_p7 = scmp.lt.s32.totalorder %s11787_s1, %s11809_s25 }
 0x742   : > { %p11811_p2 = pnand %p11810_p1, %p10820_p0  ;;  %p11816_p3 = por %p11815_p7, %p11814_p6 }
 0x744   : > { %p11812_p4 = pneg %p11811_p2 }
 0x746   : > { %p11817_p5 = pnand %p11816_p3, %p11812_p4 }
 0x748   : > { %11820 = shalt.err (!%p11817_p5)  }
 0x749   : > { %s11821_s8 = sshra.s32 %s2176_s4, 4  ;;  %s11998_s20 = smov [#allocation7]   ;;  %s11822_s8 = int_to_ptr.vmem [resolvable:$true] %s11821_s8 }
 0x74a   : > { %s11823_s23 = scalar_lea.vmem %s11822_s8, 2048  ;;  %s11827_s13 = scalar_lea.vmem %s11998_s20, 4096 }
 0x74b   : > { %p11824_p8 = scmp.ne.s32.totalorder %s11822_s8, %s11823_s23  ;;  %p11828_p11 = scmp.lt.s32.totalorder %s11822_s8, [#allocation7] }
 0x74c   : > { %p11829_p13 = scmp.lt.s32.totalorder %s11827_s13, %s11823_s23 }
 0x74d   : > { %p11825_p9 = pnand %p11824_p8, %p10820_p0 }
 0x74e   : > { %p11830_p1 = por %p11829_p13, %p11828_p11 }
 0x74f   : > { %p11826_p10 = pneg %p11825_p9 }
 0x751   : > { %p11831_p2 = pnand %p11830_p1, %p11826_p10 }
 0x753   : > { %11834 = shalt.err (!%p11831_p2)  }
 0x754   : > { %s11999_s19 = smov 512   ;;  %s12000_s0 = smov 128  }
 0x755   : > { %s12001_s3 = smov 8   ;;  %s10214_s17 = sshll.u32 %s13535_s14, 11 }
 0x756   : > { %10818 = dma.hbm_to_vmem [thread:$0]  (%p10820_p0), %s2174_s18, 32768, %s2176_s4, %s12675_s24, %s11999_s19, %s12000_s0, %s12001_s3 }
 0x757   : > { %s12696_s9 = scalar_lea.vmem [#allocation7], %s10214_s17  ;;  %s2185_s6 = scalar_lea.sflag [#allocation8], %s13535_s14 }
 0x758   : > { %11905 = dma.done.wait %s2185_s6, 32768 }
 0x759   : > { %11906 = vsyncadd %s2185_s6, 4294934528  ;;  %v7734_v37 = vld [vmem:[%s12696_s9 + $0x70] sm:$0xf]  ;;  %v10230_v38 = vld [vmem:[%s12696_s9 + $0x74] sm:$0xf0]  ;;  %s4147_s10 = sshra.s32 %s10211_s26, 7  ;;  %s13527_s28 = smov %s12658_s29 }
 0x75a   : > { %v7798_v39 = vld [vmem:[%s12696_s9 + $0xf0] sm:$0xf]  ;;  %v7735_v41 = vor.u32 %v10230_v38, %v7734_v37  ;;  %v10246_v42 = vld [vmem:[%s12696_s9 + $0xf4] sm:$0xf0]  ;;  %v7726_v50 = vld [vmem:[%s12696_s9 + $0x60] sm:$0xf] }
 0x75b   : > { %v7862_v43 = vld [vmem:[%s12696_s9 + $0x170] sm:$0xf]  ;;  %v10262_v44 = vld [vmem:[%s12696_s9 + $0x174] sm:$0xf0]  ;;  %v7799_v45 = vor.u32 %v10246_v42, %v7798_v39  ;;  %v10228_v52 = vld [vmem:[%s12696_s9 + $0x64] sm:$0xf0] }
 0x75c   : > { %v7863_v46 = vor.u32 %v10262_v44, %v7862_v43  ;;  %v7926_v47 = vld [vmem:[%s12696_s9 + $0x1f0] sm:$0xf]  ;;  %v10278_v48 = vld [vmem:[%s12696_s9 + $0x1f4] sm:$0xf0]  ;;  %3726 = vmatpush.bf16.msra.mxu0 %v7735_v41  ;;  %v7790_v54 = vld [vmem:[%s12696_s9 + $0xe0] sm:$0xf]  ;;  %v7727_v63 = vor.u32 %v10228_v52, %v7726_v50 }
 0x75d   : > { %v7927_v51 = vor.u32 %v10278_v48, %v7926_v47  ;;  %v10244_v40 = vld [vmem:[%s12696_s9 + $0xe4] sm:$0xf0]  ;;  %3739 = vmatpush.bf16.msra.mxu1 %v7799_v45  ;;  %v7854_v53 = vld [vmem:[%s12696_s9 + $0x160] sm:$0xf]  ;;  %v7718_v49 = vld [vmem:[%s12696_s9 + $0x50] sm:$0xf] }
 0x75e   : > { %3752 = vmatpush.bf16.msra.mxu2 %v7863_v46  ;;  %v7791_v0 = vor.u32 %v10244_v40, %v7790_v54  ;;  %v10260_v55 = vld [vmem:[%s12696_s9 + $0x164] sm:$0xf0]  ;;  %v7918_v56 = vld [vmem:[%s12696_s9 + $0x1e0] sm:$0xf]  ;;  %v10226_v59 = vld [vmem:[%s12696_s9 + $0x54] sm:$0xf0] }
 0x75f   : > { %3765 = vmatpush.bf16.msra.mxu3 %v7927_v51  ;;  %v7855_v57 = vor.u32 %v10260_v55, %v7854_v53  ;;  %v10276_v58 = vld [vmem:[%s12696_s9 + $0x1e4] sm:$0xf0]  ;;  %v7782_v62 = vld [vmem:[%s12696_s9 + $0xd0] sm:$0xf]  ;;  %v10242_v11 = vld [vmem:[%s12696_s9 + $0xd4] sm:$0xf0]  ;;  %v7719_v1 = vor.u32 %v10226_v59, %v7718_v49 }
 0x760   : > { %v7919_v61 = vor.u32 %v10276_v58, %v7918_v56  ;;  %v7846_v12 = vld [vmem:[%s12696_s9 + $0x150] sm:$0xf]  ;;  %3727 = vmatpush.bf16.msra.mxu0 %v7727_v63  ;;  %v10258_v3 = vld [vmem:[%s12696_s9 + $0x154] sm:$0xf0]  ;;  %v7783_v4 = vor.u32 %v10242_v11, %v7782_v62  ;;  %v7710_v7 = vld [vmem:[%s12696_s9 + $0x40] sm:$0xf] }
 0x761   : > { %v7910_v8 = vld [vmem:[%s12696_s9 + $0x1d0] sm:$0xf]  ;;  %v10274_v9 = vld [vmem:[%s12696_s9 + $0x1d4] sm:$0xf0]  ;;  %3740 = vmatpush.bf16.msra.mxu1 %v7791_v0  ;;  %v7847_v6 = vor.u32 %v10258_v3, %v7846_v12  ;;  %v10224_v15 = vld [vmem:[%s12696_s9 + $0x44] sm:$0xf0] }
 0x762   : > { %3753 = vmatpush.bf16.msra.mxu2 %v7855_v57  ;;  %v7774_v16 = vld [vmem:[%s12696_s9 + $0xc0] sm:$0xf]  ;;  %v7911_v17 = vor.u32 %v10274_v9, %v7910_v8  ;;  %v10240_v18 = vld [vmem:[%s12696_s9 + $0xc4] sm:$0xf0]  ;;  %v7711_v27 = vor.u32 %v10224_v15, %v7710_v7  ;;  %v7702_v30 = vld [vmem:[%s12696_s9 + $0x30] sm:$0xf] }
 0x763   : > { %3766 = vmatpush.bf16.msra.mxu3 %v7919_v61  ;;  %v7838_v19 = vld [vmem:[%s12696_s9 + $0x140] sm:$0xf]  ;;  %v10256_v20 = vld [vmem:[%s12696_s9 + $0x144] sm:$0xf0]  ;;  %v7775_v28 = vor.u32 %v10240_v18, %v7774_v16  ;;  %v10222_v37 = vld [vmem:[%s12696_s9 + $0x34] sm:$0xf0] }
 0x764   : > { %v7902_v13 = vld [vmem:[%s12696_s9 + $0x1c0] sm:$0xf]  ;;  %v10272_v26 = vld [vmem:[%s12696_s9 + $0x1c4] sm:$0xf0]  ;;  %3728 = vmatpush.bf16.msra.mxu0 %v7719_v1  ;;  %v7839_v29 = vor.u32 %v10256_v20, %v7838_v19  ;;  %v7766_v38 = vld [vmem:[%s12696_s9 + $0xb0] sm:$0xf]  ;;  %v7703_v46 = vor.u32 %v10222_v37, %v7702_v30 }
 0x765   : > { %3741 = vmatpush.bf16.msra.mxu1 %v7783_v4  ;;  %v7903_v39 = vor.u32 %v10272_v26, %v7902_v13  ;;  %v10238_v41 = vld [vmem:[%s12696_s9 + $0xb4] sm:$0xf0]  ;;  %v7830_v42 = vld [vmem:[%s12696_s9 + $0x130] sm:$0xf]  ;;  %v7694_v50 = vld [vmem:[%s12696_s9 + $0x20] sm:$0xf] }
 0x766   : > { %3754 = vmatpush.bf16.msra.mxu2 %v7847_v6  ;;  %v10254_v43 = vld [vmem:[%s12696_s9 + $0x134] sm:$0xf0]  ;;  %v7894_v44 = vld [vmem:[%s12696_s9 + $0x1b0] sm:$0xf]  ;;  %v7767_v47 = vor.u32 %v10238_v41, %v7766_v38  ;;  %v10220_v51 = vld [vmem:[%s12696_s9 + $0x24] sm:$0xf0] }
 0x767   : > { %3767 = vmatpush.bf16.msra.mxu3 %v7911_v17  ;;  %v10270_v45 = vld [vmem:[%s12696_s9 + $0x1b4] sm:$0xf0]  ;;  %v7831_v48 = vor.u32 %v10254_v43, %v7830_v42  ;;  %v7758_v52 = vld [vmem:[%s12696_s9 + $0xa0] sm:$0xf]  ;;  %v10236_v40 = vld [vmem:[%s12696_s9 + $0xa4] sm:$0xf0]  ;;  %v7695_v56 = vor.u32 %v10220_v51, %v7694_v50 }
 0x768   : > { %3729 = vmatpush.bf16.msra.mxu0 %v7711_v27  ;;  %v7895_v54 = vor.u32 %v10270_v45, %v7894_v44  ;;  %v7822_v63 = vld [vmem:[%s12696_s9 + $0x120] sm:$0xf]  ;;  %v10252_v0 = vld [vmem:[%s12696_s9 + $0x124] sm:$0xf0]  ;;  %v7759_v57 = vor.u32 %v10236_v40, %v7758_v52  ;;  %v7686_v49 = vld [vmem:[%s12696_s9 + $0x10] sm:$0xf] }
 0x769   : > { %3742 = vmatpush.bf16.msra.mxu1 %v7775_v28  ;;  %v7886_v53 = vld [vmem:[%s12696_s9 + $0x1a0] sm:$0xf]  ;;  %v10268_v55 = vld [vmem:[%s12696_s9 + $0x1a4] sm:$0xf0]  ;;  %v7823_v58 = vor.u32 %v10252_v0, %v7822_v63  ;;  %v10218_v59 = vld [vmem:[%s12696_s9 + $0x14] sm:$0xf0] }
 0x76a   : > { %3755 = vmatpush.bf16.msra.mxu2 %v7839_v29  ;;  %v7750_v61 = vld [vmem:[%s12696_s9 + $0x90] sm:$0xf]  ;;  %v7887_v62 = vor.u32 %v10268_v55, %v7886_v53  ;;  %v10234_v11 = vld [vmem:[%s12696_s9 + $0x94] sm:$0xf0]  ;;  %v7687_v9 = vor.u32 %v10218_v59, %v7686_v49  ;;  %v7678_v4 = vld [vmem:[%s12696_s9] sm:$0xf] }
 0x76b   : > { %3768 = vmatpush.bf16.msra.mxu3 %v7903_v39  ;;  %v7814_v12 = vld [vmem:[%s12696_s9 + $0x110] sm:$0xf]  ;;  %v10250_v1 = vld [vmem:[%s12696_s9 + $0x114] sm:$0xf0]  ;;  %v10216_v6 = vld [vmem:[%s12696_s9 + $0x4] sm:$0xf0]  ;;  %v7751_v7 = vor.u32 %v10234_v11, %v7750_v61 }
 0x76c   : > { %3730 = vmatpush.bf16.msra.mxu0 %v7703_v46  ;;  %v7878_v3 = vld [vmem:[%s12696_s9 + $0x190] sm:$0xf]  ;;  %v10266_v8 = vld [vmem:[%s12696_s9 + $0x194] sm:$0xf0]  ;;  %v7815_v15 = vor.u32 %v10250_v1, %v7814_v12  ;;  %v7742_v16 = vld [vmem:[%s12696_s9 + $0x80] sm:$0xf]  ;;  %v7679_v30 = vor.u32 %v10216_v6, %v7678_v4 }
 0x76d   : > { %3743 = vmatpush.bf16.msra.mxu1 %v7767_v47  ;;  %v10232_v17 = vld [vmem:[%s12696_s9 + $0x84] sm:$0xf0]  ;;  %v7806_v18 = vld [vmem:[%s12696_s9 + $0x100] sm:$0xf]  ;;  %v7879_v19 = vor.u32 %v10266_v8, %v7878_v3  ;;  %v7990_v27 = vld [vmem:[%s12696_s9 + $0x270] sm:$0xf] }
 0x76e   : > { %3756 = vmatpush.bf16.msra.mxu2 %v7831_v48  ;;  %v10248_v20 = vld [vmem:[%s12696_s9 + $0x104] sm:$0xf0]  ;;  %v7870_v13 = vld [vmem:[%s12696_s9 + $0x180] sm:$0xf]  ;;  %v10294_v28 = vld [vmem:[%s12696_s9 + $0x274] sm:$0xf0]  ;;  %v7743_v41 = vor.u32 %v10232_v17, %v7742_v16 }
 0x76f   : > { %3769 = vmatpush.bf16.msra.mxu3 %v7895_v54  ;;  %v10264_v26 = vld [vmem:[%s12696_s9 + $0x184] sm:$0xf0]  ;;  %v8054_v29 = vld [vmem:[%s12696_s9 + $0x2f0] sm:$0xf]  ;;  %v10310_v37 = vld [vmem:[%s12696_s9 + $0x2f4] sm:$0xf0]  ;;  %v7807_v42 = vor.u32 %v10248_v20, %v7806_v18  ;;  %v7991_v46 = vor.u32 %v10294_v28, %v7990_v27 }
 0x770   : > { %3731 = vmatpush.bf16.msra.mxu0 %v7695_v56  ;;  %v8118_v38 = vld [vmem:[%s12696_s9 + $0x370] sm:$0xf]  ;;  %v10326_v39 = vld [vmem:[%s12696_s9 + $0x374] sm:$0xf0]  ;;  %v7871_v45 = vor.u32 %v10264_v26, %v7870_v13  ;;  %v8055_v47 = vor.u32 %v10310_v37, %v8054_v29  ;;  %v7982_v50 = vld [vmem:[%s12696_s9 + $0x260] sm:$0xf] }
 0x771   : > { %3744 = vmatpush.bf16.msra.mxu1 %v7759_v57  ;;  %v8182_v43 = vld [vmem:[%s12696_s9 + $0x3f0] sm:$0xf]  ;;  %v10342_v44 = vld [vmem:[%s12696_s9 + $0x3f4] sm:$0xf0]  ;;  %v8119_v48 = vor.u32 %v10326_v39, %v8118_v38  ;;  %v10292_v51 = vld [vmem:[%s12696_s9 + $0x264] sm:$0xf0] }
 0x772   : > { %3757 = vmatpush.bf16.msra.mxu2 %v7823_v58  ;;  %v8046_v52 = vld [vmem:[%s12696_s9 + $0x2e0] sm:$0xf]  ;;  %v8183_v54 = vor.u32 %v10342_v44, %v8182_v43  ;;  %v10308_v40 = vld [vmem:[%s12696_s9 + $0x2e4] sm:$0xf0]  ;;  %v7983_v56 = vor.u32 %v10292_v51, %v7982_v50  ;;  %v7974_v49 = vld [vmem:[%s12696_s9 + $0x250] sm:$0xf] }
 0x773   : > { %3770 = vmatpush.bf16.msra.mxu3 %v7887_v62  ;;  %v8110_v63 = vld [vmem:[%s12696_s9 + $0x360] sm:$0xf]  ;;  %v10324_v0 = vld [vmem:[%s12696_s9 + $0x364] sm:$0xf0]  ;;  %v8047_v57 = vor.u32 %v10308_v40, %v8046_v52  ;;  %v10290_v59 = vld [vmem:[%s12696_s9 + $0x254] sm:$0xf0] }
 0x774   : > { %3732 = vmatpush.bf16.msra.mxu0 %v7687_v9  ;;  %v8174_v53 = vld [vmem:[%s12696_s9 + $0x3e0] sm:$0xf]  ;;  %v10340_v55 = vld [vmem:[%s12696_s9 + $0x3e4] sm:$0xf0]  ;;  %v8111_v58 = vor.u32 %v10324_v0, %v8110_v63  ;;  %v8038_v61 = vld [vmem:[%s12696_s9 + $0x2d0] sm:$0xf]  ;;  %v7975_v9 = vor.u32 %v10290_v59, %v7974_v49 }
 0x775   : > { %3745 = vmatpush.bf16.msra.mxu1 %v7751_v7  ;;  %v8175_v62 = vor.u32 %v10340_v55, %v8174_v53  ;;  %v10306_v11 = vld [vmem:[%s12696_s9 + $0x2d4] sm:$0xf0]  ;;  %v8102_v12 = vld [vmem:[%s12696_s9 + $0x350] sm:$0xf]  ;;  %v7966_v7 = vld [vmem:[%s12696_s9 + $0x240] sm:$0xf] }
 0x776   : > { %3758 = vmatpush.bf16.msra.mxu2 %v7815_v15  ;;  %v10322_v1 = vld [vmem:[%s12696_s9 + $0x354] sm:$0xf0]  ;;  %v8166_v3 = vld [vmem:[%s12696_s9 + $0x3d0] sm:$0xf]  ;;  %v8039_v4 = vor.u32 %v10306_v11, %v8038_v61  ;;  %v10288_v15 = vld [vmem:[%s12696_s9 + $0x244] sm:$0xf0] }
 0x777   : > { %3771 = vmatpush.bf16.msra.mxu3 %v7879_v19  ;;  %v10338_v8 = vld [vmem:[%s12696_s9 + $0x3d4] sm:$0xf0]  ;;  %v8103_v6 = vor.u32 %v10322_v1, %v8102_v12  ;;  %v8030_v16 = vld [vmem:[%s12696_s9 + $0x2c0] sm:$0xf]  ;;  %v10304_v18 = vld [vmem:[%s12696_s9 + $0x2c4] sm:$0xf0]  ;;  %v7967_v27 = vor.u32 %v10288_v15, %v7966_v7 }
 0x778   : > { %3733 = vmatpush.bf16.msra.mxu0 %v7679_v30  ;;  %v8167_v17 = vor.u32 %v10338_v8, %v8166_v3  ;;  %v8094_v19 = vld [vmem:[%s12696_s9 + $0x340] sm:$0xf]  ;;  %v10320_v20 = vld [vmem:[%s12696_s9 + $0x344] sm:$0xf0]  ;;  %v8031_v28 = vor.u32 %v10304_v18, %v8030_v16  ;;  %v7958_v30 = vld [vmem:[%s12696_s9 + $0x230] sm:$0xf] }
 0x779   : > { %3746 = vmatpush.bf16.msra.mxu1 %v7743_v41  ;;  %v8158_v13 = vld [vmem:[%s12696_s9 + $0x3c0] sm:$0xf]  ;;  %v10336_v26 = vld [vmem:[%s12696_s9 + $0x3c4] sm:$0xf0]  ;;  %v8095_v29 = vor.u32 %v10320_v20, %v8094_v19  ;;  %v10286_v37 = vld [vmem:[%s12696_s9 + $0x234] sm:$0xf0] }
 0x77a   : > { %3759 = vmatpush.bf16.msra.mxu2 %v7807_v42  ;;  %v8022_v38 = vld [vmem:[%s12696_s9 + $0x2b0] sm:$0xf]  ;;  %v8159_v39 = vor.u32 %v10336_v26, %v8158_v13  ;;  %v10302_v41 = vld [vmem:[%s12696_s9 + $0x2b4] sm:$0xf0]  ;;  %v7950_v50 = vld [vmem:[%s12696_s9 + $0x220] sm:$0xf] }
 0x77b   : > { %3772 = vmatpush.bf16.msra.mxu3 %v7871_v45  ;;  %3734 = vmatmul.bf16.vlgmr.msra.gmra.mxu0 %v12592_v24  ;;  %v8086_v42 = vld [vmem:[%s12696_s9 + $0x330] sm:$0xf]  ;;  %v10318_v43 = vld [vmem:[%s12696_s9 + $0x334] sm:$0xf0]  ;;  %v10284_v51 = vld [vmem:[%s12696_s9 + $0x224] sm:$0xf0] }
 0x77c   : > { %3778 = vmatpush.bf16.msrb.mxu0 %v7991_v46  ;;  %3747 = vmatmul.bf16.vlgmr.msra.gmra.mxu1 %v12594_v25  ;;  %v8150_v44 = vld [vmem:[%s12696_s9 + $0x3b0] sm:$0xf]  ;;  %v10334_v45 = vld [vmem:[%s12696_s9 + $0x3b4] sm:$0xf0]  ;;  %v7959_v46 = vor.u32 %v10286_v37, %v7958_v30  ;;  %v8014_v52 = vld [vmem:[%s12696_s9 + $0x2a0] sm:$0xf] }
 0x77d   : > { %3791 = vmatpush.bf16.msrb.mxu1 %v8055_v47  ;;  %3760 = vmatmul.bf16.vlgmr.msra.gmra.mxu2 %v12599_v33  ;;  %v8023_v47 = vor.u32 %v10302_v41, %v8022_v38  ;;  %v10300_v40 = vld [vmem:[%s12696_s9 + $0x2a4] sm:$0xf0]  ;;  %v8078_v63 = vld [vmem:[%s12696_s9 + $0x320] sm:$0xf]  ;;  %v7942_v49 = vld [vmem:[%s12696_s9 + $0x210] sm:$0xf] }
 0x77e   : > { %3804 = vmatpush.bf16.msrb.mxu2 %v8119_v48  ;;  %3773 = vmatmul.bf16.vlgmr.msra.gmra.mxu3 %v12601_v34  ;;  %v8087_v48 = vor.u32 %v10318_v43, %v8086_v42  ;;  %v10316_v0 = vld [vmem:[%s12696_s9 + $0x324] sm:$0xf0]  ;;  %v8142_v53 = vld [vmem:[%s12696_s9 + $0x3a0] sm:$0xf]  ;;  %v10282_v59 = vld [vmem:[%s12696_s9 + $0x214] sm:$0xf0] }
 0x77f   : > { %3817 = vmatpush.bf16.msrb.mxu3 %v8183_v54  ;;  %v8151_v54 = vor.u32 %v10334_v45, %v8150_v44  ;;  %v10332_v55 = vld [vmem:[%s12696_s9 + $0x3a4] sm:$0xf0]  ;;  %v8006_v61 = vld [vmem:[%s12696_s9 + $0x290] sm:$0xf]  ;;  %v10298_v11 = vld [vmem:[%s12696_s9 + $0x294] sm:$0xf0] }
 0x780   : > { %3779 = vmatpush.bf16.msrb.mxu0 %v7983_v56  ;;  %v7951_v56 = vor.u32 %v10284_v51, %v7950_v50  ;;  %v8070_v12 = vld [vmem:[%s12696_s9 + $0x310] sm:$0xf]  ;;  %v10314_v1 = vld [vmem:[%s12696_s9 + $0x314] sm:$0xf0]  ;;  %v8007_v7 = vor.u32 %v10298_v11, %v8006_v61  ;;  %v7998_v16 = vld [vmem:[%s12696_s9 + $0x280] sm:$0xf] }
 0x781   : > { %3792 = vmatpush.bf16.msrb.mxu1 %v8047_v57  ;;  %v8015_v57 = vor.u32 %v10300_v40, %v8014_v52  ;;  %v8134_v3 = vld [vmem:[%s12696_s9 + $0x390] sm:$0xf]  ;;  %v10330_v8 = vld [vmem:[%s12696_s9 + $0x394] sm:$0xf0]  ;;  %v8071_v15 = vor.u32 %v10314_v1, %v8070_v12  ;;  %v8062_v18 = vld [vmem:[%s12696_s9 + $0x300] sm:$0xf] }
 0x782   : > { %3805 = vmatpush.bf16.msrb.mxu2 %v8111_v58  ;;  %v8079_v58 = vor.u32 %v10316_v0, %v8078_v63  ;;  %v8135_v19 = vor.u32 %v10330_v8, %v8134_v3  ;;  %v10312_v20 = vld [vmem:[%s12696_s9 + $0x304] sm:$0xf0]  ;;  %v8126_v13 = vld [vmem:[%s12696_s9 + $0x380] sm:$0xf]  ;;  %v10374_v37 = vld [vmem:[%s12696_s9 + $0x4f4] sm:$0xf0] }
 0x783   : > { %3818 = vmatpush.bf16.msrb.mxu3 %v8175_v62  ;;  %v8143_v62 = vor.u32 %v10332_v55, %v8142_v53  ;;  %v10328_v26 = vld [vmem:[%s12696_s9 + $0x384] sm:$0xf0]  ;;  %v8374_v38 = vld [vmem:[%s12696_s9 + $0x570] sm:$0xf]  ;;  %v8063_v42 = vor.u32 %v10312_v20, %v8062_v18  ;;  %v10406_v44 = vld [vmem:[%s12696_s9 + $0x5f4] sm:$0xf0] }
 0x784   : > { %3780 = vmatpush.bf16.msrb.mxu0 %v7975_v9  ;;  %v7943_v9 = vor.u32 %v10282_v59, %v7942_v49  ;;  %v8438_v43 = vld [vmem:[%s12696_s9 + $0x5f0] sm:$0xf]  ;;  %v8127_v45 = vor.u32 %v10328_v26, %v8126_v13  ;;  %v8238_v50 = vld [vmem:[%s12696_s9 + $0x460] sm:$0xf]  ;;  %v10356_v51 = vld [vmem:[%s12696_s9 + $0x464] sm:$0xf0] }
 0x785   : > { %3793 = vmatpush.bf16.msrb.mxu1 %v8039_v4  ;;  %v7934_v4 = vld [vmem:[%s12696_s9 + $0x200] sm:$0xf]  ;;  %v10372_v40 = vld [vmem:[%s12696_s9 + $0x4e4] sm:$0xf0]  ;;  %v8230_v49 = vld [vmem:[%s12696_s9 + $0x450] sm:$0xf] }
 0x786   : > { %3806 = vmatpush.bf16.msrb.mxu2 %v8103_v6  ;;  %v10280_v6 = vld [vmem:[%s12696_s9 + $0x204] sm:$0xf0]  ;;  %v8302_v52 = vld [vmem:[%s12696_s9 + $0x4e0] sm:$0xf]  ;;  %v10354_v59 = vld [vmem:[%s12696_s9 + $0x454] sm:$0xf0] }
 0x787   : > { %3819 = vmatpush.bf16.msrb.mxu3 %v8167_v17  ;;  %v10296_v17 = vld [vmem:[%s12696_s9 + $0x284] sm:$0xf0]  ;;  %v7935_v30 = vor.u32 %v10280_v6, %v7934_v4  ;;  %v8366_v63 = vld [vmem:[%s12696_s9 + $0x560] sm:$0xf]  ;;  %v8294_v61 = vld [vmem:[%s12696_s9 + $0x4d0] sm:$0xf] }
 0x788   : > { %3781 = vmatpush.bf16.msrb.mxu0 %v7967_v27  ;;  %v8246_v27 = vld [vmem:[%s12696_s9 + $0x470] sm:$0xf]  ;;  %v7999_v41 = vor.u32 %v10296_v17, %v7998_v16  ;;  %v10388_v0 = vld [vmem:[%s12696_s9 + $0x564] sm:$0xf0]  ;;  %v8430_v53 = vld [vmem:[%s12696_s9 + $0x5e0] sm:$0xf] }
 0x789   : > { %3794 = vmatpush.bf16.msrb.mxu1 %v8031_v28  ;;  %v10358_v28 = vld [vmem:[%s12696_s9 + $0x474] sm:$0xf0]  ;;  %v10404_v55 = vld [vmem:[%s12696_s9 + $0x5e4] sm:$0xf0]  ;;  %v8358_v12 = vld [vmem:[%s12696_s9 + $0x550] sm:$0xf] }
 0x78a   : > { %3807 = vmatpush.bf16.msrb.mxu2 %v8095_v29  ;;  %v8310_v29 = vld [vmem:[%s12696_s9 + $0x4f0] sm:$0xf]  ;;  %v10370_v11 = vld [vmem:[%s12696_s9 + $0x4d4] sm:$0xf0]  ;;  %v8286_v16 = vld [vmem:[%s12696_s9 + $0x4c0] sm:$0xf] }
 0x78b   : > { %3820 = vmatpush.bf16.msrb.mxu3 %v8159_v39  ;;  %v10390_v39 = vld [vmem:[%s12696_s9 + $0x574] sm:$0xf0]  ;;  %v8422_v3 = vld [vmem:[%s12696_s9 + $0x5d0] sm:$0xf]  ;;  %v8295_v4 = vor.u32 %v10370_v11, %v8294_v61  ;;  %v10368_v18 = vld [vmem:[%s12696_s9 + $0x4c4] sm:$0xf0] }
 0x78c   : > { %3782 = vmatpush.bf16.msrb.mxu0 %v7959_v46  ;;  %v8247_v46 = vor.u32 %v10358_v28, %v8246_v27  ;;  %v10386_v1 = vld [vmem:[%s12696_s9 + $0x554] sm:$0xf0]  ;;  %v10384_v20 = vld [vmem:[%s12696_s9 + $0x544] sm:$0xf0]  ;;  %v8414_v13 = vld [vmem:[%s12696_s9 + $0x5c0] sm:$0xf]  ;;  %v8287_v28 = vor.u32 %v10368_v18, %v8286_v16 }
 0x78d   : > { %3795 = vmatpush.bf16.msrb.mxu1 %v8023_v47  ;;  %v8311_v47 = vor.u32 %v10374_v37, %v8310_v29  ;;  %v10402_v8 = vld [vmem:[%s12696_s9 + $0x5d4] sm:$0xf0]  ;;  %v8359_v6 = vor.u32 %v10386_v1, %v8358_v12  ;;  %v10400_v26 = vld [vmem:[%s12696_s9 + $0x5c4] sm:$0xf0]  ;;  %v8262_v61 = vld [vmem:[%s12696_s9 + $0x490] sm:$0xf] }
 0x78e   : > { %3808 = vmatpush.bf16.msrb.mxu2 %v8087_v48  ;;  %v8375_v48 = vor.u32 %v10390_v39, %v8374_v38  ;;  %v8423_v17 = vor.u32 %v10402_v8, %v8422_v3  ;;  %v10350_v37 = vld [vmem:[%s12696_s9 + $0x434] sm:$0xf0]  ;;  %v8278_v38 = vld [vmem:[%s12696_s9 + $0x4b0] sm:$0xf]  ;;  %v8415_v39 = vor.u32 %v10400_v26, %v8414_v13  ;;  %v8254_v16 = vld [vmem:[%s12696_s9 + $0x480] sm:$0xf] }
 0x78f   : > { %3821 = vmatpush.bf16.msrb.mxu3 %v8151_v54  ;;  %v8439_v54 = vor.u32 %v10406_v44, %v8438_v43  ;;  %v10382_v43 = vld [vmem:[%s12696_s9 + $0x534] sm:$0xf0]  ;;  %v8406_v44 = vld [vmem:[%s12696_s9 + $0x5b0] sm:$0xf]  ;;  %v8318_v18 = vld [vmem:[%s12696_s9 + $0x500] sm:$0xf] }
 0x790   : > { %3783 = vmatpush.bf16.msrb.mxu0 %v7951_v56  ;;  %v8239_v56 = vor.u32 %v10356_v51, %v8238_v50  ;;  %v8206_v50 = vld [vmem:[%s12696_s9 + $0x420] sm:$0xf]  ;;  %v10348_v51 = vld [vmem:[%s12696_s9 + $0x424] sm:$0xf0]  ;;  %v10362_v11 = vld [vmem:[%s12696_s9 + $0x494] sm:$0xf0] }
 0x791   : > { %3796 = vmatpush.bf16.msrb.mxu1 %v8015_v57  ;;  %v8303_v57 = vor.u32 %v10372_v40, %v8302_v52  ;;  %v8270_v52 = vld [vmem:[%s12696_s9 + $0x4a0] sm:$0xf]  ;;  %v10364_v40 = vld [vmem:[%s12696_s9 + $0x4a4] sm:$0xf0]  ;;  %v8326_v12 = vld [vmem:[%s12696_s9 + $0x510] sm:$0xf] }
 0x792   : > { %3809 = vmatpush.bf16.msrb.mxu2 %v8079_v58  ;;  %v8367_v58 = vor.u32 %v10388_v0, %v8366_v63  ;;  %v8334_v63 = vld [vmem:[%s12696_s9 + $0x520] sm:$0xf]  ;;  %v10380_v0 = vld [vmem:[%s12696_s9 + $0x524] sm:$0xf0]  ;;  %v10378_v1 = vld [vmem:[%s12696_s9 + $0x514] sm:$0xf0] }
 0x793   : > { %3822 = vmatpush.bf16.msrb.mxu3 %v8143_v62  ;;  %v8431_v62 = vor.u32 %v10404_v55, %v8430_v53  ;;  %v8398_v53 = vld [vmem:[%s12696_s9 + $0x5a0] sm:$0xf]  ;;  %v10396_v55 = vld [vmem:[%s12696_s9 + $0x5a4] sm:$0xf0]  ;;  %v8390_v3 = vld [vmem:[%s12696_s9 + $0x590] sm:$0xf] }
 0x794   : > { %3784 = vmatpush.bf16.msrb.mxu0 %v7943_v9  ;;  %v8231_v9 = vor.u32 %v10354_v59, %v8230_v49  ;;  %v8198_v49 = vld [vmem:[%s12696_s9 + $0x410] sm:$0xf]  ;;  %v10346_v59 = vld [vmem:[%s12696_s9 + $0x414] sm:$0xf0]  ;;  %v8382_v13 = vld [vmem:[%s12696_s9 + $0x580] sm:$0xf] }
 0x795   : > { %3797 = vmatpush.bf16.msrb.mxu1 %v8007_v7  ;;  %v8222_v7 = vld [vmem:[%s12696_s9 + $0x440] sm:$0xf]  ;;  %v10394_v8 = vld [vmem:[%s12696_s9 + $0x594] sm:$0xf0]  ;;  %v10392_v26 = vld [vmem:[%s12696_s9 + $0x584] sm:$0xf0] }
 0x796   : > { %3810 = vmatpush.bf16.msrb.mxu2 %v8071_v15  ;;  %v10352_v15 = vld [vmem:[%s12696_s9 + $0x444] sm:$0xf0]  ;;  %s8700_s16 = sshll.u32 %s4147_s10, 1  ;;  %s12002_s12 = smov (%p7668_p12), [#allocation57]  }
 0x797   : > { %3823 = vmatpush.bf16.msrb.mxu3 %v8135_v19  ;;  %v8350_v19 = vld [vmem:[%s12696_s9 + $0x540] sm:$0xf]  ;;  %v8223_v27 = vor.u32 %v10352_v15, %v8222_v7  ;;  %v8263_v7 = vor.u32 %v10362_v11, %v8262_v61  ;;  %v8327_v15 = vor.u32 %v10378_v1, %v8326_v12  ;;  %v8550_v61 = vld [vmem:[%s12696_s9 + $0x6d0] sm:$0xf]  ;;  %v10434_v11 = vld [vmem:[%s12696_s9 + $0x6d4] sm:$0xf0] }
 0x798   : > { %3785 = vmatpush.bf16.msrb.mxu0 %v7935_v30  ;;  %v8351_v29 = vor.u32 %v10384_v20, %v8350_v19  ;;  %v8214_v30 = vld [vmem:[%s12696_s9 + $0x430] sm:$0xf]  ;;  %v8391_v19 = vor.u32 %v10394_v8, %v8390_v3  ;;  %v10376_v20 = vld [vmem:[%s12696_s9 + $0x504] sm:$0xf0]  ;;  %v10450_v1 = vld [vmem:[%s12696_s9 + $0x754] sm:$0xf0] }
 0x799   : > { %3798 = vmatpush.bf16.msrb.mxu1 %v7999_v41  ;;  %v10366_v41 = vld [vmem:[%s12696_s9 + $0x4b4] sm:$0xf0]  ;;  %v8614_v12 = vld [vmem:[%s12696_s9 + $0x750] sm:$0xf]  ;;  %s4150_s14 = scalar_lea.vmem [#allocation5], %s8700_s16  ;;  %s7032_s1 = sshll.u32 (%p7668_p12), %s12002_s12, 4  ;;  %s7033_s1 = int_to_ptr.vmem [resolvable:$true] %s7032_s1 }
 0x79a   : > { %3811 = vmatpush.bf16.msrb.mxu2 %v8063_v42  ;;  %v8342_v42 = vld [vmem:[%s12696_s9 + $0x530] sm:$0xf]  ;;  %v10466_v8 = vld [vmem:[%s12696_s9 + $0x7d4] sm:$0xf0]  ;;  %s7034_s28 = sshll.u32 (%p7668_p12), %s12186_s5, 4  ;;  %s11851_s30 = scalar_lea.hbm (%p7668_p12), %s12186_s5, 2  ;;  %s7035_s28 = int_to_ptr.hbm [resolvable:$true] %s7034_s28 }
 0x79b   : > { %3824 = vmatpush.bf16.msrb.mxu3 %v8127_v45  ;;  %3786 = vmatmul.bf16.vlgmr.msrb.gmra.mxu0 %v12621_v2  ;;  %v10398_v45 = vld [vmem:[%s12696_s9 + $0x5b4] sm:$0xf0]  ;;  %v8678_v3 = vld [vmem:[%s12696_s9 + $0x7d0] sm:$0xf]  ;;  %s11847_s29 = sshra.s32 (%p7668_p12), %s7035_s28, 4  ;;  %s11848_s29 = int_to_ptr.hbm [resolvable:$true] %s11847_s29 }
 0x79c   : > { %3830 = vmatpush.bf16.msra.mxu0 %v8247_v46  ;;  %3799 = vmatmul.bf16.vlgmr.msrb.gmra.mxu1 %v12624_v5  ;;  %v8215_v46 = vor.u32 %v10350_v37, %v8214_v30  ;;  %v10438_v37 = vld [vmem:[%s12696_s9 + $0x6f4] sm:$0xf0]  ;;  %s11849_s26 = scalar_lea.hbm (%p7668_p12), %s11848_s29, 2  ;;  %p11852_p0 = scmp.lt.s32.totalorder (%p7668_p12), %s11848_s29, %s12186_s5 }
 0x79d   : > { %3843 = vmatpush.bf16.msra.mxu1 %v8311_v47  ;;  %3812 = vmatmul.bf16.vlgmr.msrb.gmra.mxu2 %v12627_v60  ;;  %v8279_v47 = vor.u32 %v10366_v41, %v8278_v38  ;;  %v8630_v38 = vld [vmem:[%s12696_s9 + $0x770] sm:$0xf]  ;;  %p11853_p4 = scmp.lt.s32.totalorder (%p7668_p12), %s11851_s30, %s11849_s26 }
 0x79e   : > { %3856 = vmatpush.bf16.msra.mxu2 %v8375_v48  ;;  %3825 = vmatmul.bf16.vlgmr.msrb.gmra.mxu3 %v12629_v10  ;;  %v8343_v48 = vor.u32 %v10382_v43, %v8342_v42  ;;  %v8319_v42 = vor.u32 %v10376_v20, %v8318_v18  ;;  %v8694_v43 = vld [vmem:[%s12696_s9 + $0x7f0] sm:$0xf]  ;;  %v10432_v18 = vld [vmem:[%s12696_s9 + $0x6c4] sm:$0xf0] }
 0x79f   : > { %3869 = vmatpush.bf16.msra.mxu3 %v8439_v54  ;;  %v8407_v54 = vor.u32 %v10398_v45, %v8406_v44  ;;  %v10470_v44 = vld [vmem:[%s12696_s9 + $0x7f4] sm:$0xf0]  ;;  %v8383_v45 = vor.u32 %v10392_v26, %v8382_v13  ;;  %v10448_v20 = vld [vmem:[%s12696_s9 + $0x744] sm:$0xf0]  ;;  %v8670_v13 = vld [vmem:[%s12696_s9 + $0x7c0] sm:$0xf]  ;;  %p11854_p6 = por (%p7668_p12), %p11853_p4, %p11852_p0 }
 0x7a0   : > { %3831 = vmatpush.bf16.msra.mxu0 %v8239_v56  ;;  %v8207_v56 = vor.u32 %v10348_v51, %v8206_v50  ;;  %v8494_v50 = vld [vmem:[%s12696_s9 + $0x660] sm:$0xf]  ;;  %v10420_v51 = vld [vmem:[%s12696_s9 + $0x664] sm:$0xf0] }
 0x7a1   : > { %3844 = vmatpush.bf16.msra.mxu1 %v8303_v57  ;;  %v8271_v57 = vor.u32 %v10364_v40, %v8270_v52  ;;  %v8558_v52 = vld [vmem:[%s12696_s9 + $0x6e0] sm:$0xf]  ;;  %v10436_v40 = vld [vmem:[%s12696_s9 + $0x6e4] sm:$0xf0] }
 0x7a2   : > { %3857 = vmatpush.bf16.msra.mxu2 %v8367_v58  ;;  %v8335_v58 = vor.u32 %v10380_v0, %v8334_v63  ;;  %v8622_v63 = vld [vmem:[%s12696_s9 + $0x760] sm:$0xf]  ;;  %v10452_v0 = vld [vmem:[%s12696_s9 + $0x764] sm:$0xf0] }
 0x7a3   : > { %3870 = vmatpush.bf16.msra.mxu3 %v8431_v62  ;;  %v8399_v62 = vor.u32 %v10396_v55, %v8398_v53  ;;  %v8686_v53 = vld [vmem:[%s12696_s9 + $0x7e0] sm:$0xf]  ;;  %v10468_v55 = vld [vmem:[%s12696_s9 + $0x7e4] sm:$0xf0] }
 0x7a4   : > { %3832 = vmatpush.bf16.msra.mxu0 %v8231_v9  ;;  %v8199_v9 = vor.u32 %v10346_v59, %v8198_v49  ;;  %v8486_v49 = vld [vmem:[%s12696_s9 + $0x650] sm:$0xf]  ;;  %v10418_v59 = vld [vmem:[%s12696_s9 + $0x654] sm:$0xf0]  ;;  %v10464_v26 = vld [vmem:[%s12696_s9 + $0x7c4] sm:$0xf0] }
 0x7a5   : > { %3845 = vmatpush.bf16.msra.mxu1 %v8295_v4  ;;  %v8190_v4 = vld [vmem:[%s12696_s9 + $0x400] sm:$0xf] }
 0x7a6   : > { %3858 = vmatpush.bf16.msra.mxu2 %v8359_v6  ;;  %v10344_v6 = vld [vmem:[%s12696_s9 + $0x404] sm:$0xf0] }
 0x7a7   : > { %3871 = vmatpush.bf16.msra.mxu3 %v8423_v17  ;;  %v10360_v17 = vld [vmem:[%s12696_s9 + $0x484] sm:$0xf0]  ;;  %v8191_v30 = vor.u32 %v10344_v6, %v8190_v4  ;;  %v8551_v4 = vor.u32 %v10434_v11, %v8550_v61  ;;  %v8615_v6 = vor.u32 %v10450_v1, %v8614_v12  ;;  %v8518_v61 = vld [vmem:[%s12696_s9 + $0x690] sm:$0xf]  ;;  %v10426_v11 = vld [vmem:[%s12696_s9 + $0x694] sm:$0xf0] }
 0x7a8   : > { %3833 = vmatpush.bf16.msra.mxu0 %v8223_v27  ;;  %v8502_v27 = vld [vmem:[%s12696_s9 + $0x670] sm:$0xf]  ;;  %v8255_v41 = vor.u32 %v10360_v17, %v8254_v16  ;;  %v8542_v16 = vld [vmem:[%s12696_s9 + $0x6c0] sm:$0xf]  ;;  %v8679_v17 = vor.u32 %v10466_v8, %v8678_v3  ;;  %v10442_v1 = vld [vmem:[%s12696_s9 + $0x714] sm:$0xf0] }
 0x7a9   : > { %3846 = vmatpush.bf16.msra.mxu1 %v8287_v28  ;;  %v10422_v28 = vld [vmem:[%s12696_s9 + $0x674] sm:$0xf0]  ;;  %v8582_v12 = vld [vmem:[%s12696_s9 + $0x710] sm:$0xf] }
 0x7aa   : > { %3859 = vmatpush.bf16.msra.mxu2 %v8351_v29  ;;  %v8566_v29 = vld [vmem:[%s12696_s9 + $0x6f0] sm:$0xf]  ;;  %v10458_v8 = vld [vmem:[%s12696_s9 + $0x794] sm:$0xf0] }
 0x7ab   : > { %3872 = vmatpush.bf16.msra.mxu3 %v8415_v39  ;;  %v10454_v39 = vld [vmem:[%s12696_s9 + $0x774] sm:$0xf0]  ;;  %v8646_v3 = vld [vmem:[%s12696_s9 + $0x790] sm:$0xf] }
 0x7ac   : > { %3834 = vmatpush.bf16.msra.mxu0 %v8215_v46  ;;  %v8503_v46 = vor.u32 %v10422_v28, %v8502_v27  ;;  %v8543_v28 = vor.u32 %v10432_v18, %v8542_v16  ;;  %v8510_v16 = vld [vmem:[%s12696_s9 + $0x680] sm:$0xf] }
 0x7ad   : > { %3847 = vmatpush.bf16.msra.mxu1 %v8279_v47  ;;  %v8567_v47 = vor.u32 %v10438_v37, %v8566_v29  ;;  %v10414_v37 = vld [vmem:[%s12696_s9 + $0x634] sm:$0xf0]  ;;  %v8574_v18 = vld [vmem:[%s12696_s9 + $0x700] sm:$0xf] }
 0x7ae   : > { %3860 = vmatpush.bf16.msra.mxu2 %v8343_v48  ;;  %v8631_v48 = vor.u32 %v10454_v39, %v8630_v38  ;;  %v8534_v38 = vld [vmem:[%s12696_s9 + $0x6b0] sm:$0xf]  ;;  %v8671_v39 = vor.u32 %v10464_v26, %v8670_v13  ;;  %v8638_v13 = vld [vmem:[%s12696_s9 + $0x780] sm:$0xf]  ;;  %v10456_v26 = vld [vmem:[%s12696_s9 + $0x784] sm:$0xf0] }
 0x7af   : > { %3873 = vmatpush.bf16.msra.mxu3 %v8407_v54  ;;  %v8695_v54 = vor.u32 %v10470_v44, %v8694_v43  ;;  %v10446_v43 = vld [vmem:[%s12696_s9 + $0x734] sm:$0xf0]  ;;  %v8662_v44 = vld [vmem:[%s12696_s9 + $0x7b0] sm:$0xf] }
 0x7b0   : > { %3835 = vmatpush.bf16.msra.mxu0 %v8207_v56  ;;  %v8495_v56 = vor.u32 %v10420_v51, %v8494_v50  ;;  %v8462_v50 = vld [vmem:[%s12696_s9 + $0x620] sm:$0xf]  ;;  %v10412_v51 = vld [vmem:[%s12696_s9 + $0x624] sm:$0xf0] }
 0x7b1   : > { %3848 = vmatpush.bf16.msra.mxu1 %v8271_v57  ;;  %v8559_v57 = vor.u32 %v10436_v40, %v8558_v52  ;;  %v8526_v52 = vld [vmem:[%s12696_s9 + $0x6a0] sm:$0xf]  ;;  %v10428_v40 = vld [vmem:[%s12696_s9 + $0x6a4] sm:$0xf0] }
 0x7b2   : > { %3861 = vmatpush.bf16.msra.mxu2 %v8335_v58  ;;  %v8623_v58 = vor.u32 %v10452_v0, %v8622_v63  ;;  %v8590_v63 = vld [vmem:[%s12696_s9 + $0x720] sm:$0xf]  ;;  %v10444_v0 = vld [vmem:[%s12696_s9 + $0x724] sm:$0xf0] }
 0x7b3   : > { %3874 = vmatpush.bf16.msra.mxu3 %v8399_v62  ;;  %v8687_v62 = vor.u32 %v10468_v55, %v8686_v53  ;;  %v8654_v53 = vld [vmem:[%s12696_s9 + $0x7a0] sm:$0xf]  ;;  %v10460_v55 = vld [vmem:[%s12696_s9 + $0x7a4] sm:$0xf0] }
 0x7b4   : > { %3836 = vmatpush.bf16.msra.mxu0 %v8199_v9  ;;  %v8487_v9 = vor.u32 %v10418_v59, %v8486_v49  ;;  %v8454_v49 = vld [vmem:[%s12696_s9 + $0x610] sm:$0xf]  ;;  %v10410_v59 = vld [vmem:[%s12696_s9 + $0x614] sm:$0xf0] }
 0x7b5   : > { %3849 = vmatpush.bf16.msra.mxu1 %v8263_v7  ;;  %v8478_v7 = vld [vmem:[%s12696_s9 + $0x640] sm:$0xf] }
 0x7b6   : > { %3862 = vmatpush.bf16.msra.mxu2 %v8327_v15  ;;  %v10416_v15 = vld [vmem:[%s12696_s9 + $0x644] sm:$0xf0] }
 0x7b7   : > { %3875 = vmatpush.bf16.msra.mxu3 %v8391_v19  ;;  %v8606_v19 = vld [vmem:[%s12696_s9 + $0x740] sm:$0xf]  ;;  %v8479_v27 = vor.u32 %v10416_v15, %v8478_v7  ;;  %v8519_v7 = vor.u32 %v10426_v11, %v8518_v61  ;;  %v8583_v15 = vor.u32 %v10442_v1, %v8582_v12  ;;  %v10241_v61 = vld [vmem:[%s12696_s9 + $0xd4] sm:$0xf]  ;;  %v7784_v11 = vld [vmem:[%s12696_s9 + $0xd8] sm:$0xf0] }
 0x7b8   : > { %3837 = vmatpush.bf16.msra.mxu0 %v8191_v30  ;;  %v8607_v29 = vor.u32 %v10448_v20, %v8606_v19  ;;  %v8470_v30 = vld [vmem:[%s12696_s9 + $0x630] sm:$0xf]  ;;  %v8647_v19 = vor.u32 %v10458_v8, %v8646_v3  ;;  %v10440_v20 = vld [vmem:[%s12696_s9 + $0x704] sm:$0xf0]  ;;  %v10257_v12 = vld [vmem:[%s12696_s9 + $0x154] sm:$0xf] }
 0x7b9   : > { %3850 = vmatpush.bf16.msra.mxu1 %v8255_v41  ;;  %v10430_v41 = vld [vmem:[%s12696_s9 + $0x6b4] sm:$0xf0]  ;;  %v7848_v1 = vld [vmem:[%s12696_s9 + $0x158] sm:$0xf0]  ;;  %v10273_v3 = vld [vmem:[%s12696_s9 + $0x1d4] sm:$0xf] }
 0x7ba   : > { %3863 = vmatpush.bf16.msra.mxu2 %v8319_v42  ;;  %v8598_v42 = vld [vmem:[%s12696_s9 + $0x730] sm:$0xf]  ;;  %v7912_v8 = vld [vmem:[%s12696_s9 + $0x1d8] sm:$0xf0] }
 0x7bb   : > { %3876 = vmatpush.bf16.msra.mxu3 %v8383_v45  ;;  %3838 = vmatmul.bf16.vlgmr.msra.gmra.mxu0 %v12633_v21  ;;  %v10462_v45 = vld [vmem:[%s12696_s9 + $0x7b4] sm:$0xf0] }
 0x7bc   : > { %3882 = vmatpush.bf16.msrb.mxu0 %v8503_v46  ;;  %3851 = vmatmul.bf16.vlgmr.msra.gmra.mxu1 %v12635_v14  ;;  %v8471_v46 = vor.u32 %v10414_v37, %v8470_v30  ;;  %v7800_v37 = vld [vmem:[%s12696_s9 + $0xf8] sm:$0xf0] }
 0x7bd   : > { %3895 = vmatpush.bf16.msrb.mxu1 %v8567_v47  ;;  %3864 = vmatmul.bf16.vlgmr.msra.gmra.mxu2 %v12637_v22  ;;  %v8535_v47 = vor.u32 %v10430_v41, %v8534_v38  ;;  %v10261_v38 = vld [vmem:[%s12696_s9 + $0x174] sm:$0xf] }
 0x7be   : > { %3908 = vmatpush.bf16.msrb.mxu2 %v8631_v48  ;;  %3877 = vmatmul.bf16.vlgmr.msra.gmra.mxu3 %v12639_v23  ;;  %v8599_v48 = vor.u32 %v10446_v43, %v8598_v42  ;;  %v8575_v42 = vor.u32 %v10440_v20, %v8574_v18  ;;  %v10277_v43 = vld [vmem:[%s12696_s9 + $0x1f4] sm:$0xf]  ;;  %v7776_v18 = vld [vmem:[%s12696_s9 + $0xc8] sm:$0xf0] }
 0x7bf   : > { %3921 = vmatpush.bf16.msrb.mxu3 %v8695_v54  ;;  %v8663_v54 = vor.u32 %v10462_v45, %v8662_v44  ;;  %v7928_v44 = vld [vmem:[%s12696_s9 + $0x1f8] sm:$0xf0]  ;;  %v8639_v45 = vor.u32 %v10456_v26, %v8638_v13  ;;  %v7840_v20 = vld [vmem:[%s12696_s9 + $0x148] sm:$0xf0]  ;;  %v10271_v13 = vld [vmem:[%s12696_s9 + $0x1c4] sm:$0xf] }
 0x7c0   : > { %3883 = vmatpush.bf16.msrb.mxu0 %v8495_v56  ;;  %v8463_v56 = vor.u32 %v10412_v51, %v8462_v50  ;;  %v10227_v50 = vld [vmem:[%s12696_s9 + $0x64] sm:$0xf]  ;;  %v7728_v51 = vld [vmem:[%s12696_s9 + $0x68] sm:$0xf0] }
 0x7c1   : > { %3896 = vmatpush.bf16.msrb.mxu1 %v8559_v57  ;;  %v8527_v57 = vor.u32 %v10428_v40, %v8526_v52  ;;  %v10243_v52 = vld [vmem:[%s12696_s9 + $0xe4] sm:$0xf]  ;;  %v7792_v40 = vld [vmem:[%s12696_s9 + $0xe8] sm:$0xf0] }
 0x7c2   : > { %3909 = vmatpush.bf16.msrb.mxu2 %v8623_v58  ;;  %v8591_v58 = vor.u32 %v10444_v0, %v8590_v63  ;;  %v10259_v63 = vld [vmem:[%s12696_s9 + $0x164] sm:$0xf]  ;;  %v7856_v0 = vld [vmem:[%s12696_s9 + $0x168] sm:$0xf0] }
 0x7c3   : > { %3922 = vmatpush.bf16.msrb.mxu3 %v8687_v62  ;;  %v8655_v62 = vor.u32 %v10460_v55, %v8654_v53  ;;  %v10275_v53 = vld [vmem:[%s12696_s9 + $0x1e4] sm:$0xf]  ;;  %v7920_v55 = vld [vmem:[%s12696_s9 + $0x1e8] sm:$0xf0] }
 0x7c4   : > { %3884 = vmatpush.bf16.msrb.mxu0 %v8487_v9  ;;  %v8455_v9 = vor.u32 %v10410_v59, %v8454_v49  ;;  %v10225_v49 = vld [vmem:[%s12696_s9 + $0x54] sm:$0xf]  ;;  %v7720_v59 = vld [vmem:[%s12696_s9 + $0x58] sm:$0xf0]  ;;  %v7904_v26 = vld [vmem:[%s12696_s9 + $0x1c8] sm:$0xf0] }
 0x7c5   : > { %3897 = vmatpush.bf16.msrb.mxu1 %v8551_v4  ;;  %v8446_v4 = vld [vmem:[%s12696_s9 + $0x600] sm:$0xf] }
 0x7c6   : > { %3910 = vmatpush.bf16.msrb.mxu2 %v8615_v6  ;;  %v10408_v6 = vld [vmem:[%s12696_s9 + $0x604] sm:$0xf0] }
 0x7c7   : > { %3923 = vmatpush.bf16.msrb.mxu3 %v8679_v17  ;;  %v10424_v17 = vld [vmem:[%s12696_s9 + $0x684] sm:$0xf0]  ;;  %v8447_v30 = vor.u32 %v10408_v6, %v8446_v4  ;;  %v7787_v4 = vor.u32 %v10241_v61, %v7784_v11  ;;  %v7851_v6 = vor.u32 %v10257_v12, %v7848_v1  ;;  %v10233_v61 = vld [vmem:[%s12696_s9 + $0x94] sm:$0xf]  ;;  %v7752_v11 = vld [vmem:[%s12696_s9 + $0x98] sm:$0xf0] }
 0x7c8   : > { %3885 = vmatpush.bf16.msrb.mxu0 %v8479_v27  ;;  %v10229_v27 = vld [vmem:[%s12696_s9 + $0x74] sm:$0xf]  ;;  %v8511_v41 = vor.u32 %v10424_v17, %v8510_v16  ;;  %v10239_v16 = vld [vmem:[%s12696_s9 + $0xc4] sm:$0xf]  ;;  %v7915_v17 = vor.u32 %v10273_v3, %v7912_v8  ;;  %v7816_v1 = vld [vmem:[%s12696_s9 + $0x118] sm:$0xf0] }
 0x7c9   : > { %3898 = vmatpush.bf16.msrb.mxu1 %v8543_v28  ;;  %v7736_v28 = vld [vmem:[%s12696_s9 + $0x78] sm:$0xf0]  ;;  %v10249_v12 = vld [vmem:[%s12696_s9 + $0x114] sm:$0xf] }
 0x7ca   : > { %3911 = vmatpush.bf16.msrb.mxu2 %v8607_v29  ;;  %v10245_v29 = vld [vmem:[%s12696_s9 + $0xf4] sm:$0xf]  ;;  %v7880_v8 = vld [vmem:[%s12696_s9 + $0x198] sm:$0xf0] }
 0x7cb   : > { %3924 = vmatpush.bf16.msrb.mxu3 %v8671_v39  ;;  %v7864_v39 = vld [vmem:[%s12696_s9 + $0x178] sm:$0xf0]  ;;  %v10265_v3 = vld [vmem:[%s12696_s9 + $0x194] sm:$0xf] }
 0x7cc   : > { %3886 = vmatpush.bf16.msrb.mxu0 %v8471_v46  ;;  %v7739_v46 = vor.u32 %v10229_v27, %v7736_v28  ;;  %v7779_v28 = vor.u32 %v10239_v16, %v7776_v18  ;;  %v10231_v16 = vld [vmem:[%s12696_s9 + $0x84] sm:$0xf] }
 0x7cd   : > { %3899 = vmatpush.bf16.msrb.mxu1 %v8535_v47  ;;  %v7803_v47 = vor.u32 %v10245_v29, %v7800_v37  ;;  %v7704_v37 = vld [vmem:[%s12696_s9 + $0x38] sm:$0xf0]  ;;  %v10247_v18 = vld [vmem:[%s12696_s9 + $0x104] sm:$0xf] }
 0x7ce   : > { %3912 = vmatpush.bf16.msrb.mxu2 %v8599_v48  ;;  %v7867_v48 = vor.u32 %v10261_v38, %v7864_v39  ;;  %v10237_v38 = vld [vmem:[%s12696_s9 + $0xb4] sm:$0xf]  ;;  %v7907_v39 = vor.u32 %v10271_v13, %v7904_v26  ;;  %v10263_v13 = vld [vmem:[%s12696_s9 + $0x184] sm:$0xf]  ;;  %v7872_v26 = vld [vmem:[%s12696_s9 + $0x188] sm:$0xf0] }
 0x7cf   : > { %3925 = vmatpush.bf16.msrb.mxu3 %v8663_v54  ;;  %v7931_v54 = vor.u32 %v10277_v43, %v7928_v44  ;;  %v7832_v43 = vld [vmem:[%s12696_s9 + $0x138] sm:$0xf0]  ;;  %v10269_v44 = vld [vmem:[%s12696_s9 + $0x1b4] sm:$0xf] }
 0x7d0   : > { %3887 = vmatpush.bf16.msrb.mxu0 %v8463_v56  ;;  %v7731_v56 = vor.u32 %v10227_v50, %v7728_v51  ;;  %v10219_v50 = vld [vmem:[%s12696_s9 + $0x24] sm:$0xf]  ;;  %v7696_v51 = vld [vmem:[%s12696_s9 + $0x28] sm:$0xf0] }
 0x7d1   : > { %3900 = vmatpush.bf16.msrb.mxu1 %v8527_v57  ;;  %v7795_v57 = vor.u32 %v10243_v52, %v7792_v40  ;;  %v10235_v52 = vld [vmem:[%s12696_s9 + $0xa4] sm:$0xf]  ;;  %v7760_v40 = vld [vmem:[%s12696_s9 + $0xa8] sm:$0xf0] }
 0x7d2   : > { %3913 = vmatpush.bf16.msrb.mxu2 %v8591_v58  ;;  %v7859_v58 = vor.u32 %v10259_v63, %v7856_v0  ;;  %v10251_v63 = vld [vmem:[%s12696_s9 + $0x124] sm:$0xf]  ;;  %v7824_v0 = vld [vmem:[%s12696_s9 + $0x128] sm:$0xf0] }
 0x7d3   : > { %3926 = vmatpush.bf16.msrb.mxu3 %v8655_v62  ;;  %v7923_v62 = vor.u32 %v10275_v53, %v7920_v55  ;;  %v10267_v53 = vld [vmem:[%s12696_s9 + $0x1a4] sm:$0xf]  ;;  %v7888_v55 = vld [vmem:[%s12696_s9 + $0x1a8] sm:$0xf0] }
 0x7d4   : > { %3888 = vmatpush.bf16.msrb.mxu0 %v8455_v9  ;;  %v7723_v9 = vor.u32 %v10225_v49, %v7720_v59  ;;  %v10217_v49 = vld [vmem:[%s12696_s9 + $0x14] sm:$0xf]  ;;  %v7688_v59 = vld [vmem:[%s12696_s9 + $0x18] sm:$0xf0] }
 0x7d5   : > { %3901 = vmatpush.bf16.msrb.mxu1 %v8519_v7  ;;  %v10223_v7 = vld [vmem:[%s12696_s9 + $0x44] sm:$0xf] }
 0x7d6   : > { %3914 = vmatpush.bf16.msrb.mxu2 %v8583_v15  ;;  %v7712_v15 = vld [vmem:[%s12696_s9 + $0x48] sm:$0xf0] }
 0x7d7   : > { %3927 = vmatpush.bf16.msrb.mxu3 %v8647_v19  ;;  %v10255_v19 = vld [vmem:[%s12696_s9 + $0x144] sm:$0xf]  ;;  %v7715_v27 = vor.u32 %v10223_v7, %v7712_v15  ;;  %v7755_v7 = vor.u32 %v10233_v61, %v7752_v11  ;;  %v7819_v15 = vor.u32 %v10249_v12, %v7816_v1  ;;  %v10305_v61 = vld [vmem:[%s12696_s9 + $0x2d4] sm:$0xf]  ;;  %v8040_v11 = vld [vmem:[%s12696_s9 + $0x2d8] sm:$0xf0] }
 0x7d8   : > { %3889 = vmatpush.bf16.msrb.mxu0 %v8447_v30  ;;  %v7843_v29 = vor.u32 %v10255_v19, %v7840_v20  ;;  %v10221_v30 = vld [vmem:[%s12696_s9 + $0x34] sm:$0xf]  ;;  %v7883_v19 = vor.u32 %v10265_v3, %v7880_v8  ;;  %v7808_v20 = vld [vmem:[%s12696_s9 + $0x108] sm:$0xf0]  ;;  %v8104_v1 = vld [vmem:[%s12696_s9 + $0x358] sm:$0xf0] }
 0x7d9   : > { %3902 = vmatpush.bf16.msrb.mxu1 %v8511_v41  ;;  %v7768_v41 = vld [vmem:[%s12696_s9 + $0xb8] sm:$0xf0]  ;;  %v10321_v12 = vld [vmem:[%s12696_s9 + $0x354] sm:$0xf] }
 0x7da   : > { %3915 = vmatpush.bf16.msrb.mxu2 %v8575_v42  ;;  %v10253_v42 = vld [vmem:[%s12696_s9 + $0x134] sm:$0xf]  ;;  %v8168_v8 = vld [vmem:[%s12696_s9 + $0x3d8] sm:$0xf0] }
 0x7db   : > { %3928 = vmatpush.bf16.msrb.mxu3 %v8639_v45  ;;  %3890 = vmatmul.bf16.vlgmr.msrb.gmra.mxu0 %v12641_v31  ;;  %v7896_v45 = vld [vmem:[%s12696_s9 + $0x1b8] sm:$0xf0]  ;;  %v10337_v3 = vld [vmem:[%s12696_s9 + $0x3d4] sm:$0xf] }
 0x7dc   : > { %3934 = vmatpush.bf16.msra.mxu0 %v7739_v46  ;;  %3903 = vmatmul.bf16.vlgmr.msrb.gmra.mxu1 %v12643_v32  ;;  %v7707_v46 = vor.u32 %v10221_v30, %v7704_v37  ;;  %v8056_v37 = vld [vmem:[%s12696_s9 + $0x2f8] sm:$0xf0] }
 0x7dd   : > { %3947 = vmatpush.bf16.msra.mxu1 %v7803_v47  ;;  %3916 = vmatmul.bf16.vlgmr.msrb.gmra.mxu2 %v12645_v35  ;;  %v7771_v47 = vor.u32 %v10237_v38, %v7768_v41  ;;  %v10325_v38 = vld [vmem:[%s12696_s9 + $0x374] sm:$0xf] }
 0x7de   : > { %3960 = vmatpush.bf16.msra.mxu2 %v7867_v48  ;;  %3929 = vmatmul.bf16.vlgmr.msrb.gmra.mxu3 %v12647_v36  ;;  %v7835_v48 = vor.u32 %v10253_v42, %v7832_v43  ;;  %v7811_v42 = vor.u32 %v10247_v18, %v7808_v20  ;;  %v10341_v43 = vld [vmem:[%s12696_s9 + $0x3f4] sm:$0xf]  ;;  %v8032_v18 = vld [vmem:[%s12696_s9 + $0x2c8] sm:$0xf0] }
 0x7df   : > { %3973 = vmatpush.bf16.msra.mxu3 %v7931_v54  ;;  %v7899_v54 = vor.u32 %v10269_v44, %v7896_v45  ;;  %v8184_v44 = vld [vmem:[%s12696_s9 + $0x3f8] sm:$0xf0]  ;;  %v7875_v45 = vor.u32 %v10263_v13, %v7872_v26  ;;  %v8096_v20 = vld [vmem:[%s12696_s9 + $0x348] sm:$0xf0]  ;;  %v10335_v13 = vld [vmem:[%s12696_s9 + $0x3c4] sm:$0xf] }
 0x7e0   : > { %3935 = vmatpush.bf16.msra.mxu0 %v7731_v56  ;;  %v7699_v56 = vor.u32 %v10219_v50, %v7696_v51  ;;  %v10291_v50 = vld [vmem:[%s12696_s9 + $0x264] sm:$0xf]  ;;  %v7984_v51 = vld [vmem:[%s12696_s9 + $0x268] sm:$0xf0] }
 0x7e1   : > { %3948 = vmatpush.bf16.msra.mxu1 %v7795_v57  ;;  %v7763_v57 = vor.u32 %v10235_v52, %v7760_v40  ;;  %v10307_v52 = vld [vmem:[%s12696_s9 + $0x2e4] sm:$0xf]  ;;  %v8048_v40 = vld [vmem:[%s12696_s9 + $0x2e8] sm:$0xf0] }
 0x7e2   : > { %3961 = vmatpush.bf16.msra.mxu2 %v7859_v58  ;;  %v7827_v58 = vor.u32 %v10251_v63, %v7824_v0  ;;  %v10323_v63 = vld [vmem:[%s12696_s9 + $0x364] sm:$0xf]  ;;  %v8112_v0 = vld [vmem:[%s12696_s9 + $0x368] sm:$0xf0] }
 0x7e3   : > { %3974 = vmatpush.bf16.msra.mxu3 %v7923_v62  ;;  %v7891_v62 = vor.u32 %v10267_v53, %v7888_v55  ;;  %v10339_v53 = vld [vmem:[%s12696_s9 + $0x3e4] sm:$0xf]  ;;  %v8176_v55 = vld [vmem:[%s12696_s9 + $0x3e8] sm:$0xf0] }
 0x7e4   : > { %3936 = vmatpush.bf16.msra.mxu0 %v7723_v9  ;;  %v7691_v9 = vor.u32 %v10217_v49, %v7688_v59  ;;  %v10289_v49 = vld [vmem:[%s12696_s9 + $0x254] sm:$0xf]  ;;  %v7976_v59 = vld [vmem:[%s12696_s9 + $0x258] sm:$0xf0]  ;;  %v8160_v26 = vld [vmem:[%s12696_s9 + $0x3c8] sm:$0xf0] }
 0x7e5   : > { %3949 = vmatpush.bf16.msra.mxu1 %v7787_v4  ;;  %v10215_v4 = vld [vmem:[%s12696_s9 + $0x4] sm:$0xf] }
 0x7e6   : > { %3962 = vmatpush.bf16.msra.mxu2 %v7851_v6  ;;  %v7680_v6 = vld [vmem:[%s12696_s9 + $0x8] sm:$0xf0] }
 0x7e7   : > { %3975 = vmatpush.bf16.msra.mxu3 %v7915_v17  ;;  %v7744_v17 = vld [vmem:[%s12696_s9 + $0x88] sm:$0xf0]  ;;  %v7683_v30 = vor.u32 %v10215_v4, %v7680_v6  ;;  %v8043_v4 = vor.u32 %v10305_v61, %v8040_v11  ;;  %v8107_v6 = vor.u32 %v10321_v12, %v8104_v1 }
 0x7e8   : > { %3937 = vmatpush.bf16.msra.mxu0 %v7715_v27  ;;  %v10293_v27 = vld [vmem:[%s12696_s9 + $0x274] sm:$0xf]  ;;  %v7747_v41 = vor.u32 %v10231_v16, %v7744_v17  ;;  %v10303_v16 = vld [vmem:[%s12696_s9 + $0x2c4] sm:$0xf]  ;;  %v8171_v17 = vor.u32 %v10337_v3, %v8168_v8  ;;  %v8144_v61 = vld [vmem:[%s12696_s9 + $0x3a8] sm:$0xf0] }
 0x7e9   : > { %3950 = vmatpush.bf16.msra.mxu1 %v7779_v28  ;;  %v7992_v28 = vld [vmem:[%s12696_s9 + $0x278] sm:$0xf0]  ;;  %v10281_v8 = vld [vmem:[%s12696_s9 + $0x214] sm:$0xf] }
 0x7ea   : > { %3963 = vmatpush.bf16.msra.mxu2 %v7843_v29  ;;  %v10309_v29 = vld [vmem:[%s12696_s9 + $0x2f4] sm:$0xf] }
 0x7eb   : > { %3976 = vmatpush.bf16.msra.mxu3 %v7907_v39  ;;  %v8120_v39 = vld [vmem:[%s12696_s9 + $0x378] sm:$0xf0] }
 0x7ec   : > { %3938 = vmatpush.bf16.msra.mxu0 %v7707_v46  ;;  %v7995_v46 = vor.u32 %v10293_v27, %v7992_v28 }
 0x7ed   : > { %3951 = vmatpush.bf16.msra.mxu1 %v7771_v47  ;;  %v8059_v47 = vor.u32 %v10309_v29, %v8056_v37  ;;  %v8035_v29 = vor.u32 %v10303_v16, %v8032_v18  ;;  %v10285_v37 = vld [vmem:[%s12696_s9 + $0x234] sm:$0xf] }
 0x7ee   : > { %3964 = vmatpush.bf16.msra.mxu2 %v7835_v48  ;;  %v8123_v48 = vor.u32 %v10325_v38, %v8120_v39  ;;  %v7960_v38 = vld [vmem:[%s12696_s9 + $0x238] sm:$0xf0]  ;;  %v10301_v39 = vld [vmem:[%s12696_s9 + $0x2b4] sm:$0xf] }
 0x7ef   : > { %3977 = vmatpush.bf16.msra.mxu3 %v7899_v54  ;;  %v8187_v54 = vor.u32 %v10341_v43, %v8184_v44  ;;  %v8024_v43 = vld [vmem:[%s12696_s9 + $0x2b8] sm:$0xf0]  ;;  %v10317_v44 = vld [vmem:[%s12696_s9 + $0x334] sm:$0xf] }
 0x7f0   : > { %3939 = vmatpush.bf16.msra.mxu0 %v7699_v56  ;;  %v7987_v56 = vor.u32 %v10291_v50, %v7984_v51  ;;  %v7963_v50 = vor.u32 %v10285_v37, %v7960_v38  ;;  %v8027_v51 = vor.u32 %v10301_v39, %v8024_v43  ;;  %v10313_v16 = vld [vmem:[%s12696_s9 + $0x314] sm:$0xf]  ;;  %v10311_v37 = vld [vmem:[%s12696_s9 + $0x304] sm:$0xf]  ;;  %v8128_v43 = vld [vmem:[%s12696_s9 + $0x388] sm:$0xf0] }
 0x7f1   : > { %3952 = vmatpush.bf16.msra.mxu1 %v7763_v57  ;;  %v8051_v57 = vor.u32 %v10307_v52, %v8048_v40  ;;  %v7952_v40 = vld [vmem:[%s12696_s9 + $0x228] sm:$0xf0]  ;;  %v10329_v18 = vld [vmem:[%s12696_s9 + $0x394] sm:$0xf] }
 0x7f2   : > { %3965 = vmatpush.bf16.msra.mxu2 %v7827_v58  ;;  %v8115_v58 = vor.u32 %v10323_v63, %v8112_v0  ;;  %v10299_v63 = vld [vmem:[%s12696_s9 + $0x2a4] sm:$0xf] }
 0x7f3   : > { %3978 = vmatpush.bf16.msra.mxu3 %v7891_v62  ;;  %v8179_v62 = vor.u32 %v10339_v53, %v8176_v55  ;;  %v8016_v55 = vld [vmem:[%s12696_s9 + $0x2a8] sm:$0xf0] }
 0x7f4   : > { %3940 = vmatpush.bf16.msra.mxu0 %v7691_v9  ;;  %v7979_v9 = vor.u32 %v10289_v49, %v7976_v59  ;;  %v10331_v59 = vld [vmem:[%s12696_s9 + $0x3a4] sm:$0xf]  ;;  %v8019_v1 = vor.u32 %v10299_v63, %v8016_v55  ;;  %v10405_v63 = vld [vmem:[%s12696_s9 + $0x5f4] sm:$0xf] }
 0x7f5   : > { %3953 = vmatpush.bf16.msra.mxu1 %v7755_v7  ;;  %v10287_v7 = vld [vmem:[%s12696_s9 + $0x244] sm:$0xf] }
 0x7f6   : > { %3966 = vmatpush.bf16.msra.mxu2 %v7819_v15  ;;  %v7968_v15 = vld [vmem:[%s12696_s9 + $0x248] sm:$0xf0] }
 0x7f7   : > { %3979 = vmatpush.bf16.msra.mxu3 %v7883_v19  ;;  %v10319_v19 = vld [vmem:[%s12696_s9 + $0x344] sm:$0xf]  ;;  %v7971_v27 = vor.u32 %v10287_v7, %v7968_v15  ;;  %v8147_v7 = vor.u32 %v10331_v59, %v8144_v61  ;;  %v8008_v15 = vld [vmem:[%s12696_s9 + $0x298] sm:$0xf0] }
 0x7f8   : > { %3941 = vmatpush.bf16.msra.mxu0 %v7683_v30  ;;  %v3735_v28 = vpop.f32.mrf.mxu0  ;;  %v8099_v30 = vor.u32 %v10319_v19, %v8096_v20  ;;  %v8136_v19 = vld [vmem:[%s12696_s9 + $0x398] sm:$0xf0]  ;;  %v10371_v59 = vld [vmem:[%s12696_s9 + $0x4e4] sm:$0xf] }
 0x7f9   : > { %3954 = vmatpush.bf16.msra.mxu1 %v7747_v41  ;;  %v3748_v41 = vpop.f32.mrf.mxu1  ;;  %v8139_v39 = vor.u32 %v10329_v18, %v8136_v19  ;;  %v8296_v18 = vld [vmem:[%s12696_s9 + $0x4d8] sm:$0xf0]  ;;  %v10385_v19 = vld [vmem:[%s12696_s9 + $0x554] sm:$0xf] }
 0x7fa   : > { %3967 = vmatpush.bf16.msra.mxu2 %v7811_v42  ;;  %v8163_v42 = vor.u32 %v10335_v13, %v8160_v26  ;;  %v10279_v13 = vld [vmem:[%s12696_s9 + $0x204] sm:$0xf]  ;;  %v7936_v26 = vld [vmem:[%s12696_s9 + $0x208] sm:$0xf0] }
 0x7fb   : > { %3980 = vmatpush.bf16.msra.mxu3 %v7875_v45  ;;  %3942 = vmatmul.bf16.vlgmr.msra.gmra.mxu0 %v12592_v24  ;;  %v8088_v45 = vld [vmem:[%s12696_s9 + $0x338] sm:$0xf0] }
 0x7fc   : > { %3986 = vmatpush.bf16.msrb.mxu0 %v7995_v46  ;;  %3955 = vmatmul.bf16.vlgmr.msra.gmra.mxu1 %v12594_v25  ;;  %v3749_v46 = vadd.f32 %v3748_v41, %v3735_v28  ;;  %v8091_v52 = vor.u32 %v10317_v44, %v8088_v45  ;;  %v8064_v41 = vld [vmem:[%s12696_s9 + $0x308] sm:$0xf0]  ;;  %v10357_v45 = vld [vmem:[%s12696_s9 + $0x474] sm:$0xf]  ;;  %v9055_v25 = vld [vmem:[#allocation36 + $0x2c0] sm:$0xf] (%p7668_p12) }
 0x7fd   : > { %3999 = vmatpush.bf16.msrb.mxu1 %v8059_v47  ;;  %3968 = vmatmul.bf16.vlgmr.msra.gmra.mxu2 %v12599_v33  ;;  %v10333_v47 = vld [vmem:[%s12696_s9 + $0x3b4] sm:$0xf]  ;;  %v10561_v33 = vld [vmem:[#allocation36 + $0x2cc] sm:$0xf0] (%p7668_p12) }
 0x7fe   : > { %4012 = vmatpush.bf16.msrb.mxu2 %v8123_v48  ;;  %3981 = vmatmul.bf16.vlgmr.msra.gmra.mxu3 %v12601_v34  ;;  %v8152_v48 = vld [vmem:[%s12696_s9 + $0x3b8] sm:$0xf0] }
 0x7ff   : > { %4025 = vmatpush.bf16.msrb.mxu3 %v8187_v54  ;;  %v10283_v54 = vld [vmem:[%s12696_s9 + $0x224] sm:$0xf]  ;;  %v8155_v53 = vor.u32 %v10333_v47, %v8152_v48  ;;  %v10373_v47 = vld [vmem:[%s12696_s9 + $0x4f4] sm:$0xf]  ;;  %v7939_v48 = vor.u32 %v10279_v13, %v7936_v26  ;;  %v8424_v26 = vld [vmem:[%s12696_s9 + $0x5d8] sm:$0xf0] }
 0x800   : > { %3987 = vmatpush.bf16.msrb.mxu0 %v7987_v56  ;;  %v3761_v0 = vpop.f32.mrf.mxu2  ;;  %v10315_v56 = vld [vmem:[%s12696_s9 + $0x324] sm:$0xf]  ;;  %v3737_v12 = vpop.f32.mrf.mxu0  ;;  %v10401_v13 = vld [vmem:[%s12696_s9 + $0x5d4] sm:$0xf]  ;;  %v9183_v34 = vld [vmem:[#allocation36 + $0x3c0] sm:$0xf] (%p7668_p12) }
 0x801   : > { %4000 = vmatpush.bf16.msrb.mxu1 %v8051_v57  ;;  %v8080_v57 = vld [vmem:[%s12696_s9 + $0x328] sm:$0xf0]  ;;  %v3774_v49 = vpop.f32.mrf.mxu3  ;;  %v10387_v12 = vld [vmem:[%s12696_s9 + $0x564] sm:$0xf] }
 0x802   : > { %4013 = vmatpush.bf16.msrb.mxu2 %v8115_v58  ;;  %v3762_v58 = vadd.f32 %v3761_v0, %v3749_v46  ;;  %v8083_v3 = vor.u32 %v10315_v56, %v8080_v57  ;;  %v8248_v46 = vld [vmem:[%s12696_s9 + $0x478] sm:$0xf0] }
 0x803   : > { %4026 = vmatpush.bf16.msrb.mxu3 %v8179_v62  ;;  %v7955_v62 = vor.u32 %v10283_v54, %v7952_v40  ;;  %v8067_v40 = vor.u32 %v10311_v37, %v8064_v41  ;;  %v8440_v0 = vld [vmem:[%s12696_s9 + $0x5f8] sm:$0xf0]  ;;  %v8251_v55 = vor.u32 %v10357_v45, %v8248_v46  ;;  %v8224_v37 = vld [vmem:[%s12696_s9 + $0x448] sm:$0xf0] }
 0x804   : > { %3988 = vmatpush.bf16.msrb.mxu0 %v7979_v9  ;;  %v13087_v11 = vadd.f32 %v3774_v49, %v3762_v58  ;;  %v7944_v9 = vld [vmem:[%s12696_s9 + $0x218] sm:$0xf0]  ;;  %v10355_v58 = vld [vmem:[%s12696_s9 + $0x464] sm:$0xf]  ;;  %v8240_v49 = vld [vmem:[%s12696_s9 + $0x468] sm:$0xf0]  ;;  %v8443_v61 = vor.u32 %v10405_v63, %v8440_v0 }
 0x805   : > { %4001 = vmatpush.bf16.msrb.mxu1 %v8043_v4  ;;  %v10297_v4 = vld [vmem:[%s12696_s9 + $0x294] sm:$0xf]  ;;  %v7947_v20 = vor.u32 %v10281_v8, %v7944_v9  ;;  %v8432_v8 = vld [vmem:[%s12696_s9 + $0x5e8] sm:$0xf0]  ;;  %v8243_v9 = vor.u32 %v10355_v58, %v8240_v49  ;;  %v8408_v58 = vld [vmem:[%s12696_s9 + $0x5b8] sm:$0xf0] }
 0x806   : > { %4014 = vmatpush.bf16.msrb.mxu2 %v8107_v6  ;;  %v3750_v6 = vpop.f32.mrf.mxu1  ;;  %v8288_v41 = vld [vmem:[%s12696_s9 + $0x4c8] sm:$0xf0] }
 0x807   : > { %4027 = vmatpush.bf16.msrb.mxu3 %v8171_v17  ;;  %v8072_v17 = vld [vmem:[%s12696_s9 + $0x318] sm:$0xf0]  ;;  %v8416_v45 = vld [vmem:[%s12696_s9 + $0x5c8] sm:$0xf0] }
 0x808   : > { %3989 = vmatpush.bf16.msrb.mxu0 %v7971_v27  ;;  %v8011_v27 = vor.u32 %v10297_v4, %v8008_v15  ;;  %v8075_v28 = vor.u32 %v10313_v16, %v8072_v17  ;;  %v3763_v38 = vpop.f32.mrf.mxu2  ;;  %v8232_v15 = vld [vmem:[%s12696_s9 + $0x458] sm:$0xf0]  ;;  %v10369_v16 = vld [vmem:[%s12696_s9 + $0x4d4] sm:$0xf] }
 0x809   : > { %4002 = vmatpush.bf16.msrb.mxu1 %v8035_v29  ;;  %v10295_v29 = vld [vmem:[%s12696_s9 + $0x284] sm:$0xf]  ;;  %v3776_v44 = vpop.f32.mrf.mxu3 }
 0x80a   : > { %4015 = vmatpush.bf16.msrb.mxu2 %v8099_v30  ;;  %v8000_v30 = vld [vmem:[%s12696_s9 + $0x288] sm:$0xf0]  ;;  %v10367_v38 = vld [vmem:[%s12696_s9 + $0x4c4] sm:$0xf] }
 0x80b   : > { %4028 = vmatpush.bf16.msrb.mxu3 %v8163_v42  ;;  %v10327_v42 = vld [vmem:[%s12696_s9 + $0x384] sm:$0xf]  ;;  %v8003_v54 = vor.u32 %v10295_v29, %v8000_v30 }
 0x80c   : > { %3990 = vmatpush.bf16.msrb.mxu0 %v7963_v50  ;;  %v8312_v50 = vld [vmem:[%s12696_s9 + $0x4f8] sm:$0xf0]  ;;  %v10351_v30 = vld [vmem:[%s12696_s9 + $0x444] sm:$0xf] }
 0x80d   : > { %4003 = vmatpush.bf16.msrb.mxu1 %v8027_v51  ;;  %v10389_v51 = vld [vmem:[%s12696_s9 + $0x574] sm:$0xf]  ;;  %v8315_v56 = vor.u32 %v10373_v47, %v8312_v50  ;;  %v10399_v44 = vld [vmem:[%s12696_s9 + $0x5c4] sm:$0xf]  ;;  %v8227_v46 = vor.u32 %v10351_v30, %v8224_v37 }
 0x80e   : > { %4016 = vmatpush.bf16.msrb.mxu2 %v8091_v52  ;;  %v8376_v52 = vld [vmem:[%s12696_s9 + $0x578] sm:$0xf0]  ;;  %v8419_v0 = vor.u32 %v10399_v44, %v8416_v45  ;;  %v10343_v45 = vld [vmem:[%s12696_s9 + $0x404] sm:$0xf] }
 0x80f   : > { %4029 = vmatpush.bf16.msrb.mxu3 %v8155_v53  ;;  %v8131_v53 = vor.u32 %v10327_v42, %v8128_v43  ;;  %v8379_v57 = vor.u32 %v10389_v51, %v8376_v52  ;;  %v10383_v42 = vld [vmem:[%s12696_s9 + $0x544] sm:$0xf]  ;;  %v8352_v43 = vld [vmem:[%s12696_s9 + $0x548] sm:$0xf0]  ;;  %v10349_v51 = vld [vmem:[%s12696_s9 + $0x434] sm:$0xf] }
 0x810   : > { %3991 = vmatpush.bf16.msrb.mxu0 %v7955_v62  ;;  %v8304_v62 = vld [vmem:[%s12696_s9 + $0x4e8] sm:$0xf0]  ;;  %v8355_v50 = vor.u32 %v10383_v42, %v8352_v43  ;;  %v8216_v52 = vld [vmem:[%s12696_s9 + $0x438] sm:$0xf0]  ;;  %v10393_v42 = vld [vmem:[%s12696_s9 + $0x594] sm:$0xf] }
 0x811   : > { %4004 = vmatpush.bf16.msrb.mxu1 %v8019_v1  ;;  %v8368_v1 = vld [vmem:[%s12696_s9 + $0x568] sm:$0xf0]  ;;  %v8307_v4 = vor.u32 %v10371_v59, %v8304_v62  ;;  %v8219_v59 = vor.u32 %v10349_v51, %v8216_v52  ;;  %v10347_v62 = vld [vmem:[%s12696_s9 + $0x424] sm:$0xf]  ;;  %v8392_v43 = vld [vmem:[%s12696_s9 + $0x598] sm:$0xf0] }
 0x812   : > { %4017 = vmatpush.bf16.msrb.mxu2 %v8083_v3  ;;  %v10403_v3 = vld [vmem:[%s12696_s9 + $0x5e4] sm:$0xf]  ;;  %v8371_v6 = vor.u32 %v10387_v12, %v8368_v1  ;;  %v8208_v12 = vld [vmem:[%s12696_s9 + $0x428] sm:$0xf0] }
 0x813   : > { %4030 = vmatpush.bf16.msrb.mxu3 %v8147_v7  ;;  %v10353_v7 = vld [vmem:[%s12696_s9 + $0x454] sm:$0xf]  ;;  %v8435_v17 = vor.u32 %v10403_v3, %v8432_v8  ;;  %v10363_v1 = vld [vmem:[%s12696_s9 + $0x4a4] sm:$0xf]  ;;  %v8256_v51 = vld [vmem:[%s12696_s9 + $0x488] sm:$0xf0] }
 0x814   : > { %3992 = vmatpush.bf16.msrb.mxu0 %v7947_v20  ;;  %v8360_v20 = vld [vmem:[%s12696_s9 + $0x558] sm:$0xf0]  ;;  %v10375_v52 = vld [vmem:[%s12696_s9 + $0x504] sm:$0xf] }
 0x815   : > { %4005 = vmatpush.bf16.msrb.mxu1 %v8011_v27  ;;  %v8235_v27 = vor.u32 %v10353_v7, %v8232_v15  ;;  %v8363_v29 = vor.u32 %v10385_v19, %v8360_v20 }
 0x816   : > { %4018 = vmatpush.bf16.msrb.mxu2 %v8075_v28  ;;  %v8299_v28 = vor.u32 %v10369_v16, %v8296_v18  ;;  %v10395_v16 = vld [vmem:[%s12696_s9 + $0x5a4] sm:$0xf]  ;;  %v8211_v18 = vor.u32 %v10347_v62, %v8208_v12 }
 0x817   : > { %4031 = vmatpush.bf16.msrb.mxu3 %v8139_v39  ;;  %v8427_v39 = vor.u32 %v10401_v13, %v8424_v26 }
 0x818   : > { %3993 = vmatpush.bf16.msrb.mxu0 %v7939_v48  ;;  %v3787_v47 = vpop.f32.mrf.mxu0  ;;  %v8291_v48 = vor.u32 %v10367_v38, %v8288_v41  ;;  %v8264_v38 = vld [vmem:[%s12696_s9 + $0x498] sm:$0xf0] }
 0x819   : > { %4006 = vmatpush.bf16.msrb.mxu1 %v8003_v54  ;;  %v10365_v54 = vld [vmem:[%s12696_s9 + $0x4b4] sm:$0xf]  ;;  %v3800_v63 = vpop.f32.mrf.mxu1  ;;  %v8328_v41 = vld [vmem:[%s12696_s9 + $0x518] sm:$0xf0] }
 0x81a   : > { %4019 = vmatpush.bf16.msrb.mxu2 %v8067_v40  ;;  %v3788_v40 = vadd.f32 %v3787_v47, %v13087_v11 }
 0x81b   : > { %4032 = vmatpush.bf16.msrb.mxu3 %v8131_v53  ;;  %3994 = vmatmul.bf16.vlgmr.msrb.gmra.mxu0 %v12621_v2  ;;  %v8280_v53 = vld [vmem:[%s12696_s9 + $0x4b8] sm:$0xf0]  ;;  %v9056_v2 = vor.u32 (%p7668_p12), %v10561_v33, %v9055_v25  ;;  %v10473_v25 = vld [vmem:[#allocation36 + $0xc] sm:$0xf0] (%p7668_p12) }
 0x81c   : > { %4038 = vmatpush.bf16.msra.mxu0 %v8251_v55  ;;  %4007 = vmatmul.bf16.vlgmr.msrb.gmra.mxu1 %v12624_v5  ;;  %v10381_v55 = vld [vmem:[%s12696_s9 + $0x534] sm:$0xf]  ;;  %v3801_v49 = vadd.f32 %v3800_v63, %v3788_v40  ;;  %v8283_v11 = vor.u32 %v10365_v54, %v8280_v53  ;;  %v8395_v40 = vor.u32 %v10393_v42, %v8392_v43  ;;  %v8320_v63 = vld [vmem:[%s12696_s9 + $0x508] sm:$0xf0]  ;;  %v8552_v42 = vld [vmem:[%s12696_s9 + $0x6d8] sm:$0xf0] }
 0x81d   : > { %4051 = vmatpush.bf16.msra.mxu1 %v8315_v56  ;;  %4020 = vmatmul.bf16.vlgmr.msrb.gmra.mxu2 %v12627_v60  ;;  %v8344_v56 = vld [vmem:[%s12696_s9 + $0x538] sm:$0xf0]  ;;  %v8384_v53 = vld [vmem:[%s12696_s9 + $0x588] sm:$0xf0]  ;;  %v8323_v12 = vor.u32 %v10375_v52, %v8320_v63  ;;  %v10449_v43 = vld [vmem:[%s12696_s9 + $0x754] sm:$0xf] }
 0x81e   : > { %4064 = vmatpush.bf16.msra.mxu2 %v8379_v57  ;;  %4033 = vmatmul.bf16.vlgmr.msrb.gmra.mxu3 %v12629_v10  ;;  %v10397_v57 = vld [vmem:[%s12696_s9 + $0x5b4] sm:$0xf]  ;;  %v8480_v52 = vld [vmem:[%s12696_s9 + $0x648] sm:$0xf0]  ;;  %v8783_v60 = vld [vmem:[#allocation36 + $0xa0] sm:$0xf] (%p7668_p12) }
 0x81f   : > { %4077 = vmatpush.bf16.msra.mxu3 %v8443_v61  ;;  %v8347_v61 = vor.u32 %v10381_v55, %v8344_v56  ;;  %v8411_v8 = vor.u32 %v10397_v57, %v8408_v58  ;;  %v10421_v56 = vld [vmem:[%s12696_s9 + $0x674] sm:$0xf]  ;;  %v8504_v57 = vld [vmem:[%s12696_s9 + $0x678] sm:$0xf0]  ;;  %v8544_v63 = vld [vmem:[%s12696_s9 + $0x6c8] sm:$0xf0] }
 0x820   : > { %4039 = vmatpush.bf16.msra.mxu0 %v8243_v9  ;;  %v3813_v3 = vpop.f32.mrf.mxu2  ;;  %v8272_v9 = vld [vmem:[%s12696_s9 + $0x4a8] sm:$0xf0]  ;;  %v3789_v20 = vpop.f32.mrf.mxu0  ;;  %v10437_v58 = vld [vmem:[%s12696_s9 + $0x6f4] sm:$0xf]  ;;  %v8831_v33 = vld [vmem:[#allocation36 + $0x100] sm:$0xf] (%p7668_p12) }
 0x821   : > { %4052 = vmatpush.bf16.msra.mxu1 %v8307_v4  ;;  %v10379_v4 = vld [vmem:[%s12696_s9 + $0x524] sm:$0xf]  ;;  %v3814_v7 = vadd.f32 %v3813_v3, %v3801_v49  ;;  %v3826_v15 = vpop.f32.mrf.mxu3  ;;  %v8275_v13 = vor.u32 %v10363_v1, %v8272_v9  ;;  %v3802_v30 = vpop.f32.mrf.mxu1  ;;  %v10469_v1 = vld [vmem:[%s12696_s9 + $0x7f4] sm:$0xf]  ;;  %v8696_v3 = vld [vmem:[%s12696_s9 + $0x7f8] sm:$0xf0]  ;;  %v8507_v9 = vor.u32 %v10421_v56, %v8504_v57 }
 0x822   : > { %4065 = vmatpush.bf16.msra.mxu2 %v8371_v6  ;;  %v8336_v6 = vld [vmem:[%s12696_s9 + $0x528] sm:$0xf0]  ;;  %v10451_v20 = vld [vmem:[%s12696_s9 + $0x764] sm:$0xf] }
 0x823   : > { %4078 = vmatpush.bf16.msra.mxu3 %v8435_v17  ;;  %v8400_v17 = vld [vmem:[%s12696_s9 + $0x5a8] sm:$0xf0]  ;;  %v13158_v19 = vadd.f32 %v3826_v15, %v3814_v7  ;;  %v8339_v26 = vor.u32 %v10379_v4, %v8336_v6  ;;  %v10419_v7 = vld [vmem:[%s12696_s9 + $0x664] sm:$0xf] }
 0x824   : > { %4040 = vmatpush.bf16.msra.mxu0 %v8235_v27  ;;  %v10345_v27 = vld [vmem:[%s12696_s9 + $0x414] sm:$0xf]  ;;  %v8403_v37 = vor.u32 %v10395_v16, %v8400_v17  ;;  %v8496_v15 = vld [vmem:[%s12696_s9 + $0x668] sm:$0xf0]  ;;  %v10435_v16 = vld [vmem:[%s12696_s9 + $0x6e4] sm:$0xf]  ;;  %v8699_v17 = vor.u32 %v10469_v1, %v8696_v3 }
 0x825   : > { %4053 = vmatpush.bf16.msra.mxu1 %v8299_v28  ;;  %v8200_v28 = vld [vmem:[%s12696_s9 + $0x418] sm:$0xf0]  ;;  %v10463_v56 = vld [vmem:[%s12696_s9 + $0x7c4] sm:$0xf]  ;;  %v8672_v57 = vld [vmem:[%s12696_s9 + $0x7c8] sm:$0xf0] }
 0x826   : > { %4066 = vmatpush.bf16.msra.mxu2 %v8363_v29  ;;  %v10361_v29 = vld [vmem:[%s12696_s9 + $0x494] sm:$0xf]  ;;  %v8203_v44 = vor.u32 %v10345_v27, %v8200_v28  ;;  %v8688_v27 = vld [vmem:[%s12696_s9 + $0x7e8] sm:$0xf0]  ;;  %v8499_v28 = vor.u32 %v10419_v7, %v8496_v15  ;;  %v8675_v3 = vor.u32 %v10463_v56, %v8672_v57  ;;  %v8664_v7 = vld [vmem:[%s12696_s9 + $0x7b8] sm:$0xf0] }
 0x827   : > { %4079 = vmatpush.bf16.msra.mxu3 %v8427_v39  ;;  %v10377_v39 = vld [vmem:[%s12696_s9 + $0x514] sm:$0xf]  ;;  %v8267_v47 = vor.u32 %v10361_v29, %v8264_v38  ;;  %v8488_v38 = vld [vmem:[%s12696_s9 + $0x658] sm:$0xf0]  ;;  %v10593_v5 = vld [vmem:[#allocation36 + $0x3cc] sm:$0xf0] (%p7668_p12) }
 0x828   : > { %4041 = vmatpush.bf16.msra.mxu0 %v8227_v46  ;;  %v8192_v46 = vld [vmem:[%s12696_s9 + $0x408] sm:$0xf0]  ;;  %v3815_v54 = vpop.f32.mrf.mxu2  ;;  %v10429_v1 = vld [vmem:[%s12696_s9 + $0x6b4] sm:$0xf] }
 0x829   : > { %4054 = vmatpush.bf16.msra.mxu1 %v8291_v48  ;;  %v8331_v48 = vor.u32 %v10377_v39, %v8328_v41  ;;  %v3828_v55 = vpop.f32.mrf.mxu3  ;;  %v8195_v49 = vor.u32 %v10343_v45, %v8192_v46  ;;  %v10433_v39 = vld [vmem:[%s12696_s9 + $0x6d4] sm:$0xf]  ;;  %v8680_v46 = vld [vmem:[%s12696_s9 + $0x7d8] sm:$0xf0]  ;;  %v10431_v54 = vld [vmem:[%s12696_s9 + $0x6c4] sm:$0xf] }
 0x82a   : > { %4067 = vmatpush.bf16.msra.mxu2 %v8355_v50  ;;  %v10359_v50 = vld [vmem:[%s12696_s9 + $0x484] sm:$0xf]  ;;  %v10465_v45 = vld [vmem:[%s12696_s9 + $0x7d4] sm:$0xf]  ;;  %v10493_v10 = vld [vmem:[#allocation36 + $0xac] sm:$0xf0] (%p7668_p12) }
 0x82b   : > { %4080 = vmatpush.bf16.msra.mxu3 %v8419_v0  ;;  %v10391_v0 = vld [vmem:[%s12696_s9 + $0x584] sm:$0xf]  ;;  %v8259_v62 = vor.u32 %v10359_v50, %v8256_v51 }
 0x82c   : > { %4042 = vmatpush.bf16.msra.mxu0 %v8219_v59  ;;  %v8568_v59 = vld [vmem:[%s12696_s9 + $0x6f8] sm:$0xf0]  ;;  %v10415_v51 = vld [vmem:[%s12696_s9 + $0x644] sm:$0xf] }
 0x82d   : > { %4055 = vmatpush.bf16.msra.mxu1 %v8283_v11  ;;  %v10453_v11 = vld [vmem:[%s12696_s9 + $0x774] sm:$0xf]  ;;  %v8571_v4 = vor.u32 %v10437_v58, %v8568_v59 }
 0x82e   : > { %4068 = vmatpush.bf16.msra.mxu2 %v8347_v61  ;;  %v8632_v61 = vld [vmem:[%s12696_s9 + $0x778] sm:$0xf0] }
 0x82f   : > { %4081 = vmatpush.bf16.msra.mxu3 %v8411_v8  ;;  %v8387_v8 = vor.u32 %v10391_v0, %v8384_v53  ;;  %v8635_v6 = vor.u32 %v10453_v11, %v8632_v61  ;;  %v10447_v0 = vld [vmem:[%s12696_s9 + $0x744] sm:$0xf]  ;;  %v8608_v53 = vld [vmem:[%s12696_s9 + $0x748] sm:$0xf0]  ;;  %v8547_v11 = vor.u32 %v10431_v54, %v8544_v63  ;;  %v8520_v54 = vld [vmem:[%s12696_s9 + $0x698] sm:$0xf0] }
 0x830   : > { %4043 = vmatpush.bf16.msra.mxu0 %v8211_v18  ;;  %v8560_v18 = vld [vmem:[%s12696_s9 + $0x6e8] sm:$0xf0]  ;;  %v8611_v61 = vor.u32 %v10447_v0, %v8608_v53  ;;  %v8584_v63 = vld [vmem:[%s12696_s9 + $0x718] sm:$0xf0]  ;;  %v10457_v0 = vld [vmem:[%s12696_s9 + $0x794] sm:$0xf] }
 0x831   : > { %4056 = vmatpush.bf16.msra.mxu1 %v8275_v13  ;;  %v8624_v13 = vld [vmem:[%s12696_s9 + $0x768] sm:$0xf0]  ;;  %v8563_v29 = vor.u32 %v10435_v16, %v8560_v18  ;;  %v10411_v18 = vld [vmem:[%s12696_s9 + $0x624] sm:$0xf]  ;;  %v8648_v53 = vld [vmem:[%s12696_s9 + $0x798] sm:$0xf0] }
 0x832   : > { %4069 = vmatpush.bf16.msra.mxu2 %v8339_v26  ;;  %v10467_v26 = vld [vmem:[%s12696_s9 + $0x7e4] sm:$0xf]  ;;  %v8627_v30 = vor.u32 %v10451_v20, %v8624_v13  ;;  %v8464_v20 = vld [vmem:[%s12696_s9 + $0x628] sm:$0xf0] }
 0x833   : > { %4082 = vmatpush.bf16.msra.mxu3 %v8403_v37  ;;  %v10417_v37 = vld [vmem:[%s12696_s9 + $0x654] sm:$0xf]  ;;  %v8691_v41 = vor.u32 %v10467_v26, %v8688_v27  ;;  %v10427_v13 = vld [vmem:[%s12696_s9 + $0x6a4] sm:$0xf] }
 0x834   : > { %4044 = vmatpush.bf16.msra.mxu0 %v8203_v44  ;;  %v8616_v44 = vld [vmem:[%s12696_s9 + $0x758] sm:$0xf0] }
 0x835   : > { %4057 = vmatpush.bf16.msra.mxu1 %v8267_v47  ;;  %v8491_v47 = vor.u32 %v10417_v37, %v8488_v38  ;;  %v8619_v50 = vor.u32 %v10449_v43, %v8616_v44  ;;  %v8467_v43 = vor.u32 %v10411_v18, %v8464_v20 }
 0x836   : > { %4070 = vmatpush.bf16.msra.mxu2 %v8331_v48  ;;  %v8555_v48 = vor.u32 %v10433_v39, %v8552_v42  ;;  %v10459_v39 = vld [vmem:[%s12696_s9 + $0x7a4] sm:$0xf] }
 0x837   : > { %4083 = vmatpush.bf16.msra.mxu3 %v8395_v40  ;;  %v8683_v40 = vor.u32 %v10465_v45, %v8680_v46 }
 0x838   : > { %4045 = vmatpush.bf16.msra.mxu0 %v8195_v49  ;;  %v3839_v55 = vpop.f32.mrf.mxu0  ;;  %v8483_v49 = vor.u32 %v10415_v51, %v8480_v52  ;;  %v10425_v51 = vld [vmem:[%s12696_s9 + $0x694] sm:$0xf] }
 0x839   : > { %4058 = vmatpush.bf16.msra.mxu1 %v8259_v62  ;;  %v3840_v58 = vadd.f32 %v3839_v55, %v13158_v19  ;;  %v3852_v59 = vpop.f32.mrf.mxu1  ;;  %v10413_v62 = vld [vmem:[%s12696_s9 + $0x634] sm:$0xf]  ;;  %v8600_v19 = vld [vmem:[%s12696_s9 + $0x738] sm:$0xf0]  ;;  %v8523_v56 = vor.u32 %v10425_v51, %v8520_v54 }
 0x83a   : > { %4071 = vmatpush.bf16.msra.mxu2 %v8323_v12  ;;  %v8472_v12 = vld [vmem:[%s12696_s9 + $0x638] sm:$0xf0] }
 0x83b   : > { %4084 = vmatpush.bf16.msra.mxu3 %v8387_v8  ;;  %4046 = vmatmul.bf16.vlgmr.msra.gmra.mxu0 %v12633_v21  ;;  %v3853_v8 = vadd.f32 %v3852_v59, %v3840_v58  ;;  %v8475_v15 = vor.u32 %v10413_v62, %v8472_v12  ;;  %v10407_v58 = vld [vmem:[%s12696_s9 + $0x604] sm:$0xf]  ;;  %v8576_v12 = vld [vmem:[%s12696_s9 + $0x708] sm:$0xf0]  ;;  %v9184_v21 = vor.u32 (%p7668_p12), %v10593_v5, %v9183_v34 }
 0x83c   : > { %4090 = vmatpush.bf16.msrb.mxu0 %v8507_v9  ;;  %4059 = vmatmul.bf16.vlgmr.msra.gmra.mxu1 %v12635_v14  ;;  %v8536_v9 = vld [vmem:[%s12696_s9 + $0x6b8] sm:$0xf0]  ;;  %v10423_v59 = vld [vmem:[%s12696_s9 + $0x684] sm:$0xf]  ;;  %v10505_v5 = vld [vmem:[#allocation36 + $0x10c] sm:$0xf0] (%p7668_p12) }
 0x83d   : > { %4103 = vmatpush.bf16.msrb.mxu1 %v8571_v4  ;;  %4072 = vmatmul.bf16.vlgmr.msra.gmra.mxu2 %v12637_v22  ;;  %v10445_v4 = vld [vmem:[%s12696_s9 + $0x734] sm:$0xf]  ;;  %v8539_v16 = vor.u32 %v10429_v1, %v8536_v9  ;;  %v10439_v62 = vld [vmem:[%s12696_s9 + $0x704] sm:$0xf]  ;;  %v8911_v14 = vld [vmem:[#allocation36 + $0x1a0] sm:$0xf] (%p7668_p12) }
 0x83e   : > { %4116 = vmatpush.bf16.msrb.mxu2 %v8635_v6  ;;  %4085 = vmatmul.bf16.vlgmr.msra.gmra.mxu3 %v12639_v23  ;;  %v10461_v6 = vld [vmem:[%s12696_s9 + $0x7b4] sm:$0xf]  ;;  %v10525_v22 = vld [vmem:[#allocation36 + $0x1ac] sm:$0xf0] (%p7668_p12)  ;;  %v9039_v23 = vld [vmem:[#allocation36 + $0x2a0] sm:$0xf] (%p7668_p12) }
 0x83f   : > { %4129 = vmatpush.bf16.msrb.mxu3 %v8699_v17  ;;  %v8603_v17 = vor.u32 %v10445_v4, %v8600_v19  ;;  %v8667_v26 = vor.u32 %v10461_v6, %v8664_v7  ;;  %v8579_v6 = vor.u32 %v10439_v62, %v8576_v12 }
 0x840   : > { %4091 = vmatpush.bf16.msrb.mxu0 %v8499_v28  ;;  %v3865_v27 = vpop.f32.mrf.mxu2  ;;  %v8528_v28 = vld [vmem:[%s12696_s9 + $0x6a8] sm:$0xf0]  ;;  %v3841_v42 = vpop.f32.mrf.mxu0 }
 0x841   : > { %4104 = vmatpush.bf16.msrb.mxu1 %v8563_v29  ;;  %v10443_v29 = vld [vmem:[%s12696_s9 + $0x724] sm:$0xf]  ;;  %v3866_v37 = vadd.f32 %v3865_v27, %v3853_v8  ;;  %v3878_v38 = vpop.f32.mrf.mxu3  ;;  %v3854_v44 = vpop.f32.mrf.mxu1  ;;  %v8531_v46 = vor.u32 %v10427_v13, %v8528_v28  ;;  %v8640_v8 = vld [vmem:[%s12696_s9 + $0x788] sm:$0xf0] }
 0x842   : > { %4117 = vmatpush.bf16.msrb.mxu2 %v8627_v30  ;;  %v8592_v30 = vld [vmem:[%s12696_s9 + $0x728] sm:$0xf0] }
 0x843   : > { %4130 = vmatpush.bf16.msrb.mxu3 %v8691_v41  ;;  %v8656_v41 = vld [vmem:[%s12696_s9 + $0x7a8] sm:$0xf0]  ;;  %v3879_v45 = vadd.f32 %v3878_v38, %v3866_v37 }
 0x844   : > { %4092 = vmatpush.bf16.msrb.mxu0 %v8491_v47  ;;  %v8595_v47 = vor.u32 %v10443_v29, %v8592_v30  ;;  %v8659_v52 = vor.u32 %v10459_v39, %v8656_v41 }
 0x845   : > { %4105 = vmatpush.bf16.msrb.mxu1 %v8555_v48  ;;  %v10409_v48 = vld [vmem:[%s12696_s9 + $0x614] sm:$0xf] }
 0x846   : > { %4118 = vmatpush.bf16.msrb.mxu2 %v8619_v50  ;;  %v8456_v50 = vld [vmem:[%s12696_s9 + $0x618] sm:$0xf0] }
 0x847   : > { %4131 = vmatpush.bf16.msrb.mxu3 %v8683_v40  ;;  %v10441_v40 = vld [vmem:[%s12696_s9 + $0x714] sm:$0xf]  ;;  %v8459_v55 = vor.u32 %v10409_v48, %v8456_v50 }
 0x848   : > { %4093 = vmatpush.bf16.msrb.mxu0 %v8483_v49  ;;  %v8587_v57 = vor.u32 %v10441_v40, %v8584_v63  ;;  %v8448_v49 = vld [vmem:[%s12696_s9 + $0x608] sm:$0xf0]  ;;  %v3867_v1 = vpop.f32.mrf.mxu2 }
 0x849   : > { %4106 = vmatpush.bf16.msrb.mxu1 %v8547_v11  ;;  %v8651_v11 = vor.u32 %v10457_v0, %v8648_v53  ;;  %v3880_v9 = vpop.f32.mrf.mxu3  ;;  %v8451_v4 = vor.u32 %v10407_v58, %v8448_v49 }
 0x84a   : > { %4119 = vmatpush.bf16.msrb.mxu2 %v8611_v61  ;;  %v8512_v61 = vld [vmem:[%s12696_s9 + $0x688] sm:$0xf0] }
 0x84b   : > { %4132 = vmatpush.bf16.msrb.mxu3 %v8675_v3  ;;  %v10455_v3 = vld [vmem:[%s12696_s9 + $0x784] sm:$0xf]  ;;  %v8515_v19 = vor.u32 %v10423_v59, %v8512_v61 }
 0x84c   : > { %4094 = vmatpush.bf16.msrb.mxu0 %v8475_v15  ;;  %v8643_v7 = vor.u32 %v10455_v3, %v8640_v8 }
 0x84d   : > { %4107 = vmatpush.bf16.msrb.mxu1 %v8539_v16 }
 0x84e   : > { %4120 = vmatpush.bf16.msrb.mxu2 %v8603_v17 }
 0x84f   : > { %4133 = vmatpush.bf16.msrb.mxu3 %v8667_v26 }
 0x850   : > { %4095 = vmatpush.bf16.msrb.mxu0 %v8467_v43 }
 0x851   : > { %4108 = vmatpush.bf16.msrb.mxu1 %v8531_v46 }
 0x852   : > { %4121 = vmatpush.bf16.msrb.mxu2 %v8595_v47 }
 0x853   : > { %4134 = vmatpush.bf16.msrb.mxu3 %v8659_v52 }
 0x854   : > { %4096 = vmatpush.bf16.msrb.mxu0 %v8459_v55 }
 0x855   : > { %4109 = vmatpush.bf16.msrb.mxu1 %v8523_v56 }
 0x856   : > { %4122 = vmatpush.bf16.msrb.mxu2 %v8587_v57 }
 0x857   : > { %4135 = vmatpush.bf16.msrb.mxu3 %v8651_v11 }
 0x858   : > { %4097 = vmatpush.bf16.msrb.mxu0 %v8451_v4  ;;  %v3891_v15 = vpop.f32.mrf.mxu0 }
 0x859   : > { %4110 = vmatpush.bf16.msrb.mxu1 %v8515_v19  ;;  %v3892_v16 = vadd.f32 %v3891_v15, %v3879_v45  ;;  %v3904_v17 = vpop.f32.mrf.mxu1 }
 0x85a   : > { %4123 = vmatpush.bf16.msrb.mxu2 %v8579_v6 }
 0x85b   : > { %4136 = vmatpush.bf16.msrb.mxu3 %v8643_v7  ;;  %4098 = vmatmul.bf16.vlgmr.msrb.gmra.mxu0 %v12641_v31  ;;  %v3905_v18 = vadd.f32 %v3904_v17, %v3892_v16  ;;  %v8784_v31 = vor.u32 (%p7668_p12), %v10493_v10, %v8783_v60  ;;  %v8959_v60 = vld [vmem:[#allocation36 + $0x200] sm:$0xf] (%p7668_p12)  ;;  %v10537_v10 = vld [vmem:[#allocation36 + $0x20c] sm:$0xf0] (%p7668_p12) }
 0x85c   : > { %4111 = vmatmul.bf16.vlgmr.msrb.gmra.mxu1 %v12643_v32  ;;  %v10557_v32 = vld [vmem:[#allocation36 + $0x2ac] sm:$0xf0] (%p7668_p12) }
 0x85d   : > { %4124 = vmatmul.bf16.vlgmr.msrb.gmra.mxu2 %v12645_v35  ;;  %v9167_v35 = vld [vmem:[#allocation36 + $0x3a0] sm:$0xf] (%p7668_p12) }
 0x85e   : > { %4137 = vmatmul.bf16.vlgmr.msrb.gmra.mxu3 %v12647_v36  ;;  %v10589_v36 = vld [vmem:[#allocation36 + $0x3ac] sm:$0xf0] (%p7668_p12) }
 0x860   : > { %v3917_v20 = vpop.f32.mrf.mxu2  ;;  %v3893_v27 = vpop.f32.mrf.mxu0 }
 0x861   : > { %v3918_v13 = vadd.f32 %v3917_v20, %v3905_v18  ;;  %v3930_v26 = vpop.f32.mrf.mxu3  ;;  %v3906_v28 = vpop.f32.mrf.mxu1 }
 0x863   : > { %v3931_v29 = vadd.f32 %v3930_v26, %v3918_v13 }
 0x868   : > { %v3919_v30 = vpop.f32.mrf.mxu2 }
 0x869   : > { %v3932_v37 = vpop.f32.mrf.mxu3 }
 0x878   : > { %v3943_v38 = vpop.f32.mrf.mxu0 }
 0x879   : > { %v3956_v39 = vpop.f32.mrf.mxu1 }
 0x87a   : > { %v3957_v41 = vadd.f32 %v3956_v39, %v3943_v38 }
 0x880   : > { %v3969_v42 = vpop.f32.mrf.mxu2  ;;  %v3945_v47 = vpop.f32.mrf.mxu0 }
 0x881   : > { %v3970_v43 = vadd.f32 %v3969_v42, %v3957_v41  ;;  %v3982_v44 = vpop.f32.mrf.mxu3  ;;  %v3958_v48 = vpop.f32.mrf.mxu1  ;;  %v8815_v41 = vld [vmem:[#allocation36 + $0xe0] sm:$0xf] (%p7668_p12)  ;;  %v10501_v42 = vld [vmem:[#allocation36 + $0xec] sm:$0xf0] (%p7668_p12) }
 0x882   :  { %v9071_v47 = vld [vmem:[#allocation36 + $0x2e0] sm:$0xf] (%p7668_p12)  ;;  %v10565_v48 = vld [vmem:[#allocation36 + $0x2ec] sm:$0xf0] (%p7668_p12) }
 0x883   : > { %v3983_v46 = vadd.f32 %v3982_v44, %v3970_v43  ;;  %v8943_v43 = vld [vmem:[#allocation36 + $0x1e0] sm:$0xf] (%p7668_p12)  ;;  %v8816_v44 = vor.u32 (%p7668_p12), %v10501_v42, %v8815_v41  ;;  %v10545_v42 = vld [vmem:[#allocation36 + $0x24c] sm:$0xf0] (%p7668_p12) }
 0x884   :  { %v8991_v41 = vld [vmem:[#allocation36 + $0x240] sm:$0xf] (%p7668_p12) }
 0x885   :  { %5809 = vmatpush.bf16.msra.mxu0 (%p7668_p12), %v8816_v44  ;;  %v10577_v44 = vld [vmem:[#allocation36 + $0x34c] sm:$0xf0] (%p7668_p12) }
 0x888   : > { %v3971_v45 = vpop.f32.mrf.mxu2 }
 0x889   : > { %v3984_v50 = vpop.f32.mrf.mxu3 }
 0x88a   :  { %v9072_v50 = vor.u32 (%p7668_p12), %v10565_v48, %v9071_v47  ;;  %v8992_v48 = vor.u32 (%p7668_p12), %v10545_v42, %v8991_v41  ;;  %v13259_v41 = vld [vmem:[#allocation36 + $0x48c] sm:$0xf0] (%p7668_p12)  ;;  %v13261_v42 = vld [vmem:[#allocation36 + $0x580] sm:$0xf] (%p7668_p12) }
 0x88c   :  { %5835 = vmatpush.bf16.msra.mxu2 (%p7668_p12), %v9072_v50  ;;  %v10477_v50 = vld [vmem:[#allocation36 + $0x2c] sm:$0xf0] (%p7668_p12) }
 0x890   :  { %5836 = vmatpush.bf16.msra.mxu2 (%p7668_p12), %v9056_v2 }
 0x898   : > { %v3995_v51 = vpop.f32.mrf.mxu0 }
 0x899   : > { %v4008_v52 = vpop.f32.mrf.mxu1  ;;  %v3996_v58 = vadd.f32 %v3995_v51, %v3983_v46  ;;  %v10533_v46 = vld [vmem:[#allocation36 + $0x1ec] sm:$0xf0] (%p7668_p12) }
 0x89a   :  { %v8944_v45 = vor.u32 (%p7668_p12), %v10533_v46, %v8943_v43  ;;  %v10597_v51 = vld [vmem:[#allocation36 + $0x3ec] sm:$0xf0] (%p7668_p12)  ;;  %v9119_v43 = vld [vmem:[#allocation36 + $0x340] sm:$0xf] (%p7668_p12) }
 0x89b   : > { %v4009_v61 = vadd.f32 %v4008_v52, %v3996_v58  ;;  %v8799_v52 = vld [vmem:[#allocation36 + $0xc0] sm:$0xf] (%p7668_p12)  ;;  %v10489_v58 = vld [vmem:[#allocation36 + $0x8c] sm:$0xf0] (%p7668_p12) }
 0x89c   :  { %5822 = vmatpush.bf16.msra.mxu1 (%p7668_p12), %v8944_v45  ;;  %v8719_v45 = vld [vmem:[#allocation36 + $0x20] sm:$0xf] (%p7668_p12) }
 0x8a0   : > { %v4021_v54 = vpop.f32.mrf.mxu2  ;;  %v3997_v63 = vpop.f32.mrf.mxu0 }
 0x8a1   : > { %v4034_v40 = vpop.f32.mrf.mxu3  ;;  %v4010_v0 = vpop.f32.mrf.mxu1  ;;  %v4022_v12 = vadd.f32 %v4021_v54, %v4009_v61  ;;  %v8927_v63 = vld [vmem:[#allocation36 + $0x1c0] sm:$0xf] (%p7668_p12) }
 0x8a2   :  { %v10529_v0 = vld [vmem:[#allocation36 + $0x1cc] sm:$0xf0] (%p7668_p12)  ;;  %v9023_v61 = vld [vmem:[#allocation36 + $0x280] sm:$0xf] (%p7668_p12) }
 0x8a3   : > { %v4035_v8 = vadd.f32 %v4034_v40, %v4022_v12  ;;  %v10497_v40 = vld [vmem:[#allocation36 + $0xcc] sm:$0xf0] (%p7668_p12)  ;;  %v8928_v24 = vor.u32 (%p7668_p12), %v10529_v0, %v8927_v63  ;;  %v9151_v12 = vld [vmem:[#allocation36 + $0x380] sm:$0xf] (%p7668_p12) }
 0x8a4   :  { %v9103_v63 = vld [vmem:[#allocation36 + $0x320] sm:$0xf] (%p7668_p12)  ;;  %v10573_v0 = vld [vmem:[#allocation36 + $0x32c] sm:$0xf0] (%p7668_p12) }
 0x8a5   :  { %5823 = vmatpush.bf16.msra.mxu1 (%p7668_p12), %v8928_v24  ;;  %v8703_v24 = vld [vmem:[#allocation36] sm:$0xf] (%p7668_p12) }
 0x8a8   : > { %v4023_v53 = vpop.f32.mrf.mxu2 }
 0x8a9   : > { %v4036_v55 = vpop.f32.mrf.mxu3  ;;  %v8800_v53 = vor.u32 (%p7668_p12), %v10497_v40, %v8799_v52  ;;  %v10509_v52 = vld [vmem:[#allocation36 + $0x12c] sm:$0xf0] (%p7668_p12) }
 0x8aa   :  { %v8912_v55 = vor.u32 (%p7668_p12), %v10525_v22, %v8911_v14  ;;  %v10541_v40 = vld [vmem:[#allocation36 + $0x22c] sm:$0xf0] (%p7668_p12)  ;;  %v9087_v14 = vld [vmem:[#allocation36 + $0x300] sm:$0xf] (%p7668_p12) }
 0x8ab   :  { %5810 = vmatpush.bf16.msra.mxu0 (%p7668_p12), %v8800_v53  ;;  %v8720_v53 = vor.u32 (%p7668_p12), %v10477_v50, %v8719_v45  ;;  %v10569_v22 = vld [vmem:[#allocation36 + $0x30c] sm:$0xf0] (%p7668_p12) }
 0x8ac   :  { %5824 = vmatpush.bf16.msra.mxu1 (%p7668_p12), %v8912_v55  ;;  %v9583_v55 = vld [vmem:[#allocation36 + $0x6e0] sm:$0xf] (%p7668_p12) }
 0x8af   :  { %5811 = vmatpush.bf16.msra.mxu0 (%p7668_p12), %v8784_v31  ;;  %v10629_v31 = vld [vmem:[#allocation36 + $0x4ec] sm:$0xf0] (%p7668_p12) }
 0x8b8   : > { %v4047_v56 = vpop.f32.mrf.mxu0 }
 0x8b9   : > { %v4060_v57 = vpop.f32.mrf.mxu1  ;;  %v4048_v9 = vadd.f32 %v4047_v56, %v4035_v8  ;;  %v9040_v56 = vor.u32 (%p7668_p12), %v10557_v32, %v9039_v23  ;;  %v9327_v23 = vld [vmem:[#allocation36 + $0x4e0] sm:$0xf] (%p7668_p12) }
 0x8ba   :  { %v9455_v32 = vld [vmem:[#allocation36 + $0x5e0] sm:$0xf] (%p7668_p12) }
 0x8bb   : > { %v4061_v4 = vadd.f32 %v4060_v57, %v4048_v9  ;;  %v8767_v57 = vld [vmem:[#allocation36 + $0x80] sm:$0xf] (%p7668_p12)  ;;  %5837 = vmatpush.bf16.msra.mxu2 (%p7668_p12), %v9040_v56  ;;  %v10693_v56 = vld [vmem:[#allocation36 + $0x6ec] sm:$0xf0] (%p7668_p12) }
 0x8c0   : > { %v4073_v49 = vpop.f32.mrf.mxu2  ;;  %v4049_v11 = vpop.f32.mrf.mxu0 }
 0x8c1   : > { %v4086_v59 = vpop.f32.mrf.mxu3  ;;  %v4062_v62 = vpop.f32.mrf.mxu1  ;;  %v4074_v19 = vadd.f32 %v4073_v49, %v4061_v4  ;;  %v8895_v49 = vld [vmem:[#allocation36 + $0x180] sm:$0xf] (%p7668_p12)  ;;  %v10521_v11 = vld [vmem:[#allocation36 + $0x18c] sm:$0xf0] (%p7668_p12) }
 0x8c2   :  { %v10553_v62 = vld [vmem:[#allocation36 + $0x28c] sm:$0xf0] (%p7668_p12)  ;;  %v8896_v8 = vor.u32 (%p7668_p12), %v10521_v11, %v8895_v49  ;;  %v8751_v4 = vld [vmem:[#allocation36 + $0x60] sm:$0xf] (%p7668_p12)  ;;  %v8960_v49 = vor.u32 (%p7668_p12), %v10537_v10, %v8959_v60 }
 0x8c3   : > { %v4087_v6 = vadd.f32 %v4086_v59, %v4074_v19  ;;  %v9168_v59 = vor.u32 (%p7668_p12), %v10589_v36, %v9167_v35  ;;  %v9024_v9 = vor.u32 (%p7668_p12), %v10553_v62, %v9023_v61  ;;  %v10485_v19 = vld [vmem:[#allocation36 + $0x6c] sm:$0xf0] (%p7668_p12)  ;;  %v8704_v36 = vor.u32 (%p7668_p12), %v10473_v25, %v8703_v24  ;;  %v9311_v11 = vld [vmem:[#allocation36 + $0x4c0] sm:$0xf] (%p7668_p12) }
 0x8c4   :  { %5825 = vmatpush.bf16.msra.mxu1 (%p7668_p12), %v8896_v8  ;;  %v10661_v35 = vld [vmem:[#allocation36 + $0x5ec] sm:$0xf0] (%p7668_p12)  ;;  %v9088_v62 = vor.u32 (%p7668_p12), %v10569_v22, %v9087_v14  ;;  %v9567_v8 = vld [vmem:[#allocation36 + $0x6c0] sm:$0xf] (%p7668_p12) }
 0x8c5   :  { %5838 = vmatpush.bf16.msra.mxu2 (%p7668_p12), %v9024_v9  ;;  %v10625_v61 = vld [vmem:[#allocation36 + $0x4cc] sm:$0xf0] (%p7668_p12)  ;;  %v9456_v9 = vor.u32 (%p7668_p12), %v10661_v35, %v9455_v32  ;;  %v9391_v35 = vld [vmem:[#allocation36 + $0x560] sm:$0xf] (%p7668_p12) }
 0x8c6   :  { %v13282_v25 = vld [vmem:[#allocation33] sm:$0xff] (%p7668_p12) }
 0x8c7   :  { %v4183_v60 = vperm.slane (%p7668_p12), %v13282_v25, 1  ;;  %v4184_v10 = vperm.slane (%p7668_p12), %v13282_v25, 2  ;;  %v10613_v14 = vld [vmem:[#allocation36 + $0x46c] sm:$0xf0] (%p7668_p12) }
 0x8c8   : > { %v4075_v1 = vpop.f32.mrf.mxu2 }
 0x8c9   : > { %v4088_v3 = vpop.f32.mrf.mxu3  ;;  %v10585_v1 = vld [vmem:[#allocation36 + $0x38c] sm:$0xf0] (%p7668_p12) }
 0x8ca   :  { %v8768_v3 = vor.u32 (%p7668_p12), %v10489_v58, %v8767_v57  ;;  %v9711_v57 = vld [vmem:[#allocation36 + $0x7e0] sm:$0xf] (%p7668_p12)  ;;  %v8832_v58 = vor.u32 (%p7668_p12), %v10505_v5, %v8831_v33  ;;  %v13284_v33 = vld [vmem:[#allocation35] sm:$0xff] (%p7668_p12)  ;;  %v4182_v5 = vperm.slane (%p7668_p12), %v13282_v25, 0 }
 0x8cb   :  { %v4208_v32 = vperm.slane (%p7668_p12), %v13284_v33, 0 }
 0x8cc   :  { %5812 = vmatpush.bf16.msra.mxu0 (%p7668_p12), %v8768_v3  ;;  %v10657_v3 = vld [vmem:[#allocation36 + $0x5cc] sm:$0xf0] (%p7668_p12) }
 0x8d8   : > { %v4099_v7 = vpop.f32.mrf.mxu0 }
 0x8d9   : > { %v4112_v15 = vpop.f32.mrf.mxu1  ;;  %v4100_v16 = vadd.f32 %v4099_v7, %v4087_v6  ;;  %v8879_v6 = vld [vmem:[#allocation36 + $0x160] sm:$0xf] (%p7668_p12)  ;;  %v9152_v7 = vor.u32 (%p7668_p12), %v10585_v1, %v9151_v12  ;;  %v9328_v12 = vor.u32 (%p7668_p12), %v10629_v31, %v9327_v23  ;;  %v4185_v31 = vperm.slane (%p7668_p12), %v13282_v25, 3 }
 0x8da   :  { %v9439_v1 = vld [vmem:[#allocation36 + $0x5c0] sm:$0xf] (%p7668_p12) }
 0x8db   : > { %v4113_v17 = vadd.f32 %v4112_v15, %v4100_v16  ;;  %v10517_v15 = vld [vmem:[#allocation36 + $0x16c] sm:$0xf0] (%p7668_p12)  ;;  %v9007_v16 = vld [vmem:[#allocation36 + $0x260] sm:$0xf] (%p7668_p12) }
 0x8e0   : > { %v4125_v18 = vpop.f32.mrf.mxu2  ;;  %v4101_v26 = vpop.f32.mrf.mxu0 }
 0x8e1   : > { %v4126_v20 = vadd.f32 %v4125_v18, %v4113_v17  ;;  %v4138_v13 = vpop.f32.mrf.mxu3  ;;  %v4114_v27 = vpop.f32.mrf.mxu1  ;;  %v10549_v17 = vld [vmem:[#allocation36 + $0x26c] sm:$0xf0] (%p7668_p12)  ;;  %v9135_v18 = vld [vmem:[#allocation36 + $0x360] sm:$0xf] (%p7668_p12)  ;;  %v8880_v26 = vor.u32 (%p7668_p12), %v10517_v15, %v8879_v6 }
 0x8e2   :  { %v9008_v27 = vor.u32 (%p7668_p12), %v10549_v17, %v9007_v16  ;;  %v9695_v6 = vld [vmem:[#allocation36 + $0x7c0] sm:$0xf] (%p7668_p12)  ;;  %v10621_v17 = vld [vmem:[#allocation36 + $0x4ac] sm:$0xf0] (%p7668_p12) }
 0x8e3   : > { %v4139_v28 = vadd.f32 %v4138_v13, %v4126_v20  ;;  %v10581_v20 = vld [vmem:[#allocation36 + $0x36c] sm:$0xf0] (%p7668_p12)  ;;  %v8752_v13 = vor.u32 (%p7668_p12), %v10485_v19, %v8751_v4  ;;  %5826 = vmatpush.bf16.msra.mxu1 (%p7668_p12), %v8880_v26  ;;  %v9584_v4 = vor.u32 (%p7668_p12), %v10693_v56, %v9583_v55  ;;  %v9295_v16 = vld [vmem:[#allocation36 + $0x4a0] sm:$0xf] (%p7668_p12) }
 0x8e4   :  { %5839 = vmatpush.bf16.msra.mxu2 (%p7668_p12), %v9008_v27  ;;  %v10689_v19 = vld [vmem:[#allocation36 + $0x6cc] sm:$0xf0] (%p7668_p12)  ;;  %v9312_v27 = vor.u32 (%p7668_p12), %v10625_v61, %v9311_v11  ;;  %v9519_v55 = vld [vmem:[#allocation36 + $0x660] sm:$0xf] (%p7668_p12) }
 0x8e5   : > { %v4144_v30 = vrot.slane %v4139_v28, 6  ;;  %2144 = sbr.rel (!%p7668_p12) target bundleno = 1842 (0x732), region = 359  ;;  %v8735_v28 = vld [vmem:[#allocation36 + $0x40] sm:$0xf] (%p7668_p12)  ;;  %5813 = vmatpush.bf16.msra.mxu0 (%p7668_p12), %v8752_v13  ;;  %v10685_v26 = vld [vmem:[#allocation36 + $0x6ac] sm:$0xf0] (%p7668_p12) }
 0x8e6   :  { %v9551_v13 = vld [vmem:[#allocation36 + $0x6a0] sm:$0xf] (%p7668_p12) }
 0x8e7   : > { %v4145_v37 = vsel %vm654_vm4, %v3931_v29, %v4144_v30  ;;  %v9199_v29 = vld [vmem:[#allocation36 + $0x3e0] sm:$0xf] (%p7668_p12)  ;;  %v10481_v30 = vld [vmem:[#allocation36 + $0x4c] sm:$0xf0] (%p7668_p12)  ;;  %v9552_v50 = vor.u32 (%p7668_p12), %v10685_v26, %v9551_v13 }
 0x8e8   : > { %4151 = vst [vmem:[%s4150_s14] sm:$0xf] %v4145_v37  ;;  %v4127_v38 = vpop.f32.mrf.mxu2  ;;  %v9200_v54 = vor.u32 (%p7668_p12), %v10597_v51, %v9199_v29  ;;  %v8863_v37 = vld [vmem:[#allocation36 + $0x140] sm:$0xf] (%p7668_p12)  ;;  %v8736_v46 = vor.u32 (%p7668_p12), %v10481_v30, %v8735_v28  ;;  %v9120_v51 = vor.u32 (%p7668_p12), %v10577_v44, %v9119_v43  ;;  %5840 = vmatpush.bf16.msra.mxu2 (%p7668_p12), %v8992_v48  ;;  %v10717_v30 = vld [vmem:[#allocation36 + $0x7ac] sm:$0xf0] (%p7668_p12) }
 0x8e9   : > { %v4140_v39 = vpop.f32.mrf.mxu3  ;;  %v9136_v38 = vor.u32 (%p7668_p12), %v10581_v20, %v9135_v18  ;;  %v8847_v29 = vld [vmem:[#allocation36 + $0x120] sm:$0xf] (%p7668_p12)  ;;  %v10653_v20 = vld [vmem:[#allocation36 + $0x5ac] sm:$0xf0] (%p7668_p12)  ;;  %v9296_v48 = vor.u32 (%p7668_p12), %v10621_v17, %v9295_v16  ;;  %p11850_p12 = scmp.ne.s32.totalorder (%p7668_p12), %s11848_s29, %s11849_s26 }
 0x8ea   :  { %5848 = vmatpush.bf16.msra.mxu3 %v9200_v54  ;;  %v10513_v39 = vld [vmem:[#allocation36 + $0x14c] sm:$0xf0]  ;;  %v8975_v54 = vld [vmem:[#allocation36 + $0x220] sm:$0xf]  ;;  %5814 = vmatpush.bf16.msra.mxu0 %v8736_v46  ;;  %v8848_v34 = vor.u32 %v10509_v52, %v8847_v29 }
 0x8eb   :  { %v8864_v47 = vor.u32 %v10513_v39, %v8863_v37  ;;  %v8976_v2 = vor.u32 %v10541_v40, %v8975_v54  ;;  %v9423_v18 = vld [vmem:[#allocation36 + $0x5a0] sm:$0xf]  ;;  %v9568_v39 = vor.u32 %v10689_v19, %v9567_v8  ;;  %v13263_v43 = vld [vmem:[#allocation36 + $0x58c] sm:$0xf0]  ;;  %v13273_v54 = vld [vmem:[#allocation32] sm:$0xff]  ;;  %p11855_p7 = pnand %p11854_p6, %p11850_p12 }
 0x8ec   :  { %v9679_v28 = vld [vmem:[#allocation36 + $0x7a0] sm:$0xf]  ;;  %v9424_v45 = vor.u32 %v10653_v20, %v9423_v18  ;;  %v9408_v52 = vor.u32 %v13263_v43, %v13261_v42  ;;  %v4158_v24 = vperm.slane %v13273_v54, 2 }
 0x8ed   :  { %5827 = vmatpush.bf16.msra.mxu1 %v8864_v47  ;;  %5841 = vmatpush.bf16.msra.mxu2 %v8976_v2  ;;  %v13257_v37 = vld [vmem:[#allocation36 + $0x480] sm:$0xf]  ;;  %v13267_v47 = vld [vmem:[#allocation36 + $0x68c] sm:$0xf0]  ;;  %v9680_v29 = vor.u32 %v10717_v30, %v9679_v28  ;;  %v4159_v2 = vperm.slane %v13273_v54, 3 }
 0x8ee   :  { %5849 = vmatpush.bf16.msra.mxu3 %v9184_v21  ;;  %v9104_v21 = vor.u32 %v10573_v0, %v9103_v63  ;;  %5815 = vmatpush.bf16.msra.mxu0 %v8720_v53  ;;  %v13265_v46 = vld [vmem:[#allocation36 + $0x680] sm:$0xf]  ;;  %v4156_v0 = vperm.slane %v13273_v54, 0  ;;  %v4157_v53 = vperm.slane %v13273_v54, 1  ;;  %v4165_v23 = vrot.slane %v4158_v24, 4 }
 0x8ef   :  { %v9536_v40 = vor.u32 %v13267_v47, %v13265_v46  ;;  %v13277_v63 = vld [vmem:[#allocation36 + $0x780] sm:$0xf]  ;;  %v4166_v56 = vrot.slane %v4159_v2, 2  ;;  %v4152_v11 = vld [vmem:[#allocation5] sm:$0xff] }
 0x8f0   :  { %v4164_v22 = vrot.slane %v4157_v53, 6  ;;  %v9647_v8 = vld [vmem:[#allocation36 + $0x760] sm:$0xf]  ;;  %v10673_v30 = vld [vmem:[#allocation36 + $0x64c] sm:$0xf0] }
 0x8f1   :  { %5828 = vmatpush.bf16.msra.mxu1 %v8848_v34  ;;  %5842 = vmatpush.bf16.msra.mxu2 %v8960_v49  ;;  %v10713_v34 = vld [vmem:[#allocation36 + $0x78c] sm:$0xf0]  ;;  %v4209_v49 = vperm.slane %v13284_v33, 1  ;;  %v9375_v26 = vld [vmem:[#allocation36 + $0x540] sm:$0xf] }
 0x8f2   :  { %5850 = vmatpush.bf16.msra.mxu3 %v9168_v59  ;;  %v10725_v59 = vld [vmem:[#allocation36 + $0x7ec] sm:$0xf0]  ;;  %5816 = vmatpush.bf16.msra.mxu0 %v8704_v36  ;;  %v4170_v61 = vsel %vm654_vm4, %v4156_v0, %v4164_v22  ;;  %v9503_v28 = vld [vmem:[#allocation36 + $0x640] sm:$0xf] }
 0x8f3   :  { %v9712_v15 = vor.u32 %v10725_v59, %v9711_v57  ;;  %v10645_v36 = vld [vmem:[#allocation36 + $0x56c] sm:$0xf0]  ;;  %v4190_v57 = vrot.slane %v4183_v60, 6  ;;  %v9631_v43 = vld [vmem:[#allocation36 + $0x740] sm:$0xf] }
 0x8f4   :  { %v10677_v59 = vld [vmem:[#allocation36 + $0x66c] sm:$0xf0]  ;;  %v9231_v47 = vld [vmem:[#allocation36 + $0x420] sm:$0xf] }
 0x8f5   :  { %5829 = vmatpush.bf16.msra.mxu1 %v8832_v58  ;;  %5887 = vmatpush.bf16.msrb.mxu2 %v9584_v4  ;;  %v4191_v58 = vrot.slane %v4184_v10, 4  ;;  %v4171_v4 = vsel %vm1947_vm1, %v4165_v23, %v4166_v56  ;;  %v4196_v19 = vsel %vm654_vm4, %v4182_v5, %v4190_v57  ;;  %v9520_v42 = vor.u32 %v10677_v59, %v9519_v55  ;;  %v9487_v0 = vld [vmem:[#allocation36 + $0x620] sm:$0xf]  ;;  %v10669_v53 = vld [vmem:[#allocation36 + $0x62c] sm:$0xf0] }
 0x8f6   :  { %5851 = vmatpush.bf16.msra.mxu3 %v9152_v7  ;;  %v10721_v7 = vld [vmem:[#allocation36 + $0x7cc] sm:$0xf0]  ;;  %5861 = vmatpush.bf16.msrb.mxu0 %v9328_v12  ;;  %v4210_v12 = vperm.slane %v13284_v33, 2  ;;  %v4172_v16 = vsel %vm621_vm0, %v4170_v61, %v4171_v4  ;;  %v13305_v24 = vld [vmem:[#allocation36 + $0x720] sm:$0xf]  ;;  %v9504_v10 = vor.u32 %v10673_v30, %v9503_v28  ;;  %v9488_v55 = vor.u32 %v10669_v53, %v9487_v0 }
 0x8f7   :  { %v9696_v44 = vor.u32 %v10721_v7, %v9695_v6  ;;  %v4216_v6 = vrot.slane %v4209_v49, 6  ;;  %v9247_v7 = vld [vmem:[#allocation36 + $0x440] sm:$0xf]  ;;  %v13309_v5 = vld [vmem:[#allocation36 + $0x40c] sm:$0xf0]  ;;  %v4160_v49 = vperm.slane %v13273_v54, 4 }
 0x8f8   :  { %v4217_v18 = vrot.slane %v4210_v12, 4  ;;  %v13307_v2 = vld [vmem:[#allocation36 + $0x400] sm:$0xf]  ;;  %v4161_v59 = vperm.slane %v13273_v54, 5  ;;  %v13331_v12 = vld [vmem:[#allocation36 + $0x70c] sm:$0xf0] }
 0x8f9   :  { %5874 = vmatpush.bf16.msrb.mxu1 %v9456_v9  ;;  %5888 = vmatpush.bf16.msrb.mxu2 %v9568_v39  ;;  %v10709_v9 = vld [vmem:[#allocation36 + $0x76c] sm:$0xf0]  ;;  %v4222_v39 = vsel %vm654_vm4, %v4208_v32, %v4216_v6  ;;  %v13315_v32 = vld [vmem:[#allocation36 + $0x600] sm:$0xf]  ;;  %v9216_v57 = vor.u32 %v13309_v5, %v13307_v2  ;;  %v13338_v4 = vld [vmem:[#allocation36 + $0xf0] sm:$0xf0] }
 0x8fa   :  { %5852 = vmatpush.bf16.msra.mxu3 %v9136_v38  ;;  %v9440_v38 = vor.u32 %v10657_v3, %v9439_v1  ;;  %5862 = vmatpush.bf16.msrb.mxu0 %v9312_v27  ;;  %v4211_v1 = vperm.slane %v13284_v33, 3  ;;  %v9664_v3 = vor.u32 %v10713_v34, %v13277_v63  ;;  %v10641_v27 = vld [vmem:[#allocation36 + $0x54c] sm:$0xf0] }
 0x8fb   :  { %v10637_v63 = vld [vmem:[#allocation36 + $0x52c] sm:$0xf0]  ;;  %v9376_v60 = vor.u32 %v10641_v27, %v9375_v26  ;;  %v4153_v26 = vld [vmem:[#allocation5 + $0x8] sm:$0xff] }
 0x8fc   :  { %v4218_v20 = vrot.slane %v4211_v1, 2  ;;  %v10701_v34 = vld [vmem:[#allocation36 + $0x72c] sm:$0xf0]  ;;  %v4163_v1 = vperm.slane %v13273_v54, 7 }
 0x8fd   :  { %5875 = vmatpush.bf16.msrb.mxu1 %v9440_v38  ;;  %5889 = vmatpush.bf16.msrb.mxu2 %v9552_v50  ;;  %v9616_v56 = vor.u32 %v10701_v34, %v13305_v24 }
 0x8fe   :  { %5853 = vmatpush.bf16.msra.mxu3 %v9120_v51  ;;  %v9280_v51 = vor.u32 %v13259_v41, %v13257_v37  ;;  %5863 = vmatpush.bf16.msrb.mxu0 %v9296_v48  ;;  %v4178_v37 = vadd.f32 %v4172_v16, %v4152_v11  ;;  %v9392_v41 = vor.u32 %v10645_v36, %v9391_v35  ;;  %v13317_v35 = vld [vmem:[#allocation36 + $0x60c] sm:$0xf0]  ;;  %v4162_v11 = vperm.slane %v13273_v54, 6  ;;  %v13342_v16 = vld [vmem:[#allocation36 + $0x1e4] sm:$0xf] }
 0x8ff   :  { %v4223_v46 = vsel %vm1947_vm1, %v4217_v18, %v4218_v20  ;;  %v9648_v48 = vor.u32 %v10709_v9, %v9647_v8  ;;  %v9472_v61 = vor.u32 %v13317_v35, %v13315_v32  ;;  %v4187_v8 = vperm.slane %v13282_v25, 5  ;;  %v13336_v9 = vld [vmem:[#allocation36 + $0xe4] sm:$0xf]  ;;  %v8929_v35 = vld [vmem:[#allocation36 + $0x1d0] sm:$0xf0] }
 0x900   :  { %v4224_v50 = vsel %vm621_vm0, %v4222_v39, %v4223_v46  ;;  %v4168_v6 = vrot.slane %v4162_v11, 4  ;;  %v4212_v54 = vperm.slane %v13284_v33, 4  ;;  %v4213_v20 = vperm.slane %v13284_v33, 5  ;;  %v10595_v46 = vld [vmem:[#allocation36 + $0x3e4] sm:$0xf] }
 0x901   :  { %5876 = vmatpush.bf16.msrb.mxu1 %v9424_v45  ;;  %5890 = vmatpush.bf16.msrb.mxu2 %v9536_v40  ;;  %v4193_v18 = vrot.slane %v4187_v8, 6 }
 0x902   :  { %5854 = vmatpush.bf16.msra.mxu3 %v9104_v21  ;;  %v9263_v21 = vld [vmem:[#allocation36 + $0x460] sm:$0xf]  ;;  %5864 = vmatpush.bf16.msrb.mxu0 %v9280_v51 }
 0x903   :  { %v9264_v13 = vor.u32 %v10613_v14, %v9263_v21  ;;  %v9359_v51 = vld [vmem:[#allocation36 + $0x520] sm:$0xf]  ;;  %v13313_v14 = vld [vmem:[#allocation36 + $0x50c] sm:$0xf0] }
 0x904   :  { %v13311_v21 = vld [vmem:[#allocation36 + $0x500] sm:$0xf]  ;;  %v9360_v36 = vor.u32 %v10637_v63, %v9359_v51  ;;  %v8820_v63 = vor.u32 %v13336_v9, %v13338_v4  ;;  %v8913_v9 = vld [vmem:[#allocation36 + $0x1b0] sm:$0xf0]  ;;  %v10555_v4 = vld [vmem:[#allocation36 + $0x2a4] sm:$0xf] }
 0x905   :  { %5877 = vmatpush.bf16.msrb.mxu1 %v9408_v52  ;;  %5891 = vmatpush.bf16.msrb.mxu2 %v9520_v42  ;;  %v4215_v42 = vperm.slane %v13284_v33, 7 }
 0x906   :  { %5855 = vmatpush.bf16.msra.mxu3 %v9088_v62  ;;  %v4192_v62 = vrot.slane %v4185_v31, 2  ;;  %5865 = vmatpush.bf16.msrb.mxu0 %v9264_v13  ;;  %v8945_v13 = vld [vmem:[#allocation36 + $0x1f0] sm:$0xf0] }
 0x907   :  { %v8948_v0 = vor.u32 %v13342_v16, %v8945_v13  ;;  %v10519_v13 = vld [vmem:[#allocation36 + $0x184] sm:$0xf] }
 0x908   :  { %v4197_v17 = vsel %vm1947_vm1, %v4191_v58, %v4192_v62  ;;  %v9344_v58 = vor.u32 %v13313_v14, %v13311_v21  ;;  %v13329_v62 = vld [vmem:[#allocation36 + $0x700] sm:$0xf]  ;;  %v8801_v14 = vld [vmem:[#allocation36 + $0xd0] sm:$0xf0] }
 0x909   :  { %v4198_v38 = vsel %vm621_vm0, %v4196_v19, %v4197_v17  ;;  %5878 = vmatpush.bf16.msrb.mxu1 %v9392_v41  ;;  %5892 = vmatpush.bf16.msrb.mxu2 %v9504_v10  ;;  %v4167_v19 = vrot.slane %v4161_v59, 6  ;;  %v4169_v17 = vrot.slane %v4163_v1, 2  ;;  %v8785_v1 = vld [vmem:[#allocation36 + $0xb0] sm:$0xf0] }
 0x90a   :  { %5900 = vmatpush.bf16.msrb.mxu3 %v9712_v15  ;;  %v10609_v15 = vld [vmem:[#allocation36 + $0x44c] sm:$0xf0]  ;;  %v4204_v45 = vmul.f32 %v4198_v38, %v4178_v37  ;;  %v4214_v37 = vperm.slane %v13284_v33, 6  ;;  %v9073_v38 = vld [vmem:[#allocation36 + $0x2f0] sm:$0xf0] }
 0x90b   :  { %v9248_v52 = vor.u32 %v10609_v15, %v9247_v7  ;;  %v4188_v7 = vperm.slane %v13282_v25, 6  ;;  %v4189_v15 = vperm.slane %v13282_v25, 7  ;;  %v4173_v27 = vsel %vm654_vm4, %v4160_v49, %v4167_v19  ;;  %v10495_v33 = vld [vmem:[#allocation36 + $0xc4] sm:$0xf]  ;;  %v9041_v19 = vld [vmem:[#allocation36 + $0x2b0] sm:$0xf0] }
 0x90c   :  { %v4230_v40 = vadd.f32 %v4224_v50, %v4204_v45  ;;  %v4174_v39 = vsel %vm1947_vm1, %v4168_v6, %v4169_v17  ;;  %v4220_v50 = vrot.slane %v4214_v37, 4  ;;  %v8804_v49 = vor.u32 %v10495_v33, %v8801_v14  ;;  %v10487_v17 = vld [vmem:[#allocation36 + $0x84] sm:$0xf] }
 0x90d   :  { %5866 = vmatpush.bf16.msrb.mxu0 %v9248_v52  ;;  %5879 = vmatpush.bf16.msrb.mxu1 %v9376_v60  ;;  %v4194_v28 = vrot.slane %v4188_v7, 4  ;;  %v4195_v30 = vrot.slane %v4189_v15, 2  ;;  %v10587_v7 = vld [vmem:[#allocation36 + $0x3a4] sm:$0xf]  ;;  %v9169_v15 = vld [vmem:[#allocation36 + $0x3b0] sm:$0xf0] }
 0x90e   :  { %5901 = vmatpush.bf16.msrb.mxu3 %v9696_v44  ;;  %v10705_v44 = vld [vmem:[#allocation36 + $0x74c] sm:$0xf0]  ;;  %v4232_v23 = vmax.f32 %v4230_v40, 0.0  ;;  %5893 = vmatpush.bf16.msrb.mxu2 %v9488_v55  ;;  %v9057_v55 = vld [vmem:[#allocation36 + $0x2d0] sm:$0xf0] }
 0x90f   :  { %v9632_v22 = vor.u32 %v10705_v44, %v9631_v43  ;;  %v4219_v43 = vrot.slane %v4213_v20, 6  ;;  %v9600_v44 = vor.u32 %v13331_v12, %v13329_v62  ;;  %v4200_v45 = vsel %vm1947_vm1, %v4194_v28, %v4195_v30  ;;  %v10491_v12 = vld [vmem:[#allocation36 + $0xa4] sm:$0xf]  ;;  %v8769_v20 = vld [vmem:[#allocation36 + $0x90] sm:$0xf0] }
 0x910   :  { %4236 = vst [vmem:[#allocation1] ss:$4 sm:$0xff] %v4232_v23  ;;  %v8788_v16 = vor.u32 %v10491_v12, %v8785_v1  ;;  %v10551_v28 = vld [vmem:[#allocation36 + $0x284] sm:$0xf]  ;;  %v9025_v30 = vld [vmem:[#allocation36 + $0x290] sm:$0xf0] }
 0x911   :  { %5880 = vmatpush.bf16.msrb.mxu1 %v9360_v36  ;;  %v4225_v60 = vsel %vm654_vm4, %v4212_v54, %v4219_v43  ;;  %v10559_v36 = vld [vmem:[#allocation36 + $0x2c4] sm:$0xf]  ;;  %v9044_v54 = vor.u32 %v10555_v4, %v9041_v19  ;;  %v8753_v43 = vld [vmem:[#allocation36 + $0x70] sm:$0xf0] }
 0x912   :  { %5902 = vmatpush.bf16.msrb.mxu3 %v9680_v29  ;;  %v10605_v29 = vld [vmem:[#allocation36 + $0x42c] sm:$0xf0]  ;;  %5894 = vmatpush.bf16.msrb.mxu2 %v9472_v61  ;;  %v9060_v61 = vor.u32 %v10559_v36, %v9057_v55  ;;  %v10583_v37 = vld [vmem:[#allocation36 + $0x384] sm:$0xf]  ;;  %v8993_v55 = vld [vmem:[#allocation36 + $0x250] sm:$0xf0] }
 0x913   :  { %v9232_v31 = vor.u32 %v10605_v29, %v9231_v47  ;;  %v9201_v47 = vld [vmem:[#allocation36 + $0x3f0] sm:$0xf0]  ;;  %v10479_v33 = vld [vmem:[#allocation36 + $0x44] sm:$0xf] }
 0x914   :  { %v9204_v32 = vor.u32 %v10595_v46, %v9201_v47  ;;  %v10515_v46 = vld [vmem:[#allocation36 + $0x164] sm:$0xf]  ;;  %v8881_v47 = vld [vmem:[#allocation36 + $0x170] sm:$0xf0] }
 0x915   :  { %5867 = vmatpush.bf16.msrb.mxu0 %v9232_v31  ;;  %5881 = vmatpush.bf16.msrb.mxu1 %v9344_v58  ;;  %v4221_v31 = vrot.slane %v4215_v42, 2  ;;  %v10483_v42 = vld [vmem:[#allocation36 + $0x64] sm:$0xf]  ;;  %v8849_v1 = vld [vmem:[#allocation36 + $0x130] sm:$0xf0] }
 0x916   :  { %5903 = vmatpush.bf16.msrb.mxu3 %v9664_v3  ;;  %v4186_v3 = vperm.slane %v13282_v25, 4  ;;  %v10563_v25 = vld [vmem:[#allocation36 + $0x2e4] sm:$0xf]  ;;  %v9105_v4 = vld [vmem:[#allocation36 + $0x330] sm:$0xf0] }
 0x917   :  { %v4241_v29 = vld.sshfl [vmem:[#allocation1 + $0x10] sm:$0xff pattern:$0x73625140]  ;;  %v4239_v51 = vld.sshfl [vmem:[#allocation1] sm:$0xff pattern:$0x73625140]  ;;  %v9076_v5 = vor.u32 %v10563_v25, %v9073_v38  ;;  %v4226_v58 = vsel %vm1947_vm1, %v4220_v50, %v4221_v31  ;;  %v8772_v38 = vor.u32 %v10487_v17, %v8769_v20 }
 0x918   :  { %v4199_v41 = vsel %vm654_vm4, %v4186_v3, %v4193_v18  ;;  %v13359_v52 = vpack.c.bf16 %v4241_v29, %v4241_v29  ;;  %v13361_v40 = vpack.c.bf16 %v4239_v51, %v4239_v51  ;;  %v4242_v34 = vld.sshfl [vmem:[#allocation1 + $0x18] sm:$0xff pattern:$0x73625140]  ;;  %v4240_v2 = vld.sshfl [vmem:[#allocation1 + $0x8] sm:$0xff pattern:$0x73625140]  ;;  %v4227_v59 = vsel %vm621_vm0, %v4225_v60, %v4226_v58 }
 0x919   :  { %v4201_v24 = vsel %vm621_vm0, %v4199_v41, %v4200_v45  ;;  %5868 = vmatpush.bf16.msrb.mxu0 %v9216_v57  ;;  %v13364_v10 = vpack.c.bf16 %v4242_v34, %v4242_v34  ;;  %v13366_v21 = vpack.c.bf16 %v4240_v2, %v4240_v2  ;;  %v9185_v57 = vld [vmem:[#allocation36 + $0x3d0] sm:$0xf0]  ;;  %v10523_v3 = vld [vmem:[#allocation36 + $0x1a4] sm:$0xf]  ;;  %v9028_v41 = vor.u32 %v10551_v28, %v9025_v30 }
 0x91a   :  { %5904 = vmatpush.bf16.msrb.mxu3 %v9648_v48  ;;  %v4175_v48 = vsel %vm621_vm0, %v4173_v27, %v4174_v39  ;;  %5843 = vmatmul.bf16.vlgmr.msra.gmra.mxu2 %v13359_v52  ;;  %v8916_v18 = vor.u32 %v10523_v3, %v8913_v9  ;;  %v8897_v27 = vld [vmem:[#allocation36 + $0x190] sm:$0xf0]  ;;  %v10579_v50 = vld [vmem:[#allocation36 + $0x364] sm:$0xf]  ;;  %v8884_v60 = vor.u32 %v10515_v46, %v8881_v47 }
 0x91b   :  { %v4179_v53 = vadd.f32 %v4175_v48, %v4153_v26  ;;  %5817 = vmatmul.bf16.vlgmr.msra.gmra.mxu0 %v13361_v40  ;;  %5856 = vmatmul.bf16.vlgmr.msra.gmra.mxu3 %v13364_v10  ;;  %v9172_v26 = vor.u32 %v10587_v7, %v9169_v15  ;;  %v9153_v25 = vld [vmem:[#allocation36 + $0x390] sm:$0xf0]  ;;  %v8900_v39 = vor.u32 %v10519_v13, %v8897_v27  ;;  %v10547_v48 = vld [vmem:[#allocation36 + $0x264] sm:$0xf] }
 0x91c   :  { %5830 = vmatmul.bf16.vlgmr.msra.gmra.mxu1 %v13366_v21  ;;  %5939 = vmatpush.bf16.msra.mxu2 %v9076_v5  ;;  %v9009_v45 = vld [vmem:[#allocation36 + $0x270] sm:$0xf0]  ;;  %v10543_v36 = vld [vmem:[#allocation36 + $0x244] sm:$0xf] }
 0x91d   :  { %v4205_v23 = vmul.f32 %v4201_v24, %v4179_v53  ;;  %5913 = vmatpush.bf16.msra.mxu0 %v8820_v63  ;;  %5926 = vmatpush.bf16.msra.mxu1 %v8948_v0  ;;  %v9137_v29 = vld [vmem:[#allocation36 + $0x370] sm:$0xf0]  ;;  %v8756_v0 = vor.u32 %v10483_v42, %v8753_v43  ;;  %v10507_v12 = vld [vmem:[#allocation36 + $0x124] sm:$0xf] }
 0x91e   :  { %5905 = vmatpush.bf16.msrb.mxu3 %v9632_v22  ;;  %v10527_v22 = vld [vmem:[#allocation36 + $0x1c4] sm:$0xf]  ;;  %v8737_v53 = vld [vmem:[#allocation36 + $0x50] sm:$0xf0]  ;;  %v9140_v31 = vor.u32 %v10579_v50, %v9137_v29  ;;  %v8852_v7 = vor.u32 %v10507_v12, %v8849_v1 }
 0x91f   :  { %v8932_v11 = vor.u32 %v10527_v22, %v8929_v35  ;;  %v4231_v62 = vadd.f32 %v4227_v59, %v4205_v23  ;;  %v9012_v23 = vor.u32 %v10547_v48, %v9009_v45  ;;  %v8865_v35 = vld [vmem:[#allocation36 + $0x150] sm:$0xf0]  ;;  %v8740_v58 = vor.u32 %v10479_v33, %v8737_v53  ;;  %v10475_v59 = vld [vmem:[#allocation36 + $0x24] sm:$0xf] }
 0x920   :  { %5940 = vmatpush.bf16.msra.mxu2 %v9060_v61  ;;  %v8996_v61 = vor.u32 %v10543_v36, %v8993_v55  ;;  %v10539_v3 = vld [vmem:[#allocation36 + $0x224] sm:$0xf]  ;;  %v8705_v15 = vld [vmem:[#allocation36 + $0x10] sm:$0xf0] }
 0x921   :  { %v4233_v6 = vmax.f32 %v4231_v62, 0.0  ;;  %5914 = vmatpush.bf16.msra.mxu0 %v8804_v49  ;;  %5927 = vmatpush.bf16.msra.mxu1 %v8932_v11  ;;  %v8721_v11 = vld [vmem:[#allocation36 + $0x30] sm:$0xf0]  ;;  %v10571_v9 = vld [vmem:[#allocation36 + $0x324] sm:$0xf] }
 0x922   :  { %5906 = vmatpush.bf16.msrb.mxu3 %v9616_v56  ;;  %v10591_v56 = vld [vmem:[#allocation36 + $0x3c4] sm:$0xf]  ;;  %v8833_v17 = vld [vmem:[#allocation36 + $0x110] sm:$0xf0] }
 0x923   :  { %v9188_v8 = vor.u32 %v10591_v56, %v9185_v57  ;;  %4238 = vst [vmem:[#allocation1 + $0x20] ss:$4 sm:$0xff] %v4233_v6  ;;  %v10575_v56 = vld [vmem:[#allocation36 + $0x344] sm:$0xf]  ;;  %v9121_v57 = vld [vmem:[#allocation36 + $0x350] sm:$0xf0]  ;;  %v8724_v6 = vor.u32 %v10475_v59, %v8721_v11 }
 0x924   :  { %5941 = vmatpush.bf16.msra.mxu2 %v9044_v54  ;;  %v9124_v62 = vor.u32 %v10575_v56, %v9121_v57  ;;  %v10471_v19 = vld [vmem:[#allocation36 + $0x4] sm:$0xf]  ;;  %v9108_v54 = vor.u32 %v10571_v9, %v9105_v4  ;;  %v8961_v13 = vld [vmem:[#allocation36 + $0x210] sm:$0xf0] }
 0x925   :  { %5915 = vmatpush.bf16.msra.mxu0 %v8788_v16  ;;  %5928 = vmatpush.bf16.msra.mxu1 %v8916_v18  ;;  %v10503_v16 = vld [vmem:[#allocation36 + $0x104] sm:$0xf]  ;;  %v9089_v27 = vld [vmem:[#allocation36 + $0x310] sm:$0xf0] }
 0x926   :  { %5907 = vmatpush.bf16.msrb.mxu3 %v9600_v44  ;;  %v9156_v44 = vor.u32 %v10583_v37, %v9153_v25  ;;  %v10535_v20 = vld [vmem:[#allocation36 + $0x204] sm:$0xf]  ;;  %v9329_v30 = vld [vmem:[#allocation36 + $0x4f0] sm:$0xf0] }
 0x927   :  { %v10627_v28 = vld [vmem:[#allocation36 + $0x4e4] sm:$0xf]  ;;  %v9457_v25 = vld [vmem:[#allocation36 + $0x5f0] sm:$0xf0]  ;;  %v8964_v46 = vor.u32 %v10535_v20, %v8961_v13 }
 0x928   :  { %5942 = vmatpush.bf16.msra.mxu2 %v9028_v41  ;;  %v10659_v37 = vld [vmem:[#allocation36 + $0x5e4] sm:$0xf]  ;;  %v8836_v41 = vor.u32 %v10503_v16, %v8833_v17  ;;  %v9585_v42 = vld [vmem:[#allocation36 + $0x6f0] sm:$0xf0]  ;;  %v9332_v48 = vor.u32 %v10627_v28, %v9329_v30 }
 0x929   :  { %5916 = vmatpush.bf16.msra.mxu0 %v8772_v38  ;;  %5929 = vmatpush.bf16.msra.mxu1 %v8900_v39  ;;  %v10691_v38 = vld [vmem:[#allocation36 + $0x6e4] sm:$0xf]  ;;  %v8708_v39 = vor.u32 %v10471_v19, %v8705_v15  ;;  %v9460_v45 = vor.u32 %v10659_v37, %v9457_v25  ;;  %v9313_v29 = vld [vmem:[#allocation36 + $0x4d0] sm:$0xf0] }
 0x92a   :  { %5952 = vmatpush.bf16.msra.mxu3 %v9204_v32  ;;  %v4245_v51 = vld.sshfl [vmem:[#allocation1 + $0x30] sm:$0xff pattern:$0x73625140]  ;;  %v4243_v63 = vld.sshfl [vmem:[#allocation1 + $0x20] sm:$0xff pattern:$0x73625140] }
 0x92b   :  { %v13374_v24 = vpack.c.bf16 %v4245_v51, %v4245_v51  ;;  %v13376_v34 = vpack.c.bf16 %v4243_v63, %v4243_v63  ;;  %v4246_v2 = vld.sshfl [vmem:[#allocation1 + $0x38] sm:$0xff pattern:$0x73625140]  ;;  %v4244_v5 = vld.sshfl [vmem:[#allocation1 + $0x28] sm:$0xff pattern:$0x73625140]  ;;  %v9588_v51 = vor.u32 %v10691_v38, %v9585_v42 }
 0x92c   :  { %v13378_v14 = vpack.c.bf16 %v4246_v2, %v4246_v2  ;;  %v13380_v22 = vpack.c.bf16 %v4244_v5, %v4244_v5  ;;  %v10511_v32 = vld [vmem:[#allocation36 + $0x144] sm:$0xf]  ;;  %5943 = vmatpush.bf16.msra.mxu2 %v9012_v23  ;;  %v9441_v33 = vld [vmem:[#allocation36 + $0x5d0] sm:$0xf0] }
 0x92d   :  { %5895 = vmatmul.bf16.vlgmr.msrb.gmra.mxu2 %v13374_v24  ;;  %5869 = vmatmul.bf16.vlgmr.msrb.gmra.mxu0 %v13376_v34  ;;  %v8868_v49 = vor.u32 %v10511_v32, %v8865_v35  ;;  %v10723_v43 = vld [vmem:[#allocation36 + $0x7e4] sm:$0xf]  ;;  %v9569_v2 = vld [vmem:[#allocation36 + $0x6d0] sm:$0xf0] }
 0x92e   :  { %5953 = vmatpush.bf16.msra.mxu3 %v9188_v8  ;;  %5882 = vmatmul.bf16.vlgmr.msrb.gmra.mxu1 %v13380_v22  ;;  %v8977_v8 = vld [vmem:[#allocation36 + $0x230] sm:$0xf0]  ;;  %v10623_v50 = vld [vmem:[#allocation36 + $0x4c4] sm:$0xf] }
 0x92f   :  { %5908 = vmatmul.bf16.vlgmr.msrb.gmra.mxu3 %v13378_v14  ;;  %5917 = vmatpush.bf16.msra.mxu0 %v8756_v0  ;;  %v8980_v18 = vor.u32 %v10539_v3, %v8977_v8  ;;  %v10655_v0 = vld [vmem:[#allocation36 + $0x5c4] sm:$0xf]  ;;  %v9316_v23 = vor.u32 %v10623_v50, %v9313_v29  ;;  %v9297_v35 = vld [vmem:[#allocation36 + $0x4b0] sm:$0xf0] }
 0x930   :  { %5930 = vmatpush.bf16.msra.mxu1 %v8884_v60  ;;  %5944 = vmatpush.bf16.msra.mxu2 %v8996_v61  ;;  %v10687_v53 = vld [vmem:[#allocation36 + $0x6c4] sm:$0xf]  ;;  %v9697_v60 = vld [vmem:[#allocation36 + $0x7d0] sm:$0xf0] }
 0x931   :  { %v10719_v5 = vld [vmem:[#allocation36 + $0x7c4] sm:$0xf]  ;;  %v9572_v36 = vor.u32 %v10687_v53, %v9569_v2  ;;  %v9425_v57 = vld [vmem:[#allocation36 + $0x5b0] sm:$0xf0] }
 0x932   :  { %5954 = vmatpush.bf16.msra.mxu3 %v9172_v26  ;;  %v10567_v26 = vld [vmem:[#allocation36 + $0x304] sm:$0xf]  ;;  %v9700_v55 = vor.u32 %v10719_v5, %v9697_v60  ;;  %v9681_v11 = vld [vmem:[#allocation36 + $0x7b0] sm:$0xf0] }
 0x933   :  { %5918 = vmatpush.bf16.msra.mxu0 %v8740_v58  ;;  %v9092_v47 = vor.u32 %v10567_v26, %v9089_v27  ;;  %v10619_v32 = vld [vmem:[#allocation36 + $0x4a4] sm:$0xf]  ;;  %v9281_v1 = vld [vmem:[#allocation36 + $0x490] sm:$0xf0] }
 0x934   :  { %5931 = vmatpush.bf16.msra.mxu1 %v8868_v49  ;;  %5945 = vmatpush.bf16.msra.mxu2 %v8980_v18  ;;  %v10651_v56 = vld [vmem:[#allocation36 + $0x5a4] sm:$0xf]  ;;  %v9553_v49 = vld [vmem:[#allocation36 + $0x6b0] sm:$0xf0]  ;;  %v9300_v61 = vor.u32 %v10619_v32, %v9297_v35 }
 0x935   :  { %v10683_v58 = vld [vmem:[#allocation36 + $0x6a4] sm:$0xf]  ;;  %v9409_v4 = vld [vmem:[#allocation36 + $0x590] sm:$0xf0] }
 0x936   :  { %5955 = vmatpush.bf16.msra.mxu3 %v9156_v44  ;;  %v9713_v44 = vld [vmem:[#allocation36 + $0x7f0] sm:$0xf0]  ;;  %v10715_v59 = vld [vmem:[#allocation36 + $0x7a4] sm:$0xf]  ;;  %v9556_v3 = vor.u32 %v10683_v58, %v9553_v49 }
 0x937   :  { %5919 = vmatpush.bf16.msra.mxu0 %v8724_v6  ;;  %v9716_v63 = vor.u32 %v10723_v43, %v9713_v44  ;;  %v10615_v12 = vld [vmem:[#allocation36 + $0x484] sm:$0xf]  ;;  %v9684_v8 = vor.u32 %v10715_v59, %v9681_v11  ;;  %v9537_v6 = vld [vmem:[#allocation36 + $0x690] sm:$0xf0] }
 0x938   :  { %5932 = vmatpush.bf16.msra.mxu1 %v8852_v7  ;;  %5946 = vmatpush.bf16.msra.mxu2 %v8964_v46  ;;  %v10647_v9 = vld [vmem:[#allocation36 + $0x584] sm:$0xf]  ;;  %v9665_v15 = vld [vmem:[#allocation36 + $0x790] sm:$0xf0]  ;;  %v9284_v16 = vor.u32 %v10615_v12, %v9281_v1 }
 0x939   :  { %v10679_v19 = vld [vmem:[#allocation36 + $0x684] sm:$0xf]  ;;  %v9412_v17 = vor.u32 %v10647_v9, %v9409_v4  ;;  %v9393_v27 = vld [vmem:[#allocation36 + $0x570] sm:$0xf0]  ;;  %v8951_v9 = vld [vmem:[#allocation36 + $0x1e8] sm:$0xf] }
 0x93a   :  { %5956 = vmatpush.bf16.msra.mxu3 %v9140_v31  ;;  %v9444_v31 = vor.u32 %v10655_v0, %v9441_v33  ;;  %v10711_v7 = vld [vmem:[#allocation36 + $0x784] sm:$0xf]  ;;  %v9540_v20 = vor.u32 %v10679_v19, %v9537_v6  ;;  %v9521_v30 = vld [vmem:[#allocation36 + $0x670] sm:$0xf0]  ;;  %v10534_v4 = vld [vmem:[#allocation36 + $0x1f4] sm:$0xf0] }
 0x93b   :  { %5920 = vmatpush.bf16.msra.mxu0 %v8708_v39  ;;  %v10611_v18 = vld [vmem:[#allocation36 + $0x464] sm:$0xf]  ;;  %v9668_v13 = vor.u32 %v10711_v7, %v9665_v15  ;;  %v9649_v25 = vld [vmem:[#allocation36 + $0x770] sm:$0xf0]  ;;  %v9079_v19 = vld [vmem:[#allocation36 + $0x2e8] sm:$0xf] }
 0x93c   :  { %5933 = vmatpush.bf16.msra.mxu1 %v8836_v41  ;;  %5991 = vmatpush.bf16.msrb.mxu2 %v9588_v51  ;;  %v10643_v26 = vld [vmem:[#allocation36 + $0x564] sm:$0xf]  ;;  %v9249_v42 = vld [vmem:[#allocation36 + $0x450] sm:$0xf0]  ;;  %v10566_v15 = vld [vmem:[#allocation36 + $0x2f4] sm:$0xf0] }
 0x93d   :  { %5947 = vmatmul.bf16.vlgmr.msra.gmra.mxu2 %v13359_v52  ;;  %v10675_v28 = vld [vmem:[#allocation36 + $0x664] sm:$0xf]  ;;  %v9396_v39 = vor.u32 %v10643_v26, %v9393_v27  ;;  %v9633_v29 = vld [vmem:[#allocation36 + $0x750] sm:$0xf0]  ;;  %v8807_v26 = vld [vmem:[#allocation36 + $0xc8] sm:$0xf] }
 0x93e   :  { %5957 = vmatpush.bf16.msra.mxu3 %v9124_v62  ;;  %5921 = vmatmul.bf16.vlgmr.msra.gmra.mxu0 %v13361_v40  ;;  %v9428_v62 = vor.u32 %v10651_v56, %v9425_v57  ;;  %v10707_v37 = vld [vmem:[#allocation36 + $0x764] sm:$0xf]  ;;  %v9524_v43 = vor.u32 %v10675_v28, %v9521_v30  ;;  %v9233_v33 = vld [vmem:[#allocation36 + $0x430] sm:$0xf0]  ;;  %v10498_v27 = vld [vmem:[#allocation36 + $0xd4] sm:$0xf0]  ;;  %v9080_v28 = vor.u32 %v10566_v15, %v9079_v19 }
 0x93f   :  { %5965 = vmatpush.bf16.msrb.mxu0 %v9332_v48  ;;  %5934 = vmatmul.bf16.vlgmr.msra.gmra.mxu1 %v13366_v21  ;;  %v10607_v41 = vld [vmem:[#allocation36 + $0x444] sm:$0xf]  ;;  %v9652_v44 = vor.u32 %v10707_v37, %v9649_v25  ;;  %v9361_v60 = vld [vmem:[#allocation36 + $0x530] sm:$0xf0]  ;;  %v8935_v37 = vld [vmem:[#allocation36 + $0x1c8] sm:$0xf] }
 0x940   :  { %5978 = vmatpush.bf16.msrb.mxu1 %v9460_v45  ;;  %5992 = vmatpush.bf16.msrb.mxu2 %v9572_v36  ;;  %v10639_v46 = vld [vmem:[#allocation36 + $0x544] sm:$0xf]  ;;  %v9505_v45 = vld [vmem:[#allocation36 + $0x650] sm:$0xf0]  ;;  %v9252_v51 = vor.u32 %v10607_v41, %v9249_v42  ;;  %v10530_v25 = vld [vmem:[#allocation36 + $0x1d4] sm:$0xf0] }
 0x941   :  { %v10671_v48 = vld [vmem:[#allocation36 + $0x644] sm:$0xf]  ;;  %v9617_v35 = vld [vmem:[#allocation36 + $0x730] sm:$0xf0]  ;;  %v9191_v41 = vld [vmem:[#allocation36 + $0x3c8] sm:$0xf] }
 0x942   :  { %5958 = vmatpush.bf16.msra.mxu3 %v9108_v54  ;;  %v9265_v54 = vld [vmem:[#allocation36 + $0x470] sm:$0xf0]  ;;  %v10703_v50 = vld [vmem:[#allocation36 + $0x744] sm:$0xf]  ;;  %v9508_v2 = vor.u32 %v10671_v48, %v9505_v45  ;;  %v10594_v42 = vld [vmem:[#allocation36 + $0x3d4] sm:$0xf0] }
 0x943   :  { %5966 = vmatpush.bf16.msrb.mxu0 %v9316_v23  ;;  %v9268_v38 = vor.u32 %v10611_v18, %v9265_v54  ;;  %v10603_v0 = vld [vmem:[#allocation36 + $0x424] sm:$0xf]  ;;  %v9636_v5 = vor.u32 %v10703_v50, %v9633_v29  ;;  %v9345_v57 = vld [vmem:[#allocation36 + $0x510] sm:$0xf0]  ;;  %v9192_v45 = vor.u32 %v10594_v42, %v9191_v41  ;;  %v8919_v50 = vld [vmem:[#allocation36 + $0x1a8] sm:$0xf] }
 0x944   :  { %5979 = vmatpush.bf16.msrb.mxu1 %v9444_v31  ;;  %5993 = vmatpush.bf16.msrb.mxu2 %v9556_v3  ;;  %v10635_v53 = vld [vmem:[#allocation36 + $0x524] sm:$0xf]  ;;  %v9489_v31 = vld [vmem:[#allocation36 + $0x630] sm:$0xf0]  ;;  %v9236_v58 = vor.u32 %v10603_v0, %v9233_v33  ;;  %v8823_v3 = vld [vmem:[#allocation36 + $0xe8] sm:$0xf] }
 0x945   :  { %v10667_v23 = vld [vmem:[#allocation36 + $0x624] sm:$0xf]  ;;  %v9364_v49 = vor.u32 %v10635_v53, %v9361_v60  ;;  %v9473_v11 = vld [vmem:[#allocation36 + $0x610] sm:$0xf0]  ;;  %v10526_v29 = vld [vmem:[#allocation36 + $0x1b4] sm:$0xf0] }
 0x946   :  { %5959 = vmatpush.bf16.msra.mxu3 %v9092_v47  ;;  %v9377_v47 = vld [vmem:[#allocation36 + $0x550] sm:$0xf0]  ;;  %v10699_v32 = vld [vmem:[#allocation36 + $0x724] sm:$0xf]  ;;  %v9175_v0 = vld [vmem:[#allocation36 + $0x3a8] sm:$0xf] }
 0x947   :  { %5967 = vmatpush.bf16.msrb.mxu0 %v9300_v61  ;;  %v10599_v36 = vld [vmem:[#allocation36 + $0x404] sm:$0xf]  ;;  %v9492_v61 = vor.u32 %v10667_v23, %v9489_v31  ;;  %v9601_v1 = vld [vmem:[#allocation36 + $0x710] sm:$0xf0]  ;;  %v10590_v33 = vld [vmem:[#allocation36 + $0x3b4] sm:$0xf0] }
 0x948   :  { %5980 = vmatpush.bf16.msrb.mxu1 %v9428_v62  ;;  %5994 = vmatpush.bf16.msrb.mxu2 %v9540_v20  ;;  %v10631_v56 = vld [vmem:[#allocation36 + $0x504] sm:$0xf]  ;;  %v9620_v62 = vor.u32 %v10699_v32, %v9617_v35  ;;  %v10490_v60 = vld [vmem:[#allocation36 + $0x94] sm:$0xf0]  ;;  %v9176_v31 = vor.u32 %v10590_v33, %v9175_v0  ;;  %v8903_v32 = vld [vmem:[#allocation36 + $0x188] sm:$0xf] }
 0x949   :  { %5960 = vmatmul.bf16.vlgmr.msra.gmra.mxu3 %v13364_v10  ;;  %v10663_v59 = vld [vmem:[#allocation36 + $0x604] sm:$0xf]  ;;  %v9348_v7 = vor.u32 %v10631_v56, %v9345_v57  ;;  %v10522_v35 = vld [vmem:[#allocation36 + $0x194] sm:$0xf0]  ;;  %v9159_v56 = vld [vmem:[#allocation36 + $0x388] sm:$0xf] }
 0x94a   :  { %6004 = vmatpush.bf16.msrb.mxu3 %v9716_v63  ;;  %v9380_v63 = vor.u32 %v10639_v46, %v9377_v47  ;;  %v10695_v12 = vld [vmem:[#allocation36 + $0x704] sm:$0xf]  ;;  %v9476_v18 = vor.u32 %v10663_v59, %v9473_v11  ;;  %v8791_v46 = vld [vmem:[#allocation36 + $0xa8] sm:$0xf]  ;;  %v10494_v47 = vld [vmem:[#allocation36 + $0xb4] sm:$0xf0] }
 0x94b   :  { %5968 = vmatpush.bf16.msrb.mxu0 %v9284_v16  ;;  %v9207_v16 = vld [vmem:[#allocation36 + $0x3e8] sm:$0xf]  ;;  %v9604_v54 = vor.u32 %v10695_v12, %v9601_v1  ;;  %v8792_v53 = vor.u32 %v10494_v47, %v8791_v46  ;;  %v10586_v57 = vld [vmem:[#allocation36 + $0x394] sm:$0xf0] }
 0x94c   :  { %5981 = vmatpush.bf16.msrb.mxu1 %v9412_v17  ;;  %5995 = vmatpush.bf16.msrb.mxu2 %v9524_v43  ;;  %v10598_v17 = vld [vmem:[#allocation36 + $0x3f4] sm:$0xf0]  ;;  %v8808_v43 = vor.u32 %v10498_v27, %v8807_v26  ;;  %v8759_v59 = vld [vmem:[#allocation36 + $0x68] sm:$0xf] }
 0x94d   :  { %v9208_v30 = vor.u32 %v10598_v17, %v9207_v16  ;;  %v10486_v11 = vld [vmem:[#allocation36 + $0x74] sm:$0xf0]  ;;  %v8887_v12 = vld [vmem:[#allocation36 + $0x168] sm:$0xf] }
 0x94e   :  { %6005 = vmatpush.bf16.msrb.mxu3 %v9700_v55  ;;  %v9217_v55 = vld [vmem:[#allocation36 + $0x410] sm:$0xf0]  ;;  %v10518_v1 = vld [vmem:[#allocation36 + $0x174] sm:$0xf0]  ;;  %v8760_v19 = vor.u32 %v10486_v11, %v8759_v59  ;;  %v9127_v26 = vld [vmem:[#allocation36 + $0x348] sm:$0xf] }
 0x94f   :  { %5969 = vmatpush.bf16.msrb.mxu0 %v9268_v38  ;;  %v9220_v6 = vor.u32 %v10599_v36, %v9217_v55  ;;  %v9063_v38 = vld [vmem:[#allocation36 + $0x2c8] sm:$0xf]  ;;  %v10554_v55 = vld [vmem:[#allocation36 + $0x294] sm:$0xf0] }
 0x950   :  { %5982 = vmatpush.bf16.msrb.mxu1 %v9396_v39  ;;  %5996 = vmatpush.bf16.msrb.mxu2 %v9508_v2  ;;  %v10562_v39 = vld [vmem:[#allocation36 + $0x2d4] sm:$0xf0]  ;;  %v8920_v2 = vor.u32 %v10526_v29, %v8919_v50  ;;  %v9031_v36 = vld [vmem:[#allocation36 + $0x288] sm:$0xf] }
 0x951   :  { %v9064_v48 = vor.u32 %v10562_v39, %v9063_v38  ;;  %v10482_v15 = vld [vmem:[#allocation36 + $0x54] sm:$0xf0]  ;;  %v8855_v41 = vld [vmem:[#allocation36 + $0x128] sm:$0xf] }
 0x952   :  { %6006 = vmatpush.bf16.msrb.mxu3 %v9684_v8  ;;  %v10502_v8 = vld [vmem:[#allocation36 + $0xf4] sm:$0xf0]  ;;  %v9111_v46 = vld [vmem:[#allocation36 + $0x328] sm:$0xf] }
 0x953   :  { %5970 = vmatpush.bf16.msrb.mxu0 %v9252_v51  ;;  %v8824_v20 = vor.u32 %v10502_v8, %v8823_v3  ;;  %v9047_v51 = vld [vmem:[#allocation36 + $0x2a8] sm:$0xf]  ;;  %v10550_v8 = vld [vmem:[#allocation36 + $0x274] sm:$0xf0] }
 0x954   :  { %5983 = vmatpush.bf16.msrb.mxu1 %v9380_v63  ;;  %5997 = vmatpush.bf16.msrb.mxu2 %v9492_v61  ;;  %v10558_v63 = vld [vmem:[#allocation36 + $0x2b4] sm:$0xf0]  ;;  %v9032_v61 = vor.u32 %v10554_v55, %v9031_v36  ;;  %v9015_v3 = vld [vmem:[#allocation36 + $0x268] sm:$0xf] }
 0x955   :  { %v9048_v23 = vor.u32 %v10558_v63, %v9047_v51  ;;  %v9016_v16 = vor.u32 %v10550_v8, %v9015_v3  ;;  %v10578_v27 = vld [vmem:[#allocation36 + $0x354] sm:$0xf0]  ;;  %v8839_v51 = vld [vmem:[#allocation36 + $0x108] sm:$0xf] }
 0x956   :  { %6007 = vmatpush.bf16.msrb.mxu3 %v9668_v13  ;;  %v8952_v13 = vor.u32 %v10534_v4, %v8951_v9  ;;  %v9143_v9 = vld [vmem:[#allocation36 + $0x368] sm:$0xf]  ;;  %v10582_v4 = vld [vmem:[#allocation36 + $0x374] sm:$0xf0]  ;;  %v9128_v39 = vor.u32 %v10578_v27, %v9127_v26 }
 0x957   :  { %5971 = vmatpush.bf16.msrb.mxu0 %v9236_v58  ;;  %v9144_v17 = vor.u32 %v10582_v4, %v9143_v9  ;;  %v10510_v42 = vld [vmem:[#allocation36 + $0x134] sm:$0xf0]  ;;  %v9591_v36 = vld [vmem:[#allocation36 + $0x6e8] sm:$0xf] }
 0x958   :  { %5984 = vmatpush.bf16.msrb.mxu1 %v9364_v49  ;;  %5998 = vmatpush.bf16.msrb.mxu2 %v9476_v18  ;;  %v8904_v49 = vor.u32 %v10522_v35, %v8903_v32  ;;  %v8871_v18 = vld [vmem:[#allocation36 + $0x148] sm:$0xf]  ;;  %v10574_v47 = vld [vmem:[#allocation36 + $0x334] sm:$0xf0]  ;;  %v8856_v50 = vor.u32 %v10510_v42, %v8855_v41 }
 0x959   :  { %v10474_v29 = vld [vmem:[#allocation36 + $0x14] sm:$0xf0]  ;;  %v9112_v33 = vor.u32 %v10574_v47, %v9111_v46  ;;  %v9463_v32 = vld [vmem:[#allocation36 + $0x5e8] sm:$0xf] }
 0x95a   :  { %6008 = vmatpush.bf16.msrb.mxu3 %v9652_v44  ;;  %v8936_v44 = vor.u32 %v10530_v25, %v8935_v37  ;;  %v8727_v37 = vld [vmem:[#allocation36 + $0x28] sm:$0xf]  ;;  %v10478_v25 = vld [vmem:[#allocation36 + $0x34] sm:$0xf0] }
 0x95b   :  { %5972 = vmatpush.bf16.msrb.mxu0 %v9220_v6  ;;  %5999 = vmatmul.bf16.vlgmr.msrb.gmra.mxu2 %v13374_v24  ;;  %v8888_v6 = vor.u32 %v10518_v1, %v8887_v12  ;;  %v10506_v63 = vld [vmem:[#allocation36 + $0x114] sm:$0xf0]  ;;  %v9319_v12 = vld [vmem:[#allocation36 + $0x4c8] sm:$0xf] }
 0x95c   :  { %5985 = vmatpush.bf16.msrb.mxu1 %v9348_v7  ;;  %6043 = vmatpush.bf16.msra.mxu2 %v9080_v28  ;;  %v8743_v7 = vld [vmem:[#allocation36 + $0x48] sm:$0xf]  ;;  %v10662_v35 = vld [vmem:[#allocation36 + $0x5f4] sm:$0xf0] }
 0x95d   :  { %v8744_v28 = vor.u32 %v10482_v15, %v8743_v7  ;;  %v10626_v1 = vld [vmem:[#allocation36 + $0x4d4] sm:$0xf0]  ;;  %v9447_v9 = vld [vmem:[#allocation36 + $0x5c8] sm:$0xf] }
 0x95e   :  { %6009 = vmatpush.bf16.msrb.mxu3 %v9636_v5  ;;  %5973 = vmatmul.bf16.vlgmr.msrb.gmra.mxu0 %v13376_v34  ;;  %v8775_v5 = vld [vmem:[#allocation36 + $0x88] sm:$0xf]  ;;  %v10658_v4 = vld [vmem:[#allocation36 + $0x5d4] sm:$0xf0] }
 0x95f   :  { %6017 = vmatpush.bf16.msra.mxu0 %v8824_v20  ;;  %5986 = vmatmul.bf16.vlgmr.msrb.gmra.mxu1 %v13380_v22  ;;  %v8776_v58 = vor.u32 %v10490_v60, %v8775_v5  ;;  %v8999_v20 = vld [vmem:[#allocation36 + $0x248] sm:$0xf]  ;;  %v10570_v60 = vld [vmem:[#allocation36 + $0x314] sm:$0xf0] }
 0x960   :  { %6030 = vmatpush.bf16.msra.mxu1 %v8952_v13  ;;  %6044 = vmatpush.bf16.msra.mxu2 %v9064_v48  ;;  %v10546_v13 = vld [vmem:[#allocation36 + $0x254] sm:$0xf0]  ;;  %v8711_v48 = vld [vmem:[#allocation36 + $0x8] sm:$0xf] }
 0x961   :  { %v9000_v38 = vor.u32 %v10546_v13, %v8999_v20  ;;  %v9095_v5 = vld [vmem:[#allocation36 + $0x308] sm:$0xf]  ;;  %v8712_v55 = vor.u32 %v10474_v29, %v8711_v48  ;;  %v10722_v15 = vld [vmem:[#allocation36 + $0x7d4] sm:$0xf0] }
 0x962   :  { %6010 = vmatpush.bf16.msrb.mxu3 %v9620_v62  ;;  %v9160_v62 = vor.u32 %v10586_v57, %v9159_v56  ;;  %v8840_v56 = vor.u32 %v10506_v63, %v8839_v51  ;;  %v10694_v57 = vld [vmem:[#allocation36 + $0x6f4] sm:$0xf0]  ;;  %v9096_v11 = vor.u32 %v10570_v60, %v9095_v5  ;;  %v9703_v7 = vld [vmem:[#allocation36 + $0x7c8] sm:$0xf] }
 0x963   :  { %6018 = vmatpush.bf16.msra.mxu0 %v8808_v43  ;;  %v8983_v43 = vld [vmem:[#allocation36 + $0x228] sm:$0xf]  ;;  %v9592_v3 = vor.u32 %v10694_v57, %v9591_v36  ;;  %v9704_v13 = vor.u32 %v10722_v15, %v9703_v7  ;;  %v10654_v27 = vld [vmem:[#allocation36 + $0x5b4] sm:$0xf0] }
 0x964   :  { %6031 = vmatpush.bf16.msra.mxu1 %v8936_v44  ;;  %6045 = vmatpush.bf16.msra.mxu2 %v9048_v23  ;;  %v10542_v44 = vld [vmem:[#allocation36 + $0x234] sm:$0xf0]  ;;  %v9335_v23 = vld [vmem:[#allocation36 + $0x4e8] sm:$0xf] }
 0x965   :  { %v8984_v0 = vor.u32 %v10542_v44, %v8983_v43  ;;  %v9431_v26 = vld [vmem:[#allocation36 + $0x5a8] sm:$0xf]  ;;  %v10618_v42 = vld [vmem:[#allocation36 + $0x494] sm:$0xf0] }
 0x966   :  { %6011 = vmatpush.bf16.msrb.mxu3 %v9604_v54  ;;  %v10514_v54 = vld [vmem:[#allocation36 + $0x154] sm:$0xf0]  ;;  %v9287_v41 = vld [vmem:[#allocation36 + $0x488] sm:$0xf] }
 0x967   :  { %6019 = vmatpush.bf16.msra.mxu0 %v8792_v53  ;;  %v8967_v53 = vld [vmem:[#allocation36 + $0x208] sm:$0xf]  ;;  %v10650_v47 = vld [vmem:[#allocation36 + $0x594] sm:$0xf0]  ;;  %v9288_v51 = vor.u32 %v10618_v42, %v9287_v41 }
 0x968   :  { %6032 = vmatpush.bf16.msra.mxu1 %v8920_v2  ;;  %6046 = vmatpush.bf16.msra.mxu2 %v9032_v61  ;;  %v10538_v2 = vld [vmem:[#allocation36 + $0x214] sm:$0xf0]  ;;  %v9415_v46 = vld [vmem:[#allocation36 + $0x588] sm:$0xf] }
 0x969   :  { %6012 = vmatmul.bf16.vlgmr.msrb.gmra.mxu3 %v13378_v14  ;;  %v8968_v59 = vor.u32 %v10538_v2, %v8967_v53  ;;  %v9543_v48 = vld [vmem:[#allocation36 + $0x688] sm:$0xf]  ;;  %v10714_v29 = vld [vmem:[#allocation36 + $0x794] sm:$0xf0]  ;;  %v9416_v63 = vor.u32 %v10650_v47, %v9415_v46  ;;  %v10532_v46 = vld [vmem:[#allocation36 + $0x1ec] sm:$0xf] }
 0x96a   :  { %6056 = vmatpush.bf16.msra.mxu3 %v9208_v30  ;;  %v8872_v30 = vor.u32 %v10514_v54, %v8871_v18  ;;  %v9303_v18 = vld [vmem:[#allocation36 + $0x4a8] sm:$0xf]  ;;  %v10622_v54 = vld [vmem:[#allocation36 + $0x4b4] sm:$0xf0]  ;;  %v8953_v47 = vld [vmem:[#allocation36 + $0x1f8] sm:$0xf0] }
 0x96b   :  { %6020 = vmatpush.bf16.msra.mxu0 %v8776_v58  ;;  %v9719_v58 = vld [vmem:[#allocation36 + $0x7e8] sm:$0xf]  ;;  %v10646_v60 = vld [vmem:[#allocation36 + $0x574] sm:$0xf0] }
 0x96c   :  { %6033 = vmatpush.bf16.msra.mxu1 %v8904_v49  ;;  %6047 = vmatpush.bf16.msra.mxu2 %v9016_v16  ;;  %v10726_v49 = vld [vmem:[#allocation36 + $0x7f4] sm:$0xf0]  ;;  %v9320_v16 = vor.u32 %v10626_v1, %v9319_v12  ;;  %v9399_v5 = vld [vmem:[#allocation36 + $0x568] sm:$0xf] }
 0x96d   :  { %v9720_v8 = vor.u32 %v10726_v49, %v9719_v58  ;;  %v10610_v57 = vld [vmem:[#allocation36 + $0x454] sm:$0xf0]  ;;  %v9639_v12 = vld [vmem:[#allocation36 + $0x748] sm:$0xf] }
 0x96e   :  { %6057 = vmatpush.bf16.msra.mxu3 %v9192_v45  ;;  %v8728_v45 = vor.u32 %v10478_v25, %v8727_v37  ;;  %v9687_v37 = vld [vmem:[#allocation36 + $0x7a8] sm:$0xf]  ;;  %v10718_v25 = vld [vmem:[#allocation36 + $0x7b4] sm:$0xf0] }
 0x96f   :  { %6021 = vmatpush.bf16.msra.mxu0 %v8760_v19  ;;  %v9575_v19 = vld [vmem:[#allocation36 + $0x6c8] sm:$0xf]  ;;  %v9688_v44 = vor.u32 %v10718_v25, %v9687_v37  ;;  %v10706_v1 = vld [vmem:[#allocation36 + $0x754] sm:$0xf0] }
 0x970   :  { %6034 = vmatpush.bf16.msra.mxu1 %v8888_v6  ;;  %6048 = vmatpush.bf16.msra.mxu2 %v9000_v38  ;;  %v10690_v6 = vld [vmem:[#allocation36 + $0x6d4] sm:$0xf0]  ;;  %v9304_v38 = vor.u32 %v10622_v54, %v9303_v18  ;;  %v9367_v7 = vld [vmem:[#allocation36 + $0x528] sm:$0xf] }
 0x971   :  { %v9576_v20 = vor.u32 %v10690_v6, %v9575_v19  ;;  %v9640_v6 = vor.u32 %v10706_v1, %v9639_v12  ;;  %v10638_v15 = vld [vmem:[#allocation36 + $0x534] sm:$0xf0]  ;;  %v9623_v18 = vld [vmem:[#allocation36 + $0x728] sm:$0xf] }
 0x972   :  { %6058 = vmatpush.bf16.msra.mxu3 %v9176_v31  ;;  %v10630_v31 = vld [vmem:[#allocation36 + $0x4f4] sm:$0xf0]  ;;  %v9607_v41 = vld [vmem:[#allocation36 + $0x708] sm:$0xf] }
 0x973   :  { %6022 = vmatpush.bf16.msra.mxu0 %v8744_v28  ;;  %v9336_v61 = vor.u32 %v10630_v31, %v9335_v23  ;;  %v9559_v28 = vld [vmem:[#allocation36 + $0x6a8] sm:$0xf]  ;;  %v10678_v31 = vld [vmem:[#allocation36 + $0x674] sm:$0xf0] }
 0x974   :  { %6035 = vmatpush.bf16.msra.mxu1 %v8872_v30  ;;  %6049 = vmatpush.bf16.msra.mxu2 %v8984_v0  ;;  %v10686_v30 = vld [vmem:[#allocation36 + $0x6b4] sm:$0xf0]  ;;  %v9271_v0 = vld [vmem:[#allocation36 + $0x468] sm:$0xf] }
 0x975   :  { %v9560_v43 = vor.u32 %v10686_v30, %v9559_v28  ;;  %v9527_v23 = vld [vmem:[#allocation36 + $0x668] sm:$0xf]  ;;  %v10702_v54 = vld [vmem:[#allocation36 + $0x734] sm:$0xf0] }
 0x976   :  { %6059 = vmatpush.bf16.msra.mxu3 %v9160_v62  ;;  %v9464_v62 = vor.u32 %v10662_v35, %v9463_v32  ;;  %v9655_v32 = vld [vmem:[#allocation36 + $0x768] sm:$0xf]  ;;  %v10710_v35 = vld [vmem:[#allocation36 + $0x774] sm:$0xf0]  ;;  %v9528_v58 = vor.u32 %v10678_v31, %v9527_v23  ;;  %v9624_v25 = vor.u32 %v10702_v54, %v9623_v18  ;;  %v8809_v23 = vld [vmem:[#allocation36 + $0xd8] sm:$0xf0] }
 0x977   :  { %6023 = vmatpush.bf16.msra.mxu0 %v8728_v45  ;;  %v10682_v45 = vld [vmem:[#allocation36 + $0x694] sm:$0xf0]  ;;  %v9656_v49 = vor.u32 %v10710_v35, %v9655_v32  ;;  %v9351_v28 = vld [vmem:[#allocation36 + $0x508] sm:$0xf]  ;;  %v10528_v35 = vld [vmem:[#allocation36 + $0x1cc] sm:$0xf] }
 0x978   :  { %6036 = vmatpush.bf16.msra.mxu1 %v8856_v50  ;;  %6050 = vmatpush.bf16.msra.mxu2 %v8968_v59  ;;  %v9671_v50 = vld [vmem:[#allocation36 + $0x788] sm:$0xf]  ;;  %v9544_v53 = vor.u32 %v10682_v45, %v9543_v48  ;;  %v10634_v30 = vld [vmem:[#allocation36 + $0x514] sm:$0xf0]  ;;  %v10564_v48 = vld [vmem:[#allocation36 + $0x2ec] sm:$0xf] }
 0x979   :  { %v9672_v2 = vor.u32 %v10714_v29, %v9671_v50  ;;  %v9383_v59 = vld [vmem:[#allocation36 + $0x548] sm:$0xf]  ;;  %v10698_v42 = vld [vmem:[#allocation36 + $0x714] sm:$0xf0]  ;;  %v9352_v50 = vor.u32 %v10634_v30, %v9351_v28  ;;  %v9081_v29 = vld [vmem:[#allocation36 + $0x2f8] sm:$0xf0] }
 0x97a   :  { %6060 = vmatpush.bf16.msra.mxu3 %v9144_v17  ;;  %v9448_v17 = vor.u32 %v10658_v4, %v9447_v9  ;;  %v9239_v9 = vld [vmem:[#allocation36 + $0x428] sm:$0xf]  ;;  %v10606_v4 = vld [vmem:[#allocation36 + $0x434] sm:$0xf0]  ;;  %v9084_v31 = vor.u32 %v10564_v48, %v9081_v29  ;;  %v10488_v54 = vld [vmem:[#allocation36 + $0x8c] sm:$0xf] }
 0x97b   :  { %6024 = vmatpush.bf16.msra.mxu0 %v8712_v55  ;;  %6051 = vmatmul.bf16.vlgmr.msra.gmra.mxu2 %v13359_v52  ;;  %v9400_v55 = vor.u32 %v10646_v60, %v9399_v5  ;;  %v13398_v5 = vld [vmem:[#allocation38] sm:$0xf]  ;;  %v10496_v60 = vld [vmem:[#allocation36 + $0xcc] sm:$0xf]  ;;  %v8905_v30 = vld [vmem:[#allocation36 + $0x198] sm:$0xf0] }
 0x97c   :  { %6037 = vmatpush.bf16.msra.mxu1 %v8840_v56  ;;  %6095 = vmatpush.bf16.msrb.mxu2 %v9592_v3  ;;  %v9255_v56 = vld [vmem:[#allocation36 + $0x448] sm:$0xf]  ;;  %v10520_v28 = vld [vmem:[#allocation36 + $0x18c] sm:$0xf]  ;;  %v8889_v29 = vld [vmem:[#allocation36 + $0x178] sm:$0xf0] }
 0x97d   :  { %v9256_v3 = vor.u32 %v10610_v57, %v9255_v56  ;;  %v9065_v56 = vld [vmem:[#allocation36 + $0x2d8] sm:$0xf0]  ;;  %v10592_v57 = vld [vmem:[#allocation36 + $0x3cc] sm:$0xf] }
 0x97e   :  { %6061 = vmatpush.bf16.msra.mxu3 %v9128_v39  ;;  %6025 = vmatmul.bf16.vlgmr.msra.gmra.mxu0 %v13361_v40  ;;  %v9432_v39 = vor.u32 %v10654_v27, %v9431_v26  ;;  %v9368_v26 = vor.u32 %v10638_v15, %v9367_v7  ;;  %v10602_v27 = vld [vmem:[#allocation36 + $0x414] sm:$0xf0]  ;;  %v9177_v7 = vld [vmem:[#allocation36 + $0x3b8] sm:$0xf0] }
 0x97f   :  { %6069 = vmatpush.bf16.msrb.mxu0 %v9336_v61  ;;  %6038 = vmatmul.bf16.vlgmr.msra.gmra.mxu1 %v13366_v21  ;;  %v9511_v61 = vld [vmem:[#allocation36 + $0x648] sm:$0xf] }
 0x980   :  { %6082 = vmatpush.bf16.msrb.mxu1 %v9464_v62  ;;  %6096 = vmatpush.bf16.msrb.mxu2 %v9576_v20  ;;  %v10674_v62 = vld [vmem:[#allocation36 + $0x654] sm:$0xf0]  ;;  %v9223_v20 = vld [vmem:[#allocation36 + $0x408] sm:$0xf] }
 0x981   :  { %v9512_v19 = vor.u32 %v10674_v62, %v9511_v61  ;;  %v9224_v45 = vor.u32 %v10602_v27, %v9223_v20  ;;  %v10492_v61 = vld [vmem:[#allocation36 + $0xac] sm:$0xf]  ;;  %v8793_v62 = vld [vmem:[#allocation36 + $0xb8] sm:$0xf0] }
 0x982   :  { %6062 = vmatpush.bf16.msra.mxu3 %v9112_v33  ;;  %v10614_v33 = vld [vmem:[#allocation36 + $0x474] sm:$0xf0]  ;;  %v8777_v20 = vld [vmem:[#allocation36 + $0x98] sm:$0xf0] }
 0x983   :  { %6070 = vmatpush.bf16.msrb.mxu0 %v9320_v16  ;;  %v9272_v36 = vor.u32 %v10614_v33, %v9271_v0  ;;  %v9495_v16 = vld [vmem:[#allocation36 + $0x628] sm:$0xf]  ;;  %v9608_v33 = vor.u32 %v10698_v42, %v9607_v41  ;;  %v8780_v42 = vor.u32 %v10488_v54, %v8777_v20 }
 0x984   :  { %6083 = vmatpush.bf16.msrb.mxu1 %v9448_v17  ;;  %6097 = vmatpush.bf16.msrb.mxu2 %v9560_v43  ;;  %v10670_v17 = vld [vmem:[#allocation36 + $0x634] sm:$0xf0]  ;;  %v10500_v43 = vld [vmem:[#allocation36 + $0xec] sm:$0xf] }
 0x985   :  { %v9496_v37 = vor.u32 %v10670_v17, %v9495_v16  ;;  %v8796_v17 = vor.u32 %v10492_v61, %v8793_v62 }
 0x986   :  { %6063 = vmatpush.bf16.msra.mxu3 %v9096_v11  ;;  %v10642_v11 = vld [vmem:[#allocation36 + $0x554] sm:$0xf0] }
 0x987   :  { %6071 = vmatpush.bf16.msrb.mxu0 %v9304_v38  ;;  %v9479_v38 = vld [vmem:[#allocation36 + $0x608] sm:$0xf] }
 0x988   :  { %6084 = vmatpush.bf16.msrb.mxu1 %v9432_v39  ;;  %6098 = vmatpush.bf16.msrb.mxu2 %v9544_v53  ;;  %v10666_v39 = vld [vmem:[#allocation36 + $0x614] sm:$0xf0] }
 0x989   :  { %6064 = vmatmul.bf16.vlgmr.msra.gmra.mxu3 %v13364_v10  ;;  %v9480_v0 = vor.u32 %v10666_v39, %v9479_v38  ;;  %v10584_v38 = vld [vmem:[#allocation36 + $0x38c] sm:$0xf]  ;;  %v9161_v39 = vld [vmem:[#allocation36 + $0x398] sm:$0xf0] }
 0x98a   :  { %6108 = vmatpush.bf16.msrb.mxu3 %v9720_v8  ;;  %v9384_v8 = vor.u32 %v10642_v11, %v9383_v59  ;;  %v8812_v59 = vor.u32 %v10496_v60, %v8809_v23 }
 0x98b   :  { %6072 = vmatpush.bf16.msrb.mxu0 %v9288_v51  ;;  %v10596_v51 = vld [vmem:[#allocation36 + $0x3ec] sm:$0xf] }
 0x98c   :  { %6085 = vmatpush.bf16.msrb.mxu1 %v9416_v63  ;;  %6099 = vmatpush.bf16.msrb.mxu2 %v9528_v58  ;;  %v9209_v63 = vld [vmem:[#allocation36 + $0x3f8] sm:$0xf0] }
 0x98d   :  { %v9212_v32 = vor.u32 %v10596_v51, %v9209_v63  ;;  %v9193_v58 = vld [vmem:[#allocation36 + $0x3d8] sm:$0xf0]  ;;  %v10548_v51 = vld [vmem:[#allocation36 + $0x26c] sm:$0xf] }
 0x98e   :  { %6109 = vmatpush.bf16.msrb.mxu3 %v9704_v13  ;;  %v9240_v13 = vor.u32 %v10606_v4, %v9239_v9  ;;  %v9196_v1 = vor.u32 %v10592_v57, %v9193_v58  ;;  %v10556_v9 = vld [vmem:[#allocation36 + $0x2ac] sm:$0xf]  ;;  %v9001_v58 = vld [vmem:[#allocation36 + $0x258] sm:$0xf0] }
 0x98f   :  { %6073 = vmatpush.bf16.msrb.mxu0 %v9272_v36  ;;  %v8937_v36 = vld [vmem:[#allocation36 + $0x1d8] sm:$0xf0]  ;;  %v10544_v57 = vld [vmem:[#allocation36 + $0x24c] sm:$0xf] }
 0x990   :  { %6086 = vmatpush.bf16.msrb.mxu1 %v9400_v55  ;;  %6100 = vmatpush.bf16.msrb.mxu2 %v9512_v19  ;;  %v10560_v55 = vld [vmem:[#allocation36 + $0x2cc] sm:$0xf]  ;;  %v8940_v11 = vor.u32 %v10528_v35, %v8937_v36  ;;  %v9049_v19 = vld [vmem:[#allocation36 + $0x2b8] sm:$0xf0] }
 0x991   :  { %v9068_v12 = vor.u32 %v10560_v55, %v9065_v56  ;;  %v10512_v55 = vld [vmem:[#allocation36 + $0x14c] sm:$0xf]  ;;  %v8873_v56 = vld [vmem:[#allocation36 + $0x158] sm:$0xf0] }
 0x992   :  { %6110 = vmatpush.bf16.msrb.mxu3 %v9688_v44  ;;  %v8825_v44 = vld [vmem:[#allocation36 + $0xf8] sm:$0xf0]  ;;  %v8876_v62 = vor.u32 %v10512_v55, %v8873_v56 }
 0x993   :  { %6074 = vmatpush.bf16.msrb.mxu0 %v9256_v3  ;;  %v8828_v53 = vor.u32 %v10500_v43, %v8825_v44  ;;  %v10524_v3 = vld [vmem:[#allocation36 + $0x1ac] sm:$0xf]  ;;  %v8908_v43 = vor.u32 %v10520_v28, %v8905_v30  ;;  %v8841_v30 = vld [vmem:[#allocation36 + $0x118] sm:$0xf0] }
 0x994   :  { %6087 = vmatpush.bf16.msrb.mxu1 %v9384_v8  ;;  %6101 = vmatpush.bf16.msrb.mxu2 %v9496_v37  ;;  %v8921_v8 = vld [vmem:[#allocation36 + $0x1b8] sm:$0xf0]  ;;  %v10552_v37 = vld [vmem:[#allocation36 + $0x28c] sm:$0xf] }
 0x995   :  { %v8924_v18 = vor.u32 %v10524_v3, %v8921_v8  ;;  %v10484_v44 = vld [vmem:[#allocation36 + $0x6c] sm:$0xf]  ;;  %v9004_v8 = vor.u32 %v10544_v57, %v9001_v58  ;;  %v9449_v58 = vld [vmem:[#allocation36 + $0x5d8] sm:$0xf0] }
 0x996   :  { %6111 = vmatpush.bf16.msrb.mxu3 %v9672_v2  ;;  %v8956_v2 = vor.u32 %v10532_v46, %v8953_v47  ;;  %v8761_v46 = vld [vmem:[#allocation36 + $0x78] sm:$0xf0]  ;;  %v10504_v28 = vld [vmem:[#allocation36 + $0x10c] sm:$0xf] }
 0x997   :  { %6075 = vmatpush.bf16.msrb.mxu0 %v9240_v13  ;;  %v8764_v60 = vor.u32 %v10484_v44, %v8761_v46  ;;  %v10628_v44 = vld [vmem:[#allocation36 + $0x4ec] sm:$0xf]  ;;  %v9337_v46 = vld [vmem:[#allocation36 + $0x4f8] sm:$0xf0] }
 0x998   :  { %6088 = vmatpush.bf16.msrb.mxu1 %v9368_v26  ;;  %6102 = vmatpush.bf16.msrb.mxu2 %v9480_v0  ;;  %v5818_v4 = vpop.f32.mrf.mxu0  ;;  %v9052_v26 = vor.u32 %v10556_v9, %v9049_v19  ;;  %v9017_v0 = vld [vmem:[#allocation36 + $0x278] sm:$0xf0]  ;;  %v10656_v57 = vld [vmem:[#allocation36 + $0x5cc] sm:$0xf] }
 0x999   :  { %v5831_v16 = vpop.f32.mrf.mxu1  ;;  %v9020_v35 = vor.u32 %v10548_v51, %v9017_v0  ;;  %v8857_v19 = vld [vmem:[#allocation36 + $0x138] sm:$0xf0]  ;;  %v8844_v51 = vor.u32 %v10504_v28, %v8841_v30  ;;  %v10724_v0 = vld [vmem:[#allocation36 + $0x7ec] sm:$0xf] }
 0x99a   :  { %6112 = vmatpush.bf16.msrb.mxu3 %v9656_v49  ;;  %v4521_v49 = vperm.slane %v13398_v5, 0  ;;  %v10616_v30 = vld [vmem:[#allocation36 + $0x48c] sm:$0xf] }
 0x99b   :  { %6076 = vmatpush.bf16.msrb.mxu0 %v9224_v45  ;;  %6103 = vmatmul.bf16.vlgmr.msrb.gmra.mxu2 %v13374_v24  ;;  %v9164_v45 = vor.u32 %v10584_v38, %v9161_v39  ;;  %v10536_v38 = vld [vmem:[#allocation36 + $0x20c] sm:$0xf]  ;;  %v8969_v39 = vld [vmem:[#allocation36 + $0x218] sm:$0xf0] }
 0x99c   :  { %6089 = vmatpush.bf16.msrb.mxu1 %v9352_v50  ;;  %6147 = vmatpush.bf16.msra.mxu2 %v9084_v31  ;;  %v5819_v15 = vadd.f32 %v5818_v4, %v4521_v49  ;;  %v10516_v50 = vld [vmem:[#allocation36 + $0x16c] sm:$0xf] }
 0x99d   :  { %v13407_v41 = vpop.f32.mrf.mxu2  ;;  %v8892_v23 = vor.u32 %v10516_v50, %v8889_v29  ;;  %v10480_v31 = vld [vmem:[#allocation36 + $0x4c] sm:$0xf] }
 0x99e   :  { %6113 = vmatpush.bf16.msrb.mxu3 %v9640_v6  ;;  %6077 = vmatmul.bf16.vlgmr.msrb.gmra.mxu0 %v13376_v34  ;;  %v10588_v6 = vld [vmem:[#allocation36 + $0x3ac] sm:$0xf]  ;;  %v13405_v13 = vadd.f32 %v5831_v16, %v5819_v15  ;;  %v13409_v47 = vpop.f32.mrf.mxu3  ;;  %v9113_v16 = vld [vmem:[#allocation36 + $0x338] sm:$0xf0] }
 0x99f   :  { %6121 = vmatpush.bf16.msra.mxu0 %v8828_v53  ;;  %6090 = vmatmul.bf16.vlgmr.msrb.gmra.mxu1 %v13380_v22  ;;  %v9180_v27 = vor.u32 %v10588_v6, %v9177_v7  ;;  %v9145_v53 = vld [vmem:[#allocation36 + $0x378] sm:$0xf0]  ;;  %v10576_v49 = vld [vmem:[#allocation36 + $0x34c] sm:$0xf] }
 0x9a0   :  { %6134 = vmatpush.bf16.msra.mxu1 %v8956_v2  ;;  %6148 = vmatpush.bf16.msra.mxu2 %v9068_v12  ;;  %v5820_v63 = vpop.f32.mrf.mxu0  ;;  %v10476_v12 = vld [vmem:[#allocation36 + $0x2c] sm:$0xf]  ;;  %v8985_v7 = vld [vmem:[#allocation36 + $0x238] sm:$0xf0] }
 0x9a1   :  { %v5833_v2 = vpop.f32.mrf.mxu1  ;;  %v10508_v4 = vld [vmem:[#allocation36 + $0x12c] sm:$0xf]  ;;  %v9593_v63 = vld [vmem:[#allocation36 + $0x6f8] sm:$0xf0] }
 0x9a2   :  { %6114 = vmatpush.bf16.msrb.mxu3 %v9624_v25  ;;  %v9033_v25 = vld [vmem:[#allocation36 + $0x298] sm:$0xf0]  ;;  %v10540_v6 = vld [vmem:[#allocation36 + $0x22c] sm:$0xf]  ;;  %v8972_v2 = vor.u32 %v10536_v38, %v8969_v39 }
 0x9a3   :  { %6122 = vmatpush.bf16.msra.mxu0 %v8812_v59  ;;  %v9036_v48 = vor.u32 %v10552_v37, %v9033_v25  ;;  %v9129_v59 = vld [vmem:[#allocation36 + $0x358] sm:$0xf0]  ;;  %v10572_v15 = vld [vmem:[#allocation36 + $0x32c] sm:$0xf]  ;;  %v8988_v37 = vor.u32 %v10540_v6, %v8985_v7 }
 0x9a4   :  { %6135 = vmatpush.bf16.msra.mxu1 %v8940_v11  ;;  %6149 = vmatpush.bf16.msra.mxu2 %v9052_v26  ;;  %v9132_v9 = vor.u32 %v10576_v49, %v9129_v59  ;;  %v8860_v26 = vor.u32 %v10508_v4, %v8857_v19  ;;  %v9116_v25 = vor.u32 %v10572_v15, %v9113_v16  ;;  %v10692_v50 = vld [vmem:[#allocation36 + $0x6ec] sm:$0xf]  ;;  %v9433_v7 = vld [vmem:[#allocation36 + $0x5b8] sm:$0xf0] }
 0x9a5   :  { %v5846_v11 = vpop.f32.mrf.mxu2  ;;  %v9596_v55 = vor.u32 %v10692_v50, %v9593_v63  ;;  %v10688_v49 = vld [vmem:[#allocation36 + $0x6cc] sm:$0xf]  ;;  %v9561_v16 = vld [vmem:[#allocation36 + $0x6b8] sm:$0xf0] }
 0x9a6   :  { %6115 = vmatpush.bf16.msrb.mxu3 %v9608_v33  ;;  %v10580_v33 = vld [vmem:[#allocation36 + $0x36c] sm:$0xf]  ;;  %v5859_v3 = vpop.f32.mrf.mxu3  ;;  %v9577_v11 = vld [vmem:[#allocation36 + $0x6d8] sm:$0xf0] }
 0x9a7   :  { %6123 = vmatpush.bf16.msra.mxu0 %v8796_v17  ;;  %v9148_v36 = vor.u32 %v10580_v33, %v9145_v53  ;;  %v9721_v33 = vld [vmem:[#allocation36 + $0x7f8] sm:$0xf0]  ;;  %v9452_v3 = vor.u32 %v10656_v57, %v9449_v58  ;;  %v9580_v4 = vor.u32 %v10688_v49, %v9577_v11  ;;  %v10652_v6 = vld [vmem:[#allocation36 + $0x5ac] sm:$0xf] }
 0x9a8   :  { %6136 = vmatpush.bf16.msra.mxu1 %v8924_v18  ;;  %6150 = vmatpush.bf16.msra.mxu2 %v9036_v48  ;;  %v10472_v18 = vld [vmem:[#allocation36 + $0xc] sm:$0xf]  ;;  %v9724_v56 = vor.u32 %v10724_v0, %v9721_v33  ;;  %v9436_v28 = vor.u32 %v10652_v6, %v9433_v7  ;;  %v9273_v50 = vld [vmem:[#allocation36 + $0x478] sm:$0xf0] }
 0x9a9   :  { %6116 = vmatmul.bf16.vlgmr.msrb.gmra.mxu3 %v13378_v14  ;;  %v10660_v48 = vld [vmem:[#allocation36 + $0x5ec] sm:$0xf]  ;;  %v9401_v33 = vld [vmem:[#allocation36 + $0x578] sm:$0xf0] }
 0x9aa   :  { %6160 = vmatpush.bf16.msra.mxu3 %v9212_v32  ;;  %v8745_v32 = vld [vmem:[#allocation36 + $0x58] sm:$0xf0]  ;;  %v13411_v17 = vpop.f32.mrf.mxu0  ;;  %v10684_v15 = vld [vmem:[#allocation36 + $0x6ac] sm:$0xf] }
 0x9ab   :  { %6124 = vmatpush.bf16.msra.mxu0 %v8780_v42  ;;  %v8748_v61 = vor.u32 %v10480_v31, %v8745_v32  ;;  %v13413_v54 = vpop.f32.mrf.mxu1  ;;  %v10568_v42 = vld [vmem:[#allocation36 + $0x30c] sm:$0xf]  ;;  %v9340_v31 = vor.u32 %v10628_v44, %v9337_v46  ;;  %v9241_v6 = vld [vmem:[#allocation36 + $0x438] sm:$0xf0] }
 0x9ac   :  { %6137 = vmatpush.bf16.msra.mxu1 %v8908_v43  ;;  %6151 = vmatpush.bf16.msra.mxu2 %v9020_v35  ;;  %v9097_v43 = vld [vmem:[#allocation36 + $0x318] sm:$0xf0]  ;;  %v10624_v35 = vld [vmem:[#allocation36 + $0x4cc] sm:$0xf] }
 0x9ad   :  { %v10648_v39 = vld [vmem:[#allocation36 + $0x58c] sm:$0xf] }
 0x9ae   :  { %6161 = vmatpush.bf16.msra.mxu3 %v9196_v1  ;;  %v8729_v1 = vld [vmem:[#allocation36 + $0x38] sm:$0xf0]  ;;  %v10712_v44 = vld [vmem:[#allocation36 + $0x78c] sm:$0xf] }
 0x9af   :  { %6125 = vmatpush.bf16.msra.mxu0 %v8764_v60  ;;  %v8732_v20 = vor.u32 %v10476_v12, %v8729_v1  ;;  %v9100_v60 = vor.u32 %v10568_v42, %v9097_v43  ;;  %v9417_v42 = vld [vmem:[#allocation36 + $0x598] sm:$0xf0]  ;;  %v10680_v43 = vld [vmem:[#allocation36 + $0x68c] sm:$0xf] }
 0x9b0   :  { %6138 = vmatpush.bf16.msra.mxu1 %v8892_v23  ;;  %6152 = vmatpush.bf16.msra.mxu2 %v9004_v8  ;;  %v13415_v53 = vpop.f32.mrf.mxu2  ;;  %v10620_v8 = vld [vmem:[#allocation36 + $0x4ac] sm:$0xf] }
 0x9b1   :  { %v10644_v0 = vld [vmem:[#allocation36 + $0x56c] sm:$0xf] }
 0x9b2   :  { %6162 = vmatpush.bf16.msra.mxu3 %v9180_v27  ;;  %v8713_v27 = vld [vmem:[#allocation36 + $0x18] sm:$0xf0]  ;;  %v13417_v23 = vpop.f32.mrf.mxu3  ;;  %v5872_v59 = vpop.f32.mrf.mxu0  ;;  %v10640_v49 = vld [vmem:[#allocation36 + $0x54c] sm:$0xf] }
 0x9b3   :  { %6126 = vmatpush.bf16.msra.mxu0 %v8748_v61  ;;  %v8716_v29 = vor.u32 %v10472_v18, %v8713_v27  ;;  %v10720_v61 = vld [vmem:[#allocation36 + $0x7cc] sm:$0xf]  ;;  %v5885_v12 = vpop.f32.mrf.mxu1  ;;  %v9385_v59 = vld [vmem:[#allocation36 + $0x558] sm:$0xf0] }
 0x9b4   :  { %6139 = vmatpush.bf16.msra.mxu1 %v8876_v62  ;;  %6153 = vmatpush.bf16.msra.mxu2 %v8988_v37  ;;  %v9705_v62 = vld [vmem:[#allocation36 + $0x7d8] sm:$0xf0]  ;;  %v10716_v18 = vld [vmem:[#allocation36 + $0x7ac] sm:$0xf] }
 0x9b5   :  { %v9708_v19 = vor.u32 %v10720_v61, %v9705_v62  ;;  %v9289_v37 = vld [vmem:[#allocation36 + $0x498] sm:$0xf0]  ;;  %v10672_v11 = vld [vmem:[#allocation36 + $0x64c] sm:$0xf] }
 0x9b6   :  { %6163 = vmatpush.bf16.msra.mxu3 %v9164_v45  ;;  %v9465_v45 = vld [vmem:[#allocation36 + $0x5f8] sm:$0xf0]  ;;  %v10704_v12 = vld [vmem:[#allocation36 + $0x74c] sm:$0xf] }
 0x9b7   :  { %6127 = vmatpush.bf16.msra.mxu0 %v8732_v20  ;;  %v9468_v32 = vor.u32 %v10660_v48, %v9465_v45  ;;  %v9689_v20 = vld [vmem:[#allocation36 + $0x7b8] sm:$0xf0]  ;;  %v9420_v48 = vor.u32 %v10648_v39, %v9417_v42  ;;  %v10612_v45 = vld [vmem:[#allocation36 + $0x46c] sm:$0xf] }
 0x9b8   :  { %6140 = vmatpush.bf16.msra.mxu1 %v8860_v26  ;;  %6154 = vmatpush.bf16.msra.mxu2 %v8972_v2  ;;  %v5898_v26 = vpop.f32.mrf.mxu2  ;;  %v9692_v38 = vor.u32 %v10716_v18, %v9689_v20  ;;  %v10676_v2 = vld [vmem:[#allocation36 + $0x66c] sm:$0xf]  ;;  %v9513_v62 = vld [vmem:[#allocation36 + $0x658] sm:$0xf0] }
 0x9b9   :  { %v10636_v7 = vld [vmem:[#allocation36 + $0x52c] sm:$0xf]  ;;  %v9369_v20 = vld [vmem:[#allocation36 + $0x538] sm:$0xf0] }
 0x9ba   :  { %6164 = vmatpush.bf16.msra.mxu3 %v9148_v36  ;;  %v9321_v36 = vld [vmem:[#allocation36 + $0x4d8] sm:$0xf0]  ;;  %v10668_v26 = vld [vmem:[#allocation36 + $0x62c] sm:$0xf] }
 0x9bb   :  { %6128 = vmatpush.bf16.msra.mxu0 %v8716_v29  ;;  %v9324_v1 = vor.u32 %v10624_v35, %v9321_v36  ;;  %6155 = vmatmul.bf16.vlgmr.msra.gmra.mxu2 %v13359_v52  ;;  %v9564_v52 = vor.u32 %v10684_v15, %v9561_v16  ;;  %v13423_v46 = vpop.f32.mrf.mxu0  ;;  %v9276_v35 = vor.u32 %v10612_v45, %v9273_v50  ;;  %v9225_v39 = vld [vmem:[#allocation36 + $0x418] sm:$0xf0]  ;;  %v10632_v42 = vld [vmem:[#allocation36 + $0x50c] sm:$0xf] }
 0x9bc   :  { %6141 = vmatpush.bf16.msra.mxu1 %v8844_v51  ;;  %6199 = vmatpush.bf16.msrb.mxu2 %v9596_v55  ;;  %v13425_v29 = vpop.f32.mrf.mxu1  ;;  %v9404_v36 = vor.u32 %v10644_v0, %v9401_v33  ;;  %v10608_v55 = vld [vmem:[#allocation36 + $0x44c] sm:$0xf]  ;;  %v9516_v16 = vor.u32 %v10672_v11, %v9513_v62  ;;  %v9783_v0 = vld [vmem:[#allocation42 + $0x70] sm:$0xf] }
 0x9be   :  { %6165 = vmatpush.bf16.msra.mxu3 %v9132_v9  ;;  %v9305_v9 = vld [vmem:[#allocation36 + $0x4b8] sm:$0xf0]  ;;  %6129 = vmatmul.bf16.vlgmr.msra.gmra.mxu0 %v13361_v40 }
 0x9bf   :  { %6173 = vmatpush.bf16.msrb.mxu0 %v9340_v31  ;;  %6142 = vmatmul.bf16.vlgmr.msra.gmra.mxu1 %v13366_v21  ;;  %v9308_v27 = vor.u32 %v10620_v8, %v9305_v9  ;;  %v9545_v40 = vld [vmem:[#allocation36 + $0x698] sm:$0xf0]  ;;  %v9292_v21 = vor.u32 %v10616_v30, %v9289_v37  ;;  %v10708_v31 = vld [vmem:[#allocation36 + $0x76c] sm:$0xf]  ;;  %v4522_v37 = vperm.slane %v13398_v5, 1 }
 0x9c0   :  { %6186 = vmatpush.bf16.msrb.mxu1 %v9468_v32  ;;  %6200 = vmatpush.bf16.msrb.mxu2 %v9580_v4  ;;  %v9548_v51 = vor.u32 %v10680_v43, %v9545_v40  ;;  %v9657_v32 = vld [vmem:[#allocation36 + $0x778] sm:$0xf0]  ;;  %v13427_v61 = vpop.f32.mrf.mxu2  ;;  %v9388_v4 = vor.u32 %v10640_v49, %v9385_v59  ;;  %v5845_v43 = vadd.f32 %v13407_v41, %v13405_v13  ;;  %v9839_v49 = vld [vmem:[#allocation42 + $0xe0] sm:$0xf]  ;;  %v10756_v59 = vld [vmem:[#allocation42 + $0xe4] sm:$0xf0] }
 0x9c1   :  { %v9660_v58 = vor.u32 %v10708_v31, %v9657_v32  ;;  %v9625_v30 = vld [vmem:[#allocation36 + $0x738] sm:$0xf0]  ;;  %v5923_v50 = vadd.f32 %v13423_v46, %v4522_v37  ;;  %v10758_v31 = vld [vmem:[#allocation42 + $0xf4] sm:$0xf0] }
 0x9c2   :  { %6166 = vmatpush.bf16.msra.mxu3 %v9116_v25  ;;  %v5911_v25 = vpop.f32.mrf.mxu3  ;;  %v5858_v32 = vadd.f32 %v13409_v47, %v5845_v43  ;;  %v10774_v37 = vld [vmem:[#allocation42 + $0x174] sm:$0xf0] }
 0x9c3   :  { %6174 = vmatpush.bf16.msrb.mxu0 %v9324_v1  ;;  %v9641_v1 = vld [vmem:[#allocation36 + $0x758] sm:$0xf0]  ;;  %v5924_v8 = vpop.f32.mrf.mxu0 }
 0x9c4   :  { %6187 = vmatpush.bf16.msrb.mxu1 %v9452_v3  ;;  %6201 = vmatpush.bf16.msrb.mxu2 %v9564_v52  ;;  %v5937_v15 = vpop.f32.mrf.mxu1  ;;  %v9644_v18 = vor.u32 %v10704_v12, %v9641_v1  ;;  %v9372_v52 = vor.u32 %v10636_v7, %v9369_v20  ;;  %v5871_v11 = vadd.f32 %v13411_v17, %v5858_v32  ;;  %v9767_v1 = vld [vmem:[#allocation42 + $0x50] sm:$0xf]  ;;  %v10736_v7 = vld [vmem:[#allocation42 + $0x44] sm:$0xf0] }
 0x9c5   :  { %v9840_v12 = vor.u32 %v10756_v59, %v9839_v49  ;;  %v9831_v8 = vld [vmem:[#allocation42 + $0xd0] sm:$0xf]  ;;  %v10752_v15 = vld [vmem:[#allocation42 + $0xc4] sm:$0xf0] }
 0x9c6   :  { %6167 = vmatpush.bf16.msra.mxu3 %v9100_v60  ;;  %v9529_v60 = vld [vmem:[#allocation36 + $0x678] sm:$0xf0]  ;;  %v5884_v17 = vadd.f32 %v13413_v54, %v5871_v11 }
 0x9c7   :  { %6175 = vmatpush.bf16.msrb.mxu0 %v9308_v27  ;;  %v9532_v57 = vor.u32 %v10676_v2, %v9529_v60  ;;  %v9497_v27 = vld [vmem:[#allocation36 + $0x638] sm:$0xf0]  ;;  %v10742_v2 = vld [vmem:[#allocation42 + $0x74] sm:$0xf0] }
 0x9c8   :  { %6188 = vmatpush.bf16.msrb.mxu1 %v9436_v28  ;;  %6202 = vmatpush.bf16.msrb.mxu2 %v9548_v51  ;;  %v10700_v28 = vld [vmem:[#allocation36 + $0x72c] sm:$0xf]  ;;  %v9500_v40 = vor.u32 %v10668_v26, %v9497_v27  ;;  %v5950_v45 = vpop.f32.mrf.mxu2  ;;  %v9847_v60 = vld [vmem:[#allocation42 + $0xf0] sm:$0xf]  ;;  %v9784_v46 = vor.u32 %v10742_v2, %v9783_v0  ;;  %v10734_v26 = vld [vmem:[#allocation42 + $0x34] sm:$0xf0] }
 0x9c9   :  { %6168 = vmatmul.bf16.vlgmr.msra.gmra.mxu3 %v13364_v10  ;;  %v9673_v10 = vld [vmem:[#allocation36 + $0x798] sm:$0xf0]  ;;  %v10696_v51 = vld [vmem:[#allocation36 + $0x70c] sm:$0xf] }
 0x9ca   :  { %6212 = vmatpush.bf16.msrb.mxu3 %v9724_v56  ;;  %v9676_v63 = vor.u32 %v10712_v44, %v9673_v10  ;;  %v9257_v56 = vld [vmem:[#allocation36 + $0x458] sm:$0xf0]  ;;  %v9628_v44 = vor.u32 %v10700_v28, %v9625_v30  ;;  %v10750_v28 = vld [vmem:[#allocation42 + $0xb4] sm:$0xf0]  ;;  %v9903_v45 = vld [vmem:[#allocation42 + $0x160] sm:$0xf] }
 0x9cb   :  { %6176 = vmatpush.bf16.msrb.mxu0 %v9292_v21  ;;  %v9260_v9 = vor.u32 %v10608_v55, %v9257_v56  ;;  %v9353_v10 = vld [vmem:[#allocation36 + $0x518] sm:$0xf0]  ;;  %v10664_v21 = vld [vmem:[#allocation36 + $0x60c] sm:$0xf]  ;;  %v5936_v55 = vadd.f32 %v13425_v29, %v5923_v50  ;;  %v9848_v56 = vor.u32 %v10758_v31, %v9847_v60  ;;  %v10738_v29 = vld [vmem:[#allocation42 + $0x54] sm:$0xf0] }
 0x9cc   :  { %6189 = vmatpush.bf16.msrb.mxu1 %v9420_v48  ;;  %v13429_v3 = vpop.f32.mrf.mxu3  ;;  %6203 = vmatpush.bf16.msrb.mxu2 %v9532_v57  ;;  %v9481_v48 = vld [vmem:[#allocation36 + $0x618] sm:$0xf0]  ;;  %v9356_v41 = vor.u32 %v10632_v42, %v9353_v10  ;;  %v9775_v57 = vld [vmem:[#allocation42 + $0x60] sm:$0xf]  ;;  %v10772_v50 = vld [vmem:[#allocation42 + $0x164] sm:$0xf0] }
 0x9cd   :  { %v5949_v47 = vadd.f32 %v13427_v61, %v5936_v55  ;;  %v9768_v61 = vor.u32 %v10738_v29, %v9767_v1  ;;  %v9815_v27 = vld [vmem:[#allocation42 + $0xb0] sm:$0xf]  ;;  %v9807_v10 = vld [vmem:[#allocation42 + $0xa0] sm:$0xf]  ;;  %v9904_v0 = vor.u32 %v10772_v50, %v9903_v45  ;;  %v10728_v29 = vld [vmem:[#allocation42 + $0x4] sm:$0xf0] }
 0x9ce   :  { %6213 = vmatpush.bf16.msrb.mxu3 %v9708_v19  ;;  %v10604_v19 = vld [vmem:[#allocation36 + $0x42c] sm:$0xf]  ;;  %v9911_v30 = vld [vmem:[#allocation42 + $0x170] sm:$0xf]  ;;  %v9816_v43 = vor.u32 %v10750_v28, %v9815_v27  ;;  %v10766_v28 = vld [vmem:[#allocation42 + $0x134] sm:$0xf0] }
 0x9cf   :  { %6177 = vmatpush.bf16.msrb.mxu0 %v9276_v35  ;;  %v9244_v25 = vor.u32 %v10604_v19, %v9241_v6  ;;  %v9484_v35 = vor.u32 %v10664_v21, %v9481_v48  ;;  %v9759_v6 = vld [vmem:[#allocation42 + $0x40] sm:$0xf]  ;;  %v10748_v48 = vld [vmem:[#allocation42 + $0xa4] sm:$0xf0]  ;;  %v9799_v55 = vld [vmem:[#allocation42 + $0x90] sm:$0xf] }
 0x9d0   :  { %6190 = vmatpush.bf16.msrb.mxu1 %v9404_v36  ;;  %6204 = vmatpush.bf16.msrb.mxu2 %v9516_v16  ;;  %v13446_v16 = vld [vmem:[#allocation39] sm:$0xf]  ;;  %v9808_v32 = vor.u32 %v10748_v48, %v9807_v10  ;;  %v9879_v27 = vld [vmem:[#allocation42 + $0x130] sm:$0xf]  ;;  %v10737_v10 = vld [vmem:[#allocation42 + $0x54] sm:$0xf] }
 0x9d1   :  { %v10753_v48 = vld [vmem:[#allocation42 + $0xd4] sm:$0xf]  ;;  %v9833_v45 = vld [vmem:[#allocation42 + $0xd8] sm:$0xf0] }
 0x9d2   :  { %6214 = vmatpush.bf16.msrb.mxu3 %v9692_v38  ;;  %v10600_v38 = vld [vmem:[#allocation36 + $0x40c] sm:$0xf] }
 0x9d3   :  { %6178 = vmatpush.bf16.msrb.mxu0 %v9260_v9  ;;  %v9228_v13 = vor.u32 %v10600_v38, %v9225_v39  ;;  %v10754_v9 = vld [vmem:[#allocation42 + $0xd4] sm:$0xf0]  ;;  %v13450_v39 = vld [vmem:[#allocation41] sm:$0xf] }
 0x9d4   :  { %6191 = vmatpush.bf16.msrb.mxu1 %v9388_v4  ;;  %v5963_v33 = vpop.f32.mrf.mxu3  ;;  %6205 = vmatpush.bf16.msrb.mxu2 %v9500_v40  ;;  %v5962_v4 = vadd.f32 %v13429_v3, %v5949_v47  ;;  %v9832_v19 = vor.u32 %v10754_v9, %v9831_v8  ;;  %v9751_v3 = vld [vmem:[#allocation42 + $0x30] sm:$0xf]  ;;  %v9743_v40 = vld [vmem:[#allocation42 + $0x20] sm:$0xf]  ;;  %v6241_v2 = vperm.slane %v13450_v39, 0  ;;  %v6242_v60 = vperm.slane %v13450_v39, 1 }
 0x9d5   :  { %v9752_v42 = vor.u32 %v10734_v26, %v9751_v3  ;;  %v9727_v47 = vld [vmem:[#allocation42] sm:$0xf]  ;;  %v10744_v9 = vld [vmem:[#allocation42 + $0x84] sm:$0xf0]  ;;  %v10739_v26 = vld [vmem:[#allocation42 + $0x64] sm:$0xf] }
 0x9d6   :  { %6215 = vmatpush.bf16.msrb.mxu3 %v9676_v63  ;;  %v9609_v63 = vld [vmem:[#allocation36 + $0x718] sm:$0xf0]  ;;  %v9791_v8 = vld [vmem:[#allocation42 + $0x80] sm:$0xf] }
 0x9d7   :  { %6179 = vmatpush.bf16.msrb.mxu0 %v9244_v25  ;;  %v9612_v36 = vor.u32 %v10696_v51, %v9609_v63 }
 0x9d8   :  { %6192 = vmatpush.bf16.msrb.mxu1 %v9372_v52  ;;  %6206 = vmatpush.bf16.msrb.mxu2 %v9484_v35  ;;  %v9912_v52 = vor.u32 %v10774_v37, %v9911_v30  ;;  %v9735_v35 = vld [vmem:[#allocation42 + $0x10] sm:$0xf]  ;;  %v9777_v30 = vld [vmem:[#allocation42 + $0x68] sm:$0xf0]  ;;  %v10755_v37 = vld [vmem:[#allocation42 + $0xe4] sm:$0xf] }
 0x9da   :  { %6216 = vmatpush.bf16.msrb.mxu3 %v9660_v58  ;;  %v10740_v58 = vld [vmem:[#allocation42 + $0x64] sm:$0xf0] }
 0x9db   :  { %6180 = vmatpush.bf16.msrb.mxu0 %v9228_v13  ;;  %v9776_v62 = vor.u32 %v10740_v58, %v9775_v57  ;;  %6207 = vmatmul.bf16.vlgmr.msrb.gmra.mxu2 %v13374_v24  ;;  %v9760_v24 = vor.u32 %v10736_v7, %v9759_v6  ;;  %v9895_v57 = vld [vmem:[#allocation42 + $0x150] sm:$0xf]  ;;  %v10770_v58 = vld [vmem:[#allocation42 + $0x154] sm:$0xf0]  ;;  %v9785_v6 = vld [vmem:[#allocation42 + $0x78] sm:$0xf0] }
 0x9dc   :  { %6193 = vmatpush.bf16.msrb.mxu1 %v9356_v41  ;;  %v5987_v20 = vpop.f32.mrf.mxu1  ;;  %6677 = vmatpush.bf16.msra.mxu2 %v9912_v52  ;;  %v9896_v59 = vor.u32 %v10770_v58, %v9895_v57  ;;  %v10757_v7 = vld [vmem:[#allocation42 + $0xf4] sm:$0xf]  ;;  %v9880_v52 = vor.u32 %v10766_v28, %v9879_v27  ;;  %v9817_v58 = vld [vmem:[#allocation42 + $0xb8] sm:$0xf0]  ;;  %v4523_v28 = vperm.slane %v13398_v5, 2 }
 0x9dd   :  { %v10765_v5 = vld [vmem:[#allocation42 + $0x134] sm:$0xf] }
 0x9de   :  { %6217 = vmatpush.bf16.msrb.mxu3 %v9644_v18  ;;  %6181 = vmatmul.bf16.vlgmr.msrb.gmra.mxu0 %v13376_v34  ;;  %v9823_v34 = vld [vmem:[#allocation42 + $0xc0] sm:$0xf]  ;;  %v5974_v18 = vpop.f32.mrf.mxu0  ;;  %v6000_v21 = vpop.f32.mrf.mxu2 }
 0x9df   :  { %6651 = vmatpush.bf16.msra.mxu0 %v9784_v46  ;;  %6194 = vmatmul.bf16.vlgmr.msrb.gmra.mxu1 %v13380_v22  ;;  %v5897_v22 = vadd.f32 %v13415_v53, %v5884_v17  ;;  %v5975_v54 = vadd.f32 %v5974_v18, %v5962_v4  ;;  %v6227_v53 = vperm.slane %v13446_v16, 0  ;;  %v10741_v17 = vld [vmem:[#allocation42 + $0x74] sm:$0xf] }
 0x9e0   :  { %6664 = vmatpush.bf16.msra.mxu1 %v9848_v56  ;;  %v10746_v56 = vld [vmem:[#allocation42 + $0x94] sm:$0xf0]  ;;  %6678 = vmatpush.bf16.msra.mxu2 %v9904_v0  ;;  %v9836_v0 = vor.u32 %v10753_v48, %v9833_v45 }
 0x9e1   :  { %v5988_v25 = vadd.f32 %v5987_v20, %v5975_v54  ;;  %v5910_v38 = vadd.f32 %v13417_v23, %v5897_v22  ;;  %v6228_v23 = vperm.slane %v13446_v16, 1  ;;  %v9800_v1 = vor.u32 %v10746_v56, %v9799_v55  ;;  %v10733_v55 = vld [vmem:[#allocation42 + $0x34] sm:$0xf] }
 0x9e2   :  { %6218 = vmatpush.bf16.msrb.mxu3 %v9628_v44  ;;  %v10732_v44 = vld [vmem:[#allocation42 + $0x24] sm:$0xf0]  ;;  %v9792_v54 = vor.u32 %v10744_v9, %v9791_v8  ;;  %v9788_v20 = vor.u32 %v10741_v17, %v9785_v6  ;;  %v10749_v56 = vld [vmem:[#allocation42 + $0xb4] sm:$0xf]  ;;  %v9745_v8 = vld [vmem:[#allocation42 + $0x28] sm:$0xf0] }
 0x9e3   :  { %6652 = vmatpush.bf16.msra.mxu0 %v9776_v62  ;;  %v6001_v51 = vadd.f32 %v6000_v21, %v5988_v25  ;;  %v6235_v33 = vmul.f32 %v6227_v53, %v5910_v38  ;;  %v9744_v41 = vor.u32 %v10732_v44, %v9743_v40  ;;  %v9841_v25 = vld [vmem:[#allocation42 + $0xe8] sm:$0xf0]  ;;  %v9871_v53 = vld [vmem:[#allocation42 + $0x120] sm:$0xf]  ;;  %v9780_v40 = vor.u32 %v10739_v26, %v9777_v30  ;;  %v9769_v21 = vld [vmem:[#allocation42 + $0x58] sm:$0xf0] }
 0x9e4   :  { %6665 = vmatpush.bf16.msra.mxu1 %v9840_v12  ;;  %v5989_v46 = vpop.f32.mrf.mxu1  ;;  %6679 = vmatpush.bf16.msra.mxu2 %v9896_v59  ;;  %v9844_v44 = vor.u32 %v10755_v37, %v9841_v25  ;;  %v10747_v9 = vld [vmem:[#allocation42 + $0xa4] sm:$0xf]  ;;  %v9809_v17 = vld [vmem:[#allocation42 + $0xa8] sm:$0xf0]  ;;  %v9897_v26 = vld [vmem:[#allocation42 + $0x158] sm:$0xf0] }
 0x9e5   :  { %v6249_v11 = vadd.f32 %v6241_v2, %v6235_v33  ;;  %v10735_v33 = vld [vmem:[#allocation42 + $0x44] sm:$0xf]  ;;  %v9761_v2 = vld [vmem:[#allocation42 + $0x48] sm:$0xf0]  ;;  %v9753_v46 = vld [vmem:[#allocation42 + $0x38] sm:$0xf0] }
 0x9e6   :  { %6219 = vmatpush.bf16.msrb.mxu3 %v9612_v36  ;;  %v5976_v31 = vpop.f32.mrf.mxu0  ;;  %v10730_v36 = vld [vmem:[#allocation42 + $0x14] sm:$0xf0]  ;;  %v6002_v4 = vpop.f32.mrf.mxu2  ;;  %v10727_v25 = vld [vmem:[#allocation42 + $0x4] sm:$0xf] }
 0x9e7   :  { %6653 = vmatpush.bf16.msra.mxu0 %v9768_v61  ;;  %v9736_v12 = vor.u32 %v10730_v36, %v9735_v35  ;;  %v9887_v61 = vld [vmem:[#allocation42 + $0x140] sm:$0xf]  ;;  %v9825_v31 = vld [vmem:[#allocation42 + $0xc8] sm:$0xf0]  ;;  %v9764_v35 = vor.u32 %v10735_v33, %v9761_v2  ;;  %v10771_v4 = vld [vmem:[#allocation42 + $0x164] sm:$0xf] }
 0x9e8   :  { %6666 = vmatpush.bf16.msra.mxu1 %v9832_v19  ;;  %v10768_v19 = vld [vmem:[#allocation42 + $0x144] sm:$0xf0]  ;;  %v10763_v33 = vld [vmem:[#allocation42 + $0x124] sm:$0xf]  ;;  %v9873_v2 = vld [vmem:[#allocation42 + $0x128] sm:$0xf0] }
 0x9e9   :  { %6220 = vmatmul.bf16.vlgmr.msrb.gmra.mxu3 %v13378_v14  ;;  %v9824_v14 = vor.u32 %v10752_v15, %v9823_v34  ;;  %v9849_v34 = vld [vmem:[#allocation42 + $0xf8] sm:$0xf0]  ;;  %v9888_v22 = vor.u32 %v10768_v19, %v9887_v61  ;;  %v9905_v61 = vld [vmem:[#allocation42 + $0x168] sm:$0xf0] }
 0x9ea   :  { %v9852_v3 = vor.u32 %v10757_v7, %v9849_v34  ;;  %v9908_v6 = vor.u32 %v10771_v4, %v9905_v61  ;;  %v6229_v4 = vperm.slane %v13446_v16, 2  ;;  %v9951_v61 = vld [vmem:[#allocation42 + $0x1c0] sm:$0xf] }
 0x9eb   :  { %6654 = vmatpush.bf16.msra.mxu0 %v9760_v24  ;;  %v6253_v24 = vmax.f32 %v6249_v11, 0.0  ;;  %6680 = vmatpush.bf16.msra.mxu2 %v9888_v22  ;;  %v10773_v11 = vld [vmem:[#allocation42 + $0x174] sm:$0xf] }
 0x9ec   :  { %6667 = vmatpush.bf16.msra.mxu1 %v9824_v14  ;;  %v6013_v63 = vpop.f32.mrf.mxu3  ;;  %v9728_v14 = vor.u32 %v10728_v29, %v9727_v47  ;;  %v9913_v47 = vld [vmem:[#allocation42 + $0x178] sm:$0xf0]  ;;  %v10731_v29 = vld [vmem:[#allocation42 + $0x24] sm:$0xf]  ;;  %v10729_v22 = vld [vmem:[#allocation42 + $0x14] sm:$0xf] }
 0x9ed   :  { %v6014_v13 = vadd.f32 %v6013_v63, %v6001_v51  ;;  %v9863_v51 = vld [vmem:[#allocation42 + $0x110] sm:$0xf]  ;;  %v10762_v63 = vld [vmem:[#allocation42 + $0x114] sm:$0xf0]  ;;  %v9748_v34 = vor.u32 %v10731_v29, %v9745_v8 }
 0x9ef   :  { %6655 = vmatpush.bf16.msra.mxu0 %v9752_v42  ;;  %v6236_v49 = vmul.f32 %v6228_v23, %v6014_v13  ;;  %v10764_v42 = vld [vmem:[#allocation42 + $0x124] sm:$0xf0]  ;;  %6681 = vmatpush.bf16.msra.mxu2 %v9880_v52  ;;  %v9772_v23 = vor.u32 %v10737_v10, %v9769_v21  ;;  %v9864_v13 = vor.u32 %v10762_v63, %v9863_v51  ;;  %v9729_v52 = vld [vmem:[#allocation42 + $0x8] sm:$0xf0]  ;;  %v9881_v63 = vld [vmem:[#allocation42 + $0x138] sm:$0xf0] }
 0x9f0   :  { %6668 = vmatpush.bf16.msra.mxu1 %v9816_v43  ;;  %v13457_v43 = vpack.c.bf16 %v6253_v24, %v6253_v24  ;;  %v9872_v50 = vor.u32 %v10764_v42, %v9871_v53  ;;  %v10745_v24 = vld [vmem:[#allocation42 + $0x94] sm:$0xf]  ;;  %v10743_v53 = vld [vmem:[#allocation42 + $0x84] sm:$0xf]  ;;  %v9793_v42 = vld [vmem:[#allocation42 + $0x88] sm:$0xf0] }
 0x9f1   :  { %v6250_v62 = vadd.f32 %v6242_v60, %v6236_v49  ;;  %v10751_v60 = vld [vmem:[#allocation42 + $0xc4] sm:$0xf]  ;;  %v9796_v51 = vor.u32 %v10743_v53, %v9793_v42  ;;  %v10778_v53 = vld [vmem:[#allocation42 + $0x194] sm:$0xf0] }
 0x9f2   :  { %v9828_v36 = vor.u32 %v10751_v60, %v9825_v31  ;;  %v9975_v60 = vld [vmem:[#allocation42 + $0x1f0] sm:$0xf]  ;;  %v10790_v31 = vld [vmem:[#allocation42 + $0x1f4] sm:$0xf0] }
 0x9f3   :  { %6656 = vmatpush.bf16.msra.mxu0 %v9744_v41  ;;  %v6254_v18 = vmax.f32 %v6250_v62, 0.0  ;;  %6682 = vmatpush.bf16.msra.mxu2 %v9872_v50  ;;  %v9855_v41 = vld [vmem:[#allocation42 + $0x100] sm:$0xf]  ;;  %v9916_v62 = vor.u32 %v10773_v11, %v9913_v47  ;;  %v9732_v50 = vor.u32 %v10727_v25, %v9729_v52  ;;  %v9927_v52 = vld [vmem:[#allocation42 + $0x190] sm:$0xf] }
 0x9f4   :  { %6669 = vmatpush.bf16.msra.mxu1 %v9808_v32  ;;  %v6015_v15 = vpop.f32.mrf.mxu3  ;;  %v10760_v32 = vld [vmem:[#allocation42 + $0x104] sm:$0xf0]  ;;  %v9928_v42 = vor.u32 %v10778_v53, %v9927_v52  ;;  %v6325_v52 = vld [vmem:[#allocation44] sm:$0x3] }
 0x9f5   :  { %v13455_v38 = vpack.c.bf16 %v6254_v18, %v6254_v18  ;;  %v9856_v59 = vor.u32 %v10760_v32, %v9855_v41  ;;  %v9812_v15 = vor.u32 %v10747_v9, %v9809_v17  ;;  %v9737_v18 = vld [vmem:[#allocation42 + $0x18] sm:$0xf0]  ;;  %v9876_v41 = vor.u32 %v10763_v33, %v9873_v2  ;;  %v10785_v2 = vld [vmem:[#allocation42 + $0x1d4] sm:$0xf] }
 0x9f6   :  { %v9740_v30 = vor.u32 %v10729_v22, %v9737_v18  ;;  %v6327_v53 = vperm.slane %v6325_v52, 0 }
 0x9f7   :  { %6657 = vmatpush.bf16.msra.mxu0 %v9736_v12  ;;  %6683 = vmatpush.bf16.msra.mxu2 %v9864_v13  ;;  %v9756_v12 = vor.u32 %v10733_v55, %v9753_v46  ;;  %v9976_v13 = vor.u32 %v10790_v31, %v9975_v60  ;;  %v9961_v60 = vld [vmem:[#allocation42 + $0x1d8] sm:$0xf0] }
 0x9f8   :  { %6670 = vmatpush.bf16.msra.mxu1 %v9800_v1  ;;  %v9820_v1 = vor.u32 %v10749_v56, %v9817_v58  ;;  %v10759_v56 = vld [vmem:[#allocation42 + $0x104] sm:$0xf] }
 0x9f9   :  { %6690 = vmatpush.bf16.msra.mxu3 %v9976_v13  ;;  %v9964_v13 = vor.u32 %v10785_v2, %v9961_v60  ;;  %v10796_v2 = vld [vmem:[#allocation48 + $0x28] sm:$0xff] }
 0x9fb   :  { %6658 = vmatpush.bf16.msra.mxu0 %v9728_v14  ;;  %v6026_v57 = vpop.f32.mrf.mxu0  ;;  %6684 = vmatpush.bf16.msra.mxu2 %v9856_v59 }
 0x9fc   :  { %6671 = vmatpush.bf16.msra.mxu1 %v9792_v54  ;;  %v6039_v49 = vpop.f32.mrf.mxu1  ;;  %v9801_v54 = vld [vmem:[#allocation42 + $0x98] sm:$0xf0]  ;;  %v6027_v48 = vadd.f32 %v6026_v57, %v4523_v28  ;;  %v9857_v57 = vld [vmem:[#allocation42 + $0x108] sm:$0xf0]  ;;  %v9935_v28 = vld [vmem:[#allocation42 + $0x1a0] sm:$0xf] }
 0x9fd   :  { %v9804_v37 = vor.u32 %v10745_v24, %v9801_v54  ;;  %v9943_v24 = vld [vmem:[#allocation42 + $0x1b0] sm:$0xf] }
 0x9fe   :  { %6659 = vmatmul.bf16.vlgmr.msra.gmra.mxu0 %v13457_v43  ;;  %v6052_v19 = vpop.f32.mrf.mxu2 }
 0x9ff   :  { %6703 = vmatpush.bf16.msrb.mxu0 %v9788_v20  ;;  %6672 = vmatmul.bf16.vlgmr.msra.gmra.mxu1 %v13455_v38 }
 0xa00   :  { %6716 = vmatpush.bf16.msrb.mxu1 %v9852_v3  ;;  %6729 = vmatpush.bf16.msrb.mxu2 %v9916_v62  ;;  %v10769_v3 = vld [vmem:[#allocation42 + $0x154] sm:$0xf]  ;;  %v9967_v62 = vld [vmem:[#allocation42 + $0x1e0] sm:$0xf] }
 0xa01   :  { %v9900_v27 = vor.u32 %v10769_v3, %v9897_v26 }
 0xa03   :  { %6704 = vmatpush.bf16.msrb.mxu0 %v9780_v40  ;;  %v6028_v14 = vpop.f32.mrf.mxu0  ;;  %v10767_v40 = vld [vmem:[#allocation42 + $0x144] sm:$0xf] }
 0xa04   :  { %6717 = vmatpush.bf16.msrb.mxu1 %v9844_v44  ;;  %v6041_v20 = vpop.f32.mrf.mxu1  ;;  %6730 = vmatpush.bf16.msrb.mxu2 %v9908_v6  ;;  %v9889_v44 = vld [vmem:[#allocation42 + $0x148] sm:$0xf0]  ;;  %v10782_v14 = vld [vmem:[#allocation42 + $0x1b4] sm:$0xf0] }
 0xa05   :  { %v9892_v21 = vor.u32 %v10767_v40, %v9889_v44  ;;  %v9944_v3 = vor.u32 %v10782_v14, %v9943_v24  ;;  %v9919_v40 = vld [vmem:[#allocation42 + $0x180] sm:$0xf]  ;;  %v10776_v44 = vld [vmem:[#allocation42 + $0x184] sm:$0xf0]  ;;  %v6230_v24 = vperm.slane %v13446_v16, 3 }
 0xa06   :  { %v6054_v10 = vpop.f32.mrf.mxu2 }
 0xa07   :  { %6705 = vmatpush.bf16.msrb.mxu0 %v9772_v23  ;;  %v9884_v23 = vor.u32 %v10765_v5, %v9881_v63  ;;  %v9920_v10 = vor.u32 %v10776_v44, %v9919_v40  ;;  %v10787_v5 = vld [vmem:[#allocation42 + $0x1e4] sm:$0xf]  ;;  %v9969_v63 = vld [vmem:[#allocation42 + $0x1e8] sm:$0xf0] }
 0xa08   :  { %6718 = vmatpush.bf16.msrb.mxu1 %v9836_v0  ;;  %6731 = vmatpush.bf16.msrb.mxu2 %v9900_v27  ;;  %v6040_v0 = vadd.f32 %v6039_v49, %v6027_v48  ;;  %v9860_v49 = vor.u32 %v10759_v56, %v9857_v57  ;;  %v9977_v48 = vld [vmem:[#allocation42 + $0x1f8] sm:$0xf0] }
 0xa0a   :  { %v6053_v32 = vadd.f32 %v6052_v19, %v6040_v0  ;;  %v10784_v19 = vld [vmem:[#allocation42 + $0x1c4] sm:$0xf0] }
 0xa0b   :  { %6706 = vmatpush.bf16.msrb.mxu0 %v9764_v35  ;;  %v10761_v35 = vld [vmem:[#allocation42 + $0x114] sm:$0xf]  ;;  %v9952_v22 = vor.u32 %v10784_v19, %v9951_v61 }
 0xa0c   :  { %6719 = vmatpush.bf16.msrb.mxu1 %v9828_v36  ;;  %v6065_v7 = vpop.f32.mrf.mxu3  ;;  %6732 = vmatpush.bf16.msrb.mxu2 %v9892_v21  ;;  %v9865_v36 = vld [vmem:[#allocation42 + $0x118] sm:$0xf0]  ;;  %v10789_v21 = vld [vmem:[#allocation42 + $0x1f4] sm:$0xf] }
 0xa0d   :  { %v9868_v55 = vor.u32 %v10761_v35, %v9865_v36  ;;  %v6066_v46 = vadd.f32 %v6065_v7, %v6053_v32  ;;  %v10783_v32 = vld [vmem:[#allocation42 + $0x1c4] sm:$0xf]  ;;  %v9953_v35 = vld [vmem:[#allocation42 + $0x1c8] sm:$0xf0] }
 0xa0e   :  { %v9956_v36 = vor.u32 %v10783_v32, %v9953_v35 }
 0xa0f   :  { %6707 = vmatpush.bf16.msrb.mxu0 %v9756_v12  ;;  %v10788_v12 = vld [vmem:[#allocation42 + $0x1e4] sm:$0xf0] }
 0xa10   :  { %6720 = vmatpush.bf16.msrb.mxu1 %v9820_v1  ;;  %6733 = vmatpush.bf16.msrb.mxu2 %v9884_v23  ;;  %v9959_v1 = vld [vmem:[#allocation42 + $0x1d0] sm:$0xf]  ;;  %v9972_v23 = vor.u32 %v10787_v5, %v9969_v63 }
 0xa13   :  { %6708 = vmatpush.bf16.msrb.mxu0 %v9748_v34  ;;  %v6243_v34 = vperm.slane %v13450_v39, 2 }
 0xa14   :  { %6721 = vmatpush.bf16.msrb.mxu1 %v9812_v15  ;;  %v6067_v45 = vpop.f32.mrf.mxu3  ;;  %6734 = vmatpush.bf16.msrb.mxu2 %v9876_v41 }
 0xa17   :  { %6709 = vmatpush.bf16.msrb.mxu0 %v9740_v30  ;;  %v10780_v30 = vld [vmem:[#allocation42 + $0x1a4] sm:$0xf0] }
 0xa18   :  { %6722 = vmatpush.bf16.msrb.mxu1 %v9804_v37  ;;  %6735 = vmatpush.bf16.msrb.mxu2 %v9868_v55  ;;  %v9936_v25 = vor.u32 %v10780_v30, %v9935_v28  ;;  %v10938_v55 = vld [vmem:[#allocation38] sm:$0xf] }
 0xa1b   :  { %6710 = vmatpush.bf16.msrb.mxu0 %v9732_v50  ;;  %v6078_v58 = vpop.f32.mrf.mxu0  ;;  %v9980_v50 = vor.u32 %v10789_v21, %v9977_v48  ;;  %v6328_v48 = vperm.slane %v6325_v52, 1  ;;  %v10807_v52 = vld [vmem:[#allocation54] sm:$0xff] }
 0xa1c   :  { %6723 = vmatpush.bf16.msrb.mxu1 %v9796_v51  ;;  %v6079_v59 = vadd.f32 %v6078_v58, %v6066_v46  ;;  %v6091_v11 = vpop.f32.mrf.mxu1  ;;  %6736 = vmatpush.bf16.msrb.mxu2 %v9860_v49  ;;  %v4524_v46 = vperm.slane %v10938_v55, 3  ;;  %v10781_v58 = vld [vmem:[#allocation42 + $0x1b4] sm:$0xf]  ;;  %v9945_v49 = vld [vmem:[#allocation42 + $0x1b8] sm:$0xf0] }
 0xa1d   :  { %v10805_v55 = vld [vmem:[#allocation48 + $0x70] sm:$0xff] }
 0xa1e   :  { %6711 = vmatmul.bf16.vlgmr.msrb.gmra.mxu0 %v13457_v43  ;;  %v6092_v47 = vadd.f32 %v6091_v11, %v6079_v59  ;;  %v9968_v43 = vor.u32 %v10788_v12, %v9967_v62  ;;  %v6104_v29 = vpop.f32.mrf.mxu2  ;;  %v9948_v59 = vor.u32 %v10781_v58, %v9945_v49  ;;  %v9937_v62 = vld [vmem:[#allocation42 + $0x1a8] sm:$0xf0]  ;;  %v10802_v49 = vld [vmem:[#allocation48 + $0x58] sm:$0xff] }
 0xa1f   :  { %6724 = vmatmul.bf16.vlgmr.msrb.gmra.mxu1 %v13455_v38  ;;  %v10786_v38 = vld [vmem:[#allocation42 + $0x1d4] sm:$0xf0]  ;;  %v10803_v58 = vld [vmem:[#allocation48 + $0x60] sm:$0xff] }
 0xa20   :  { %6691 = vmatpush.bf16.msra.mxu3 %v9968_v43  ;;  %v9960_v8 = vor.u32 %v10786_v38, %v9959_v1  ;;  %v6105_v9 = vadd.f32 %v6104_v29, %v6092_v47  ;;  %v10779_v47 = vld [vmem:[#allocation42 + $0x1a4] sm:$0xf]  ;;  %v10777_v43 = vld [vmem:[#allocation42 + $0x194] sm:$0xf]  ;;  %v9929_v1 = vld [vmem:[#allocation42 + $0x198] sm:$0xf0] }
 0xa21   :  { %v9940_v12 = vor.u32 %v10779_v47, %v9937_v62  ;;  %v9932_v29 = vor.u32 %v10777_v43, %v9929_v1  ;;  %v10799_v47 = vld [vmem:[#allocation48 + $0x40] sm:$0xff]  ;;  %v6763_v43 = vld [vmem:[#allocation47] sm:$0x3] }
 0xa22   :  { %v10814_v62 = vld [vmem:[#allocation54 + $0x38] sm:$0xff] }
 0xa23   :  { %v6080_v6 = vpop.f32.mrf.mxu0 }
 0xa24   :  { %v6093_v15 = vpop.f32.mrf.mxu1  ;;  %6692 = vmatpush.bf16.msra.mxu3 %v9960_v8 }
 0xa26   :  { %v6106_v20 = vpop.f32.mrf.mxu2 }
 0xa28   :  { %6693 = vmatpush.bf16.msra.mxu3 %v9952_v22 }
 0xa2c   :  { %v6117_v17 = vpop.f32.mrf.mxu3  ;;  %6694 = vmatpush.bf16.msra.mxu3 %v9944_v3  ;;  %v6244_v3 = vperm.slane %v13450_v39, 3 }
 0xa2d   :  { %v6118_v7 = vadd.f32 %v6117_v17, %v6105_v9  ;;  %v10775_v9 = vld [vmem:[#allocation42 + $0x184] sm:$0xf]  ;;  %v9921_v17 = vld [vmem:[#allocation42 + $0x188] sm:$0xf0] }
 0xa2f   :  { %v6237_v18 = vmul.f32 %v6229_v4, %v6118_v7  ;;  %v9924_v4 = vor.u32 %v10775_v9, %v9921_v17  ;;  %v6765_v9 = vperm.slane %v6763_v43, 0 }
 0xa30   :  { %6695 = vmatpush.bf16.msra.mxu3 %v9936_v25 }
 0xa31   :  { %v6251_v54 = vadd.f32 %v6243_v34, %v6237_v18 }
 0xa33   :  { %v6255_v26 = vmax.f32 %v6251_v54, 0.0 }
 0xa34   :  { %v6119_v27 = vpop.f32.mrf.mxu3  ;;  %6696 = vmatpush.bf16.msra.mxu3 %v9928_v42 }
 0xa35   :  { %v6259_v37 = vpack.c.bf16 %v6255_v26, %v6255_v26 }
 0xa37   :  { %6685 = vmatmul.bf16.vlgmr.msra.gmra.mxu2 %v6259_v37 }
 0xa38   :  { %6697 = vmatpush.bf16.msra.mxu3 %v9920_v10  ;;  %7013 = vmatpush.bf16.msra.mxu2 %v10814_v62 }
 0xa3b   :  { %v6130_v45 = vpop.f32.mrf.mxu0 }
 0xa3c   :  { %v6143_v51 = vpop.f32.mrf.mxu1  ;;  %6742 = vmatpush.bf16.msrb.mxu3 %v9980_v50  ;;  %v6131_v11 = vadd.f32 %v6130_v45, %v4524_v46  ;;  %v10792_v46 = vld [vmem:[#allocation48 + $0x8] sm:$0xff] }
 0xa3e   :  { %v6156_v0 = vpop.f32.mrf.mxu2  ;;  %v6144_v38 = vadd.f32 %v6143_v51, %v6131_v11  ;;  %v10800_v11 = vld [vmem:[#allocation48 + $0x48] sm:$0xff] }
 0xa40   :  { %6743 = vmatpush.bf16.msrb.mxu3 %v9972_v23  ;;  %v6157_v8 = vadd.f32 %v6156_v0, %v6144_v38  ;;  %v10798_v23 = vld [vmem:[#allocation48 + $0x38] sm:$0xff] }
 0xa41   :  { %v10806_v0 = vld [vmem:[#allocation48 + $0x78] sm:$0xff]  ;;  %6907 = vmatpush.bf16.msra.mxu0 %v10798_v23 }
 0xa42   :  { %6920 = vmatpush.bf16.msra.mxu1 %v10806_v0 }
 0xa43   :  { %v6132_v31 = vpop.f32.mrf.mxu0 }
 0xa44   :  { %v6145_v41 = vpop.f32.mrf.mxu1  ;;  %6744 = vmatpush.bf16.msrb.mxu3 %v9964_v13  ;;  %v10795_v31 = vld [vmem:[#allocation48 + $0x20] sm:$0xff]  ;;  %v10794_v13 = vld [vmem:[#allocation48 + $0x18] sm:$0xff] }
 0xa46   :  { %v6158_v56 = vpop.f32.mrf.mxu2  ;;  %6921 = vmatpush.bf16.msra.mxu1 %v10805_v55 }
 0xa47   :  { %6737 = vmatmul.bf16.vlgmr.msrb.gmra.mxu2 %v6259_v37  ;;  %v10804_v56 = vld [vmem:[#allocation48 + $0x68] sm:$0xff] }
 0xa48   :  { %6745 = vmatpush.bf16.msrb.mxu3 %v9956_v36  ;;  %v10793_v36 = vld [vmem:[#allocation48 + $0x10] sm:$0xff] }
 0xa4a   :  { %6922 = vmatpush.bf16.msra.mxu1 %v10804_v56 }
 0xa4c   :  { %v6169_v33 = vpop.f32.mrf.mxu3  ;;  %6746 = vmatpush.bf16.msrb.mxu3 %v9948_v59  ;;  %v10801_v59 = vld [vmem:[#allocation48 + $0x50] sm:$0xff] }
 0xa4d   :  { %v6170_v61 = vadd.f32 %v6169_v33, %v6157_v8  ;;  %v10797_v33 = vld [vmem:[#allocation48 + $0x30] sm:$0xff] }
 0xa4e   :  { %6908 = vmatpush.bf16.msra.mxu0 %v10797_v33  ;;  %6923 = vmatpush.bf16.msra.mxu1 %v10803_v58 }
 0xa50   :  { %6747 = vmatpush.bf16.msrb.mxu3 %v9940_v12  ;;  %v6755_v12 = vld [vmem:[#allocation45] sm:$0x3] }
 0xa51   :  { %v6757_v38 = vperm.slane %v6755_v12, 0 }
 0xa52   :  { %6909 = vmatpush.bf16.msra.mxu0 %v10796_v2  ;;  %6924 = vmatpush.bf16.msra.mxu1 %v10802_v49 }
 0xa54   :  { %v6171_v57 = vpop.f32.mrf.mxu3  ;;  %6748 = vmatpush.bf16.msrb.mxu3 %v9932_v29 }
 0xa55   :  { %v10791_v57 = vld [vmem:[#allocation48] sm:$0xff] }
 0xa56   :  { %6910 = vmatpush.bf16.msra.mxu0 %v10795_v31  ;;  %6925 = vmatpush.bf16.msra.mxu1 %v10801_v59 }
 0xa58   :  { %6749 = vmatpush.bf16.msrb.mxu3 %v9924_v4 }
 0xa5a   :  { %6911 = vmatpush.bf16.msra.mxu0 %v10794_v13  ;;  %6926 = vmatpush.bf16.msra.mxu1 %v10800_v11 }
 0xa5b   :  { %v6182_v19 = vpop.f32.mrf.mxu0 }
 0xa5c   :  { %v6195_v6 = vpop.f32.mrf.mxu1  ;;  %v6183_v7 = vadd.f32 %v6182_v19, %v6170_v61 }
 0xa5e   :  { %v6196_v34 = vadd.f32 %v6195_v6, %v6183_v7  ;;  %v6208_v15 = vpop.f32.mrf.mxu2  ;;  %6912 = vmatpush.bf16.msra.mxu0 %v10793_v36  ;;  %6927 = vmatpush.bf16.msra.mxu1 %v10799_v47 }
 0xa60   :  { %v6209_v18 = vadd.f32 %v6208_v15, %v6196_v34  ;;  %v6758_v34 = vperm.slane %v6755_v12, 1 }
 0xa62   :  { %6913 = vmatpush.bf16.msra.mxu0 %v10792_v46 }
 0xa63   :  { %v6184_v14 = vpop.f32.mrf.mxu0 }
 0xa64   :  { %v6197_v54 = vpop.f32.mrf.mxu1 }
 0xa66   :  { %v6210_v28 = vpop.f32.mrf.mxu2  ;;  %6914 = vmatpush.bf16.msra.mxu0 %v10791_v57 }
 0xa67   :  { %v10811_v28 = vld [vmem:[#allocation54 + $0x20] sm:$0xff] }
 0xa6c   :  { %v6221_v22 = vpop.f32.mrf.mxu3 }
 0xa6d   :  { %v6222_v20 = vadd.f32 %v6221_v22, %v6209_v18  ;;  %v6766_v18 = vperm.slane %v6763_v43, 1 }
 0xa6f   :  { %v6238_v26 = vmul.f32 %v6230_v24, %v6222_v20 }
 0xa71   :  { %v6252_v27 = vadd.f32 %v6244_v3, %v6238_v26  ;;  %v10813_v26 = vld [vmem:[#allocation54 + $0x30] sm:$0xff] }
 0xa72   :  { %7014 = vmatpush.bf16.msra.mxu2 %v10813_v26 }
 0xa73   :  { %v6256_v37 = vmax.f32 %v6252_v27, 0.0  ;;  %v10812_v27 = vld [vmem:[#allocation54 + $0x28] sm:$0xff] }
 0xa74   :  { %v6223_v30 = vpop.f32.mrf.mxu3 }
 0xa75   :  { %v6260_v25 = vpack.c.bf16 %v6256_v37, %v6256_v37  ;;  %v10810_v30 = vld [vmem:[#allocation54 + $0x18] sm:$0xff]  ;;  %v10809_v37 = vld [vmem:[#allocation54 + $0x10] sm:$0xff] }
 0xa76   :  { %7015 = vmatpush.bf16.msra.mxu2 %v10812_v27 }
 0xa77   :  { %6698 = vmatmul.bf16.vlgmr.msra.gmra.mxu3 %v6260_v25 }
 0xa7a   :  { %7016 = vmatpush.bf16.msra.mxu2 %v10811_v28 }
 0xa7b   :  { %v6660_v42 = vpop.f32.mrf.mxu0 }
 0xa7c   :  { %v6673_v40 = vpop.f32.mrf.mxu1  ;;  %v6661_v44 = vadd.f32 %v6660_v42, %v6327_v53 }
 0xa7e   :  { %v6674_v10 = vadd.f32 %v6673_v40, %v6661_v44  ;;  %7017 = vmatpush.bf16.msra.mxu2 %v10810_v30  ;;  %v10934_v40 = vld [vmem:[#allocation50] ss:$0 sm:$0xff] }
 0xa82   :  { %7018 = vmatpush.bf16.msra.mxu2 %v10809_v37 }
 0xa83   :  { %v6662_v16 = vpop.f32.mrf.mxu0 }
 0xa84   :  { %v6675_v21 = vpop.f32.mrf.mxu1 }
 0xa87   :  { %6750 = vmatmul.bf16.vlgmr.msrb.gmra.mxu3 %v6260_v25  ;;  %v10808_v25 = vld [vmem:[#allocation54 + $0x8] sm:$0xff] }
 0xa88   :  { %7019 = vmatpush.bf16.msra.mxu2 %v10808_v25 }
 0xa8c   :  { %7020 = vmatpush.bf16.msra.mxu2 %v10807_v52 }
 0xa9b   :  { %v6712_v45 = vpop.f32.mrf.mxu0 }
 0xa9c   :  { %v6725_v50 = vpop.f32.mrf.mxu1  ;;  %v6713_v39 = vadd.f32 %v6712_v45, %v6328_v48  ;;  %v10936_v48 = vld [vmem:[#allocation53] ss:$0 sm:$0xff] }
 0xa9e   :  { %v6726_v51 = vadd.f32 %v6725_v50, %v6713_v39 }
 0xaa3   :  { %v6714_v5 = vpop.f32.mrf.mxu0 }
 0xaa4   :  { %v6727_v63 = vpop.f32.mrf.mxu1 }
 0xaa5   :  { %v10937_v63 = vld [vmem:[#allocation56] ss:$0 sm:$0xff] }
 0xaba   :  { %v6686_v60 = vpop.f32.mrf.mxu2 }
 0xabb   :  { %v6687_v1 = vadd.f32 %v6686_v60, %v6674_v10  ;;  %v10935_v10 = vld [vmem:[#allocation51] ss:$0 sm:$0xff] }
 0xac2   :  { %v6688_v41 = vpop.f32.mrf.mxu2 }
 0xaca   :  { %v6738_v32 = vpop.f32.mrf.mxu2 }
 0xacb   :  { %v6739_v7 = vadd.f32 %v6738_v32, %v6726_v51 }
 0xad2   :  { %v6740_v35 = vpop.f32.mrf.mxu2 }
 0xafa   :  { %v6699_v29 = vpop.f32.mrf.mxu3 }
 0xafb   :  { %v6700_v8 = vadd.f32 %v6699_v29, %v6687_v1 }
 0xafd   :  { %v6761_v17 = vmul.f32 %v6757_v38, %v6700_v8 }
 0xaff   :  { %v6769_v4 = vadd.f32 %v6765_v9, %v6761_v17 }
 0xb01   :  { %v6771_v61 = vmax.f32 %v6769_v4, 0.0 }
 0xb02   :  { %v6701_v19 = vpop.f32.mrf.mxu3 }
 0xb03   :  { %v6773_v6 = vpack.c.bf16 %v6771_v61, %v6771_v61 }
 0xb05   :  { %6915 = vmatmul.bf16.vlgmr.msra.gmra.mxu0 %v6773_v6 }
 0xb0a   :  { %v6751_v15 = vpop.f32.mrf.mxu3 }
 0xb0b   :  { %v6752_v22 = vadd.f32 %v6751_v15, %v6739_v7 }
 0xb0d   :  { %v6762_v24 = vmul.f32 %v6758_v34, %v6752_v22 }
 0xb0f   :  { %v6770_v14 = vadd.f32 %v6766_v18, %v6762_v24 }
 0xb11   :  { %v6772_v54 = vmax.f32 %v6770_v14, 0.0 }
 0xb12   :  { %v6753_v20 = vpop.f32.mrf.mxu3 }
 0xb13   :  { %v6774_v3 = vpack.c.bf16 %v6772_v54, %v6772_v54 }
 0xb15   :  { %6928 = vmatmul.bf16.vlgmr.msra.gmra.mxu1 %v6774_v3 }
 0xb82   :  { %v6916_v53 = vpop.f32.mrf.mxu0 }
 0xb83   :  { %v6917_v44 = vadd.f32 %v10934_v40, %v6916_v53 }
 0xb8a   :  { %v6918_v42 = vpop.f32.mrf.mxu0 }
 0xb92   :  { %v6929_v16 = vpop.f32.mrf.mxu1 }
 0xb93   :  { %v6930_v21 = vadd.f32 %v6929_v16, %v6917_v44 }
 0xb95   :  { %v6937_v45 = vmul.f32 %v10935_v10, %v6930_v21 }
 0xb97   :  { %v6942_v50 = vadd.f32 %v10936_v48, %v6937_v45 }
 0xb99   :  { %v6943_v39 = vmax.f32 %v6942_v50, 0.0 }
 0xb9a   :  { %v6931_v51 = vpop.f32.mrf.mxu1 }
 0xb9b   :  { %v6944_v5 = vpack.c.bf16 %v6943_v39, %v6943_v39 }
 0xb9d   :  { %7021 = vmatmul.bf16.vlgmr.msra.gmra.mxu2 %v6944_v5 }
 0xc20   :  { %v7022_v23 = vpop.f32.mrf.mxu2 }
 0xc21   :  { %v7023_v0 = vadd.f32 %v10937_v63, %v7022_v23 }
 0xc23   :  { %7026 = vst [vmem:[#allocation57] sm:$0x3] %v7023_v0 }
 0xc24   :  { %11858 = shalt.err (!%p11855_p7)
}
 0xc25   :  { %7037 = dma.vmem_to_hbm [thread:$0]  %s7033_s1, 32, %s7035_s28, [#allocation11]  }
 0xc28   :  { %v7024_v33 = vpop.f32.mrf.mxu2 }
 0xc29   :  { %11907 = dma.done.wait [#allocation11], 32  }
 0xc2a   :  { %11908 = vsyncadd [#allocation11], 4294967264 }
 0xc2b   :  { %7042 = vsyncpa [#allocation10], 1 }
 0xc2c   :  { %7043 = vsyncpa [#allocation13], 1 }
 0xc2d   :  { %7044 = vsyncpa [#allocation16], 1 }
 0xc2e   :  { %7045 = vsyncpa [#allocation19], 1 }
 0xc2f   :  { %7046 = vsyncpa [#allocation22], 1 }
 0xc30   :  { %7047 = vsyncpa [#allocation25], 1 }
 0xc31   :  { %7048 = vsyncpa [#allocation28], 1 }
 0xc32   :  { %7049 = vsyncpa [#allocation31], 1 }
 0xc33   :  { %7050 = vsyncpa [#allocation34], 1 }
 0xc34   :  { %7051 = vsyncpa [#allocation37], 1 }
 0xc35   :  { %7052 = vsyncpa [#allocation40], 1 }
 0xc36   :  { %7053 = vsyncpa [#allocation43], 1 }
 0xc37   :  { %7054 = vsyncpa [#allocation46], 1 }
 0xc38   :  { %7055 = vsyncpa [#allocation49], 1 }
 0xc39   :  { %7056 = vsyncpa [#allocation52], 1 }
 0xc3a   :  { %7057 = vsyncpa [#allocation55], 1 }
 0xc3b   :  { %7058 = vsyncpa [#allocation11], 1 }
 0xc3c   :  { %7059 = vsyncmov [#allocation8] }
 0xc3f   :  { %s7060_s5 = vpop.sfrf %7059 }
 0xc40   :  { %p10077_p3 = scmp.ne.s32.totalorder %s7060_s5, 0 }
 0xc42   :  { %7064 = shalt.err (%p10077_p3)  }
 0xc43   :  { %7066 = vsyncmov [#allocation8 + $0x1] }
 0xc46   :  { %s7067_s2 = vpop.sfrf %7066 }
 0xc47   :  { %p10078_p5 = scmp.ne.s32.totalorder %s7067_s2, 0 }
 0xc49   :  { %7071 = shalt.err (%p10078_p5)  }

</bundles_post_ra>
